<compile_context>
chip_gen: v7x
topology: tpu7x:2x2x1
jax: 0.10.0
libtpu: 0.0.40
codegen_flags: <defaults>
</compile_context>

<pallas_src>
import functools

import numpy as np
import jax
import jax.numpy as jnp
from jax.experimental import pallas as pl
from jax.experimental.pallas import tpu as pltpu


# ----------------------------------------------------------------- helpers --

def _cdiv(a, b):
    return (a + b - 1) // b


def _round_up(x, m):
    return _cdiv(x, m) * m


_HEAD_LANES = 128        # classifier output padded to one full lane group

# Geometry implied by the module (fc1 expects 64*7*7 features -> 28x28 input).
_P1I, _P1O = 30, 26      # conv1: padded input width, output width
_C1 = 32                 # conv1 output channels
_POOL1 = 14              # spatial after first 2x2/2 pool (pad 1)
_P2I, _P2O = 16, 12      # conv2: padded input width, output width
_C2 = 64                 # conv2 output channels
_POOL2 = 7               # spatial after second pool
_FEAT = _POOL2 * _POOL2 * _C2   # 3136


# --------------------------------------------------------------- kernels ----

def _conv_trunk_kernel(x_ref, m1_ref, b1_ref, m2_ref, b2_ref, o_ref):
    """Per-image conv1+ReLU+pool -> conv2+ReLU+pool, all in VMEM.

    Layouts (rows = image rows on sublanes, cols = width*channels on lanes):
      x_ref  : (1, 30, 30)        conv1-padded bf16 image
      m1_ref : (5, 30, 26*32)     banded conv1 weights, one (30, 832) mat per kh
      b1_ref : (1, 26*32)         conv1 bias tiled over the 26 output columns
      m2_ref : (5, 16*32, 12*64)  banded conv2 weights, one (512, 768) mat per kh
      b2_ref : (1, 12*64)         conv2 bias tiled over the 12 output columns
      o_ref  : (1, 7, 7*64)       pooled conv2 features, (h, w*64 + c), bf16
    """
    xp = x_ref[0]                                        # (30, 30) bf16

    # ---- conv1 as 5 row-shifted banded matmuls (bf16 x bf16 -> f32 acc) ----
    acc1 = jnp.zeros((_P1O, _P1O * _C1), jnp.float32)
    for kh in range(5):
        acc1 = acc1 + jnp.dot(xp[kh:kh + _P1O, :], m1_ref[kh],
                              preferred_element_type=jnp.float32)
    h1 = jnp.maximum(acc1 + b1_ref[...], 0.0)            # (26, 832)

    # ---- maxpool 2x2 stride 2 pad 1: window p covers source rows {2p-1, 2p} ----
    rows = [h1[0:1, :]]
    for p in range(1, _POOL1 - 1):
        rows.append(jnp.maximum(h1[2 * p - 1:2 * p, :], h1[2 * p:2 * p + 1, :]))
    rows.append(h1[_P1O - 1:_P1O, :])
    hr = jnp.concatenate(rows, axis=0)                   # (14, 832)

    cols = [hr[:, 0:_C1]]
    for q in range(1, _POOL1 - 1):
        a = hr[:, (2 * q - 1) * _C1:(2 * q) * _C1]
        b = hr[:, (2 * q) * _C1:(2 * q + 1) * _C1]
        cols.append(jnp.maximum(a, b))
    cols.append(hr[:, (_P1O - 1) * _C1:_P1O * _C1])

    # assemble the conv2-padded (16, 512) input (zero spatial border of 1)
    zc = jnp.zeros((_POOL1, _C1), jnp.float32)
    body = jnp.concatenate([zc] + cols + [zc], axis=1)   # (14, 512)
    zr = jnp.zeros((1, _P2I * _C1), jnp.float32)
    x2 = jnp.concatenate([zr, body, zr], axis=0).astype(jnp.bfloat16)   # (16, 512)

    # ---- conv2 as 5 row-shifted banded matmuls ----
    acc2 = jnp.zeros((_P2O, _P2O * _C2), jnp.float32)
    for kh in range(5):
        acc2 = acc2 + jnp.dot(x2[kh:kh + _P2O, :], m2_ref[kh],
                              preferred_element_type=jnp.float32)
    h2 = jnp.maximum(acc2 + b2_ref[...], 0.0)            # (12, 768)

    # ---- second maxpool 2x2 stride 2 pad 1 ----
    rows2 = [h2[0:1, :]]
    for p in range(1, _POOL2 - 1):
        rows2.append(jnp.maximum(h2[2 * p - 1:2 * p, :], h2[2 * p:2 * p + 1, :]))
    rows2.append(h2[_P2O - 1:_P2O, :])
    hr2 = jnp.concatenate(rows2, axis=0)                 # (7, 768)

    cols2 = [hr2[:, 0:_C2]]
    for q in range(1, _POOL2 - 1):
        a = hr2[:, (2 * q - 1) * _C2:(2 * q) * _C2]
        b = hr2[:, (2 * q) * _C2:(2 * q + 1) * _C2]
        cols2.append(jnp.maximum(a, b))
    cols2.append(hr2[:, (_P2O - 1) * _C2:_P2O * _C2])
    feat = jnp.concatenate(cols2, axis=1)                # (7, 448), (h, w, c) order

    o_ref[0] = feat.astype(o_ref.dtype)


def _mlp_head_kernel(x_ref, w1_ref, b1_ref, w2_ref, b2_ref, o_ref):
    # o = relu(x @ w1 + b1) @ w2 + b2   (bf16 operands, f32 accumulation)
    h = jnp.dot(x_ref[...], w1_ref[...], preferred_element_type=jnp.float32)
    h = jnp.maximum(h + b1_ref[...], 0.0).astype(w2_ref.dtype)
    o = jnp.dot(h, w2_ref[...], preferred_element_type=jnp.float32)
    o_ref[...] = (o + b2_ref[...]).astype(o_ref.dtype)


# ------------------------------------------------------------ pallas glue ---

def _conv_trunk(x_pad, prepared):
    """Fused conv trunk; one grid step per image."""
    B = x_pad.shape[0]
    flops_per_img = 2 * 5 * (_P1O * _P1I * (_P1O * _C1)
                             + _P2O * (_P2I * _C1) * (_P2O * _C2))
    cost = pl.CostEstimate(
        flops=B * flops_per_img,
        transcendentals=0,
        bytes_accessed=(B * 2 * (_P1I * _P1I + _POOL2 * _POOL2 * _C2)
                        + 2 * 5 * (_P1I * _P1O * _C1 + _P2I * _C1 * _P2O * _C2)
                        + 4 * (_P1O * _C1 + _P2O * _C2)))
    return pl.pallas_call(
        _conv_trunk_kernel,
        out_shape=jax.ShapeDtypeStruct((B, _POOL2, _POOL2 * _C2), jnp.bfloat16),
        grid=(B,),
        in_specs=[
            pl.BlockSpec((1, _P1I, _P1I), lambda b: (b, 0, 0)),
            pl.BlockSpec((5, _P1I, _P1O * _C1), lambda b: (0, 0, 0)),
            pl.BlockSpec((1, _P1O * _C1), lambda b: (0, 0)),
            pl.BlockSpec((5, _P2I * _C1, _P2O * _C2), lambda b: (0, 0, 0)),
            pl.BlockSpec((1, _P2O * _C2), lambda b: (0, 0)),
        ],
        out_specs=pl.BlockSpec((1, _POOL2, _POOL2 * _C2), lambda b: (b, 0, 0)),
        compiler_params=pltpu.CompilerParams(
            dimension_semantics=("parallel",),
            vmem_limit_bytes=32 * 1024 * 1024),
        cost_estimate=cost,
    )(x_pad, prepared["conv1_m"], prepared["conv1_b"],
      prepared["conv2_m"], prepared["conv2_b"])


def _choose_tm(m, tm_max):
    """Row tile: multiple of 8, minimal dead padding, and >=2 grid steps when the
    batch is large enough to split usefully (v7x megacore); 1 step otherwise."""
    n_steps = max(_cdiv(m, tm_max), 2 if m >= 16 else 1)
    return min(_round_up(_cdiv(m, n_steps), 8), tm_max)


def _mlp_head(x, w1, b1, w2, b2, *, tm_max=512):
    """Fused fc1+ReLU+fc2 over batch row tiles; both weights VMEM-resident."""
    M, K = x.shape
    H = w1.shape[1]
    N = w2.shape[1]
    tm = _choose_tm(M, tm_max)
    m_pad = _round_up(M, tm)
    if m_pad != M:
        x = jnp.pad(x, ((0, m_pad - M), (0, 0)))
    cost = pl.CostEstimate(
        flops=2 * m_pad * K * H + 2 * m_pad * H * N,
        transcendentals=0,
        bytes_accessed=2 * (m_pad * K + K * H + H * N) + 4 * (H + N + m_pad * N))
    out = pl.pallas_call(
        _mlp_head_kernel,
        out_shape=jax.ShapeDtypeStruct((m_pad, N), jnp.float32),
        grid=(m_pad // tm,),
        in_specs=[
            pl.BlockSpec((tm, K), lambda i: (i, 0)),
            pl.BlockSpec((K, H), lambda i: (0, 0)),
            pl.BlockSpec((1, H), lambda i: (0, 0)),
            pl.BlockSpec((H, N), lambda i: (0, 0)),
            pl.BlockSpec((1, N), lambda i: (0, 0)),
        ],
        out_specs=pl.BlockSpec((tm, N), lambda i: (i, 0)),
        compiler_params=pltpu.CompilerParams(
            dimension_semantics=("parallel",),
            vmem_limit_bytes=32 * 1024 * 1024),
        cost_estimate=cost,
    )(x, w1, b1, w2, b2)
    return out[:M]


# ------------------------------------------------------------- parameters ---

def init_params(key, num_classes=10):
    """PyTorch-layout parameters with nn.Module-style U(-1/sqrt(fan_in), .) init."""
    ks = jax.random.split(key, 8)

    def u(k, shape, fan_in):
        bound = 1.0 / jnp.sqrt(jnp.float32(fan_in))
        return jax.random.uniform(k, shape, jnp.float32, -bound, bound)

    return {
        "conv1_w": u(ks[0], (32, 1, 5, 5), 1 * 5 * 5),        # OIHW
        "conv1_b": u(ks[1], (32,), 1 * 5 * 5),
        "conv2_w": u(ks[2], (64, 32, 5, 5), 32 * 5 * 5),
        "conv2_b": u(ks[3], (64,), 32 * 5 * 5),
        "fc1_w": u(ks[4], (512, 64 * 7 * 7), 64 * 7 * 7),     # (out, in), NCHW-flattened
        "fc1_b": u(ks[5], (512,), 64 * 7 * 7),
        "fc2_w": u(ks[6], (num_classes, 512), 512),
        "fc2_b": u(ks[7], (num_classes,), 512),
    }


def _conv_band(w_oihw, wi, wo):
    """OIHW conv weight -> (K, wi*cin, wo*cout) block-banded matrices, one per kh.

    band[kh][(j+kw)*cin + c, j*cout + n] = w[n, c, kh, kw], so the row-shifted
    matmul   out[i, :] += x_padded[i+kh, :] @ band[kh]   computes the 5x5
    convolution in the (width, channel)-interleaved lane layout used in-kernel.
    """
    w = np.asarray(w_oihw, np.float32)
    cout, cin, K, _ = w.shape
    band = np.zeros((K, wi * cin, wo * cout), np.float32)
    for kh in range(K):
        for kw in range(K):
            blk = w[:, :, kh, kw].T                      # (cin, cout)
            for j in range(wo):
                r = (j + kw) * cin
                band[kh, r:r + cin, j * cout:(j + 1) * cout] = blk
    return band


def prepare_params(params, num_classes=10):
    """One-time host-side re-layout of PyTorch-format weights for the kernels."""
    assert num_classes <= _HEAD_LANES

    m1 = _conv_band(params["conv1_w"], _P1I, _P1O)       # (5, 30, 832)
    m2 = _conv_band(params["conv2_w"], _P2I, _P2O)       # (5, 512, 768)
    b1 = np.tile(np.asarray(params["conv1_b"], np.float32), _P1O)   # (832,)
    b2 = np.tile(np.asarray(params["conv2_b"], np.float32), _P2O)   # (768,)

    # fc1 columns permuted once: PyTorch flattens NCHW (c,h,w); kernel-A features
    # are (h, w, c)-flattened.
    fc1 = np.asarray(params["fc1_w"], np.float32).reshape(512, _C2, _POOL2, _POOL2)
    fc1 = fc1.transpose(2, 3, 1, 0).reshape(_FEAT, 512)

    fc2 = np.asarray(params["fc2_w"], np.float32).T                 # (512, nc)
    fc2 = np.pad(fc2, ((0, 0), (0, _HEAD_LANES - num_classes)))
    fc2_b = np.pad(np.asarray(params["fc2_b"], np.float32),
                   (0, _HEAD_LANES - num_classes))

    return {
        "conv1_m": jnp.asarray(m1, jnp.bfloat16),
        "conv1_b": jnp.asarray(b1.reshape(1, -1), jnp.float32),
        "conv2_m": jnp.asarray(m2, jnp.bfloat16),
        "conv2_b": jnp.asarray(b2.reshape(1, -1), jnp.float32),
        "fc1_w": jnp.asarray(fc1, jnp.bfloat16),
        "fc1_b": jnp.asarray(
            np.asarray(params["fc1_b"], np.float32).reshape(1, -1), jnp.float32),
        "fc2_w": jnp.asarray(fc2, jnp.bfloat16),
        "fc2_b": jnp.asarray(fc2_b.reshape(1, -1), jnp.float32),
    }


# ----------------------------------------------------------------- forward --

@functools.partial(jax.jit, static_argnames=("num_classes",))
def net_forward(x_nchw, prepared, *, num_classes=10):
    """Pallas forward matching Net.forward (NCHW float32, (B,1,28,28) input)."""
    B = x_nchw.shape[0]
    # conv1 padding (=1) baked into the trunk input; single input channel.
    xp = jnp.pad(x_nchw[:, 0, :, :], ((0, 0), (1, 1), (1, 1))).astype(jnp.bfloat16)
    feat = _conv_trunk(xp, prepared)                     # (B, 7, 448) bf16
    feat = feat.reshape(B, _FEAT)                        # NHWC (h, w, c) flatten
    logits = _mlp_head(feat, prepared["fc1_w"], prepared["fc1_b"],
                       prepared["fc2_w"], prepared["fc2_b"])
    return logits[:, :num_classes]


def net_forward_ref(x_nchw, params):
    """Pure-JAX/XLA reference mirroring the PyTorch module op-for-op."""
    hp = jax.lax.Precision.HIGHEST

    def conv(x, w, b):
        y = jax.lax.conv_general_dilated(
            x, w, window_strides=(1, 1), padding=((1, 1), (1, 1)),
            dimension_numbers=("NCHW", "OIHW", "NCHW"), precision=hp)
        return y + b[None, :, None, None]

    def pool(x):
        return jax.lax.reduce_window(
            x, -jnp.inf, jax.lax.max, (1, 1, 2, 2), (1, 1, 2, 2),
            ((0, 0), (0, 0), (1, 1), (1, 1)))

    y = pool(jnp.maximum(conv(x_nchw, params["conv1_w"], params["conv1_b"]), 0.0))
    y = pool(jnp.maximum(conv(y, params["conv2_w"], params["conv2_b"]), 0.0))
    y = y.reshape(y.shape[0], -1)                        # NCHW flatten
    y = jnp.maximum(jnp.dot(y, params["fc1_w"].T, precision=hp) + params["fc1_b"], 0.0)
    return jnp.dot(y, params["fc2_w"].T, precision=hp) + params["fc2_b"]


if __name__ == "__main__":
    key = jax.random.PRNGKey(0)
    k_x, k_p = jax.random.split(key)

    num_classes = 10
    x = jax.random.normal(k_x, (2, 1, 28, 28), dtype=jnp.float32)   # MNIST-shaped NCHW
    params = init_params(k_p, num_classes=num_classes)
    prepared = prepare_params(params, num_classes=num_classes)      # one-time re-layout

    y = net_forward(x, prepared, num_classes=num_classes)
    jax.block_until_ready(y)

    y_ref = net_forward_ref(x, params)
    assert y.shape == (2, num_classes)
    err = float(jnp.max(jnp.abs(y - y_ref)))
    assert jnp.allclose(y, y_ref, atol=2e-2, rtol=2e-2), "max|diff| = %e" % err

    print("KERNEL_OK")
</pallas_src>

<mosaic_0001>
module attributes {stable_mosaic.version = 11 : i64} {
  func.func @_conv_trunk_kernel(%arg0: i32, %arg1: memref<1x30x30xbf16, #tpu.memory_space<vmem>>, %arg2: memref<5x30x832xbf16, #tpu.memory_space<vmem>>, %arg3: memref<1x832xf32, #tpu.memory_space<vmem>>, %arg4: memref<5x512x768xbf16, #tpu.memory_space<vmem>>, %arg5: memref<1x768xf32, #tpu.memory_space<vmem>>, %arg6: memref<1x7x448xbf16, #tpu.memory_space<vmem>>) attributes {dimension_semantics = [#tpu.dimension_semantics<parallel>], iteration_bounds = array<i64: 2>, scalar_prefetch = 0 : i64, scratch_operands = 0 : i64, tpu.core_type = #tpu.core_type<tc>, window_params = [{transform_indices = @transform_0, window_bounds = array<i64: 1, 30, 30>}, {pipeline_mode = #tpu.pipeline_mode<synchronous>, transform_indices = @transform_1, window_bounds = array<i64: 5, 30, 832>}, {pipeline_mode = #tpu.pipeline_mode<synchronous>, transform_indices = @transform_2, window_bounds = array<i64: 1, 832>}, {pipeline_mode = #tpu.pipeline_mode<synchronous>, transform_indices = @transform_3, window_bounds = array<i64: 5, 512, 768>}, {pipeline_mode = #tpu.pipeline_mode<synchronous>, transform_indices = @transform_4, window_bounds = array<i64: 1, 768>}, {transform_indices = @transform_5, window_bounds = array<i64: 1, 7, 448>}]} {
    %c0 = arith.constant 0 : index
    %c0_0 = arith.constant 0 : index
    %c0_1 = arith.constant 0 : index
    %0 = vector.load %arg1[%c0, %c0_0, %c0_1] : memref<1x30x30xbf16, #tpu.memory_space<vmem>>, vector<1x30x30xbf16>
    %1 = vector.shape_cast %0 : vector<1x30x30xbf16> to vector<30x30xbf16>
    %cst = arith.constant 0.000000e+00 : f32
    %2 = vector.broadcast %cst : f32 to vector<26x832xf32>
    %3 = vector.extract_strided_slice %1 {offsets = [0, 0], sizes = [26, 30], strides = [1, 1]} : vector<30x30xbf16> to vector<26x30xbf16>
    %c0_2 = arith.constant 0 : index
    %c0_3 = arith.constant 0 : index
    %c0_4 = arith.constant 0 : index
    %4 = vector.load %arg2[%c0_2, %c0_3, %c0_4] : memref<5x30x832xbf16, #tpu.memory_space<vmem>>, vector<1x30x832xbf16>
    %5 = vector.shape_cast %4 : vector<1x30x832xbf16> to vector<30x832xbf16>
    %cst_5 = arith.constant dense<0.000000e+00> : vector<26x832xf32>
    %6 = tpu.matmul %3, %5, %cst_5 {dimension_numbers = #tpu.dot_dimension_numbers<[1], [0], [0], [1], [0, 0, 1, 1], [], []>} : vector<26x30xbf16>, vector<30x832xbf16>, vector<26x832xf32> -> vector<26x832xf32>
    %7 = arith.addf %2, %6 : vector<26x832xf32>
    %8 = vector.extract_strided_slice %1 {offsets = [1, 0], sizes = [26, 30], strides = [1, 1]} : vector<30x30xbf16> to vector<26x30xbf16>
    %c1 = arith.constant 1 : index
    %c0_6 = arith.constant 0 : index
    %c0_7 = arith.constant 0 : index
    %9 = vector.load %arg2[%c1, %c0_6, %c0_7] : memref<5x30x832xbf16, #tpu.memory_space<vmem>>, vector<1x30x832xbf16>
    %10 = vector.shape_cast %9 : vector<1x30x832xbf16> to vector<30x832xbf16>
    %cst_8 = arith.constant dense<0.000000e+00> : vector<26x832xf32>
    %11 = tpu.matmul %8, %10, %cst_8 {dimension_numbers = #tpu.dot_dimension_numbers<[1], [0], [0], [1], [0, 0, 1, 1], [], []>} : vector<26x30xbf16>, vector<30x832xbf16>, vector<26x832xf32> -> vector<26x832xf32>
    %12 = arith.addf %7, %11 : vector<26x832xf32>
    %13 = vector.extract_strided_slice %1 {offsets = [2, 0], sizes = [26, 30], strides = [1, 1]} : vector<30x30xbf16> to vector<26x30xbf16>
    %c2 = arith.constant 2 : index
    %c0_9 = arith.constant 0 : index
    %c0_10 = arith.constant 0 : index
    %14 = vector.load %arg2[%c2, %c0_9, %c0_10] : memref<5x30x832xbf16, #tpu.memory_space<vmem>>, vector<1x30x832xbf16>
    %15 = vector.shape_cast %14 : vector<1x30x832xbf16> to vector<30x832xbf16>
    %cst_11 = arith.constant dense<0.000000e+00> : vector<26x832xf32>
    %16 = tpu.matmul %13, %15, %cst_11 {dimension_numbers = #tpu.dot_dimension_numbers<[1], [0], [0], [1], [0, 0, 1, 1], [], []>} : vector<26x30xbf16>, vector<30x832xbf16>, vector<26x832xf32> -> vector<26x832xf32>
    %17 = arith.addf %12, %16 : vector<26x832xf32>
    %18 = vector.extract_strided_slice %1 {offsets = [3, 0], sizes = [26, 30], strides = [1, 1]} : vector<30x30xbf16> to vector<26x30xbf16>
    %c3 = arith.constant 3 : index
    %c0_12 = arith.constant 0 : index
    %c0_13 = arith.constant 0 : index
    %19 = vector.load %arg2[%c3, %c0_12, %c0_13] : memref<5x30x832xbf16, #tpu.memory_space<vmem>>, vector<1x30x832xbf16>
    %20 = vector.shape_cast %19 : vector<1x30x832xbf16> to vector<30x832xbf16>
    %cst_14 = arith.constant dense<0.000000e+00> : vector<26x832xf32>
    %21 = tpu.matmul %18, %20, %cst_14 {dimension_numbers = #tpu.dot_dimension_numbers<[1], [0], [0], [1], [0, 0, 1, 1], [], []>} : vector<26x30xbf16>, vector<30x832xbf16>, vector<26x832xf32> -> vector<26x832xf32>
    %22 = arith.addf %17, %21 : vector<26x832xf32>
    %23 = vector.extract_strided_slice %1 {offsets = [4, 0], sizes = [26, 30], strides = [1, 1]} : vector<30x30xbf16> to vector<26x30xbf16>
    %c4 = arith.constant 4 : index
    %c0_15 = arith.constant 0 : index
    %c0_16 = arith.constant 0 : index
    %24 = vector.load %arg2[%c4, %c0_15, %c0_16] : memref<5x30x832xbf16, #tpu.memory_space<vmem>>, vector<1x30x832xbf16>
    %25 = vector.shape_cast %24 : vector<1x30x832xbf16> to vector<30x832xbf16>
    %cst_17 = arith.constant dense<0.000000e+00> : vector<26x832xf32>
    %26 = tpu.matmul %23, %25, %cst_17 {dimension_numbers = #tpu.dot_dimension_numbers<[1], [0], [0], [1], [0, 0, 1, 1], [], []>} : vector<26x30xbf16>, vector<30x832xbf16>, vector<26x832xf32> -> vector<26x832xf32>
    %27 = arith.addf %22, %26 : vector<26x832xf32>
    %c0_18 = arith.constant 0 : index
    %c0_19 = arith.constant 0 : index
    %28 = vector.load %arg3[%c0_18, %c0_19] : memref<1x832xf32, #tpu.memory_space<vmem>>, vector<1x832xf32>
    %29 = vector.broadcast %28 : vector<1x832xf32> to vector<26x832xf32>
    %30 = arith.addf %27, %29 : vector<26x832xf32>
    %cst_20 = arith.constant 0.000000e+00 : f32
    %31 = vector.broadcast %cst_20 : f32 to vector<26x832xf32>
    %32 = arith.maximumf %30, %31 : vector<26x832xf32>
    %33 = vector.extract_strided_slice %32 {offsets = [0, 0], sizes = [1, 832], strides = [1, 1]} : vector<26x832xf32> to vector<1x832xf32>
    %34 = vector.extract_strided_slice %32 {offsets = [1, 0], sizes = [1, 832], strides = [1, 1]} : vector<26x832xf32> to vector<1x832xf32>
    %35 = vector.extract_strided_slice %32 {offsets = [2, 0], sizes = [1, 832], strides = [1, 1]} : vector<26x832xf32> to vector<1x832xf32>
    %36 = arith.maximumf %34, %35 : vector<1x832xf32>
    %37 = vector.extract_strided_slice %32 {offsets = [3, 0], sizes = [1, 832], strides = [1, 1]} : vector<26x832xf32> to vector<1x832xf32>
    %38 = vector.extract_strided_slice %32 {offsets = [4, 0], sizes = [1, 832], strides = [1, 1]} : vector<26x832xf32> to vector<1x832xf32>
    %39 = arith.maximumf %37, %38 : vector<1x832xf32>
    %40 = vector.extract_strided_slice %32 {offsets = [5, 0], sizes = [1, 832], strides = [1, 1]} : vector<26x832xf32> to vector<1x832xf32>
    %41 = vector.extract_strided_slice %32 {offsets = [6, 0], sizes = [1, 832], strides = [1, 1]} : vector<26x832xf32> to vector<1x832xf32>
    %42 = arith.maximumf %40, %41 : vector<1x832xf32>
    %43 = vector.extract_strided_slice %32 {offsets = [7, 0], sizes = [1, 832], strides = [1, 1]} : vector<26x832xf32> to vector<1x832xf32>
    %44 = vector.extract_strided_slice %32 {offsets = [8, 0], sizes = [1, 832], strides = [1, 1]} : vector<26x832xf32> to vector<1x832xf32>
    %45 = arith.maximumf %43, %44 : vector<1x832xf32>
    %46 = vector.extract_strided_slice %32 {offsets = [9, 0], sizes = [1, 832], strides = [1, 1]} : vector<26x832xf32> to vector<1x832xf32>
    %47 = vector.extract_strided_slice %32 {offsets = [10, 0], sizes = [1, 832], strides = [1, 1]} : vector<26x832xf32> to vector<1x832xf32>
    %48 = arith.maximumf %46, %47 : vector<1x832xf32>
    %49 = vector.extract_strided_slice %32 {offsets = [11, 0], sizes = [1, 832], strides = [1, 1]} : vector<26x832xf32> to vector<1x832xf32>
    %50 = vector.extract_strided_slice %32 {offsets = [12, 0], sizes = [1, 832], strides = [1, 1]} : vector<26x832xf32> to vector<1x832xf32>
    %51 = arith.maximumf %49, %50 : vector<1x832xf32>
    %52 = vector.extract_strided_slice %32 {offsets = [13, 0], sizes = [1, 832], strides = [1, 1]} : vector<26x832xf32> to vector<1x832xf32>
    %53 = vector.extract_strided_slice %32 {offsets = [14, 0], sizes = [1, 832], strides = [1, 1]} : vector<26x832xf32> to vector<1x832xf32>
    %54 = arith.maximumf %52, %53 : vector<1x832xf32>
    %55 = vector.extract_strided_slice %32 {offsets = [15, 0], sizes = [1, 832], strides = [1, 1]} : vector<26x832xf32> to vector<1x832xf32>
    %56 = vector.extract_strided_slice %32 {offsets = [16, 0], sizes = [1, 832], strides = [1, 1]} : vector<26x832xf32> to vector<1x832xf32>
    %57 = arith.maximumf %55, %56 : vector<1x832xf32>
    %58 = vector.extract_strided_slice %32 {offsets = [17, 0], sizes = [1, 832], strides = [1, 1]} : vector<26x832xf32> to vector<1x832xf32>
    %59 = vector.extract_strided_slice %32 {offsets = [18, 0], sizes = [1, 832], strides = [1, 1]} : vector<26x832xf32> to vector<1x832xf32>
    %60 = arith.maximumf %58, %59 : vector<1x832xf32>
    %61 = vector.extract_strided_slice %32 {offsets = [19, 0], sizes = [1, 832], strides = [1, 1]} : vector<26x832xf32> to vector<1x832xf32>
    %62 = vector.extract_strided_slice %32 {offsets = [20, 0], sizes = [1, 832], strides = [1, 1]} : vector<26x832xf32> to vector<1x832xf32>
    %63 = arith.maximumf %61, %62 : vector<1x832xf32>
    %64 = vector.extract_strided_slice %32 {offsets = [21, 0], sizes = [1, 832], strides = [1, 1]} : vector<26x832xf32> to vector<1x832xf32>
    %65 = vector.extract_strided_slice %32 {offsets = [22, 0], sizes = [1, 832], strides = [1, 1]} : vector<26x832xf32> to vector<1x832xf32>
    %66 = arith.maximumf %64, %65 : vector<1x832xf32>
    %67 = vector.extract_strided_slice %32 {offsets = [23, 0], sizes = [1, 832], strides = [1, 1]} : vector<26x832xf32> to vector<1x832xf32>
    %68 = vector.extract_strided_slice %32 {offsets = [24, 0], sizes = [1, 832], strides = [1, 1]} : vector<26x832xf32> to vector<1x832xf32>
    %69 = arith.maximumf %67, %68 : vector<1x832xf32>
    %70 = vector.extract_strided_slice %32 {offsets = [25, 0], sizes = [1, 832], strides = [1, 1]} : vector<26x832xf32> to vector<1x832xf32>
    %71 = tpu.concatenate %33, %36, %39, %42, %45, %48, %51, %54, %57, %60, %63, %66, %69, %70 in 0 : vector<1x832xf32>, vector<1x832xf32>, vector<1x832xf32>, vector<1x832xf32>, vector<1x832xf32>, vector<1x832xf32>, vector<1x832xf32>, vector<1x832xf32>, vector<1x832xf32>, vector<1x832xf32>, vector<1x832xf32>, vector<1x832xf32>, vector<1x832xf32>, vector<1x832xf32> -> vector<14x832xf32>
    %72 = vector.extract_strided_slice %71 {offsets = [0, 0], sizes = [14, 32], strides = [1, 1]} : vector<14x832xf32> to vector<14x32xf32>
    %73 = vector.extract_strided_slice %71 {offsets = [0, 32], sizes = [14, 32], strides = [1, 1]} : vector<14x832xf32> to vector<14x32xf32>
    %74 = vector.extract_strided_slice %71 {offsets = [0, 64], sizes = [14, 32], strides = [1, 1]} : vector<14x832xf32> to vector<14x32xf32>
    %75 = arith.maximumf %73, %74 : vector<14x32xf32>
    %76 = vector.extract_strided_slice %71 {offsets = [0, 96], sizes = [14, 32], strides = [1, 1]} : vector<14x832xf32> to vector<14x32xf32>
    %77 = vector.extract_strided_slice %71 {offsets = [0, 128], sizes = [14, 32], strides = [1, 1]} : vector<14x832xf32> to vector<14x32xf32>
    %78 = arith.maximumf %76, %77 : vector<14x32xf32>
    %79 = vector.extract_strided_slice %71 {offsets = [0, 160], sizes = [14, 32], strides = [1, 1]} : vector<14x832xf32> to vector<14x32xf32>
    %80 = vector.extract_strided_slice %71 {offsets = [0, 192], sizes = [14, 32], strides = [1, 1]} : vector<14x832xf32> to vector<14x32xf32>
    %81 = arith.maximumf %79, %80 : vector<14x32xf32>
    %82 = vector.extract_strided_slice %71 {offsets = [0, 224], sizes = [14, 32], strides = [1, 1]} : vector<14x832xf32> to vector<14x32xf32>
    %83 = vector.extract_strided_slice %71 {offsets = [0, 256], sizes = [14, 32], strides = [1, 1]} : vector<14x832xf32> to vector<14x32xf32>
    %84 = arith.maximumf %82, %83 : vector<14x32xf32>
    %85 = vector.extract_strided_slice %71 {offsets = [0, 288], sizes = [14, 32], strides = [1, 1]} : vector<14x832xf32> to vector<14x32xf32>
    %86 = vector.extract_strided_slice %71 {offsets = [0, 320], sizes = [14, 32], strides = [1, 1]} : vector<14x832xf32> to vector<14x32xf32>
    %87 = arith.maximumf %85, %86 : vector<14x32xf32>
    %88 = vector.extract_strided_slice %71 {offsets = [0, 352], sizes = [14, 32], strides = [1, 1]} : vector<14x832xf32> to vector<14x32xf32>
    %89 = vector.extract_strided_slice %71 {offsets = [0, 384], sizes = [14, 32], strides = [1, 1]} : vector<14x832xf32> to vector<14x32xf32>
    %90 = arith.maximumf %88, %89 : vector<14x32xf32>
    %91 = vector.extract_strided_slice %71 {offsets = [0, 416], sizes = [14, 32], strides = [1, 1]} : vector<14x832xf32> to vector<14x32xf32>
    %92 = vector.extract_strided_slice %71 {offsets = [0, 448], sizes = [14, 32], strides = [1, 1]} : vector<14x832xf32> to vector<14x32xf32>
    %93 = arith.maximumf %91, %92 : vector<14x32xf32>
    %94 = vector.extract_strided_slice %71 {offsets = [0, 480], sizes = [14, 32], strides = [1, 1]} : vector<14x832xf32> to vector<14x32xf32>
    %95 = vector.extract_strided_slice %71 {offsets = [0, 512], sizes = [14, 32], strides = [1, 1]} : vector<14x832xf32> to vector<14x32xf32>
    %96 = arith.maximumf %94, %95 : vector<14x32xf32>
    %97 = vector.extract_strided_slice %71 {offsets = [0, 544], sizes = [14, 32], strides = [1, 1]} : vector<14x832xf32> to vector<14x32xf32>
    %98 = vector.extract_strided_slice %71 {offsets = [0, 576], sizes = [14, 32], strides = [1, 1]} : vector<14x832xf32> to vector<14x32xf32>
    %99 = arith.maximumf %97, %98 : vector<14x32xf32>
    %100 = vector.extract_strided_slice %71 {offsets = [0, 608], sizes = [14, 32], strides = [1, 1]} : vector<14x832xf32> to vector<14x32xf32>
    %101 = vector.extract_strided_slice %71 {offsets = [0, 640], sizes = [14, 32], strides = [1, 1]} : vector<14x832xf32> to vector<14x32xf32>
    %102 = arith.maximumf %100, %101 : vector<14x32xf32>
    %103 = vector.extract_strided_slice %71 {offsets = [0, 672], sizes = [14, 32], strides = [1, 1]} : vector<14x832xf32> to vector<14x32xf32>
    %104 = vector.extract_strided_slice %71 {offsets = [0, 704], sizes = [14, 32], strides = [1, 1]} : vector<14x832xf32> to vector<14x32xf32>
    %105 = arith.maximumf %103, %104 : vector<14x32xf32>
    %106 = vector.extract_strided_slice %71 {offsets = [0, 736], sizes = [14, 32], strides = [1, 1]} : vector<14x832xf32> to vector<14x32xf32>
    %107 = vector.extract_strided_slice %71 {offsets = [0, 768], sizes = [14, 32], strides = [1, 1]} : vector<14x832xf32> to vector<14x32xf32>
    %108 = arith.maximumf %106, %107 : vector<14x32xf32>
    %109 = vector.extract_strided_slice %71 {offsets = [0, 800], sizes = [14, 32], strides = [1, 1]} : vector<14x832xf32> to vector<14x32xf32>
    %cst_21 = arith.constant 0.000000e+00 : f32
    %110 = vector.broadcast %cst_21 : f32 to vector<14x32xf32>
    %111 = tpu.concatenate %110, %72, %75, %78, %81, %84, %87, %90, %93, %96, %99, %102, %105, %108, %109, %110 in 1 : vector<14x32xf32>, vector<14x32xf32>, vector<14x32xf32>, vector<14x32xf32>, vector<14x32xf32>, vector<14x32xf32>, vector<14x32xf32>, vector<14x32xf32>, vector<14x32xf32>, vector<14x32xf32>, vector<14x32xf32>, vector<14x32xf32>, vector<14x32xf32>, vector<14x32xf32>, vector<14x32xf32>, vector<14x32xf32> -> vector<14x512xf32>
    %cst_22 = arith.constant 0.000000e+00 : f32
    %112 = vector.broadcast %cst_22 : f32 to vector<1x512xf32>
    %113 = tpu.concatenate %112, %111, %112 in 0 : vector<1x512xf32>, vector<14x512xf32>, vector<1x512xf32> -> vector<16x512xf32>
    %114 = arith.truncf %113 : vector<16x512xf32> to vector<16x512xbf16>
    %cst_23 = arith.constant 0.000000e+00 : f32
    %115 = vector.broadcast %cst_23 : f32 to vector<12x768xf32>
    %116 = vector.extract_strided_slice %114 {offsets = [0, 0], sizes = [12, 512], strides = [1, 1]} : vector<16x512xbf16> to vector<12x512xbf16>
    %c0_24 = arith.constant 0 : index
    %c0_25 = arith.constant 0 : index
    %c0_26 = arith.constant 0 : index
    %117 = vector.load %arg4[%c0_24, %c0_25, %c0_26] : memref<5x512x768xbf16, #tpu.memory_space<vmem>>, vector<1x512x768xbf16>
    %118 = vector.shape_cast %117 : vector<1x512x768xbf16> to vector<512x768xbf16>
    %cst_27 = arith.constant dense<0.000000e+00> : vector<12x768xf32>
    %119 = tpu.matmul %116, %118, %cst_27 {dimension_numbers = #tpu.dot_dimension_numbers<[1], [0], [0], [1], [0, 0, 1, 1], [], []>} : vector<12x512xbf16>, vector<512x768xbf16>, vector<12x768xf32> -> vector<12x768xf32>
    %120 = arith.addf %115, %119 : vector<12x768xf32>
    %121 = vector.extract_strided_slice %114 {offsets = [1, 0], sizes = [12, 512], strides = [1, 1]} : vector<16x512xbf16> to vector<12x512xbf16>
    %c1_28 = arith.constant 1 : index
    %c0_29 = arith.constant 0 : index
    %c0_30 = arith.constant 0 : index
    %122 = vector.load %arg4[%c1_28, %c0_29, %c0_30] : memref<5x512x768xbf16, #tpu.memory_space<vmem>>, vector<1x512x768xbf16>
    %123 = vector.shape_cast %122 : vector<1x512x768xbf16> to vector<512x768xbf16>
    %cst_31 = arith.constant dense<0.000000e+00> : vector<12x768xf32>
    %124 = tpu.matmul %121, %123, %cst_31 {dimension_numbers = #tpu.dot_dimension_numbers<[1], [0], [0], [1], [0, 0, 1, 1], [], []>} : vector<12x512xbf16>, vector<512x768xbf16>, vector<12x768xf32> -> vector<12x768xf32>
    %125 = arith.addf %120, %124 : vector<12x768xf32>
    %126 = vector.extract_strided_slice %114 {offsets = [2, 0], sizes = [12, 512], strides = [1, 1]} : vector<16x512xbf16> to vector<12x512xbf16>
    %c2_32 = arith.constant 2 : index
    %c0_33 = arith.constant 0 : index
    %c0_34 = arith.constant 0 : index
    %127 = vector.load %arg4[%c2_32, %c0_33, %c0_34] : memref<5x512x768xbf16, #tpu.memory_space<vmem>>, vector<1x512x768xbf16>
    %128 = vector.shape_cast %127 : vector<1x512x768xbf16> to vector<512x768xbf16>
    %cst_35 = arith.constant dense<0.000000e+00> : vector<12x768xf32>
    %129 = tpu.matmul %126, %128, %cst_35 {dimension_numbers = #tpu.dot_dimension_numbers<[1], [0], [0], [1], [0, 0, 1, 1], [], []>} : vector<12x512xbf16>, vector<512x768xbf16>, vector<12x768xf32> -> vector<12x768xf32>
    %130 = arith.addf %125, %129 : vector<12x768xf32>
    %131 = vector.extract_strided_slice %114 {offsets = [3, 0], sizes = [12, 512], strides = [1, 1]} : vector<16x512xbf16> to vector<12x512xbf16>
    %c3_36 = arith.constant 3 : index
    %c0_37 = arith.constant 0 : index
    %c0_38 = arith.constant 0 : index
    %132 = vector.load %arg4[%c3_36, %c0_37, %c0_38] : memref<5x512x768xbf16, #tpu.memory_space<vmem>>, vector<1x512x768xbf16>
    %133 = vector.shape_cast %132 : vector<1x512x768xbf16> to vector<512x768xbf16>
    %cst_39 = arith.constant dense<0.000000e+00> : vector<12x768xf32>
    %134 = tpu.matmul %131, %133, %cst_39 {dimension_numbers = #tpu.dot_dimension_numbers<[1], [0], [0], [1], [0, 0, 1, 1], [], []>} : vector<12x512xbf16>, vector<512x768xbf16>, vector<12x768xf32> -> vector<12x768xf32>
    %135 = arith.addf %130, %134 : vector<12x768xf32>
    %136 = vector.extract_strided_slice %114 {offsets = [4, 0], sizes = [12, 512], strides = [1, 1]} : vector<16x512xbf16> to vector<12x512xbf16>
    %c4_40 = arith.constant 4 : index
    %c0_41 = arith.constant 0 : index
    %c0_42 = arith.constant 0 : index
    %137 = vector.load %arg4[%c4_40, %c0_41, %c0_42] : memref<5x512x768xbf16, #tpu.memory_space<vmem>>, vector<1x512x768xbf16>
    %138 = vector.shape_cast %137 : vector<1x512x768xbf16> to vector<512x768xbf16>
    %cst_43 = arith.constant dense<0.000000e+00> : vector<12x768xf32>
    %139 = tpu.matmul %136, %138, %cst_43 {dimension_numbers = #tpu.dot_dimension_numbers<[1], [0], [0], [1], [0, 0, 1, 1], [], []>} : vector<12x512xbf16>, vector<512x768xbf16>, vector<12x768xf32> -> vector<12x768xf32>
    %140 = arith.addf %135, %139 : vector<12x768xf32>
    %c0_44 = arith.constant 0 : index
    %c0_45 = arith.constant 0 : index
    %141 = vector.load %arg5[%c0_44, %c0_45] : memref<1x768xf32, #tpu.memory_space<vmem>>, vector<1x768xf32>
    %142 = vector.broadcast %141 : vector<1x768xf32> to vector<12x768xf32>
    %143 = arith.addf %140, %142 : vector<12x768xf32>
    %cst_46 = arith.constant 0.000000e+00 : f32
    %144 = vector.broadcast %cst_46 : f32 to vector<12x768xf32>
    %145 = arith.maximumf %143, %144 : vector<12x768xf32>
    %146 = vector.extract_strided_slice %145 {offsets = [0, 0], sizes = [1, 768], strides = [1, 1]} : vector<12x768xf32> to vector<1x768xf32>
    %147 = vector.extract_strided_slice %145 {offsets = [1, 0], sizes = [1, 768], strides = [1, 1]} : vector<12x768xf32> to vector<1x768xf32>
    %148 = vector.extract_strided_slice %145 {offsets = [2, 0], sizes = [1, 768], strides = [1, 1]} : vector<12x768xf32> to vector<1x768xf32>
    %149 = arith.maximumf %147, %148 : vector<1x768xf32>
    %150 = vector.extract_strided_slice %145 {offsets = [3, 0], sizes = [1, 768], strides = [1, 1]} : vector<12x768xf32> to vector<1x768xf32>
    %151 = vector.extract_strided_slice %145 {offsets = [4, 0], sizes = [1, 768], strides = [1, 1]} : vector<12x768xf32> to vector<1x768xf32>
    %152 = arith.maximumf %150, %151 : vector<1x768xf32>
    %153 = vector.extract_strided_slice %145 {offsets = [5, 0], sizes = [1, 768], strides = [1, 1]} : vector<12x768xf32> to vector<1x768xf32>
    %154 = vector.extract_strided_slice %145 {offsets = [6, 0], sizes = [1, 768], strides = [1, 1]} : vector<12x768xf32> to vector<1x768xf32>
    %155 = arith.maximumf %153, %154 : vector<1x768xf32>
    %156 = vector.extract_strided_slice %145 {offsets = [7, 0], sizes = [1, 768], strides = [1, 1]} : vector<12x768xf32> to vector<1x768xf32>
    %157 = vector.extract_strided_slice %145 {offsets = [8, 0], sizes = [1, 768], strides = [1, 1]} : vector<12x768xf32> to vector<1x768xf32>
    %158 = arith.maximumf %156, %157 : vector<1x768xf32>
    %159 = vector.extract_strided_slice %145 {offsets = [9, 0], sizes = [1, 768], strides = [1, 1]} : vector<12x768xf32> to vector<1x768xf32>
    %160 = vector.extract_strided_slice %145 {offsets = [10, 0], sizes = [1, 768], strides = [1, 1]} : vector<12x768xf32> to vector<1x768xf32>
    %161 = arith.maximumf %159, %160 : vector<1x768xf32>
    %162 = vector.extract_strided_slice %145 {offsets = [11, 0], sizes = [1, 768], strides = [1, 1]} : vector<12x768xf32> to vector<1x768xf32>
    %163 = tpu.concatenate %146, %149, %152, %155, %158, %161, %162 in 0 : vector<1x768xf32>, vector<1x768xf32>, vector<1x768xf32>, vector<1x768xf32>, vector<1x768xf32>, vector<1x768xf32>, vector<1x768xf32> -> vector<7x768xf32>
    %164 = vector.extract_strided_slice %163 {offsets = [0, 0], sizes = [7, 64], strides = [1, 1]} : vector<7x768xf32> to vector<7x64xf32>
    %165 = vector.extract_strided_slice %163 {offsets = [0, 64], sizes = [7, 64], strides = [1, 1]} : vector<7x768xf32> to vector<7x64xf32>
    %166 = vector.extract_strided_slice %163 {offsets = [0, 128], sizes = [7, 64], strides = [1, 1]} : vector<7x768xf32> to vector<7x64xf32>
    %167 = arith.maximumf %165, %166 : vector<7x64xf32>
    %168 = vector.extract_strided_slice %163 {offsets = [0, 192], sizes = [7, 64], strides = [1, 1]} : vector<7x768xf32> to vector<7x64xf32>
    %169 = vector.extract_strided_slice %163 {offsets = [0, 256], sizes = [7, 64], strides = [1, 1]} : vector<7x768xf32> to vector<7x64xf32>
    %170 = arith.maximumf %168, %169 : vector<7x64xf32>
    %171 = vector.extract_strided_slice %163 {offsets = [0, 320], sizes = [7, 64], strides = [1, 1]} : vector<7x768xf32> to vector<7x64xf32>
    %172 = vector.extract_strided_slice %163 {offsets = [0, 384], sizes = [7, 64], strides = [1, 1]} : vector<7x768xf32> to vector<7x64xf32>
    %173 = arith.maximumf %171, %172 : vector<7x64xf32>
    %174 = vector.extract_strided_slice %163 {offsets = [0, 448], sizes = [7, 64], strides = [1, 1]} : vector<7x768xf32> to vector<7x64xf32>
    %175 = vector.extract_strided_slice %163 {offsets = [0, 512], sizes = [7, 64], strides = [1, 1]} : vector<7x768xf32> to vector<7x64xf32>
    %176 = arith.maximumf %174, %175 : vector<7x64xf32>
    %177 = vector.extract_strided_slice %163 {offsets = [0, 576], sizes = [7, 64], strides = [1, 1]} : vector<7x768xf32> to vector<7x64xf32>
    %178 = vector.extract_strided_slice %163 {offsets = [0, 640], sizes = [7, 64], strides = [1, 1]} : vector<7x768xf32> to vector<7x64xf32>
    %179 = arith.maximumf %177, %178 : vector<7x64xf32>
    %180 = vector.extract_strided_slice %163 {offsets = [0, 704], sizes = [7, 64], strides = [1, 1]} : vector<7x768xf32> to vector<7x64xf32>
    %181 = tpu.concatenate %164, %167, %170, %173, %176, %179, %180 in 1 : vector<7x64xf32>, vector<7x64xf32>, vector<7x64xf32>, vector<7x64xf32>, vector<7x64xf32>, vector<7x64xf32>, vector<7x64xf32> -> vector<7x448xf32>
    %182 = arith.truncf %181 : vector<7x448xf32> to vector<7x448xbf16>
    %c0_47 = arith.constant 0 : index
    %c0_48 = arith.constant 0 : index
    %c0_49 = arith.constant 0 : index
    %183 = vector.load %arg6[%c0_47, %c0_48, %c0_49] : memref<1x7x448xbf16, #tpu.memory_space<vmem>>, vector<1x7x448xbf16>
    %184 = vector.shape_cast %183 : vector<1x7x448xbf16> to vector<7x448xbf16>
    %185 = vector.shape_cast %182 : vector<7x448xbf16> to vector<1x7x448xbf16>
    tpu.vector_store %arg6[%c0_47, %c0_48, %c0_49], %185 {strides = array<i32>} : memref<1x7x448xbf16, #tpu.memory_space<vmem>>, vector<1x7x448xbf16>,
    return
  }
  func.func @transform_0(%arg0: i32) -> (i32, i32, i32) {
    %c0_i32 = arith.constant 0 : i32
    %c0_i32_0 = arith.constant 0 : i32
    %c0_i32_1 = arith.constant 0 : i32
    return %arg0, %c0_i32, %c0_i32_0 : i32, i32, i32
  }
  func.func @transform_1(%arg0: i32) -> (i32, i32, i32) {
    %c0_i32 = arith.constant 0 : i32
    %c0_i32_0 = arith.constant 0 : i32
    %c0_i32_1 = arith.constant 0 : i32
    %c0_i32_2 = arith.constant 0 : i32
    return %c0_i32, %c0_i32_0, %c0_i32_1 : i32, i32, i32
  }
  func.func @transform_2(%arg0: i32) -> (i32, i32) {
    %c0_i32 = arith.constant 0 : i32
    %c0_i32_0 = arith.constant 0 : i32
    %c0_i32_1 = arith.constant 0 : i32
    return %c0_i32, %c0_i32_0 : i32, i32
  }
  func.func @transform_3(%arg0: i32) -> (i32, i32, i32) {
    %c0_i32 = arith.constant 0 : i32
    %c0_i32_0 = arith.constant 0 : i32
    %c0_i32_1 = arith.constant 0 : i32
    %c0_i32_2 = arith.constant 0 : i32
    return %c0_i32, %c0_i32_0, %c0_i32_1 : i32, i32, i32
  }
  func.func @transform_4(%arg0: i32) -> (i32, i32) {
    %c0_i32 = arith.constant 0 : i32
    %c0_i32_0 = arith.constant 0 : i32
    %c0_i32_1 = arith.constant 0 : i32
    return %c0_i32, %c0_i32_0 : i32, i32
  }
  func.func @transform_5(%arg0: i32) -> (i32, i32, i32) {
    %c0_i32 = arith.constant 0 : i32
    %c0_i32_0 = arith.constant 0 : i32
    %c0_i32_1 = arith.constant 0 : i32
    return %arg0, %c0_i32, %c0_i32_0 : i32, i32, i32
  }
}

module attributes {stable_mosaic.version = 11 : i64} {
  func.func @_mlp_head_kernel(%arg0: i32, %arg1: memref<8x3136xbf16, #tpu.memory_space<vmem>>, %arg2: memref<3136x512xbf16, #tpu.memory_space<vmem>>, %arg3: memref<1x512xf32, #tpu.memory_space<vmem>>, %arg4: memref<512x128xbf16, #tpu.memory_space<vmem>>, %arg5: memref<1x128xf32, #tpu.memory_space<vmem>>, %arg6: memref<8x128xf32, #tpu.memory_space<vmem>>) attributes {dimension_semantics = [#tpu.dimension_semantics<parallel>], iteration_bounds = array<i64: 1>, scalar_prefetch = 0 : i64, scratch_operands = 0 : i64, tpu.core_type = #tpu.core_type<tc>, window_params = [{transform_indices = @transform_0, window_bounds = array<i64: 8, 3136>}, {pipeline_mode = #tpu.pipeline_mode<synchronous>, transform_indices = @transform_1, window_bounds = array<i64: 3136, 512>}, {pipeline_mode = #tpu.pipeline_mode<synchronous>, transform_indices = @transform_2, window_bounds = array<i64: 1, 512>}, {pipeline_mode = #tpu.pipeline_mode<synchronous>, transform_indices = @transform_3, window_bounds = array<i64: 512, 128>}, {pipeline_mode = #tpu.pipeline_mode<synchronous>, transform_indices = @transform_4, window_bounds = array<i64: 1, 128>}, {transform_indices = @transform_5, window_bounds = array<i64: 8, 128>}]} {
    %c0 = arith.constant 0 : index
    %c0_0 = arith.constant 0 : index
    %0 = vector.load %arg1[%c0, %c0_0] : memref<8x3136xbf16, #tpu.memory_space<vmem>>, vector<8x3136xbf16>
    %c0_1 = arith.constant 0 : index
    %c0_2 = arith.constant 0 : index
    %1 = vector.load %arg2[%c0_1, %c0_2] : memref<3136x512xbf16, #tpu.memory_space<vmem>>, vector<3136x512xbf16>
    %cst = arith.constant dense<0.000000e+00> : vector<8x512xf32>
    %2 = tpu.matmul %0, %1, %cst {dimension_numbers = #tpu.dot_dimension_numbers<[1], [0], [0], [1], [0, 0, 1, 1], [], []>} : vector<8x3136xbf16>, vector<3136x512xbf16>, vector<8x512xf32> -> vector<8x512xf32>
    %c0_3 = arith.constant 0 : index
    %c0_4 = arith.constant 0 : index
    %3 = vector.load %arg3[%c0_3, %c0_4] : memref<1x512xf32, #tpu.memory_space<vmem>>, vector<1x512xf32>
    %4 = vector.broadcast %3 : vector<1x512xf32> to vector<8x512xf32>
    %5 = arith.addf %2, %4 : vector<8x512xf32>
    %cst_5 = arith.constant 0.000000e+00 : f32
    %6 = vector.broadcast %cst_5 : f32 to vector<8x512xf32>
    %7 = arith.maximumf %5, %6 : vector<8x512xf32>
    %8 = arith.truncf %7 : vector<8x512xf32> to vector<8x512xbf16>
    %c0_6 = arith.constant 0 : index
    %c0_7 = arith.constant 0 : index
    %9 = vector.load %arg4[%c0_6, %c0_7] : memref<512x128xbf16, #tpu.memory_space<vmem>>, vector<512x128xbf16>
    %cst_8 = arith.constant dense<0.000000e+00> : vector<8x128xf32>
    %10 = tpu.matmul %8, %9, %cst_8 {dimension_numbers = #tpu.dot_dimension_numbers<[1], [0], [0], [1], [0, 0, 1, 1], [], []>} : vector<8x512xbf16>, vector<512x128xbf16>, vector<8x128xf32> -> vector<8x128xf32>
    %c0_9 = arith.constant 0 : index
    %c0_10 = arith.constant 0 : index
    %11 = vector.load %arg5[%c0_9, %c0_10] : memref<1x128xf32, #tpu.memory_space<vmem>>, vector<1x128xf32>
    %12 = vector.broadcast %11 : vector<1x128xf32> to vector<8x128xf32>
    %13 = arith.addf %10, %12 : vector<8x128xf32>
    %c0_11 = arith.constant 0 : index
    %c0_12 = arith.constant 0 : index
    %14 = vector.load %arg6[%c0_11, %c0_12] : memref<8x128xf32, #tpu.memory_space<vmem>>, vector<8x128xf32>
    tpu.vector_store %arg6[%c0_11, %c0_12], %13 {strides = array<i32>} : memref<8x128xf32, #tpu.memory_space<vmem>>, vector<8x128xf32>,
    return
  }
  func.func @transform_0(%arg0: i32) -> (i32, i32) {
    %c0_i32 = arith.constant 0 : i32
    %c0_i32_0 = arith.constant 0 : i32
    return %arg0, %c0_i32 : i32, i32
  }
  func.func @transform_1(%arg0: i32) -> (i32, i32) {
    %c0_i32 = arith.constant 0 : i32
    %c0_i32_0 = arith.constant 0 : i32
    %c0_i32_1 = arith.constant 0 : i32
    return %c0_i32, %c0_i32_0 : i32, i32
  }
  func.func @transform_2(%arg0: i32) -> (i32, i32) {
    %c0_i32 = arith.constant 0 : i32
    %c0_i32_0 = arith.constant 0 : i32
    %c0_i32_1 = arith.constant 0 : i32
    return %c0_i32, %c0_i32_0 : i32, i32
  }
  func.func @transform_3(%arg0: i32) -> (i32, i32) {
    %c0_i32 = arith.constant 0 : i32
    %c0_i32_0 = arith.constant 0 : i32
    %c0_i32_1 = arith.constant 0 : i32
    return %c0_i32, %c0_i32_0 : i32, i32
  }
  func.func @transform_4(%arg0: i32) -> (i32, i32) {
    %c0_i32 = arith.constant 0 : i32
    %c0_i32_0 = arith.constant 0 : i32
    %c0_i32_1 = arith.constant 0 : i32
    return %c0_i32, %c0_i32_0 : i32, i32
  }
  func.func @transform_5(%arg0: i32) -> (i32, i32) {
    %c0_i32 = arith.constant 0 : i32
    %c0_i32_0 = arith.constant 0 : i32
    return %arg0, %c0_i32 : i32, i32
  }
}

</mosaic_0001>

<bundles_post_ra>
// kernel: net_forward.3
= control target key start
LH: loop header
LB: loop body
LE: loop exit
PB: predicated region body
PF: predicated region fallthrough
CT: control target
= control target key end

     0   :  { %vm4847_vm0 = vcmask 523264   ;;  %s11088_s1 = inlined_call_operand.vmem [shape: bf16[3136,512], index: 1, kind: input, shape index: {}]   ;;  %s11089_s0 = inlined_call_operand.vmem [shape: bf16[8,3136], index: 0, kind: input, shape index: {}]   ;;  %s11090_s3 = inlined_call_operand.vmem [shape: bf16[512,128], index: 3, kind: input, shape index: {}]   ;;  %s11091_s2 = inlined_call_operand.vmem [shape: f32[1,512], index: 2, kind: input, shape index: {}]   ;;  %s11092_s4 = inlined_call_operand.vmem [shape: f32[1,128], index: 4, kind: input, shape index: {}]   ;;  %s11093_s5 = inlined_call_operand.vmem [shape: f32[8,128], index: 5, kind: output, shape index: {}]  }
   0x1   :  { %v7262_v0 = vld [vmem:[%s11088_s1 + $0x4] ss:$16 sps:$4 sm:$0xff]   ;;  %v7264_v1 = vld [vmem:[%s11088_s1 + $0xc] ss:$16 sps:$4 sm:$0xff]   ;;  %v7266_v2 = vld [vmem:[%s11088_s1] ss:$16 sps:$4 sm:$0xff]  }
   0x2   :  { %4851 = vmatprep.subr.bf16.mxu0 %v7262_v0  ;;  %v7267_v3 = vld [vmem:[%s11088_s1 + $0x8] ss:$16 sps:$4 sm:$0xff]   ;;  %5384 = vmatprep.subr.bf16.mxu1 %v7264_v1  ;;  %v7268_v4 = vld [vmem:[%s11088_s1 + $0x24] ss:$16 sps:$4 sm:$0xff]   ;;  %v7270_v5 = vld [vmem:[%s11088_s1 + $0x2c] ss:$16 sps:$4 sm:$0xff]  }
   0x3   :  { %4852 = vmatpush1.bf16.msra.mxu0 %v7266_v2  ;;  %5385 = vmatpush1.bf16.msra.mxu1 %v7267_v3  ;;  %v7272_v6 = vld [vmem:[%s11088_s1 + $0x20] ss:$16 sps:$4 sm:$0xff]   ;;  %v7273_v7 = vld [vmem:[%s11088_s1 + $0x28] ss:$16 sps:$4 sm:$0xff]   ;;  %v7274_v8 = vld [vmem:[%s11088_s1 + $0x44] ss:$16 sps:$4 sm:$0xff]  }
   0x4   :  { %4853 = vmatprep.subr.bf16.mxu0 %v7268_v4  ;;  %5386 = vmatprep.subr.bf16.mxu1 %v7270_v5  ;;  %v7276_v9 = vld [vmem:[%s11088_s1 + $0x4c] ss:$16 sps:$4 sm:$0xff]   ;;  %v7278_v10 = vld [vmem:[%s11088_s1 + $0x40] ss:$16 sps:$4 sm:$0xff]   ;;  %v7279_v11 = vld [vmem:[%s11088_s1 + $0x48] ss:$16 sps:$4 sm:$0xff]  }
   0x5   :  { %v7280_v12 = vld [vmem:[%s11088_s1 + $0x64] ss:$16 sps:$4 sm:$0xff]   ;;  %v7282_v13 = vld [vmem:[%s11088_s1 + $0x6c] ss:$16 sps:$4 sm:$0xff]   ;;  %v7284_v14 = vld [vmem:[%s11088_s1 + $0x60] ss:$16 sps:$4 sm:$0xff]  }
   0x6   :  { %v7285_v15 = vld [vmem:[%s11088_s1 + $0x68] ss:$16 sps:$4 sm:$0xff]   ;;  %v7286_v16 = vld [vmem:[%s11088_s1 + $0x84] ss:$16 sps:$4 sm:$0xff]   ;;  %v7288_v17 = vld [vmem:[%s11088_s1 + $0x8c] ss:$16 sps:$4 sm:$0xff]  }
   0x7   :  { %4854 = vmatpush1.bf16.msra.mxu0 %v7272_v6  ;;  %5387 = vmatpush1.bf16.msra.mxu1 %v7273_v7  ;;  %v7290_v18 = vld [vmem:[%s11088_s1 + $0x80] ss:$16 sps:$4 sm:$0xff]   ;;  %v7291_v19 = vld [vmem:[%s11088_s1 + $0x88] ss:$16 sps:$4 sm:$0xff]   ;;  %v7292_v20 = vld [vmem:[%s11088_s1 + $0xa4] ss:$16 sps:$4 sm:$0xff]  }
   0x8   :  { %4855 = vmatprep.subr.bf16.mxu0 %v7274_v8  ;;  %5388 = vmatprep.subr.bf16.mxu1 %v7276_v9  ;;  %v7294_v21 = vld [vmem:[%s11088_s1 + $0xac] ss:$16 sps:$4 sm:$0xff]   ;;  %v7296_v22 = vld [vmem:[%s11088_s1 + $0xa0] ss:$16 sps:$4 sm:$0xff]   ;;  %v7297_v23 = vld [vmem:[%s11088_s1 + $0xa8] ss:$16 sps:$4 sm:$0xff]  }
   0x9   :  { %v7298_v24 = vld [vmem:[%s11088_s1 + $0xc4] ss:$16 sps:$4 sm:$0xff]   ;;  %v7300_v25 = vld [vmem:[%s11088_s1 + $0xcc] ss:$16 sps:$4 sm:$0xff]   ;;  %v7302_v26 = vld [vmem:[%s11088_s1 + $0xc0] ss:$16 sps:$4 sm:$0xff]  }
   0xa   :  { %v7303_v27 = vld [vmem:[%s11088_s1 + $0xc8] ss:$16 sps:$4 sm:$0xff]   ;;  %v7304_v28 = vld [vmem:[%s11088_s1 + $0xe4] ss:$16 sps:$4 sm:$0xff]   ;;  %v7306_v29 = vld [vmem:[%s11088_s1 + $0xec] ss:$16 sps:$4 sm:$0xff]  }
   0xb   :  { %4856 = vmatpush1.bf16.msra.mxu0 %v7278_v10  ;;  %5389 = vmatpush1.bf16.msra.mxu1 %v7279_v11  ;;  %v7308_v30 = vld [vmem:[%s11088_s1 + $0xe0] ss:$16 sps:$4 sm:$0xff]   ;;  %v7309_v31 = vld [vmem:[%s11088_s1 + $0xe8] ss:$16 sps:$4 sm:$0xff]   ;;  %v7310_v32 = vld [vmem:[%s11088_s1 + $0x104] ss:$16 sps:$4 sm:$0xff]  }
   0xc   :  { %4857 = vmatprep.subr.bf16.mxu0 %v7280_v12  ;;  %5390 = vmatprep.subr.bf16.mxu1 %v7282_v13  ;;  %v7312_v33 = vld [vmem:[%s11088_s1 + $0x10c] ss:$16 sps:$4 sm:$0xff]   ;;  %v7314_v34 = vld [vmem:[%s11088_s1 + $0x100] ss:$16 sps:$4 sm:$0xff]   ;;  %v7315_v35 = vld [vmem:[%s11088_s1 + $0x108] ss:$16 sps:$4 sm:$0xff]  }
   0xd   :  { %v7316_v36 = vld [vmem:[%s11088_s1 + $0x124] ss:$16 sps:$4 sm:$0xff]   ;;  %v7318_v37 = vld [vmem:[%s11088_s1 + $0x12c] ss:$16 sps:$4 sm:$0xff]   ;;  %v7320_v38 = vld [vmem:[%s11088_s1 + $0x120] ss:$16 sps:$4 sm:$0xff]  }
   0xe   :  { %v7321_v39 = vld [vmem:[%s11088_s1 + $0x128] ss:$16 sps:$4 sm:$0xff]   ;;  %v7322_v40 = vld [vmem:[%s11088_s1 + $0x144] ss:$16 sps:$4 sm:$0xff]   ;;  %v7324_v41 = vld [vmem:[%s11088_s1 + $0x14c] ss:$16 sps:$4 sm:$0xff]  }
   0xf   :  { %4858 = vmatpush1.bf16.msra.mxu0 %v7284_v14  ;;  %5391 = vmatpush1.bf16.msra.mxu1 %v7285_v15  ;;  %v7326_v42 = vld [vmem:[%s11088_s1 + $0x140] ss:$16 sps:$4 sm:$0xff]   ;;  %v7327_v43 = vld [vmem:[%s11088_s1 + $0x148] ss:$16 sps:$4 sm:$0xff]   ;;  %v7328_v44 = vld [vmem:[%s11088_s1 + $0x164] ss:$16 sps:$4 sm:$0xff]  }
  0x10   :  { %4859 = vmatprep.subr.bf16.mxu0 %v7286_v16  ;;  %5392 = vmatprep.subr.bf16.mxu1 %v7288_v17  ;;  %v7330_v45 = vld [vmem:[%s11088_s1 + $0x16c] ss:$16 sps:$4 sm:$0xff]   ;;  %v21_v46 = vld [vmem:[%s11089_s0] sm:$0xff]  ;;  %v7333_v49 = vld [vmem:[%s11088_s1 + $0x168] ss:$16 sps:$4 sm:$0xff]  }
  0x11   :  { %v7332_v47 = vld [vmem:[%s11088_s1 + $0x160] ss:$16 sps:$4 sm:$0xff]   ;;  %v6274_v48 = vcombine.high %v21_v46, %v21_v46  ;;  %v7334_v50 = vld [vmem:[%s11088_s1 + $0x184] ss:$16 sps:$4 sm:$0xff]   ;;  %v7336_v51 = vld [vmem:[%s11088_s1 + $0x18c] ss:$16 sps:$4 sm:$0xff]   ;;  %v6273_v4 = vcombine.low %v21_v46, %v21_v46 }
  0x12   :  { %v7338_v52 = vld [vmem:[%s11088_s1 + $0x180] ss:$16 sps:$4 sm:$0xff]   ;;  %v7339_v53 = vld [vmem:[%s11088_s1 + $0x188] ss:$16 sps:$4 sm:$0xff]   ;;  %v7340_v54 = vld [vmem:[%s11088_s1 + $0x1a4] ss:$16 sps:$4 sm:$0xff]  }
  0x13   :  { %4860 = vmatpush1.bf16.msra.mxu0 %v7290_v18  ;;  %5393 = vmatpush1.bf16.msra.mxu1 %v7291_v19  ;;  %v7342_v55 = vld [vmem:[%s11088_s1 + $0x1ac] ss:$16 sps:$4 sm:$0xff]   ;;  %v7344_v56 = vld [vmem:[%s11088_s1 + $0x1a0] ss:$16 sps:$4 sm:$0xff]   ;;  %v7345_v57 = vld [vmem:[%s11088_s1 + $0x1a8] ss:$16 sps:$4 sm:$0xff]  }
  0x14   :  { %4861 = vmatprep.subr.bf16.mxu0 %v7292_v20  ;;  %5394 = vmatprep.subr.bf16.mxu1 %v7294_v21  ;;  %v7346_v58 = vld [vmem:[%s11088_s1 + $0x1c4] ss:$16 sps:$4 sm:$0xff]   ;;  %v7348_v59 = vld [vmem:[%s11088_s1 + $0x1cc] ss:$16 sps:$4 sm:$0xff]   ;;  %v7350_v60 = vld [vmem:[%s11088_s1 + $0x1c0] ss:$16 sps:$4 sm:$0xff]  }
  0x15   :  { %4883 = vmatprep.mubr.bf16.mxu0 %v6274_v48  ;;  %5416 = vmatprep.mubr.bf16.mxu1 %v6274_v48  ;;  %v7351_v61 = vld [vmem:[%s11088_s1 + $0x1c8] ss:$16 sps:$4 sm:$0xff]   ;;  %v7352_v62 = vld [vmem:[%s11088_s1 + $0x1e4] ss:$16 sps:$4 sm:$0xff]   ;;  %v7354_v63 = vld [vmem:[%s11088_s1 + $0x1ec] ss:$16 sps:$4 sm:$0xff]  }
  0x16   :  { %v7356_v0 = vld [vmem:[%s11088_s1 + $0x1e0] ss:$16 sps:$4 sm:$0xff]   ;;  %v7357_v1 = vld [vmem:[%s11088_s1 + $0x1e8] ss:$16 sps:$4 sm:$0xff]   ;;  %v7362_v2 = vld [vmem:[%s11088_s1 + $0x204] ss:$16 sps:$4 sm:$0xff]  }
  0x17   :  { %4862 = vmatpush1.bf16.msra.mxu0 %v7296_v22  ;;  %5395 = vmatpush1.bf16.msra.mxu1 %v7297_v23  ;;  %v7365_v3 = vld [vmem:[%s11088_s1 + $0x20c] ss:$16 sps:$4 sm:$0xff]   ;;  %v7360_v5 = vld [vmem:[%s11088_s1 + $0x200] ss:$16 sps:$4 sm:$0xff]   ;;  %v7363_v6 = vld [vmem:[%s11088_s1 + $0x208] ss:$16 sps:$4 sm:$0xff]  }
  0x18   :  { %4863 = vmatprep.subr.bf16.mxu0 %v7298_v24  ;;  %5396 = vmatprep.subr.bf16.mxu1 %v7300_v25  ;;  %v7368_v7 = vld [vmem:[%s11088_s1 + $0x224] ss:$16 sps:$4 sm:$0xff]   ;;  %v7371_v8 = vld [vmem:[%s11088_s1 + $0x22c] ss:$16 sps:$4 sm:$0xff]   ;;  %v7366_v9 = vld [vmem:[%s11088_s1 + $0x220] ss:$16 sps:$4 sm:$0xff]  }
  0x19   :  { %v7369_v10 = vld [vmem:[%s11088_s1 + $0x228] ss:$16 sps:$4 sm:$0xff]   ;;  %v7374_v11 = vld [vmem:[%s11088_s1 + $0x244] ss:$16 sps:$4 sm:$0xff]   ;;  %v7377_v12 = vld [vmem:[%s11088_s1 + $0x24c] ss:$16 sps:$4 sm:$0xff]  }
  0x1a   :  { %v7372_v13 = vld [vmem:[%s11088_s1 + $0x240] ss:$16 sps:$4 sm:$0xff]   ;;  %v7375_v14 = vld [vmem:[%s11088_s1 + $0x248] ss:$16 sps:$4 sm:$0xff]   ;;  %v7380_v15 = vld [vmem:[%s11088_s1 + $0x264] ss:$16 sps:$4 sm:$0xff]  }
  0x1b   :  { %4864 = vmatpush1.bf16.msra.mxu0 %v7302_v26  ;;  %5397 = vmatpush1.bf16.msra.mxu1 %v7303_v27  ;;  %v7383_v16 = vld [vmem:[%s11088_s1 + $0x26c] ss:$16 sps:$4 sm:$0xff]   ;;  %v7378_v17 = vld [vmem:[%s11088_s1 + $0x260] ss:$16 sps:$4 sm:$0xff]   ;;  %v7381_v18 = vld [vmem:[%s11088_s1 + $0x268] ss:$16 sps:$4 sm:$0xff]  }
  0x1c   :  { %4865 = vmatprep.subr.bf16.mxu0 %v7304_v28  ;;  %5398 = vmatprep.subr.bf16.mxu1 %v7306_v29  ;;  %v7386_v19 = vld [vmem:[%s11088_s1 + $0x284] ss:$16 sps:$4 sm:$0xff]   ;;  %v7389_v20 = vld [vmem:[%s11088_s1 + $0x28c] ss:$16 sps:$4 sm:$0xff]   ;;  %v7384_v21 = vld [vmem:[%s11088_s1 + $0x280] ss:$16 sps:$4 sm:$0xff]  }
  0x1d   :  { %v7387_v22 = vld [vmem:[%s11088_s1 + $0x288] ss:$16 sps:$4 sm:$0xff]   ;;  %v7392_v23 = vld [vmem:[%s11088_s1 + $0x2a4] ss:$16 sps:$4 sm:$0xff]   ;;  %v7395_v24 = vld [vmem:[%s11088_s1 + $0x2ac] ss:$16 sps:$4 sm:$0xff]  }
  0x1e   :  { %v7390_v25 = vld [vmem:[%s11088_s1 + $0x2a0] ss:$16 sps:$4 sm:$0xff]   ;;  %v7393_v26 = vld [vmem:[%s11088_s1 + $0x2a8] ss:$16 sps:$4 sm:$0xff]   ;;  %v7398_v27 = vld [vmem:[%s11088_s1 + $0x2c4] ss:$16 sps:$4 sm:$0xff]  }
  0x1f   :  { %4866 = vmatpush1.bf16.msra.mxu0 %v7308_v30  ;;  %5399 = vmatpush1.bf16.msra.mxu1 %v7309_v31  ;;  %v7401_v28 = vld [vmem:[%s11088_s1 + $0x2cc] ss:$16 sps:$4 sm:$0xff]   ;;  %v7396_v31 = vld [vmem:[%s11088_s1 + $0x2c0] ss:$16 sps:$4 sm:$0xff]   ;;  %v7423_v48 = vld [vmem:[%s11088_s1 + $0x348] ss:$16 sps:$4 sm:$0xff]  }
  0x20   :  { %4867 = vmatprep.subr.bf16.mxu0 %v7310_v32  ;;  %5400 = vmatprep.subr.bf16.mxu1 %v7312_v33  ;;  %v8802_v29 = vld [vmem:[%s11089_s0 + $0x8] sm:$0xff]  ;;  %v7404_v33 = vld [vmem:[%s11088_s1 + $0x2e4] ss:$16 sps:$4 sm:$0xff]  }
  0x21   :  { %v6276_v30 = vcombine.high %v8802_v29, %v8802_v29  ;;  %v7399_v32 = vld [vmem:[%s11088_s1 + $0x2c8] ss:$16 sps:$4 sm:$0xff]   ;;  %v7425_v46 = vld [vmem:[%s11088_s1 + $0x34c] ss:$16 sps:$4 sm:$0xff]  }
  0x23   :  { %4868 = vmatpush1.bf16.msra.mxu0 %v7314_v34  ;;  %5401 = vmatpush1.bf16.msra.mxu1 %v7315_v35  ;;  %v7407_v34 = vld [vmem:[%s11088_s1 + $0x2ec] ss:$16 sps:$4 sm:$0xff]   ;;  %v7402_v35 = vld [vmem:[%s11088_s1 + $0x2e0] ss:$16 sps:$4 sm:$0xff]  }
  0x24   :  { %4869 = vmatprep.subr.bf16.mxu0 %v7316_v36  ;;  %5402 = vmatprep.subr.bf16.mxu1 %v7318_v37  ;;  %v7405_v36 = vld [vmem:[%s11088_s1 + $0x2e8] ss:$16 sps:$4 sm:$0xff]   ;;  %v7410_v37 = vld [vmem:[%s11088_s1 + $0x304] ss:$16 sps:$4 sm:$0xff]  }
  0x27   :  { %4870 = vmatpush1.bf16.msra.mxu0 %v7320_v38  ;;  %5403 = vmatpush1.bf16.msra.mxu1 %v7321_v39  ;;  %v7413_v38 = vld [vmem:[%s11088_s1 + $0x30c] ss:$16 sps:$4 sm:$0xff]   ;;  %v7408_v39 = vld [vmem:[%s11088_s1 + $0x300] ss:$16 sps:$4 sm:$0xff]  }
  0x28   :  { %4871 = vmatprep.subr.bf16.mxu0 %v7322_v40  ;;  %5404 = vmatprep.subr.bf16.mxu1 %v7324_v41  ;;  %v7411_v40 = vld [vmem:[%s11088_s1 + $0x308] ss:$16 sps:$4 sm:$0xff]   ;;  %v7416_v41 = vld [vmem:[%s11088_s1 + $0x324] ss:$16 sps:$4 sm:$0xff]  }
  0x2b   :  { %4872 = vmatpush1.bf16.msra.mxu0 %v7326_v42  ;;  %5405 = vmatpush1.bf16.msra.mxu1 %v7327_v43  ;;  %v7419_v42 = vld [vmem:[%s11088_s1 + $0x32c] ss:$16 sps:$4 sm:$0xff]   ;;  %v7414_v43 = vld [vmem:[%s11088_s1 + $0x320] ss:$16 sps:$4 sm:$0xff]  }
  0x2c   :  { %4873 = vmatprep.subr.bf16.mxu0 %v7328_v44  ;;  %5406 = vmatprep.subr.bf16.mxu1 %v7330_v45  ;;  %v7417_v44 = vld [vmem:[%s11088_s1 + $0x328] ss:$16 sps:$4 sm:$0xff]   ;;  %v7422_v45 = vld [vmem:[%s11088_s1 + $0x344] ss:$16 sps:$4 sm:$0xff]  }
  0x2f   :  { %4874 = vmatpush1.bf16.msra.mxu0 %v7332_v47  ;;  %5407 = vmatpush1.bf16.msra.mxu1 %v7333_v49  ;;  %v7420_v47 = vld [vmem:[%s11088_s1 + $0x340] ss:$16 sps:$4 sm:$0xff]   ;;  %v7428_v49 = vld [vmem:[%s11088_s1 + $0x364] ss:$16 sps:$4 sm:$0xff]  }
  0x30   :  { %4875 = vmatprep.subr.bf16.mxu0 %v7334_v50  ;;  %5408 = vmatprep.subr.bf16.mxu1 %v7336_v51  ;;  %v7431_v50 = vld [vmem:[%s11088_s1 + $0x36c] ss:$16 sps:$4 sm:$0xff]   ;;  %v7426_v51 = vld [vmem:[%s11088_s1 + $0x360] ss:$16 sps:$4 sm:$0xff]  }
  0x33   :  { %4876 = vmatpush1.bf16.msra.mxu0 %v7338_v52  ;;  %5409 = vmatpush1.bf16.msra.mxu1 %v7339_v53  ;;  %v7429_v52 = vld [vmem:[%s11088_s1 + $0x368] ss:$16 sps:$4 sm:$0xff]   ;;  %v7434_v53 = vld [vmem:[%s11088_s1 + $0x384] ss:$16 sps:$4 sm:$0xff]  }
  0x34   :  { %4877 = vmatprep.subr.bf16.mxu0 %v7340_v54  ;;  %5410 = vmatprep.subr.bf16.mxu1 %v7342_v55  ;;  %v7437_v54 = vld [vmem:[%s11088_s1 + $0x38c] ss:$16 sps:$4 sm:$0xff]   ;;  %v7432_v55 = vld [vmem:[%s11088_s1 + $0x380] ss:$16 sps:$4 sm:$0xff]  }
  0x37   :  { %4878 = vmatpush1.bf16.msra.mxu0 %v7344_v56  ;;  %5411 = vmatpush1.bf16.msra.mxu1 %v7345_v57  ;;  %v7435_v56 = vld [vmem:[%s11088_s1 + $0x388] ss:$16 sps:$4 sm:$0xff]   ;;  %v7440_v57 = vld [vmem:[%s11088_s1 + $0x3a4] ss:$16 sps:$4 sm:$0xff]  }
  0x38   :  { %4879 = vmatprep.subr.bf16.mxu0 %v7346_v58  ;;  %5412 = vmatprep.subr.bf16.mxu1 %v7348_v59  ;;  %v7443_v58 = vld [vmem:[%s11088_s1 + $0x3ac] ss:$16 sps:$4 sm:$0xff]   ;;  %v7438_v59 = vld [vmem:[%s11088_s1 + $0x3a0] ss:$16 sps:$4 sm:$0xff]  }
  0x3b   :  { %4880 = vmatpush1.bf16.msra.mxu0 %v7350_v60  ;;  %5413 = vmatpush1.bf16.msra.mxu1 %v7351_v61  ;;  %v7441_v60 = vld [vmem:[%s11088_s1 + $0x3a8] ss:$16 sps:$4 sm:$0xff]   ;;  %v7446_v61 = vld [vmem:[%s11088_s1 + $0x3c4] ss:$16 sps:$4 sm:$0xff]  }
  0x3c   :  { %4881 = vmatprep.subr.bf16.mxu0 %v7352_v62  ;;  %5414 = vmatprep.subr.bf16.mxu1 %v7354_v63  ;;  %v7449_v62 = vld [vmem:[%s11088_s1 + $0x3cc] ss:$16 sps:$4 sm:$0xff]   ;;  %v7444_v63 = vld [vmem:[%s11088_s1 + $0x3c0] ss:$16 sps:$4 sm:$0xff]  }
  0x3f   :  { %4882 = vmatpush1.bf16.msra.mxu0 %v7356_v0  ;;  %5415 = vmatpush1.bf16.msra.mxu1 %v7357_v1  ;;  %v7447_v0 = vld [vmem:[%s11088_s1 + $0x3c8] ss:$16 sps:$4 sm:$0xff]   ;;  %v7452_v1 = vld [vmem:[%s11088_s1 + $0x3e4] ss:$16 sps:$4 sm:$0xff]  }
  0x40   :  { %4892 = vmatprep.subr.bf16.mxu0 %v7362_v2  ;;  %5425 = vmatprep.subr.bf16.mxu1 %v7365_v3  ;;  %v7455_v2 = vld [vmem:[%s11088_s1 + $0x3ec] ss:$16 sps:$4 sm:$0xff]   ;;  %v7450_v3 = vld [vmem:[%s11088_s1 + $0x3e0] ss:$16 sps:$4 sm:$0xff]  }
  0x42   :  { %4884 = vmatmul.mubr.bf16.vlgmr.msra.gmra.mrb[0].mxu0 %v6273_v4  ;;  %5417 = vmatmul.mubr.bf16.vlgmr.msra.gmra.mrb[0].mxu1 %v6273_v4  ;;  %v7453_v4 = vld [vmem:[%s11088_s1 + $0x3e8] ss:$16 sps:$4 sm:$0xff]  }
  0x43   :  { %4893 = vmatpush1.bf16.msra.mxu0 %v7360_v5  ;;  %5426 = vmatpush1.bf16.msra.mxu1 %v7363_v6  ;;  %v7460_v5 = vld [vmem:[%s11088_s1 + $0x404] ss:$16 sps:$4 sm:$0xff]   ;;  %v7463_v6 = vld [vmem:[%s11088_s1 + $0x40c] ss:$16 sps:$4 sm:$0xff]  }
  0x44   :  { %4894 = vmatprep.subr.bf16.mxu0 %v7368_v7  ;;  %5427 = vmatprep.subr.bf16.mxu1 %v7371_v8  ;;  %v6275_v7 = vcombine.low %v8802_v29, %v8802_v29  ;;  %v7458_v8 = vld [vmem:[%s11088_s1 + $0x400] ss:$16 sps:$4 sm:$0xff]   ;;  %v7493_v29 = vld [vmem:[%s11088_s1 + $0x4ac] ss:$16 sps:$4 sm:$0xff]  }
  0x45   :  { %4924 = vmatprep.mubr.bf16.mxu0 %v6276_v30  ;;  %5457 = vmatprep.mubr.bf16.mxu1 %v6276_v30  ;;  %v7488_v30 = vld [vmem:[%s11088_s1 + $0x4a0] ss:$16 sps:$4 sm:$0xff]  }
  0x47   :  { %4895 = vmatpush1.bf16.msra.mxu0 %v7366_v9  ;;  %5428 = vmatpush1.bf16.msra.mxu1 %v7369_v10  ;;  %v7461_v9 = vld [vmem:[%s11088_s1 + $0x408] ss:$16 sps:$4 sm:$0xff]   ;;  %v7466_v10 = vld [vmem:[%s11088_s1 + $0x424] ss:$16 sps:$4 sm:$0xff]  }
  0x48   :  { %4896 = vmatprep.subr.bf16.mxu0 %v7374_v11  ;;  %5429 = vmatprep.subr.bf16.mxu1 %v7377_v12  ;;  %v8940_v11 = vld [vmem:[%s11089_s0 + $0x10] sm:$0xff]  ;;  %v7469_v12 = vld [vmem:[%s11088_s1 + $0x42c] ss:$16 sps:$4 sm:$0xff]  }
  0x4b   :  { %4897 = vmatpush1.bf16.msra.mxu0 %v7372_v13  ;;  %5430 = vmatpush1.bf16.msra.mxu1 %v7375_v14  ;;  %v6278_v13 = vcombine.high %v8940_v11, %v8940_v11  ;;  %v7464_v14 = vld [vmem:[%s11088_s1 + $0x420] ss:$16 sps:$4 sm:$0xff]  }
  0x4c   :  { %4898 = vmatprep.subr.bf16.mxu0 %v7380_v15  ;;  %5431 = vmatprep.subr.bf16.mxu1 %v7383_v16  ;;  %v7467_v15 = vld [vmem:[%s11088_s1 + $0x428] ss:$16 sps:$4 sm:$0xff]   ;;  %v7472_v16 = vld [vmem:[%s11088_s1 + $0x444] ss:$16 sps:$4 sm:$0xff]  }
  0x4f   :  { %4899 = vmatpush1.bf16.msra.mxu0 %v7378_v17  ;;  %5432 = vmatpush1.bf16.msra.mxu1 %v7381_v18  ;;  %v7475_v17 = vld [vmem:[%s11088_s1 + $0x44c] ss:$16 sps:$4 sm:$0xff]   ;;  %v7470_v18 = vld [vmem:[%s11088_s1 + $0x440] ss:$16 sps:$4 sm:$0xff]  }
  0x50   :  { %4900 = vmatprep.subr.bf16.mxu0 %v7386_v19  ;;  %5433 = vmatprep.subr.bf16.mxu1 %v7389_v20  ;;  %v7473_v19 = vld [vmem:[%s11088_s1 + $0x448] ss:$16 sps:$4 sm:$0xff]   ;;  %v7478_v20 = vld [vmem:[%s11088_s1 + $0x464] ss:$16 sps:$4 sm:$0xff]  }
  0x53   :  { %4901 = vmatpush1.bf16.msra.mxu0 %v7384_v21  ;;  %5434 = vmatpush1.bf16.msra.mxu1 %v7387_v22  ;;  %v7481_v21 = vld [vmem:[%s11088_s1 + $0x46c] ss:$16 sps:$4 sm:$0xff]   ;;  %v7476_v22 = vld [vmem:[%s11088_s1 + $0x460] ss:$16 sps:$4 sm:$0xff]  }
  0x54   :  { %4902 = vmatprep.subr.bf16.mxu0 %v7392_v23  ;;  %5435 = vmatprep.subr.bf16.mxu1 %v7395_v24  ;;  %v7479_v23 = vld [vmem:[%s11088_s1 + $0x468] ss:$16 sps:$4 sm:$0xff]   ;;  %v7484_v24 = vld [vmem:[%s11088_s1 + $0x484] ss:$16 sps:$4 sm:$0xff]  }
  0x57   :  { %4903 = vmatpush1.bf16.msra.mxu0 %v7390_v25  ;;  %5436 = vmatpush1.bf16.msra.mxu1 %v7393_v26  ;;  %v7487_v25 = vld [vmem:[%s11088_s1 + $0x48c] ss:$16 sps:$4 sm:$0xff]   ;;  %v7482_v26 = vld [vmem:[%s11088_s1 + $0x480] ss:$16 sps:$4 sm:$0xff]  }
  0x58   :  { %4904 = vmatprep.subr.bf16.mxu0 %v7398_v27  ;;  %5437 = vmatprep.subr.bf16.mxu1 %v7401_v28  ;;  %v7485_v27 = vld [vmem:[%s11088_s1 + $0x488] ss:$16 sps:$4 sm:$0xff]   ;;  %v7490_v28 = vld [vmem:[%s11088_s1 + $0x4a4] ss:$16 sps:$4 sm:$0xff]  }
  0x5b   :  { %4905 = vmatpush1.bf16.msra.mxu0 %v7396_v31  ;;  %5438 = vmatpush1.bf16.msra.mxu1 %v7399_v32  ;;  %v7491_v31 = vld [vmem:[%s11088_s1 + $0x4a8] ss:$16 sps:$4 sm:$0xff]   ;;  %v7496_v32 = vld [vmem:[%s11088_s1 + $0x4c4] ss:$16 sps:$4 sm:$0xff]  }
  0x5c   :  { %4906 = vmatprep.subr.bf16.mxu0 %v7404_v33  ;;  %5439 = vmatprep.subr.bf16.mxu1 %v7407_v34  ;;  %v7499_v33 = vld [vmem:[%s11088_s1 + $0x4cc] ss:$16 sps:$4 sm:$0xff]   ;;  %v7494_v34 = vld [vmem:[%s11088_s1 + $0x4c0] ss:$16 sps:$4 sm:$0xff]  }
  0x5f   :  { %4907 = vmatpush1.bf16.msra.mxu0 %v7402_v35  ;;  %5440 = vmatpush1.bf16.msra.mxu1 %v7405_v36  ;;  %v7497_v35 = vld [vmem:[%s11088_s1 + $0x4c8] ss:$16 sps:$4 sm:$0xff]   ;;  %v7502_v36 = vld [vmem:[%s11088_s1 + $0x4e4] ss:$16 sps:$4 sm:$0xff]  }
  0x60   :  { %4908 = vmatprep.subr.bf16.mxu0 %v7410_v37  ;;  %5441 = vmatprep.subr.bf16.mxu1 %v7413_v38  ;;  %v7505_v37 = vld [vmem:[%s11088_s1 + $0x4ec] ss:$16 sps:$4 sm:$0xff]   ;;  %v7500_v38 = vld [vmem:[%s11088_s1 + $0x4e0] ss:$16 sps:$4 sm:$0xff]  }
  0x63   :  { %4909 = vmatpush1.bf16.msra.mxu0 %v7408_v39  ;;  %5442 = vmatpush1.bf16.msra.mxu1 %v7411_v40  ;;  %v7503_v39 = vld [vmem:[%s11088_s1 + $0x4e8] ss:$16 sps:$4 sm:$0xff]   ;;  %v7508_v40 = vld [vmem:[%s11088_s1 + $0x504] ss:$16 sps:$4 sm:$0xff]  }
  0x64   :  { %4910 = vmatprep.subr.bf16.mxu0 %v7416_v41  ;;  %5443 = vmatprep.subr.bf16.mxu1 %v7419_v42  ;;  %v7511_v41 = vld [vmem:[%s11088_s1 + $0x50c] ss:$16 sps:$4 sm:$0xff]   ;;  %v7506_v42 = vld [vmem:[%s11088_s1 + $0x500] ss:$16 sps:$4 sm:$0xff]  }
  0x67   :  { %4911 = vmatpush1.bf16.msra.mxu0 %v7414_v43  ;;  %5444 = vmatpush1.bf16.msra.mxu1 %v7417_v44  ;;  %v7509_v43 = vld [vmem:[%s11088_s1 + $0x508] ss:$16 sps:$4 sm:$0xff]   ;;  %v7514_v44 = vld [vmem:[%s11088_s1 + $0x524] ss:$16 sps:$4 sm:$0xff]  }
  0x68   :  { %4912 = vmatprep.subr.bf16.mxu0 %v7422_v45  ;;  %5445 = vmatprep.subr.bf16.mxu1 %v7425_v46  ;;  %v7517_v45 = vld [vmem:[%s11088_s1 + $0x52c] ss:$16 sps:$4 sm:$0xff]   ;;  %v7512_v46 = vld [vmem:[%s11088_s1 + $0x520] ss:$16 sps:$4 sm:$0xff]  }
  0x6b   :  { %4913 = vmatpush1.bf16.msra.mxu0 %v7420_v47  ;;  %5446 = vmatpush1.bf16.msra.mxu1 %v7423_v48  ;;  %v7515_v47 = vld [vmem:[%s11088_s1 + $0x528] ss:$16 sps:$4 sm:$0xff]   ;;  %v7520_v48 = vld [vmem:[%s11088_s1 + $0x544] ss:$16 sps:$4 sm:$0xff]  }
  0x6c   :  { %4914 = vmatprep.subr.bf16.mxu0 %v7428_v49  ;;  %5447 = vmatprep.subr.bf16.mxu1 %v7431_v50  ;;  %v7523_v49 = vld [vmem:[%s11088_s1 + $0x54c] ss:$16 sps:$4 sm:$0xff]   ;;  %v7518_v50 = vld [vmem:[%s11088_s1 + $0x540] ss:$16 sps:$4 sm:$0xff]  }
  0x6f   :  { %4915 = vmatpush1.bf16.msra.mxu0 %v7426_v51  ;;  %5448 = vmatpush1.bf16.msra.mxu1 %v7429_v52  ;;  %v7521_v51 = vld [vmem:[%s11088_s1 + $0x548] ss:$16 sps:$4 sm:$0xff]   ;;  %v7526_v52 = vld [vmem:[%s11088_s1 + $0x564] ss:$16 sps:$4 sm:$0xff]  }
  0x70   :  { %4916 = vmatprep.subr.bf16.mxu0 %v7434_v53  ;;  %5449 = vmatprep.subr.bf16.mxu1 %v7437_v54  ;;  %v7529_v53 = vld [vmem:[%s11088_s1 + $0x56c] ss:$16 sps:$4 sm:$0xff]   ;;  %v7524_v54 = vld [vmem:[%s11088_s1 + $0x560] ss:$16 sps:$4 sm:$0xff]  }
  0x73   :  { %4917 = vmatpush1.bf16.msra.mxu0 %v7432_v55  ;;  %5450 = vmatpush1.bf16.msra.mxu1 %v7435_v56  ;;  %v7527_v55 = vld [vmem:[%s11088_s1 + $0x568] ss:$16 sps:$4 sm:$0xff]   ;;  %v7532_v56 = vld [vmem:[%s11088_s1 + $0x584] ss:$16 sps:$4 sm:$0xff]  }
  0x74   :  { %4918 = vmatprep.subr.bf16.mxu0 %v7440_v57  ;;  %5451 = vmatprep.subr.bf16.mxu1 %v7443_v58  ;;  %v7535_v57 = vld [vmem:[%s11088_s1 + $0x58c] ss:$16 sps:$4 sm:$0xff]   ;;  %v7530_v58 = vld [vmem:[%s11088_s1 + $0x580] ss:$16 sps:$4 sm:$0xff]  }
  0x77   :  { %4919 = vmatpush1.bf16.msra.mxu0 %v7438_v59  ;;  %5452 = vmatpush1.bf16.msra.mxu1 %v7441_v60  ;;  %v7533_v59 = vld [vmem:[%s11088_s1 + $0x588] ss:$16 sps:$4 sm:$0xff]   ;;  %v7538_v60 = vld [vmem:[%s11088_s1 + $0x5a4] ss:$16 sps:$4 sm:$0xff]  }
  0x78   :  { %4920 = vmatprep.subr.bf16.mxu0 %v7446_v61  ;;  %5453 = vmatprep.subr.bf16.mxu1 %v7449_v62  ;;  %v7541_v61 = vld [vmem:[%s11088_s1 + $0x5ac] ss:$16 sps:$4 sm:$0xff]   ;;  %v7536_v62 = vld [vmem:[%s11088_s1 + $0x5a0] ss:$16 sps:$4 sm:$0xff]  }
  0x7b   :  { %4921 = vmatpush1.bf16.msra.mxu0 %v7444_v63  ;;  %5454 = vmatpush1.bf16.msra.mxu1 %v7447_v0  ;;  %v7539_v63 = vld [vmem:[%s11088_s1 + $0x5a8] ss:$16 sps:$4 sm:$0xff]   ;;  %v7544_v0 = vld [vmem:[%s11088_s1 + $0x5c4] ss:$16 sps:$4 sm:$0xff]  }
  0x7c   :  { %4922 = vmatprep.subr.bf16.mxu0 %v7452_v1  ;;  %5455 = vmatprep.subr.bf16.mxu1 %v7455_v2  ;;  %v7547_v1 = vld [vmem:[%s11088_s1 + $0x5cc] ss:$16 sps:$4 sm:$0xff]   ;;  %v7542_v2 = vld [vmem:[%s11088_s1 + $0x5c0] ss:$16 sps:$4 sm:$0xff]  }
  0x7f   :  { %4923 = vmatpush1.bf16.msra.mxu0 %v7450_v3  ;;  %5456 = vmatpush1.bf16.msra.mxu1 %v7453_v4  ;;  %v7545_v3 = vld [vmem:[%s11088_s1 + $0x5c8] ss:$16 sps:$4 sm:$0xff]   ;;  %v7550_v4 = vld [vmem:[%s11088_s1 + $0x5e4] ss:$16 sps:$4 sm:$0xff]  }
  0x80   :  { %4933 = vmatprep.subr.bf16.mxu0 %v7460_v5  ;;  %5466 = vmatprep.subr.bf16.mxu1 %v7463_v6  ;;  %v7553_v5 = vld [vmem:[%s11088_s1 + $0x5ec] ss:$16 sps:$4 sm:$0xff]   ;;  %v7548_v6 = vld [vmem:[%s11088_s1 + $0x5e0] ss:$16 sps:$4 sm:$0xff]  }
  0x82   :  { %4925 = vmatmul.mubr.bf16.vlgmr.msra.gmra.mrb[0].mxu0 %v6275_v7  ;;  %5458 = vmatmul.mubr.bf16.vlgmr.msra.gmra.mrb[0].mxu1 %v6275_v7  ;;  %v7551_v7 = vld [vmem:[%s11088_s1 + $0x5e8] ss:$16 sps:$4 sm:$0xff]  }
  0x83   :  { %4934 = vmatpush1.bf16.msra.mxu0 %v7458_v8  ;;  %5467 = vmatpush1.bf16.msra.mxu1 %v7461_v9  ;;  %v7558_v8 = vld [vmem:[%s11088_s1 + $0x604] ss:$16 sps:$4 sm:$0xff]   ;;  %v7561_v9 = vld [vmem:[%s11088_s1 + $0x60c] ss:$16 sps:$4 sm:$0xff]  }
  0x84   :  { %4935 = vmatprep.subr.bf16.mxu0 %v7466_v10  ;;  %5468 = vmatprep.subr.bf16.mxu1 %v7469_v12  ;;  %v7556_v10 = vld [vmem:[%s11088_s1 + $0x600] ss:$16 sps:$4 sm:$0xff]   ;;  %v6277_v12 = vcombine.low %v8940_v11, %v8940_v11  ;;  %v7567_v11 = vld [vmem:[%s11088_s1 + $0x62c] ss:$16 sps:$4 sm:$0xff]  }
  0x85   :  { %4965 = vmatprep.mubr.bf16.mxu0 %v6278_v13  ;;  %5498 = vmatprep.mubr.bf16.mxu1 %v6278_v13  ;;  %v7559_v13 = vld [vmem:[%s11088_s1 + $0x608] ss:$16 sps:$4 sm:$0xff]  }
  0x87   :  { %4936 = vmatpush1.bf16.msra.mxu0 %v7464_v14  ;;  %5469 = vmatpush1.bf16.msra.mxu1 %v7467_v15  ;;  %v9138_v14 = vld [vmem:[%s11089_s0 + $0x18] sm:$0xff]  ;;  %v7564_v15 = vld [vmem:[%s11088_s1 + $0x624] ss:$16 sps:$4 sm:$0xff]  }
  0x88   :  { %4937 = vmatprep.subr.bf16.mxu0 %v7472_v16  ;;  %5470 = vmatprep.subr.bf16.mxu1 %v7475_v17  ;;  %v6280_v16 = vcombine.high %v9138_v14, %v9138_v14  ;;  %v7562_v17 = vld [vmem:[%s11088_s1 + $0x620] ss:$16 sps:$4 sm:$0xff]  }
  0x8b   :  { %4938 = vmatpush1.bf16.msra.mxu0 %v7470_v18  ;;  %5471 = vmatpush1.bf16.msra.mxu1 %v7473_v19  ;;  %v7565_v18 = vld [vmem:[%s11088_s1 + $0x628] ss:$16 sps:$4 sm:$0xff]   ;;  %v7570_v19 = vld [vmem:[%s11088_s1 + $0x644] ss:$16 sps:$4 sm:$0xff]  }
  0x8c   :  { %4939 = vmatprep.subr.bf16.mxu0 %v7478_v20  ;;  %5472 = vmatprep.subr.bf16.mxu1 %v7481_v21  ;;  %v7573_v20 = vld [vmem:[%s11088_s1 + $0x64c] ss:$16 sps:$4 sm:$0xff]   ;;  %v7568_v21 = vld [vmem:[%s11088_s1 + $0x640] ss:$16 sps:$4 sm:$0xff]  }
  0x8f   :  { %4940 = vmatpush1.bf16.msra.mxu0 %v7476_v22  ;;  %5473 = vmatpush1.bf16.msra.mxu1 %v7479_v23  ;;  %v7571_v22 = vld [vmem:[%s11088_s1 + $0x648] ss:$16 sps:$4 sm:$0xff]   ;;  %v7576_v23 = vld [vmem:[%s11088_s1 + $0x664] ss:$16 sps:$4 sm:$0xff]  }
  0x90   :  { %4941 = vmatprep.subr.bf16.mxu0 %v7484_v24  ;;  %5474 = vmatprep.subr.bf16.mxu1 %v7487_v25  ;;  %v7579_v24 = vld [vmem:[%s11088_s1 + $0x66c] ss:$16 sps:$4 sm:$0xff]   ;;  %v7574_v25 = vld [vmem:[%s11088_s1 + $0x660] ss:$16 sps:$4 sm:$0xff]  }
  0x93   :  { %4942 = vmatpush1.bf16.msra.mxu0 %v7482_v26  ;;  %5475 = vmatpush1.bf16.msra.mxu1 %v7485_v27  ;;  %v7577_v26 = vld [vmem:[%s11088_s1 + $0x668] ss:$16 sps:$4 sm:$0xff]   ;;  %v7582_v27 = vld [vmem:[%s11088_s1 + $0x684] ss:$16 sps:$4 sm:$0xff]  }
  0x94   :  { %4943 = vmatprep.subr.bf16.mxu0 %v7490_v28  ;;  %5476 = vmatprep.subr.bf16.mxu1 %v7493_v29  ;;  %v7585_v28 = vld [vmem:[%s11088_s1 + $0x68c] ss:$16 sps:$4 sm:$0xff]   ;;  %v7580_v29 = vld [vmem:[%s11088_s1 + $0x680] ss:$16 sps:$4 sm:$0xff]  }
  0x97   :  { %4944 = vmatpush1.bf16.msra.mxu0 %v7488_v30  ;;  %5477 = vmatpush1.bf16.msra.mxu1 %v7491_v31  ;;  %v7583_v30 = vld [vmem:[%s11088_s1 + $0x688] ss:$16 sps:$4 sm:$0xff]   ;;  %v7588_v31 = vld [vmem:[%s11088_s1 + $0x6a4] ss:$16 sps:$4 sm:$0xff]  }
  0x98   :  { %4945 = vmatprep.subr.bf16.mxu0 %v7496_v32  ;;  %5478 = vmatprep.subr.bf16.mxu1 %v7499_v33  ;;  %v7591_v32 = vld [vmem:[%s11088_s1 + $0x6ac] ss:$16 sps:$4 sm:$0xff]   ;;  %v7586_v33 = vld [vmem:[%s11088_s1 + $0x6a0] ss:$16 sps:$4 sm:$0xff]  }
  0x9b   :  { %4946 = vmatpush1.bf16.msra.mxu0 %v7494_v34  ;;  %5479 = vmatpush1.bf16.msra.mxu1 %v7497_v35  ;;  %v7589_v34 = vld [vmem:[%s11088_s1 + $0x6a8] ss:$16 sps:$4 sm:$0xff]   ;;  %v7594_v35 = vld [vmem:[%s11088_s1 + $0x6c4] ss:$16 sps:$4 sm:$0xff]  }
  0x9c   :  { %4947 = vmatprep.subr.bf16.mxu0 %v7502_v36  ;;  %5480 = vmatprep.subr.bf16.mxu1 %v7505_v37  ;;  %v7597_v36 = vld [vmem:[%s11088_s1 + $0x6cc] ss:$16 sps:$4 sm:$0xff]   ;;  %v7592_v37 = vld [vmem:[%s11088_s1 + $0x6c0] ss:$16 sps:$4 sm:$0xff]  }
  0x9f   :  { %4948 = vmatpush1.bf16.msra.mxu0 %v7500_v38  ;;  %5481 = vmatpush1.bf16.msra.mxu1 %v7503_v39  ;;  %v7595_v38 = vld [vmem:[%s11088_s1 + $0x6c8] ss:$16 sps:$4 sm:$0xff]   ;;  %v7600_v39 = vld [vmem:[%s11088_s1 + $0x6e4] ss:$16 sps:$4 sm:$0xff]  }
  0xa0   :  { %4949 = vmatprep.subr.bf16.mxu0 %v7508_v40  ;;  %5482 = vmatprep.subr.bf16.mxu1 %v7511_v41  ;;  %v7603_v40 = vld [vmem:[%s11088_s1 + $0x6ec] ss:$16 sps:$4 sm:$0xff]   ;;  %v7598_v41 = vld [vmem:[%s11088_s1 + $0x6e0] ss:$16 sps:$4 sm:$0xff]  }
  0xa3   :  { %4950 = vmatpush1.bf16.msra.mxu0 %v7506_v42  ;;  %5483 = vmatpush1.bf16.msra.mxu1 %v7509_v43  ;;  %v7601_v42 = vld [vmem:[%s11088_s1 + $0x6e8] ss:$16 sps:$4 sm:$0xff]   ;;  %v7606_v43 = vld [vmem:[%s11088_s1 + $0x704] ss:$16 sps:$4 sm:$0xff]  }
  0xa4   :  { %4951 = vmatprep.subr.bf16.mxu0 %v7514_v44  ;;  %5484 = vmatprep.subr.bf16.mxu1 %v7517_v45  ;;  %v7609_v44 = vld [vmem:[%s11088_s1 + $0x70c] ss:$16 sps:$4 sm:$0xff]   ;;  %v7604_v45 = vld [vmem:[%s11088_s1 + $0x700] ss:$16 sps:$4 sm:$0xff]  }
  0xa7   :  { %4952 = vmatpush1.bf16.msra.mxu0 %v7512_v46  ;;  %5485 = vmatpush1.bf16.msra.mxu1 %v7515_v47  ;;  %v7607_v46 = vld [vmem:[%s11088_s1 + $0x708] ss:$16 sps:$4 sm:$0xff]   ;;  %v7612_v47 = vld [vmem:[%s11088_s1 + $0x724] ss:$16 sps:$4 sm:$0xff]  }
  0xa8   :  { %4953 = vmatprep.subr.bf16.mxu0 %v7520_v48  ;;  %5486 = vmatprep.subr.bf16.mxu1 %v7523_v49  ;;  %v7615_v48 = vld [vmem:[%s11088_s1 + $0x72c] ss:$16 sps:$4 sm:$0xff]   ;;  %v7610_v49 = vld [vmem:[%s11088_s1 + $0x720] ss:$16 sps:$4 sm:$0xff]  }
  0xab   :  { %4954 = vmatpush1.bf16.msra.mxu0 %v7518_v50  ;;  %5487 = vmatpush1.bf16.msra.mxu1 %v7521_v51  ;;  %v7613_v50 = vld [vmem:[%s11088_s1 + $0x728] ss:$16 sps:$4 sm:$0xff]   ;;  %v7618_v51 = vld [vmem:[%s11088_s1 + $0x744] ss:$16 sps:$4 sm:$0xff]  }
  0xac   :  { %4955 = vmatprep.subr.bf16.mxu0 %v7526_v52  ;;  %5488 = vmatprep.subr.bf16.mxu1 %v7529_v53  ;;  %v7621_v52 = vld [vmem:[%s11088_s1 + $0x74c] ss:$16 sps:$4 sm:$0xff]   ;;  %v7616_v53 = vld [vmem:[%s11088_s1 + $0x740] ss:$16 sps:$4 sm:$0xff]  }
  0xaf   :  { %4956 = vmatpush1.bf16.msra.mxu0 %v7524_v54  ;;  %5489 = vmatpush1.bf16.msra.mxu1 %v7527_v55  ;;  %v7619_v54 = vld [vmem:[%s11088_s1 + $0x748] ss:$16 sps:$4 sm:$0xff]   ;;  %v7624_v55 = vld [vmem:[%s11088_s1 + $0x764] ss:$16 sps:$4 sm:$0xff]  }
  0xb0   :  { %4957 = vmatprep.subr.bf16.mxu0 %v7532_v56  ;;  %5490 = vmatprep.subr.bf16.mxu1 %v7535_v57  ;;  %v7627_v56 = vld [vmem:[%s11088_s1 + $0x76c] ss:$16 sps:$4 sm:$0xff]   ;;  %v7622_v57 = vld [vmem:[%s11088_s1 + $0x760] ss:$16 sps:$4 sm:$0xff]  }
  0xb3   :  { %4958 = vmatpush1.bf16.msra.mxu0 %v7530_v58  ;;  %5491 = vmatpush1.bf16.msra.mxu1 %v7533_v59  ;;  %v7625_v58 = vld [vmem:[%s11088_s1 + $0x768] ss:$16 sps:$4 sm:$0xff]   ;;  %v7630_v59 = vld [vmem:[%s11088_s1 + $0x784] ss:$16 sps:$4 sm:$0xff]  }
  0xb4   :  { %4959 = vmatprep.subr.bf16.mxu0 %v7538_v60  ;;  %5492 = vmatprep.subr.bf16.mxu1 %v7541_v61  ;;  %v7633_v60 = vld [vmem:[%s11088_s1 + $0x78c] ss:$16 sps:$4 sm:$0xff]   ;;  %v7628_v61 = vld [vmem:[%s11088_s1 + $0x780] ss:$16 sps:$4 sm:$0xff]  }
  0xb7   :  { %4960 = vmatpush1.bf16.msra.mxu0 %v7536_v62  ;;  %5493 = vmatpush1.bf16.msra.mxu1 %v7539_v63  ;;  %v7631_v62 = vld [vmem:[%s11088_s1 + $0x788] ss:$16 sps:$4 sm:$0xff]   ;;  %v7636_v63 = vld [vmem:[%s11088_s1 + $0x7a4] ss:$16 sps:$4 sm:$0xff]  }
  0xb8   :  { %4961 = vmatprep.subr.bf16.mxu0 %v7544_v0  ;;  %5494 = vmatprep.subr.bf16.mxu1 %v7547_v1  ;;  %v7639_v0 = vld [vmem:[%s11088_s1 + $0x7ac] ss:$16 sps:$4 sm:$0xff]   ;;  %v7634_v1 = vld [vmem:[%s11088_s1 + $0x7a0] ss:$16 sps:$4 sm:$0xff]  }
  0xbb   :  { %4962 = vmatpush1.bf16.msra.mxu0 %v7542_v2  ;;  %5495 = vmatpush1.bf16.msra.mxu1 %v7545_v3  ;;  %v7637_v2 = vld [vmem:[%s11088_s1 + $0x7a8] ss:$16 sps:$4 sm:$0xff]   ;;  %v7642_v3 = vld [vmem:[%s11088_s1 + $0x7c4] ss:$16 sps:$4 sm:$0xff]  }
  0xbc   :  { %4963 = vmatprep.subr.bf16.mxu0 %v7550_v4  ;;  %5496 = vmatprep.subr.bf16.mxu1 %v7553_v5  ;;  %v7645_v4 = vld [vmem:[%s11088_s1 + $0x7cc] ss:$16 sps:$4 sm:$0xff]   ;;  %v7640_v5 = vld [vmem:[%s11088_s1 + $0x7c0] ss:$16 sps:$4 sm:$0xff]  }
  0xbf   :  { %4964 = vmatpush1.bf16.msra.mxu0 %v7548_v6  ;;  %5497 = vmatpush1.bf16.msra.mxu1 %v7551_v7  ;;  %v7643_v6 = vld [vmem:[%s11088_s1 + $0x7c8] ss:$16 sps:$4 sm:$0xff]   ;;  %v7648_v7 = vld [vmem:[%s11088_s1 + $0x7e4] ss:$16 sps:$4 sm:$0xff]  }
  0xc0   :  { %4974 = vmatprep.subr.bf16.mxu0 %v7558_v8  ;;  %5507 = vmatprep.subr.bf16.mxu1 %v7561_v9  ;;  %v7651_v8 = vld [vmem:[%s11088_s1 + $0x7ec] ss:$16 sps:$4 sm:$0xff]   ;;  %v7646_v9 = vld [vmem:[%s11088_s1 + $0x7e0] ss:$16 sps:$4 sm:$0xff]  }
  0xc2   :  { %4966 = vmatmul.mubr.bf16.vlgmr.msra.gmra.mrb[0].mxu0 %v6277_v12  ;;  %5499 = vmatmul.mubr.bf16.vlgmr.msra.gmra.mrb[0].mxu1 %v6277_v12  ;;  %v7656_v12 = vld [vmem:[%s11088_s1 + $0x804] ss:$16 sps:$4 sm:$0xff]  }
  0xc3   :  { %4975 = vmatpush1.bf16.msra.mxu0 %v7556_v10  ;;  %5508 = vmatpush1.bf16.msra.mxu1 %v7559_v13  ;;  %v7649_v10 = vld [vmem:[%s11088_s1 + $0x7e8] ss:$16 sps:$4 sm:$0xff]   ;;  %v7659_v13 = vld [vmem:[%s11088_s1 + $0x80c] ss:$16 sps:$4 sm:$0xff]  }
  0xc4   :  { %4976 = vmatprep.subr.bf16.mxu0 %v7564_v15  ;;  %5509 = vmatprep.subr.bf16.mxu1 %v7567_v11  ;;  %v7654_v15 = vld [vmem:[%s11088_s1 + $0x800] ss:$16 sps:$4 sm:$0xff]   ;;  %v6279_v11 = vcombine.low %v9138_v14, %v9138_v14  ;;  %v7665_v14 = vld [vmem:[%s11088_s1 + $0x82c] ss:$16 sps:$4 sm:$0xff]  }
  0xc5   :  { %5006 = vmatprep.mubr.bf16.mxu0 %v6280_v16  ;;  %5539 = vmatprep.mubr.bf16.mxu1 %v6280_v16  ;;  %v9336_v16 = vld [vmem:[%s11089_s0 + $0x20] sm:$0xff] }
  0xc7   :  { %4977 = vmatpush1.bf16.msra.mxu0 %v7562_v17  ;;  %5510 = vmatpush1.bf16.msra.mxu1 %v7565_v18  ;;  %v7657_v17 = vld [vmem:[%s11088_s1 + $0x808] ss:$16 sps:$4 sm:$0xff]   ;;  %v7662_v18 = vld [vmem:[%s11088_s1 + $0x824] ss:$16 sps:$4 sm:$0xff]  }
  0xc8   :  { %4978 = vmatprep.subr.bf16.mxu0 %v7570_v19  ;;  %5511 = vmatprep.subr.bf16.mxu1 %v7573_v20  ;;  %v6282_v19 = vcombine.high %v9336_v16, %v9336_v16  ;;  %v7660_v20 = vld [vmem:[%s11088_s1 + $0x820] ss:$16 sps:$4 sm:$0xff]  }
  0xcb   :  { %4979 = vmatpush1.bf16.msra.mxu0 %v7568_v21  ;;  %5512 = vmatpush1.bf16.msra.mxu1 %v7571_v22  ;;  %v7663_v21 = vld [vmem:[%s11088_s1 + $0x828] ss:$16 sps:$4 sm:$0xff]   ;;  %v7668_v22 = vld [vmem:[%s11088_s1 + $0x844] ss:$16 sps:$4 sm:$0xff]  }
  0xcc   :  { %4980 = vmatprep.subr.bf16.mxu0 %v7576_v23  ;;  %5513 = vmatprep.subr.bf16.mxu1 %v7579_v24  ;;  %v7671_v23 = vld [vmem:[%s11088_s1 + $0x84c] ss:$16 sps:$4 sm:$0xff]   ;;  %v7666_v24 = vld [vmem:[%s11088_s1 + $0x840] ss:$16 sps:$4 sm:$0xff]  }
  0xcf   :  { %4981 = vmatpush1.bf16.msra.mxu0 %v7574_v25  ;;  %5514 = vmatpush1.bf16.msra.mxu1 %v7577_v26  ;;  %v7669_v25 = vld [vmem:[%s11088_s1 + $0x848] ss:$16 sps:$4 sm:$0xff]   ;;  %v7674_v26 = vld [vmem:[%s11088_s1 + $0x864] ss:$16 sps:$4 sm:$0xff]  }
  0xd0   :  { %4982 = vmatprep.subr.bf16.mxu0 %v7582_v27  ;;  %5515 = vmatprep.subr.bf16.mxu1 %v7585_v28  ;;  %v7677_v27 = vld [vmem:[%s11088_s1 + $0x86c] ss:$16 sps:$4 sm:$0xff]   ;;  %v7672_v28 = vld [vmem:[%s11088_s1 + $0x860] ss:$16 sps:$4 sm:$0xff]  }
  0xd3   :  { %4983 = vmatpush1.bf16.msra.mxu0 %v7580_v29  ;;  %5516 = vmatpush1.bf16.msra.mxu1 %v7583_v30  ;;  %v7675_v29 = vld [vmem:[%s11088_s1 + $0x868] ss:$16 sps:$4 sm:$0xff]   ;;  %v7680_v30 = vld [vmem:[%s11088_s1 + $0x884] ss:$16 sps:$4 sm:$0xff]  }
  0xd4   :  { %4984 = vmatprep.subr.bf16.mxu0 %v7588_v31  ;;  %5517 = vmatprep.subr.bf16.mxu1 %v7591_v32  ;;  %v7683_v31 = vld [vmem:[%s11088_s1 + $0x88c] ss:$16 sps:$4 sm:$0xff]   ;;  %v7678_v32 = vld [vmem:[%s11088_s1 + $0x880] ss:$16 sps:$4 sm:$0xff]  }
  0xd7   :  { %4985 = vmatpush1.bf16.msra.mxu0 %v7586_v33  ;;  %5518 = vmatpush1.bf16.msra.mxu1 %v7589_v34  ;;  %v7681_v33 = vld [vmem:[%s11088_s1 + $0x888] ss:$16 sps:$4 sm:$0xff]   ;;  %v7686_v34 = vld [vmem:[%s11088_s1 + $0x8a4] ss:$16 sps:$4 sm:$0xff]  }
  0xd8   :  { %4986 = vmatprep.subr.bf16.mxu0 %v7594_v35  ;;  %5519 = vmatprep.subr.bf16.mxu1 %v7597_v36  ;;  %v7689_v35 = vld [vmem:[%s11088_s1 + $0x8ac] ss:$16 sps:$4 sm:$0xff]   ;;  %v7684_v36 = vld [vmem:[%s11088_s1 + $0x8a0] ss:$16 sps:$4 sm:$0xff]  }
  0xdb   :  { %4987 = vmatpush1.bf16.msra.mxu0 %v7592_v37  ;;  %5520 = vmatpush1.bf16.msra.mxu1 %v7595_v38  ;;  %v7687_v37 = vld [vmem:[%s11088_s1 + $0x8a8] ss:$16 sps:$4 sm:$0xff]   ;;  %v7692_v38 = vld [vmem:[%s11088_s1 + $0x8c4] ss:$16 sps:$4 sm:$0xff]  }
  0xdc   :  { %4988 = vmatprep.subr.bf16.mxu0 %v7600_v39  ;;  %5521 = vmatprep.subr.bf16.mxu1 %v7603_v40  ;;  %v7695_v39 = vld [vmem:[%s11088_s1 + $0x8cc] ss:$16 sps:$4 sm:$0xff]   ;;  %v7690_v40 = vld [vmem:[%s11088_s1 + $0x8c0] ss:$16 sps:$4 sm:$0xff]  }
  0xdf   :  { %4989 = vmatpush1.bf16.msra.mxu0 %v7598_v41  ;;  %5522 = vmatpush1.bf16.msra.mxu1 %v7601_v42  ;;  %v7693_v41 = vld [vmem:[%s11088_s1 + $0x8c8] ss:$16 sps:$4 sm:$0xff]   ;;  %v7698_v42 = vld [vmem:[%s11088_s1 + $0x8e4] ss:$16 sps:$4 sm:$0xff]  }
  0xe0   :  { %4990 = vmatprep.subr.bf16.mxu0 %v7606_v43  ;;  %5523 = vmatprep.subr.bf16.mxu1 %v7609_v44  ;;  %v7701_v43 = vld [vmem:[%s11088_s1 + $0x8ec] ss:$16 sps:$4 sm:$0xff]   ;;  %v7696_v44 = vld [vmem:[%s11088_s1 + $0x8e0] ss:$16 sps:$4 sm:$0xff]  }
  0xe3   :  { %4991 = vmatpush1.bf16.msra.mxu0 %v7604_v45  ;;  %5524 = vmatpush1.bf16.msra.mxu1 %v7607_v46  ;;  %v7699_v45 = vld [vmem:[%s11088_s1 + $0x8e8] ss:$16 sps:$4 sm:$0xff]   ;;  %v7704_v46 = vld [vmem:[%s11088_s1 + $0x904] ss:$16 sps:$4 sm:$0xff]  }
  0xe4   :  { %4992 = vmatprep.subr.bf16.mxu0 %v7612_v47  ;;  %5525 = vmatprep.subr.bf16.mxu1 %v7615_v48  ;;  %v7707_v47 = vld [vmem:[%s11088_s1 + $0x90c] ss:$16 sps:$4 sm:$0xff]   ;;  %v7702_v48 = vld [vmem:[%s11088_s1 + $0x900] ss:$16 sps:$4 sm:$0xff]  }
  0xe7   :  { %4993 = vmatpush1.bf16.msra.mxu0 %v7610_v49  ;;  %5526 = vmatpush1.bf16.msra.mxu1 %v7613_v50  ;;  %v7705_v49 = vld [vmem:[%s11088_s1 + $0x908] ss:$16 sps:$4 sm:$0xff]   ;;  %v7710_v50 = vld [vmem:[%s11088_s1 + $0x924] ss:$16 sps:$4 sm:$0xff]  }
  0xe8   :  { %4994 = vmatprep.subr.bf16.mxu0 %v7618_v51  ;;  %5527 = vmatprep.subr.bf16.mxu1 %v7621_v52  ;;  %v7713_v51 = vld [vmem:[%s11088_s1 + $0x92c] ss:$16 sps:$4 sm:$0xff]   ;;  %v7708_v52 = vld [vmem:[%s11088_s1 + $0x920] ss:$16 sps:$4 sm:$0xff]  }
  0xeb   :  { %4995 = vmatpush1.bf16.msra.mxu0 %v7616_v53  ;;  %5528 = vmatpush1.bf16.msra.mxu1 %v7619_v54  ;;  %v7711_v53 = vld [vmem:[%s11088_s1 + $0x928] ss:$16 sps:$4 sm:$0xff]   ;;  %v7716_v54 = vld [vmem:[%s11088_s1 + $0x944] ss:$16 sps:$4 sm:$0xff]  }
  0xec   :  { %4996 = vmatprep.subr.bf16.mxu0 %v7624_v55  ;;  %5529 = vmatprep.subr.bf16.mxu1 %v7627_v56  ;;  %v7719_v55 = vld [vmem:[%s11088_s1 + $0x94c] ss:$16 sps:$4 sm:$0xff]   ;;  %v7714_v56 = vld [vmem:[%s11088_s1 + $0x940] ss:$16 sps:$4 sm:$0xff]  }
  0xef   :  { %4997 = vmatpush1.bf16.msra.mxu0 %v7622_v57  ;;  %5530 = vmatpush1.bf16.msra.mxu1 %v7625_v58  ;;  %v7717_v57 = vld [vmem:[%s11088_s1 + $0x948] ss:$16 sps:$4 sm:$0xff]   ;;  %v7722_v58 = vld [vmem:[%s11088_s1 + $0x964] ss:$16 sps:$4 sm:$0xff]  }
  0xf0   :  { %4998 = vmatprep.subr.bf16.mxu0 %v7630_v59  ;;  %5531 = vmatprep.subr.bf16.mxu1 %v7633_v60  ;;  %v7725_v59 = vld [vmem:[%s11088_s1 + $0x96c] ss:$16 sps:$4 sm:$0xff]   ;;  %v7720_v60 = vld [vmem:[%s11088_s1 + $0x960] ss:$16 sps:$4 sm:$0xff]  }
  0xf3   :  { %4999 = vmatpush1.bf16.msra.mxu0 %v7628_v61  ;;  %5532 = vmatpush1.bf16.msra.mxu1 %v7631_v62  ;;  %v7723_v61 = vld [vmem:[%s11088_s1 + $0x968] ss:$16 sps:$4 sm:$0xff]   ;;  %v7728_v62 = vld [vmem:[%s11088_s1 + $0x984] ss:$16 sps:$4 sm:$0xff]  }
  0xf4   :  { %5000 = vmatprep.subr.bf16.mxu0 %v7636_v63  ;;  %5533 = vmatprep.subr.bf16.mxu1 %v7639_v0  ;;  %v7731_v63 = vld [vmem:[%s11088_s1 + $0x98c] ss:$16 sps:$4 sm:$0xff]   ;;  %v7726_v0 = vld [vmem:[%s11088_s1 + $0x980] ss:$16 sps:$4 sm:$0xff]  }
  0xf7   :  { %5001 = vmatpush1.bf16.msra.mxu0 %v7634_v1  ;;  %5534 = vmatpush1.bf16.msra.mxu1 %v7637_v2  ;;  %v7729_v1 = vld [vmem:[%s11088_s1 + $0x988] ss:$16 sps:$4 sm:$0xff]   ;;  %v7734_v2 = vld [vmem:[%s11088_s1 + $0x9a4] ss:$16 sps:$4 sm:$0xff]  }
  0xf8   :  { %5002 = vmatprep.subr.bf16.mxu0 %v7642_v3  ;;  %5535 = vmatprep.subr.bf16.mxu1 %v7645_v4  ;;  %v7737_v3 = vld [vmem:[%s11088_s1 + $0x9ac] ss:$16 sps:$4 sm:$0xff]   ;;  %v7732_v4 = vld [vmem:[%s11088_s1 + $0x9a0] ss:$16 sps:$4 sm:$0xff]  }
  0xfb   :  { %5003 = vmatpush1.bf16.msra.mxu0 %v7640_v5  ;;  %5536 = vmatpush1.bf16.msra.mxu1 %v7643_v6  ;;  %v7735_v5 = vld [vmem:[%s11088_s1 + $0x9a8] ss:$16 sps:$4 sm:$0xff]   ;;  %v7740_v6 = vld [vmem:[%s11088_s1 + $0x9c4] ss:$16 sps:$4 sm:$0xff]  }
  0xfc   :  { %5004 = vmatprep.subr.bf16.mxu0 %v7648_v7  ;;  %5537 = vmatprep.subr.bf16.mxu1 %v7651_v8  ;;  %v7743_v7 = vld [vmem:[%s11088_s1 + $0x9cc] ss:$16 sps:$4 sm:$0xff]   ;;  %v7738_v8 = vld [vmem:[%s11088_s1 + $0x9c0] ss:$16 sps:$4 sm:$0xff]  }
  0xff   :  { %5005 = vmatpush1.bf16.msra.mxu0 %v7646_v9  ;;  %5538 = vmatpush1.bf16.msra.mxu1 %v7649_v10  ;;  %v7741_v9 = vld [vmem:[%s11088_s1 + $0x9c8] ss:$16 sps:$4 sm:$0xff]   ;;  %v7746_v10 = vld [vmem:[%s11088_s1 + $0x9e4] ss:$16 sps:$4 sm:$0xff]  }
 0x100   :  { %5015 = vmatprep.subr.bf16.mxu0 %v7656_v12  ;;  %5548 = vmatprep.subr.bf16.mxu1 %v7659_v13  ;;  %v7749_v12 = vld [vmem:[%s11088_s1 + $0x9ec] ss:$16 sps:$4 sm:$0xff]   ;;  %v7744_v13 = vld [vmem:[%s11088_s1 + $0x9e0] ss:$16 sps:$4 sm:$0xff]  }
 0x102   :  { %5007 = vmatmul.mubr.bf16.vlgmr.msra.gmra.mrb[0].mxu0 %v6279_v11  ;;  %5540 = vmatmul.mubr.bf16.vlgmr.msra.gmra.mrb[0].mxu1 %v6279_v11  ;;  %v7754_v11 = vld [vmem:[%s11088_s1 + $0xa04] ss:$16 sps:$4 sm:$0xff]  }
 0x103   :  { %5016 = vmatpush1.bf16.msra.mxu0 %v7654_v15  ;;  %5549 = vmatpush1.bf16.msra.mxu1 %v7657_v17  ;;  %v7747_v15 = vld [vmem:[%s11088_s1 + $0x9e8] ss:$16 sps:$4 sm:$0xff]   ;;  %v7757_v17 = vld [vmem:[%s11088_s1 + $0xa0c] ss:$16 sps:$4 sm:$0xff]  }
 0x104   :  { %5017 = vmatprep.subr.bf16.mxu0 %v7662_v18  ;;  %5550 = vmatprep.subr.bf16.mxu1 %v7665_v14  ;;  %v9532_v18 = vld [vmem:[%s11089_s0 + $0x28] sm:$0xff]  ;;  %v6281_v14 = vcombine.low %v9336_v16, %v9336_v16 }
 0x105   :  { %5047 = vmatprep.mubr.bf16.mxu0 %v6282_v19  ;;  %5580 = vmatprep.mubr.bf16.mxu1 %v6282_v19  ;;  %v7752_v19 = vld [vmem:[%s11088_s1 + $0xa00] ss:$16 sps:$4 sm:$0xff]   ;;  %v7763_v16 = vld [vmem:[%s11088_s1 + $0xa2c] ss:$16 sps:$4 sm:$0xff]  }
 0x107   :  { %5018 = vmatpush1.bf16.msra.mxu0 %v7660_v20  ;;  %5551 = vmatpush1.bf16.msra.mxu1 %v7663_v21  ;;  %v7755_v20 = vld [vmem:[%s11088_s1 + $0xa08] ss:$16 sps:$4 sm:$0xff]   ;;  %v7760_v21 = vld [vmem:[%s11088_s1 + $0xa24] ss:$16 sps:$4 sm:$0xff]  }
 0x108   :  { %5019 = vmatprep.subr.bf16.mxu0 %v7668_v22  ;;  %5552 = vmatprep.subr.bf16.mxu1 %v7671_v23  ;;  %v6284_v22 = vcombine.high %v9532_v18, %v9532_v18  ;;  %v7758_v23 = vld [vmem:[%s11088_s1 + $0xa20] ss:$16 sps:$4 sm:$0xff]  }
 0x10b   :  { %5020 = vmatpush1.bf16.msra.mxu0 %v7666_v24  ;;  %5553 = vmatpush1.bf16.msra.mxu1 %v7669_v25  ;;  %v7761_v24 = vld [vmem:[%s11088_s1 + $0xa28] ss:$16 sps:$4 sm:$0xff]   ;;  %v7766_v25 = vld [vmem:[%s11088_s1 + $0xa44] ss:$16 sps:$4 sm:$0xff]  }
 0x10c   :  { %5021 = vmatprep.subr.bf16.mxu0 %v7674_v26  ;;  %5554 = vmatprep.subr.bf16.mxu1 %v7677_v27  ;;  %v7769_v26 = vld [vmem:[%s11088_s1 + $0xa4c] ss:$16 sps:$4 sm:$0xff]   ;;  %v7764_v27 = vld [vmem:[%s11088_s1 + $0xa40] ss:$16 sps:$4 sm:$0xff]  }
 0x10f   :  { %5022 = vmatpush1.bf16.msra.mxu0 %v7672_v28  ;;  %5555 = vmatpush1.bf16.msra.mxu1 %v7675_v29  ;;  %v7767_v28 = vld [vmem:[%s11088_s1 + $0xa48] ss:$16 sps:$4 sm:$0xff]   ;;  %v7772_v29 = vld [vmem:[%s11088_s1 + $0xa64] ss:$16 sps:$4 sm:$0xff]  }
 0x110   :  { %5023 = vmatprep.subr.bf16.mxu0 %v7680_v30  ;;  %5556 = vmatprep.subr.bf16.mxu1 %v7683_v31  ;;  %v7775_v30 = vld [vmem:[%s11088_s1 + $0xa6c] ss:$16 sps:$4 sm:$0xff]   ;;  %v7770_v31 = vld [vmem:[%s11088_s1 + $0xa60] ss:$16 sps:$4 sm:$0xff]  }
 0x113   :  { %5024 = vmatpush1.bf16.msra.mxu0 %v7678_v32  ;;  %5557 = vmatpush1.bf16.msra.mxu1 %v7681_v33  ;;  %v7773_v32 = vld [vmem:[%s11088_s1 + $0xa68] ss:$16 sps:$4 sm:$0xff]   ;;  %v7778_v33 = vld [vmem:[%s11088_s1 + $0xa84] ss:$16 sps:$4 sm:$0xff]  }
 0x114   :  { %5025 = vmatprep.subr.bf16.mxu0 %v7686_v34  ;;  %5558 = vmatprep.subr.bf16.mxu1 %v7689_v35  ;;  %v7781_v34 = vld [vmem:[%s11088_s1 + $0xa8c] ss:$16 sps:$4 sm:$0xff]   ;;  %v7776_v35 = vld [vmem:[%s11088_s1 + $0xa80] ss:$16 sps:$4 sm:$0xff]  }
 0x117   :  { %5026 = vmatpush1.bf16.msra.mxu0 %v7684_v36  ;;  %5559 = vmatpush1.bf16.msra.mxu1 %v7687_v37  ;;  %v7779_v36 = vld [vmem:[%s11088_s1 + $0xa88] ss:$16 sps:$4 sm:$0xff]   ;;  %v7784_v37 = vld [vmem:[%s11088_s1 + $0xaa4] ss:$16 sps:$4 sm:$0xff]  }
 0x118   :  { %5027 = vmatprep.subr.bf16.mxu0 %v7692_v38  ;;  %5560 = vmatprep.subr.bf16.mxu1 %v7695_v39  ;;  %v7787_v38 = vld [vmem:[%s11088_s1 + $0xaac] ss:$16 sps:$4 sm:$0xff]   ;;  %v7782_v39 = vld [vmem:[%s11088_s1 + $0xaa0] ss:$16 sps:$4 sm:$0xff]  }
 0x11b   :  { %5028 = vmatpush1.bf16.msra.mxu0 %v7690_v40  ;;  %5561 = vmatpush1.bf16.msra.mxu1 %v7693_v41  ;;  %v7785_v40 = vld [vmem:[%s11088_s1 + $0xaa8] ss:$16 sps:$4 sm:$0xff]   ;;  %v7790_v41 = vld [vmem:[%s11088_s1 + $0xac4] ss:$16 sps:$4 sm:$0xff]  }
 0x11c   :  { %5029 = vmatprep.subr.bf16.mxu0 %v7698_v42  ;;  %5562 = vmatprep.subr.bf16.mxu1 %v7701_v43  ;;  %v7793_v42 = vld [vmem:[%s11088_s1 + $0xacc] ss:$16 sps:$4 sm:$0xff]   ;;  %v7788_v43 = vld [vmem:[%s11088_s1 + $0xac0] ss:$16 sps:$4 sm:$0xff]  }
 0x11f   :  { %5030 = vmatpush1.bf16.msra.mxu0 %v7696_v44  ;;  %5563 = vmatpush1.bf16.msra.mxu1 %v7699_v45  ;;  %v7791_v44 = vld [vmem:[%s11088_s1 + $0xac8] ss:$16 sps:$4 sm:$0xff]   ;;  %v7796_v45 = vld [vmem:[%s11088_s1 + $0xae4] ss:$16 sps:$4 sm:$0xff]  }
 0x120   :  { %5031 = vmatprep.subr.bf16.mxu0 %v7704_v46  ;;  %5564 = vmatprep.subr.bf16.mxu1 %v7707_v47  ;;  %v7799_v46 = vld [vmem:[%s11088_s1 + $0xaec] ss:$16 sps:$4 sm:$0xff]   ;;  %v7794_v47 = vld [vmem:[%s11088_s1 + $0xae0] ss:$16 sps:$4 sm:$0xff]  }
 0x123   :  { %5032 = vmatpush1.bf16.msra.mxu0 %v7702_v48  ;;  %5565 = vmatpush1.bf16.msra.mxu1 %v7705_v49  ;;  %v7797_v48 = vld [vmem:[%s11088_s1 + $0xae8] ss:$16 sps:$4 sm:$0xff]   ;;  %v7802_v49 = vld [vmem:[%s11088_s1 + $0xb04] ss:$16 sps:$4 sm:$0xff]  }
 0x124   :  { %5033 = vmatprep.subr.bf16.mxu0 %v7710_v50  ;;  %5566 = vmatprep.subr.bf16.mxu1 %v7713_v51  ;;  %v7805_v50 = vld [vmem:[%s11088_s1 + $0xb0c] ss:$16 sps:$4 sm:$0xff]   ;;  %v7800_v51 = vld [vmem:[%s11088_s1 + $0xb00] ss:$16 sps:$4 sm:$0xff]  }
 0x127   :  { %5034 = vmatpush1.bf16.msra.mxu0 %v7708_v52  ;;  %5567 = vmatpush1.bf16.msra.mxu1 %v7711_v53  ;;  %v7803_v52 = vld [vmem:[%s11088_s1 + $0xb08] ss:$16 sps:$4 sm:$0xff]   ;;  %v7808_v53 = vld [vmem:[%s11088_s1 + $0xb24] ss:$16 sps:$4 sm:$0xff]  }
 0x128   :  { %5035 = vmatprep.subr.bf16.mxu0 %v7716_v54  ;;  %5568 = vmatprep.subr.bf16.mxu1 %v7719_v55  ;;  %v7811_v54 = vld [vmem:[%s11088_s1 + $0xb2c] ss:$16 sps:$4 sm:$0xff]   ;;  %v7806_v55 = vld [vmem:[%s11088_s1 + $0xb20] ss:$16 sps:$4 sm:$0xff]  }
 0x12b   :  { %5036 = vmatpush1.bf16.msra.mxu0 %v7714_v56  ;;  %5569 = vmatpush1.bf16.msra.mxu1 %v7717_v57  ;;  %v7809_v56 = vld [vmem:[%s11088_s1 + $0xb28] ss:$16 sps:$4 sm:$0xff]   ;;  %v7814_v57 = vld [vmem:[%s11088_s1 + $0xb44] ss:$16 sps:$4 sm:$0xff]  }
 0x12c   :  { %5037 = vmatprep.subr.bf16.mxu0 %v7722_v58  ;;  %5570 = vmatprep.subr.bf16.mxu1 %v7725_v59  ;;  %v7817_v58 = vld [vmem:[%s11088_s1 + $0xb4c] ss:$16 sps:$4 sm:$0xff]   ;;  %v7812_v59 = vld [vmem:[%s11088_s1 + $0xb40] ss:$16 sps:$4 sm:$0xff]  }
 0x12f   :  { %5038 = vmatpush1.bf16.msra.mxu0 %v7720_v60  ;;  %5571 = vmatpush1.bf16.msra.mxu1 %v7723_v61  ;;  %v7815_v60 = vld [vmem:[%s11088_s1 + $0xb48] ss:$16 sps:$4 sm:$0xff]   ;;  %v7820_v61 = vld [vmem:[%s11088_s1 + $0xb64] ss:$16 sps:$4 sm:$0xff]  }
 0x130   :  { %5039 = vmatprep.subr.bf16.mxu0 %v7728_v62  ;;  %5572 = vmatprep.subr.bf16.mxu1 %v7731_v63  ;;  %v7823_v62 = vld [vmem:[%s11088_s1 + $0xb6c] ss:$16 sps:$4 sm:$0xff]   ;;  %v7818_v63 = vld [vmem:[%s11088_s1 + $0xb60] ss:$16 sps:$4 sm:$0xff]  }
 0x133   :  { %5040 = vmatpush1.bf16.msra.mxu0 %v7726_v0  ;;  %5573 = vmatpush1.bf16.msra.mxu1 %v7729_v1  ;;  %v7821_v0 = vld [vmem:[%s11088_s1 + $0xb68] ss:$16 sps:$4 sm:$0xff]   ;;  %v7826_v1 = vld [vmem:[%s11088_s1 + $0xb84] ss:$16 sps:$4 sm:$0xff]  }
 0x134   :  { %5041 = vmatprep.subr.bf16.mxu0 %v7734_v2  ;;  %5574 = vmatprep.subr.bf16.mxu1 %v7737_v3  ;;  %v7829_v2 = vld [vmem:[%s11088_s1 + $0xb8c] ss:$16 sps:$4 sm:$0xff]   ;;  %v7824_v3 = vld [vmem:[%s11088_s1 + $0xb80] ss:$16 sps:$4 sm:$0xff]  }
 0x137   :  { %5042 = vmatpush1.bf16.msra.mxu0 %v7732_v4  ;;  %5575 = vmatpush1.bf16.msra.mxu1 %v7735_v5  ;;  %v7827_v4 = vld [vmem:[%s11088_s1 + $0xb88] ss:$16 sps:$4 sm:$0xff]   ;;  %v7832_v5 = vld [vmem:[%s11088_s1 + $0xba4] ss:$16 sps:$4 sm:$0xff]  }
 0x138   :  { %5043 = vmatprep.subr.bf16.mxu0 %v7740_v6  ;;  %5576 = vmatprep.subr.bf16.mxu1 %v7743_v7  ;;  %v7835_v6 = vld [vmem:[%s11088_s1 + $0xbac] ss:$16 sps:$4 sm:$0xff]   ;;  %v7830_v7 = vld [vmem:[%s11088_s1 + $0xba0] ss:$16 sps:$4 sm:$0xff]  }
 0x13b   :  { %5044 = vmatpush1.bf16.msra.mxu0 %v7738_v8  ;;  %5577 = vmatpush1.bf16.msra.mxu1 %v7741_v9  ;;  %v7833_v8 = vld [vmem:[%s11088_s1 + $0xba8] ss:$16 sps:$4 sm:$0xff]   ;;  %v7838_v9 = vld [vmem:[%s11088_s1 + $0xbc4] ss:$16 sps:$4 sm:$0xff]  }
 0x13c   :  { %5045 = vmatprep.subr.bf16.mxu0 %v7746_v10  ;;  %5578 = vmatprep.subr.bf16.mxu1 %v7749_v12  ;;  %v7841_v10 = vld [vmem:[%s11088_s1 + $0xbcc] ss:$16 sps:$4 sm:$0xff]   ;;  %v7836_v12 = vld [vmem:[%s11088_s1 + $0xbc0] ss:$16 sps:$4 sm:$0xff]  }
 0x13f   :  { %5046 = vmatpush1.bf16.msra.mxu0 %v7744_v13  ;;  %5579 = vmatpush1.bf16.msra.mxu1 %v7747_v15  ;;  %v7839_v13 = vld [vmem:[%s11088_s1 + $0xbc8] ss:$16 sps:$4 sm:$0xff]   ;;  %v7844_v15 = vld [vmem:[%s11088_s1 + $0xbe4] ss:$16 sps:$4 sm:$0xff]  }
 0x140   :  { %5056 = vmatprep.subr.bf16.mxu0 %v7754_v11  ;;  %5589 = vmatprep.subr.bf16.mxu1 %v7757_v17  ;;  %v7847_v11 = vld [vmem:[%s11088_s1 + $0xbec] ss:$16 sps:$4 sm:$0xff]   ;;  %v7842_v17 = vld [vmem:[%s11088_s1 + $0xbe0] ss:$16 sps:$4 sm:$0xff]  }
 0x142   :  { %5048 = vmatmul.mubr.bf16.vlgmr.msra.gmra.mrb[0].mxu0 %v6281_v14  ;;  %5581 = vmatmul.mubr.bf16.vlgmr.msra.gmra.mrb[0].mxu1 %v6281_v14  ;;  %v7845_v14 = vld [vmem:[%s11088_s1 + $0xbe8] ss:$16 sps:$4 sm:$0xff]  }
 0x143   :  { %5057 = vmatpush1.bf16.msra.mxu0 %v7752_v19  ;;  %5590 = vmatpush1.bf16.msra.mxu1 %v7755_v20  ;;  %v7852_v19 = vld [vmem:[%s11088_s1 + $0xc04] ss:$16 sps:$4 sm:$0xff]   ;;  %v7855_v20 = vld [vmem:[%s11088_s1 + $0xc0c] ss:$16 sps:$4 sm:$0xff]  }
 0x144   :  { %5058 = vmatprep.subr.bf16.mxu0 %v7760_v21  ;;  %5591 = vmatprep.subr.bf16.mxu1 %v7763_v16  ;;  %v9733_v21 = vld [vmem:[%s11089_s0 + $0x30] sm:$0xff]  ;;  %v6283_v16 = vcombine.low %v9532_v18, %v9532_v18  ;;  %v7861_v18 = vld [vmem:[%s11088_s1 + $0xc2c] ss:$16 sps:$4 sm:$0xff]  }
 0x145   :  { %5088 = vmatprep.mubr.bf16.mxu0 %v6284_v22  ;;  %5621 = vmatprep.mubr.bf16.mxu1 %v6284_v22  ;;  %v7850_v22 = vld [vmem:[%s11088_s1 + $0xc00] ss:$16 sps:$4 sm:$0xff]  }
 0x147   :  { %5059 = vmatpush1.bf16.msra.mxu0 %v7758_v23  ;;  %5592 = vmatpush1.bf16.msra.mxu1 %v7761_v24  ;;  %v7853_v23 = vld [vmem:[%s11088_s1 + $0xc08] ss:$16 sps:$4 sm:$0xff]   ;;  %v7858_v24 = vld [vmem:[%s11088_s1 + $0xc24] ss:$16 sps:$4 sm:$0xff]  }
 0x148   :  { %5060 = vmatprep.subr.bf16.mxu0 %v7766_v25  ;;  %5593 = vmatprep.subr.bf16.mxu1 %v7769_v26  ;;  %v6286_v25 = vcombine.high %v9733_v21, %v9733_v21  ;;  %v7856_v26 = vld [vmem:[%s11088_s1 + $0xc20] ss:$16 sps:$4 sm:$0xff]  }
 0x14b   :  { %5061 = vmatpush1.bf16.msra.mxu0 %v7764_v27  ;;  %5594 = vmatpush1.bf16.msra.mxu1 %v7767_v28  ;;  %v7859_v27 = vld [vmem:[%s11088_s1 + $0xc28] ss:$16 sps:$4 sm:$0xff]   ;;  %v7864_v28 = vld [vmem:[%s11088_s1 + $0xc44] ss:$16 sps:$4 sm:$0xff]  }
 0x14c   :  { %5062 = vmatprep.subr.bf16.mxu0 %v7772_v29  ;;  %5595 = vmatprep.subr.bf16.mxu1 %v7775_v30  ;;  %v7867_v29 = vld [vmem:[%s11088_s1 + $0xc4c] ss:$16 sps:$4 sm:$0xff]   ;;  %v7862_v30 = vld [vmem:[%s11088_s1 + $0xc40] ss:$16 sps:$4 sm:$0xff]  }
 0x14f   :  { %5063 = vmatpush1.bf16.msra.mxu0 %v7770_v31  ;;  %5596 = vmatpush1.bf16.msra.mxu1 %v7773_v32  ;;  %v7865_v31 = vld [vmem:[%s11088_s1 + $0xc48] ss:$16 sps:$4 sm:$0xff]   ;;  %v7870_v32 = vld [vmem:[%s11088_s1 + $0xc64] ss:$16 sps:$4 sm:$0xff]  }
 0x150   :  { %5064 = vmatprep.subr.bf16.mxu0 %v7778_v33  ;;  %5597 = vmatprep.subr.bf16.mxu1 %v7781_v34  ;;  %v7873_v33 = vld [vmem:[%s11088_s1 + $0xc6c] ss:$16 sps:$4 sm:$0xff]   ;;  %v7868_v34 = vld [vmem:[%s11088_s1 + $0xc60] ss:$16 sps:$4 sm:$0xff]  }
 0x153   :  { %5065 = vmatpush1.bf16.msra.mxu0 %v7776_v35  ;;  %5598 = vmatpush1.bf16.msra.mxu1 %v7779_v36  ;;  %v7871_v35 = vld [vmem:[%s11088_s1 + $0xc68] ss:$16 sps:$4 sm:$0xff]   ;;  %v7876_v36 = vld [vmem:[%s11088_s1 + $0xc84] ss:$16 sps:$4 sm:$0xff]  }
 0x154   :  { %5066 = vmatprep.subr.bf16.mxu0 %v7784_v37  ;;  %5599 = vmatprep.subr.bf16.mxu1 %v7787_v38  ;;  %v7879_v37 = vld [vmem:[%s11088_s1 + $0xc8c] ss:$16 sps:$4 sm:$0xff]   ;;  %v7874_v38 = vld [vmem:[%s11088_s1 + $0xc80] ss:$16 sps:$4 sm:$0xff]  }
 0x157   :  { %5067 = vmatpush1.bf16.msra.mxu0 %v7782_v39  ;;  %5600 = vmatpush1.bf16.msra.mxu1 %v7785_v40  ;;  %v7877_v39 = vld [vmem:[%s11088_s1 + $0xc88] ss:$16 sps:$4 sm:$0xff]   ;;  %v7882_v40 = vld [vmem:[%s11088_s1 + $0xca4] ss:$16 sps:$4 sm:$0xff]  }
 0x158   :  { %5068 = vmatprep.subr.bf16.mxu0 %v7790_v41  ;;  %5601 = vmatprep.subr.bf16.mxu1 %v7793_v42  ;;  %v7885_v41 = vld [vmem:[%s11088_s1 + $0xcac] ss:$16 sps:$4 sm:$0xff]   ;;  %v7880_v42 = vld [vmem:[%s11088_s1 + $0xca0] ss:$16 sps:$4 sm:$0xff]  }
 0x15b   :  { %5069 = vmatpush1.bf16.msra.mxu0 %v7788_v43  ;;  %5602 = vmatpush1.bf16.msra.mxu1 %v7791_v44  ;;  %v7883_v43 = vld [vmem:[%s11088_s1 + $0xca8] ss:$16 sps:$4 sm:$0xff]   ;;  %v7888_v44 = vld [vmem:[%s11088_s1 + $0xcc4] ss:$16 sps:$4 sm:$0xff]  }
 0x15c   :  { %5070 = vmatprep.subr.bf16.mxu0 %v7796_v45  ;;  %5603 = vmatprep.subr.bf16.mxu1 %v7799_v46  ;;  %v7891_v45 = vld [vmem:[%s11088_s1 + $0xccc] ss:$16 sps:$4 sm:$0xff]   ;;  %v7886_v46 = vld [vmem:[%s11088_s1 + $0xcc0] ss:$16 sps:$4 sm:$0xff]  }
 0x15f   :  { %5071 = vmatpush1.bf16.msra.mxu0 %v7794_v47  ;;  %5604 = vmatpush1.bf16.msra.mxu1 %v7797_v48  ;;  %v7889_v47 = vld [vmem:[%s11088_s1 + $0xcc8] ss:$16 sps:$4 sm:$0xff]   ;;  %v7894_v48 = vld [vmem:[%s11088_s1 + $0xce4] ss:$16 sps:$4 sm:$0xff]  }
 0x160   :  { %5072 = vmatprep.subr.bf16.mxu0 %v7802_v49  ;;  %5605 = vmatprep.subr.bf16.mxu1 %v7805_v50  ;;  %v7897_v49 = vld [vmem:[%s11088_s1 + $0xcec] ss:$16 sps:$4 sm:$0xff]   ;;  %v7892_v50 = vld [vmem:[%s11088_s1 + $0xce0] ss:$16 sps:$4 sm:$0xff]  }
 0x163   :  { %5073 = vmatpush1.bf16.msra.mxu0 %v7800_v51  ;;  %5606 = vmatpush1.bf16.msra.mxu1 %v7803_v52  ;;  %v7895_v51 = vld [vmem:[%s11088_s1 + $0xce8] ss:$16 sps:$4 sm:$0xff]   ;;  %v7900_v52 = vld [vmem:[%s11088_s1 + $0xd04] ss:$16 sps:$4 sm:$0xff]  }
 0x164   :  { %5074 = vmatprep.subr.bf16.mxu0 %v7808_v53  ;;  %5607 = vmatprep.subr.bf16.mxu1 %v7811_v54  ;;  %v7903_v53 = vld [vmem:[%s11088_s1 + $0xd0c] ss:$16 sps:$4 sm:$0xff]   ;;  %v7898_v54 = vld [vmem:[%s11088_s1 + $0xd00] ss:$16 sps:$4 sm:$0xff]  }
 0x167   :  { %5075 = vmatpush1.bf16.msra.mxu0 %v7806_v55  ;;  %5608 = vmatpush1.bf16.msra.mxu1 %v7809_v56  ;;  %v7901_v55 = vld [vmem:[%s11088_s1 + $0xd08] ss:$16 sps:$4 sm:$0xff]   ;;  %v7906_v56 = vld [vmem:[%s11088_s1 + $0xd24] ss:$16 sps:$4 sm:$0xff]  }
 0x168   :  { %5076 = vmatprep.subr.bf16.mxu0 %v7814_v57  ;;  %5609 = vmatprep.subr.bf16.mxu1 %v7817_v58  ;;  %v7909_v57 = vld [vmem:[%s11088_s1 + $0xd2c] ss:$16 sps:$4 sm:$0xff]   ;;  %v7904_v58 = vld [vmem:[%s11088_s1 + $0xd20] ss:$16 sps:$4 sm:$0xff]  }
 0x16b   :  { %5077 = vmatpush1.bf16.msra.mxu0 %v7812_v59  ;;  %5610 = vmatpush1.bf16.msra.mxu1 %v7815_v60  ;;  %v7907_v59 = vld [vmem:[%s11088_s1 + $0xd28] ss:$16 sps:$4 sm:$0xff]   ;;  %v7912_v60 = vld [vmem:[%s11088_s1 + $0xd44] ss:$16 sps:$4 sm:$0xff]  }
 0x16c   :  { %5078 = vmatprep.subr.bf16.mxu0 %v7820_v61  ;;  %5611 = vmatprep.subr.bf16.mxu1 %v7823_v62  ;;  %v7915_v61 = vld [vmem:[%s11088_s1 + $0xd4c] ss:$16 sps:$4 sm:$0xff]   ;;  %v7910_v62 = vld [vmem:[%s11088_s1 + $0xd40] ss:$16 sps:$4 sm:$0xff]  }
 0x16f   :  { %5079 = vmatpush1.bf16.msra.mxu0 %v7818_v63  ;;  %5612 = vmatpush1.bf16.msra.mxu1 %v7821_v0  ;;  %v7913_v63 = vld [vmem:[%s11088_s1 + $0xd48] ss:$16 sps:$4 sm:$0xff]   ;;  %v7918_v0 = vld [vmem:[%s11088_s1 + $0xd64] ss:$16 sps:$4 sm:$0xff]  }
 0x170   :  { %5080 = vmatprep.subr.bf16.mxu0 %v7826_v1  ;;  %5613 = vmatprep.subr.bf16.mxu1 %v7829_v2  ;;  %v7921_v1 = vld [vmem:[%s11088_s1 + $0xd6c] ss:$16 sps:$4 sm:$0xff]   ;;  %v7916_v2 = vld [vmem:[%s11088_s1 + $0xd60] ss:$16 sps:$4 sm:$0xff]  }
 0x173   :  { %5081 = vmatpush1.bf16.msra.mxu0 %v7824_v3  ;;  %5614 = vmatpush1.bf16.msra.mxu1 %v7827_v4  ;;  %v7919_v3 = vld [vmem:[%s11088_s1 + $0xd68] ss:$16 sps:$4 sm:$0xff]   ;;  %v7924_v4 = vld [vmem:[%s11088_s1 + $0xd84] ss:$16 sps:$4 sm:$0xff]  }
 0x174   :  { %5082 = vmatprep.subr.bf16.mxu0 %v7832_v5  ;;  %5615 = vmatprep.subr.bf16.mxu1 %v7835_v6  ;;  %v7927_v5 = vld [vmem:[%s11088_s1 + $0xd8c] ss:$16 sps:$4 sm:$0xff]   ;;  %v7922_v6 = vld [vmem:[%s11088_s1 + $0xd80] ss:$16 sps:$4 sm:$0xff]  }
 0x177   :  { %5083 = vmatpush1.bf16.msra.mxu0 %v7830_v7  ;;  %5616 = vmatpush1.bf16.msra.mxu1 %v7833_v8  ;;  %v7925_v7 = vld [vmem:[%s11088_s1 + $0xd88] ss:$16 sps:$4 sm:$0xff]   ;;  %v7930_v8 = vld [vmem:[%s11088_s1 + $0xda4] ss:$16 sps:$4 sm:$0xff]  }
 0x178   :  { %5084 = vmatprep.subr.bf16.mxu0 %v7838_v9  ;;  %5617 = vmatprep.subr.bf16.mxu1 %v7841_v10  ;;  %v7933_v9 = vld [vmem:[%s11088_s1 + $0xdac] ss:$16 sps:$4 sm:$0xff]   ;;  %v7928_v10 = vld [vmem:[%s11088_s1 + $0xda0] ss:$16 sps:$4 sm:$0xff]  }
 0x17b   :  { %5085 = vmatpush1.bf16.msra.mxu0 %v7836_v12  ;;  %5618 = vmatpush1.bf16.msra.mxu1 %v7839_v13  ;;  %v7931_v12 = vld [vmem:[%s11088_s1 + $0xda8] ss:$16 sps:$4 sm:$0xff]   ;;  %v7936_v13 = vld [vmem:[%s11088_s1 + $0xdc4] ss:$16 sps:$4 sm:$0xff]  }
 0x17c   :  { %5086 = vmatprep.subr.bf16.mxu0 %v7844_v15  ;;  %5619 = vmatprep.subr.bf16.mxu1 %v7847_v11  ;;  %v7939_v15 = vld [vmem:[%s11088_s1 + $0xdcc] ss:$16 sps:$4 sm:$0xff]   ;;  %v7934_v11 = vld [vmem:[%s11088_s1 + $0xdc0] ss:$16 sps:$4 sm:$0xff]  }
 0x17f   :  { %5087 = vmatpush1.bf16.msra.mxu0 %v7842_v17  ;;  %5620 = vmatpush1.bf16.msra.mxu1 %v7845_v14  ;;  %v7937_v17 = vld [vmem:[%s11088_s1 + $0xdc8] ss:$16 sps:$4 sm:$0xff]   ;;  %v7942_v14 = vld [vmem:[%s11088_s1 + $0xde4] ss:$16 sps:$4 sm:$0xff]  }
 0x180   :  { %5097 = vmatprep.subr.bf16.mxu0 %v7852_v19  ;;  %5630 = vmatprep.subr.bf16.mxu1 %v7855_v20  ;;  %v7945_v19 = vld [vmem:[%s11088_s1 + $0xdec] ss:$16 sps:$4 sm:$0xff]   ;;  %v7940_v20 = vld [vmem:[%s11088_s1 + $0xde0] ss:$16 sps:$4 sm:$0xff]  }
 0x182   :  { %5089 = vmatmul.mubr.bf16.vlgmr.msra.gmra.mrb[0].mxu0 %v6283_v16  ;;  %5622 = vmatmul.mubr.bf16.vlgmr.msra.gmra.mrb[0].mxu1 %v6283_v16  ;;  %v7943_v16 = vld [vmem:[%s11088_s1 + $0xde8] ss:$16 sps:$4 sm:$0xff]  }
 0x183   :  { %5098 = vmatpush1.bf16.msra.mxu0 %v7850_v22  ;;  %5631 = vmatpush1.bf16.msra.mxu1 %v7853_v23  ;;  %v7950_v22 = vld [vmem:[%s11088_s1 + $0xe04] ss:$16 sps:$4 sm:$0xff]   ;;  %v7953_v23 = vld [vmem:[%s11088_s1 + $0xe0c] ss:$16 sps:$4 sm:$0xff]  }
 0x184   :  { %5099 = vmatprep.subr.bf16.mxu0 %v7858_v24  ;;  %5632 = vmatprep.subr.bf16.mxu1 %v7861_v18  ;;  %v9934_v24 = vld [vmem:[%s11089_s0 + $0x38] sm:$0xff]  ;;  %v6285_v18 = vcombine.low %v9733_v21, %v9733_v21 }
 0x185   :  { %5129 = vmatprep.mubr.bf16.mxu0 %v6286_v25  ;;  %5662 = vmatprep.mubr.bf16.mxu1 %v6286_v25  ;;  %v7948_v25 = vld [vmem:[%s11088_s1 + $0xe00] ss:$16 sps:$4 sm:$0xff]   ;;  %v7959_v21 = vld [vmem:[%s11088_s1 + $0xe2c] ss:$16 sps:$4 sm:$0xff]  }
 0x187   :  { %5100 = vmatpush1.bf16.msra.mxu0 %v7856_v26  ;;  %5633 = vmatpush1.bf16.msra.mxu1 %v7859_v27  ;;  %v7951_v26 = vld [vmem:[%s11088_s1 + $0xe08] ss:$16 sps:$4 sm:$0xff]   ;;  %v7956_v27 = vld [vmem:[%s11088_s1 + $0xe24] ss:$16 sps:$4 sm:$0xff]  }
 0x188   :  { %5101 = vmatprep.subr.bf16.mxu0 %v7864_v28  ;;  %5634 = vmatprep.subr.bf16.mxu1 %v7867_v29  ;;  %v6288_v28 = vcombine.high %v9934_v24, %v9934_v24  ;;  %v7954_v29 = vld [vmem:[%s11088_s1 + $0xe20] ss:$16 sps:$4 sm:$0xff]  }
 0x18b   :  { %5102 = vmatpush1.bf16.msra.mxu0 %v7862_v30  ;;  %5635 = vmatpush1.bf16.msra.mxu1 %v7865_v31  ;;  %v7957_v30 = vld [vmem:[%s11088_s1 + $0xe28] ss:$16 sps:$4 sm:$0xff]   ;;  %v7962_v31 = vld [vmem:[%s11088_s1 + $0xe44] ss:$16 sps:$4 sm:$0xff]  }
 0x18c   :  { %5103 = vmatprep.subr.bf16.mxu0 %v7870_v32  ;;  %5636 = vmatprep.subr.bf16.mxu1 %v7873_v33  ;;  %v7965_v32 = vld [vmem:[%s11088_s1 + $0xe4c] ss:$16 sps:$4 sm:$0xff]   ;;  %v7960_v33 = vld [vmem:[%s11088_s1 + $0xe40] ss:$16 sps:$4 sm:$0xff]  }
 0x18f   :  { %5104 = vmatpush1.bf16.msra.mxu0 %v7868_v34  ;;  %5637 = vmatpush1.bf16.msra.mxu1 %v7871_v35  ;;  %v7963_v34 = vld [vmem:[%s11088_s1 + $0xe48] ss:$16 sps:$4 sm:$0xff]   ;;  %v7968_v35 = vld [vmem:[%s11088_s1 + $0xe64] ss:$16 sps:$4 sm:$0xff]  }
 0x190   :  { %5105 = vmatprep.subr.bf16.mxu0 %v7876_v36  ;;  %5638 = vmatprep.subr.bf16.mxu1 %v7879_v37  ;;  %v7971_v36 = vld [vmem:[%s11088_s1 + $0xe6c] ss:$16 sps:$4 sm:$0xff]   ;;  %v7966_v37 = vld [vmem:[%s11088_s1 + $0xe60] ss:$16 sps:$4 sm:$0xff]  }
 0x193   :  { %5106 = vmatpush1.bf16.msra.mxu0 %v7874_v38  ;;  %5639 = vmatpush1.bf16.msra.mxu1 %v7877_v39  ;;  %v7969_v38 = vld [vmem:[%s11088_s1 + $0xe68] ss:$16 sps:$4 sm:$0xff]   ;;  %v7974_v39 = vld [vmem:[%s11088_s1 + $0xe84] ss:$16 sps:$4 sm:$0xff]  }
 0x194   :  { %5107 = vmatprep.subr.bf16.mxu0 %v7882_v40  ;;  %5640 = vmatprep.subr.bf16.mxu1 %v7885_v41  ;;  %v7977_v40 = vld [vmem:[%s11088_s1 + $0xe8c] ss:$16 sps:$4 sm:$0xff]   ;;  %v7972_v41 = vld [vmem:[%s11088_s1 + $0xe80] ss:$16 sps:$4 sm:$0xff]  }
 0x197   :  { %5108 = vmatpush1.bf16.msra.mxu0 %v7880_v42  ;;  %5641 = vmatpush1.bf16.msra.mxu1 %v7883_v43  ;;  %v7975_v42 = vld [vmem:[%s11088_s1 + $0xe88] ss:$16 sps:$4 sm:$0xff]   ;;  %v7980_v43 = vld [vmem:[%s11088_s1 + $0xea4] ss:$16 sps:$4 sm:$0xff]  }
 0x198   :  { %5109 = vmatprep.subr.bf16.mxu0 %v7888_v44  ;;  %5642 = vmatprep.subr.bf16.mxu1 %v7891_v45  ;;  %v7983_v44 = vld [vmem:[%s11088_s1 + $0xeac] ss:$16 sps:$4 sm:$0xff]   ;;  %v7978_v45 = vld [vmem:[%s11088_s1 + $0xea0] ss:$16 sps:$4 sm:$0xff]  }
 0x19b   :  { %5110 = vmatpush1.bf16.msra.mxu0 %v7886_v46  ;;  %5643 = vmatpush1.bf16.msra.mxu1 %v7889_v47  ;;  %v7981_v46 = vld [vmem:[%s11088_s1 + $0xea8] ss:$16 sps:$4 sm:$0xff]   ;;  %v7986_v47 = vld [vmem:[%s11088_s1 + $0xec4] ss:$16 sps:$4 sm:$0xff]  }
 0x19c   :  { %5111 = vmatprep.subr.bf16.mxu0 %v7894_v48  ;;  %5644 = vmatprep.subr.bf16.mxu1 %v7897_v49  ;;  %v7989_v48 = vld [vmem:[%s11088_s1 + $0xecc] ss:$16 sps:$4 sm:$0xff]   ;;  %v7984_v49 = vld [vmem:[%s11088_s1 + $0xec0] ss:$16 sps:$4 sm:$0xff]  }
 0x19f   :  { %5112 = vmatpush1.bf16.msra.mxu0 %v7892_v50  ;;  %5645 = vmatpush1.bf16.msra.mxu1 %v7895_v51  ;;  %v7987_v50 = vld [vmem:[%s11088_s1 + $0xec8] ss:$16 sps:$4 sm:$0xff]   ;;  %v7992_v51 = vld [vmem:[%s11088_s1 + $0xee4] ss:$16 sps:$4 sm:$0xff]  }
 0x1a0   :  { %5113 = vmatprep.subr.bf16.mxu0 %v7900_v52  ;;  %5646 = vmatprep.subr.bf16.mxu1 %v7903_v53  ;;  %v7995_v52 = vld [vmem:[%s11088_s1 + $0xeec] ss:$16 sps:$4 sm:$0xff]   ;;  %v7990_v53 = vld [vmem:[%s11088_s1 + $0xee0] ss:$16 sps:$4 sm:$0xff]  }
 0x1a3   :  { %5114 = vmatpush1.bf16.msra.mxu0 %v7898_v54  ;;  %5647 = vmatpush1.bf16.msra.mxu1 %v7901_v55  ;;  %v7993_v54 = vld [vmem:[%s11088_s1 + $0xee8] ss:$16 sps:$4 sm:$0xff]   ;;  %v7998_v55 = vld [vmem:[%s11088_s1 + $0xf04] ss:$16 sps:$4 sm:$0xff]  }
 0x1a4   :  { %5115 = vmatprep.subr.bf16.mxu0 %v7906_v56  ;;  %5648 = vmatprep.subr.bf16.mxu1 %v7909_v57  ;;  %v8001_v56 = vld [vmem:[%s11088_s1 + $0xf0c] ss:$16 sps:$4 sm:$0xff]   ;;  %v7996_v57 = vld [vmem:[%s11088_s1 + $0xf00] ss:$16 sps:$4 sm:$0xff]  }
 0x1a7   :  { %5116 = vmatpush1.bf16.msra.mxu0 %v7904_v58  ;;  %5649 = vmatpush1.bf16.msra.mxu1 %v7907_v59  ;;  %v7999_v58 = vld [vmem:[%s11088_s1 + $0xf08] ss:$16 sps:$4 sm:$0xff]   ;;  %v8004_v59 = vld [vmem:[%s11088_s1 + $0xf24] ss:$16 sps:$4 sm:$0xff]  }
 0x1a8   :  { %5117 = vmatprep.subr.bf16.mxu0 %v7912_v60  ;;  %5650 = vmatprep.subr.bf16.mxu1 %v7915_v61  ;;  %v8007_v60 = vld [vmem:[%s11088_s1 + $0xf2c] ss:$16 sps:$4 sm:$0xff]   ;;  %v8002_v61 = vld [vmem:[%s11088_s1 + $0xf20] ss:$16 sps:$4 sm:$0xff]  }
 0x1ab   :  { %5118 = vmatpush1.bf16.msra.mxu0 %v7910_v62  ;;  %5651 = vmatpush1.bf16.msra.mxu1 %v7913_v63  ;;  %v8005_v62 = vld [vmem:[%s11088_s1 + $0xf28] ss:$16 sps:$4 sm:$0xff]   ;;  %v8010_v63 = vld [vmem:[%s11088_s1 + $0xf44] ss:$16 sps:$4 sm:$0xff]  }
 0x1ac   :  { %5119 = vmatprep.subr.bf16.mxu0 %v7918_v0  ;;  %5652 = vmatprep.subr.bf16.mxu1 %v7921_v1  ;;  %v8013_v0 = vld [vmem:[%s11088_s1 + $0xf4c] ss:$16 sps:$4 sm:$0xff]   ;;  %v8008_v1 = vld [vmem:[%s11088_s1 + $0xf40] ss:$16 sps:$4 sm:$0xff]  }
 0x1af   :  { %5120 = vmatpush1.bf16.msra.mxu0 %v7916_v2  ;;  %5653 = vmatpush1.bf16.msra.mxu1 %v7919_v3  ;;  %v8011_v2 = vld [vmem:[%s11088_s1 + $0xf48] ss:$16 sps:$4 sm:$0xff]   ;;  %v8016_v3 = vld [vmem:[%s11088_s1 + $0xf64] ss:$16 sps:$4 sm:$0xff]  }
 0x1b0   :  { %5121 = vmatprep.subr.bf16.mxu0 %v7924_v4  ;;  %5654 = vmatprep.subr.bf16.mxu1 %v7927_v5  ;;  %v8019_v4 = vld [vmem:[%s11088_s1 + $0xf6c] ss:$16 sps:$4 sm:$0xff]   ;;  %v8014_v5 = vld [vmem:[%s11088_s1 + $0xf60] ss:$16 sps:$4 sm:$0xff]  }
 0x1b3   :  { %5122 = vmatpush1.bf16.msra.mxu0 %v7922_v6  ;;  %5655 = vmatpush1.bf16.msra.mxu1 %v7925_v7  ;;  %v8017_v6 = vld [vmem:[%s11088_s1 + $0xf68] ss:$16 sps:$4 sm:$0xff]   ;;  %v8022_v7 = vld [vmem:[%s11088_s1 + $0xf84] ss:$16 sps:$4 sm:$0xff]  }
 0x1b4   :  { %5123 = vmatprep.subr.bf16.mxu0 %v7930_v8  ;;  %5656 = vmatprep.subr.bf16.mxu1 %v7933_v9  ;;  %v8025_v8 = vld [vmem:[%s11088_s1 + $0xf8c] ss:$16 sps:$4 sm:$0xff]   ;;  %v8020_v9 = vld [vmem:[%s11088_s1 + $0xf80] ss:$16 sps:$4 sm:$0xff]  }
 0x1b7   :  { %5124 = vmatpush1.bf16.msra.mxu0 %v7928_v10  ;;  %5657 = vmatpush1.bf16.msra.mxu1 %v7931_v12  ;;  %v8023_v10 = vld [vmem:[%s11088_s1 + $0xf88] ss:$16 sps:$4 sm:$0xff]   ;;  %v8028_v12 = vld [vmem:[%s11088_s1 + $0xfa4] ss:$16 sps:$4 sm:$0xff]  }
 0x1b8   :  { %5125 = vmatprep.subr.bf16.mxu0 %v7936_v13  ;;  %5658 = vmatprep.subr.bf16.mxu1 %v7939_v15  ;;  %v8031_v13 = vld [vmem:[%s11088_s1 + $0xfac] ss:$16 sps:$4 sm:$0xff]   ;;  %v8026_v15 = vld [vmem:[%s11088_s1 + $0xfa0] ss:$16 sps:$4 sm:$0xff]  }
 0x1bb   :  { %5126 = vmatpush1.bf16.msra.mxu0 %v7934_v11  ;;  %5659 = vmatpush1.bf16.msra.mxu1 %v7937_v17  ;;  %v8029_v11 = vld [vmem:[%s11088_s1 + $0xfa8] ss:$16 sps:$4 sm:$0xff]   ;;  %v8034_v17 = vld [vmem:[%s11088_s1 + $0xfc4] ss:$16 sps:$4 sm:$0xff]  }
 0x1bc   :  { %5127 = vmatprep.subr.bf16.mxu0 %v7942_v14  ;;  %5660 = vmatprep.subr.bf16.mxu1 %v7945_v19  ;;  %v8037_v14 = vld [vmem:[%s11088_s1 + $0xfcc] ss:$16 sps:$4 sm:$0xff]   ;;  %v8032_v19 = vld [vmem:[%s11088_s1 + $0xfc0] ss:$16 sps:$4 sm:$0xff]  }
 0x1bf   :  { %5128 = vmatpush1.bf16.msra.mxu0 %v7940_v20  ;;  %5661 = vmatpush1.bf16.msra.mxu1 %v7943_v16  ;;  %v8035_v20 = vld [vmem:[%s11088_s1 + $0xfc8] ss:$16 sps:$4 sm:$0xff]   ;;  %v8040_v16 = vld [vmem:[%s11088_s1 + $0xfe4] ss:$16 sps:$4 sm:$0xff]  }
 0x1c0   :  { %5138 = vmatprep.subr.bf16.mxu0 %v7950_v22  ;;  %5671 = vmatprep.subr.bf16.mxu1 %v7953_v23  ;;  %v8043_v22 = vld [vmem:[%s11088_s1 + $0xfec] ss:$16 sps:$4 sm:$0xff]   ;;  %v8038_v23 = vld [vmem:[%s11088_s1 + $0xfe0] ss:$16 sps:$4 sm:$0xff]  }
 0x1c2   :  { %5130 = vmatmul.mubr.bf16.vlgmr.msra.gmra.mrb[0].mxu0 %v6285_v18  ;;  %5663 = vmatmul.mubr.bf16.vlgmr.msra.gmra.mrb[0].mxu1 %v6285_v18  ;;  %v8041_v18 = vld [vmem:[%s11088_s1 + $0xfe8] ss:$16 sps:$4 sm:$0xff]  }
 0x1c3   :  { %5139 = vmatpush1.bf16.msra.mxu0 %v7948_v25  ;;  %5672 = vmatpush1.bf16.msra.mxu1 %v7951_v26  ;;  %v8048_v25 = vld [vmem:[%s11088_s1 + $0x1004] ss:$16 sps:$4 sm:$0xff]   ;;  %v8051_v26 = vld [vmem:[%s11088_s1 + $0x100c] ss:$16 sps:$4 sm:$0xff]  }
 0x1c4   :  { %5140 = vmatprep.subr.bf16.mxu0 %v7956_v27  ;;  %5673 = vmatprep.subr.bf16.mxu1 %v7959_v21  ;;  %v6287_v27 = vcombine.low %v9934_v24, %v9934_v24  ;;  %v10137_v21 = vld [vmem:[%s11089_s0 + $0x40] sm:$0xff] }
 0x1c5   :  { %5170 = vmatprep.mubr.bf16.mxu0 %v6288_v28  ;;  %5703 = vmatprep.mubr.bf16.mxu1 %v6288_v28  ;;  %v8046_v28 = vld [vmem:[%s11088_s1 + $0x1000] ss:$16 sps:$4 sm:$0xff]   ;;  %v8054_v24 = vld [vmem:[%s11088_s1 + $0x1024] ss:$16 sps:$4 sm:$0xff]  }
 0x1c7   :  { %5141 = vmatpush1.bf16.msra.mxu0 %v7954_v29  ;;  %5674 = vmatpush1.bf16.msra.mxu1 %v7957_v30  ;;  %v8049_v29 = vld [vmem:[%s11088_s1 + $0x1008] ss:$16 sps:$4 sm:$0xff]   ;;  %v8057_v30 = vld [vmem:[%s11088_s1 + $0x102c] ss:$16 sps:$4 sm:$0xff]  }
 0x1c8   :  { %5142 = vmatprep.subr.bf16.mxu0 %v7962_v31  ;;  %5675 = vmatprep.subr.bf16.mxu1 %v7965_v32  ;;  %v6290_v31 = vcombine.high %v10137_v21, %v10137_v21  ;;  %v8052_v32 = vld [vmem:[%s11088_s1 + $0x1020] ss:$16 sps:$4 sm:$0xff]  }
 0x1cb   :  { %5143 = vmatpush1.bf16.msra.mxu0 %v7960_v33  ;;  %5676 = vmatpush1.bf16.msra.mxu1 %v7963_v34  ;;  %v8055_v33 = vld [vmem:[%s11088_s1 + $0x1028] ss:$16 sps:$4 sm:$0xff]   ;;  %v8060_v34 = vld [vmem:[%s11088_s1 + $0x1044] ss:$16 sps:$4 sm:$0xff]  }
 0x1cc   :  { %5144 = vmatprep.subr.bf16.mxu0 %v7968_v35  ;;  %5677 = vmatprep.subr.bf16.mxu1 %v7971_v36  ;;  %v8063_v35 = vld [vmem:[%s11088_s1 + $0x104c] ss:$16 sps:$4 sm:$0xff]   ;;  %v8058_v36 = vld [vmem:[%s11088_s1 + $0x1040] ss:$16 sps:$4 sm:$0xff]  }
 0x1cf   :  { %5145 = vmatpush1.bf16.msra.mxu0 %v7966_v37  ;;  %5678 = vmatpush1.bf16.msra.mxu1 %v7969_v38  ;;  %v8061_v37 = vld [vmem:[%s11088_s1 + $0x1048] ss:$16 sps:$4 sm:$0xff]   ;;  %v8066_v38 = vld [vmem:[%s11088_s1 + $0x1064] ss:$16 sps:$4 sm:$0xff]  }
 0x1d0   :  { %5146 = vmatprep.subr.bf16.mxu0 %v7974_v39  ;;  %5679 = vmatprep.subr.bf16.mxu1 %v7977_v40  ;;  %v8069_v39 = vld [vmem:[%s11088_s1 + $0x106c] ss:$16 sps:$4 sm:$0xff]   ;;  %v8064_v40 = vld [vmem:[%s11088_s1 + $0x1060] ss:$16 sps:$4 sm:$0xff]  }
 0x1d3   :  { %5147 = vmatpush1.bf16.msra.mxu0 %v7972_v41  ;;  %5680 = vmatpush1.bf16.msra.mxu1 %v7975_v42  ;;  %v8067_v41 = vld [vmem:[%s11088_s1 + $0x1068] ss:$16 sps:$4 sm:$0xff]   ;;  %v8072_v42 = vld [vmem:[%s11088_s1 + $0x1084] ss:$16 sps:$4 sm:$0xff]  }
 0x1d4   :  { %5148 = vmatprep.subr.bf16.mxu0 %v7980_v43  ;;  %5681 = vmatprep.subr.bf16.mxu1 %v7983_v44  ;;  %v8075_v43 = vld [vmem:[%s11088_s1 + $0x108c] ss:$16 sps:$4 sm:$0xff]   ;;  %v8070_v44 = vld [vmem:[%s11088_s1 + $0x1080] ss:$16 sps:$4 sm:$0xff]  }
 0x1d7   :  { %5149 = vmatpush1.bf16.msra.mxu0 %v7978_v45  ;;  %5682 = vmatpush1.bf16.msra.mxu1 %v7981_v46  ;;  %v8073_v45 = vld [vmem:[%s11088_s1 + $0x1088] ss:$16 sps:$4 sm:$0xff]   ;;  %v8078_v46 = vld [vmem:[%s11088_s1 + $0x10a4] ss:$16 sps:$4 sm:$0xff]  }
 0x1d8   :  { %5150 = vmatprep.subr.bf16.mxu0 %v7986_v47  ;;  %5683 = vmatprep.subr.bf16.mxu1 %v7989_v48  ;;  %v8081_v47 = vld [vmem:[%s11088_s1 + $0x10ac] ss:$16 sps:$4 sm:$0xff]   ;;  %v8076_v48 = vld [vmem:[%s11088_s1 + $0x10a0] ss:$16 sps:$4 sm:$0xff]  }
 0x1db   :  { %5151 = vmatpush1.bf16.msra.mxu0 %v7984_v49  ;;  %5684 = vmatpush1.bf16.msra.mxu1 %v7987_v50  ;;  %v8079_v49 = vld [vmem:[%s11088_s1 + $0x10a8] ss:$16 sps:$4 sm:$0xff]   ;;  %v8084_v50 = vld [vmem:[%s11088_s1 + $0x10c4] ss:$16 sps:$4 sm:$0xff]  }
 0x1dc   :  { %5152 = vmatprep.subr.bf16.mxu0 %v7992_v51  ;;  %5685 = vmatprep.subr.bf16.mxu1 %v7995_v52  ;;  %v8087_v51 = vld [vmem:[%s11088_s1 + $0x10cc] ss:$16 sps:$4 sm:$0xff]   ;;  %v8082_v52 = vld [vmem:[%s11088_s1 + $0x10c0] ss:$16 sps:$4 sm:$0xff]  }
 0x1df   :  { %5153 = vmatpush1.bf16.msra.mxu0 %v7990_v53  ;;  %5686 = vmatpush1.bf16.msra.mxu1 %v7993_v54  ;;  %v8085_v53 = vld [vmem:[%s11088_s1 + $0x10c8] ss:$16 sps:$4 sm:$0xff]   ;;  %v8090_v54 = vld [vmem:[%s11088_s1 + $0x10e4] ss:$16 sps:$4 sm:$0xff]  }
 0x1e0   :  { %5154 = vmatprep.subr.bf16.mxu0 %v7998_v55  ;;  %5687 = vmatprep.subr.bf16.mxu1 %v8001_v56  ;;  %v8093_v55 = vld [vmem:[%s11088_s1 + $0x10ec] ss:$16 sps:$4 sm:$0xff]   ;;  %v8088_v56 = vld [vmem:[%s11088_s1 + $0x10e0] ss:$16 sps:$4 sm:$0xff]  }
 0x1e3   :  { %5155 = vmatpush1.bf16.msra.mxu0 %v7996_v57  ;;  %5688 = vmatpush1.bf16.msra.mxu1 %v7999_v58  ;;  %v8091_v57 = vld [vmem:[%s11088_s1 + $0x10e8] ss:$16 sps:$4 sm:$0xff]   ;;  %v8096_v58 = vld [vmem:[%s11088_s1 + $0x1104] ss:$16 sps:$4 sm:$0xff]  }
 0x1e4   :  { %5156 = vmatprep.subr.bf16.mxu0 %v8004_v59  ;;  %5689 = vmatprep.subr.bf16.mxu1 %v8007_v60  ;;  %v8099_v59 = vld [vmem:[%s11088_s1 + $0x110c] ss:$16 sps:$4 sm:$0xff]   ;;  %v8094_v60 = vld [vmem:[%s11088_s1 + $0x1100] ss:$16 sps:$4 sm:$0xff]  }
 0x1e7   :  { %5157 = vmatpush1.bf16.msra.mxu0 %v8002_v61  ;;  %5690 = vmatpush1.bf16.msra.mxu1 %v8005_v62  ;;  %v8097_v61 = vld [vmem:[%s11088_s1 + $0x1108] ss:$16 sps:$4 sm:$0xff]   ;;  %v8102_v62 = vld [vmem:[%s11088_s1 + $0x1124] ss:$16 sps:$4 sm:$0xff]  }
 0x1e8   :  { %5158 = vmatprep.subr.bf16.mxu0 %v8010_v63  ;;  %5691 = vmatprep.subr.bf16.mxu1 %v8013_v0  ;;  %v8105_v63 = vld [vmem:[%s11088_s1 + $0x112c] ss:$16 sps:$4 sm:$0xff]   ;;  %v8100_v0 = vld [vmem:[%s11088_s1 + $0x1120] ss:$16 sps:$4 sm:$0xff]  }
 0x1eb   :  { %5159 = vmatpush1.bf16.msra.mxu0 %v8008_v1  ;;  %5692 = vmatpush1.bf16.msra.mxu1 %v8011_v2  ;;  %v8103_v1 = vld [vmem:[%s11088_s1 + $0x1128] ss:$16 sps:$4 sm:$0xff]   ;;  %v8108_v2 = vld [vmem:[%s11088_s1 + $0x1144] ss:$16 sps:$4 sm:$0xff]  }
 0x1ec   :  { %5160 = vmatprep.subr.bf16.mxu0 %v8016_v3  ;;  %5693 = vmatprep.subr.bf16.mxu1 %v8019_v4  ;;  %v8111_v3 = vld [vmem:[%s11088_s1 + $0x114c] ss:$16 sps:$4 sm:$0xff]   ;;  %v8106_v4 = vld [vmem:[%s11088_s1 + $0x1140] ss:$16 sps:$4 sm:$0xff]  }
 0x1ef   :  { %5161 = vmatpush1.bf16.msra.mxu0 %v8014_v5  ;;  %5694 = vmatpush1.bf16.msra.mxu1 %v8017_v6  ;;  %v8109_v5 = vld [vmem:[%s11088_s1 + $0x1148] ss:$16 sps:$4 sm:$0xff]   ;;  %v8114_v6 = vld [vmem:[%s11088_s1 + $0x1164] ss:$16 sps:$4 sm:$0xff]  }
 0x1f0   :  { %5162 = vmatprep.subr.bf16.mxu0 %v8022_v7  ;;  %5695 = vmatprep.subr.bf16.mxu1 %v8025_v8  ;;  %v8117_v7 = vld [vmem:[%s11088_s1 + $0x116c] ss:$16 sps:$4 sm:$0xff]   ;;  %v8112_v8 = vld [vmem:[%s11088_s1 + $0x1160] ss:$16 sps:$4 sm:$0xff]  }
 0x1f3   :  { %5163 = vmatpush1.bf16.msra.mxu0 %v8020_v9  ;;  %5696 = vmatpush1.bf16.msra.mxu1 %v8023_v10  ;;  %v8115_v9 = vld [vmem:[%s11088_s1 + $0x1168] ss:$16 sps:$4 sm:$0xff]   ;;  %v8120_v10 = vld [vmem:[%s11088_s1 + $0x1184] ss:$16 sps:$4 sm:$0xff]  }
 0x1f4   :  { %5164 = vmatprep.subr.bf16.mxu0 %v8028_v12  ;;  %5697 = vmatprep.subr.bf16.mxu1 %v8031_v13  ;;  %v8123_v12 = vld [vmem:[%s11088_s1 + $0x118c] ss:$16 sps:$4 sm:$0xff]   ;;  %v8118_v13 = vld [vmem:[%s11088_s1 + $0x1180] ss:$16 sps:$4 sm:$0xff]  }
 0x1f7   :  { %5165 = vmatpush1.bf16.msra.mxu0 %v8026_v15  ;;  %5698 = vmatpush1.bf16.msra.mxu1 %v8029_v11  ;;  %v8121_v15 = vld [vmem:[%s11088_s1 + $0x1188] ss:$16 sps:$4 sm:$0xff]   ;;  %v8126_v11 = vld [vmem:[%s11088_s1 + $0x11a4] ss:$16 sps:$4 sm:$0xff]  }
 0x1f8   :  { %5166 = vmatprep.subr.bf16.mxu0 %v8034_v17  ;;  %5699 = vmatprep.subr.bf16.mxu1 %v8037_v14  ;;  %v8129_v17 = vld [vmem:[%s11088_s1 + $0x11ac] ss:$16 sps:$4 sm:$0xff]   ;;  %v8124_v14 = vld [vmem:[%s11088_s1 + $0x11a0] ss:$16 sps:$4 sm:$0xff]  }
 0x1fb   :  { %5167 = vmatpush1.bf16.msra.mxu0 %v8032_v19  ;;  %5700 = vmatpush1.bf16.msra.mxu1 %v8035_v20  ;;  %v8127_v19 = vld [vmem:[%s11088_s1 + $0x11a8] ss:$16 sps:$4 sm:$0xff]   ;;  %v8132_v20 = vld [vmem:[%s11088_s1 + $0x11c4] ss:$16 sps:$4 sm:$0xff]  }
 0x1fc   :  { %5168 = vmatprep.subr.bf16.mxu0 %v8040_v16  ;;  %5701 = vmatprep.subr.bf16.mxu1 %v8043_v22  ;;  %v8135_v16 = vld [vmem:[%s11088_s1 + $0x11cc] ss:$16 sps:$4 sm:$0xff]   ;;  %v8130_v22 = vld [vmem:[%s11088_s1 + $0x11c0] ss:$16 sps:$4 sm:$0xff]  }
 0x1ff   :  { %5169 = vmatpush1.bf16.msra.mxu0 %v8038_v23  ;;  %5702 = vmatpush1.bf16.msra.mxu1 %v8041_v18  ;;  %v8133_v23 = vld [vmem:[%s11088_s1 + $0x11c8] ss:$16 sps:$4 sm:$0xff]   ;;  %v8138_v18 = vld [vmem:[%s11088_s1 + $0x11e4] ss:$16 sps:$4 sm:$0xff]  }
 0x200   :  { %5179 = vmatprep.subr.bf16.mxu0 %v8048_v25  ;;  %5712 = vmatprep.subr.bf16.mxu1 %v8051_v26  ;;  %v8141_v25 = vld [vmem:[%s11088_s1 + $0x11ec] ss:$16 sps:$4 sm:$0xff]   ;;  %v8136_v26 = vld [vmem:[%s11088_s1 + $0x11e0] ss:$16 sps:$4 sm:$0xff]  }
 0x202   :  { %5171 = vmatmul.mubr.bf16.vlgmr.msra.gmra.mrb[0].mxu0 %v6287_v27  ;;  %5704 = vmatmul.mubr.bf16.vlgmr.msra.gmra.mrb[0].mxu1 %v6287_v27  ;;  %v8139_v27 = vld [vmem:[%s11088_s1 + $0x11e8] ss:$16 sps:$4 sm:$0xff]  }
 0x203   :  { %5180 = vmatpush1.bf16.msra.mxu0 %v8046_v28  ;;  %5713 = vmatpush1.bf16.msra.mxu1 %v8049_v29  ;;  %v8146_v28 = vld [vmem:[%s11088_s1 + $0x1204] ss:$16 sps:$4 sm:$0xff]   ;;  %v8149_v29 = vld [vmem:[%s11088_s1 + $0x120c] ss:$16 sps:$4 sm:$0xff]  }
 0x204   :  { %5181 = vmatprep.subr.bf16.mxu0 %v8054_v24  ;;  %5714 = vmatprep.subr.bf16.mxu1 %v8057_v30  ;;  %v6289_v24 = vcombine.low %v10137_v21, %v10137_v21  ;;  %v10338_v30 = vld [vmem:[%s11089_s0 + $0x48] sm:$0xff]  ;;  %v8152_v21 = vld [vmem:[%s11088_s1 + $0x1224] ss:$16 sps:$4 sm:$0xff]  }
 0x205   :  { %5211 = vmatprep.mubr.bf16.mxu0 %v6290_v31  ;;  %5744 = vmatprep.mubr.bf16.mxu1 %v6290_v31  ;;  %v8144_v31 = vld [vmem:[%s11088_s1 + $0x1200] ss:$16 sps:$4 sm:$0xff]  }
 0x207   :  { %5182 = vmatpush1.bf16.msra.mxu0 %v8052_v32  ;;  %5715 = vmatpush1.bf16.msra.mxu1 %v8055_v33  ;;  %v8147_v32 = vld [vmem:[%s11088_s1 + $0x1208] ss:$16 sps:$4 sm:$0xff]   ;;  %v8155_v33 = vld [vmem:[%s11088_s1 + $0x122c] ss:$16 sps:$4 sm:$0xff]  }
 0x208   :  { %5183 = vmatprep.subr.bf16.mxu0 %v8060_v34  ;;  %5716 = vmatprep.subr.bf16.mxu1 %v8063_v35  ;;  %v6292_v34 = vcombine.high %v10338_v30, %v10338_v30  ;;  %v8150_v35 = vld [vmem:[%s11088_s1 + $0x1220] ss:$16 sps:$4 sm:$0xff]  }
 0x20b   :  { %5184 = vmatpush1.bf16.msra.mxu0 %v8058_v36  ;;  %5717 = vmatpush1.bf16.msra.mxu1 %v8061_v37  ;;  %v8153_v36 = vld [vmem:[%s11088_s1 + $0x1228] ss:$16 sps:$4 sm:$0xff]   ;;  %v8158_v37 = vld [vmem:[%s11088_s1 + $0x1244] ss:$16 sps:$4 sm:$0xff]  }
 0x20c   :  { %5185 = vmatprep.subr.bf16.mxu0 %v8066_v38  ;;  %5718 = vmatprep.subr.bf16.mxu1 %v8069_v39  ;;  %v8161_v38 = vld [vmem:[%s11088_s1 + $0x124c] ss:$16 sps:$4 sm:$0xff]   ;;  %v8156_v39 = vld [vmem:[%s11088_s1 + $0x1240] ss:$16 sps:$4 sm:$0xff]  }
 0x20f   :  { %5186 = vmatpush1.bf16.msra.mxu0 %v8064_v40  ;;  %5719 = vmatpush1.bf16.msra.mxu1 %v8067_v41  ;;  %v8159_v40 = vld [vmem:[%s11088_s1 + $0x1248] ss:$16 sps:$4 sm:$0xff]   ;;  %v8164_v41 = vld [vmem:[%s11088_s1 + $0x1264] ss:$16 sps:$4 sm:$0xff]  }
 0x210   :  { %5187 = vmatprep.subr.bf16.mxu0 %v8072_v42  ;;  %5720 = vmatprep.subr.bf16.mxu1 %v8075_v43  ;;  %v8167_v42 = vld [vmem:[%s11088_s1 + $0x126c] ss:$16 sps:$4 sm:$0xff]   ;;  %v8162_v43 = vld [vmem:[%s11088_s1 + $0x1260] ss:$16 sps:$4 sm:$0xff]  }
 0x213   :  { %5188 = vmatpush1.bf16.msra.mxu0 %v8070_v44  ;;  %5721 = vmatpush1.bf16.msra.mxu1 %v8073_v45  ;;  %v8165_v44 = vld [vmem:[%s11088_s1 + $0x1268] ss:$16 sps:$4 sm:$0xff]   ;;  %v8170_v45 = vld [vmem:[%s11088_s1 + $0x1284] ss:$16 sps:$4 sm:$0xff]  }
 0x214   :  { %5189 = vmatprep.subr.bf16.mxu0 %v8078_v46  ;;  %5722 = vmatprep.subr.bf16.mxu1 %v8081_v47  ;;  %v8173_v46 = vld [vmem:[%s11088_s1 + $0x128c] ss:$16 sps:$4 sm:$0xff]   ;;  %v8168_v47 = vld [vmem:[%s11088_s1 + $0x1280] ss:$16 sps:$4 sm:$0xff]  }
 0x217   :  { %5190 = vmatpush1.bf16.msra.mxu0 %v8076_v48  ;;  %5723 = vmatpush1.bf16.msra.mxu1 %v8079_v49  ;;  %v8171_v48 = vld [vmem:[%s11088_s1 + $0x1288] ss:$16 sps:$4 sm:$0xff]   ;;  %v8176_v49 = vld [vmem:[%s11088_s1 + $0x12a4] ss:$16 sps:$4 sm:$0xff]  }
 0x218   :  { %5191 = vmatprep.subr.bf16.mxu0 %v8084_v50  ;;  %5724 = vmatprep.subr.bf16.mxu1 %v8087_v51  ;;  %v8179_v50 = vld [vmem:[%s11088_s1 + $0x12ac] ss:$16 sps:$4 sm:$0xff]   ;;  %v8174_v51 = vld [vmem:[%s11088_s1 + $0x12a0] ss:$16 sps:$4 sm:$0xff]  }
 0x21b   :  { %5192 = vmatpush1.bf16.msra.mxu0 %v8082_v52  ;;  %5725 = vmatpush1.bf16.msra.mxu1 %v8085_v53  ;;  %v8177_v52 = vld [vmem:[%s11088_s1 + $0x12a8] ss:$16 sps:$4 sm:$0xff]   ;;  %v8182_v53 = vld [vmem:[%s11088_s1 + $0x12c4] ss:$16 sps:$4 sm:$0xff]  }
 0x21c   :  { %5193 = vmatprep.subr.bf16.mxu0 %v8090_v54  ;;  %5726 = vmatprep.subr.bf16.mxu1 %v8093_v55  ;;  %v8185_v54 = vld [vmem:[%s11088_s1 + $0x12cc] ss:$16 sps:$4 sm:$0xff]   ;;  %v8180_v55 = vld [vmem:[%s11088_s1 + $0x12c0] ss:$16 sps:$4 sm:$0xff]  }
 0x21f   :  { %5194 = vmatpush1.bf16.msra.mxu0 %v8088_v56  ;;  %5727 = vmatpush1.bf16.msra.mxu1 %v8091_v57  ;;  %v8183_v56 = vld [vmem:[%s11088_s1 + $0x12c8] ss:$16 sps:$4 sm:$0xff]   ;;  %v8188_v57 = vld [vmem:[%s11088_s1 + $0x12e4] ss:$16 sps:$4 sm:$0xff]  }
 0x220   :  { %5195 = vmatprep.subr.bf16.mxu0 %v8096_v58  ;;  %5728 = vmatprep.subr.bf16.mxu1 %v8099_v59  ;;  %v8191_v58 = vld [vmem:[%s11088_s1 + $0x12ec] ss:$16 sps:$4 sm:$0xff]   ;;  %v8186_v59 = vld [vmem:[%s11088_s1 + $0x12e0] ss:$16 sps:$4 sm:$0xff]  }
 0x223   :  { %5196 = vmatpush1.bf16.msra.mxu0 %v8094_v60  ;;  %5729 = vmatpush1.bf16.msra.mxu1 %v8097_v61  ;;  %v8189_v60 = vld [vmem:[%s11088_s1 + $0x12e8] ss:$16 sps:$4 sm:$0xff]   ;;  %v8194_v61 = vld [vmem:[%s11088_s1 + $0x1304] ss:$16 sps:$4 sm:$0xff]  }
 0x224   :  { %5197 = vmatprep.subr.bf16.mxu0 %v8102_v62  ;;  %5730 = vmatprep.subr.bf16.mxu1 %v8105_v63  ;;  %v8197_v62 = vld [vmem:[%s11088_s1 + $0x130c] ss:$16 sps:$4 sm:$0xff]   ;;  %v8192_v63 = vld [vmem:[%s11088_s1 + $0x1300] ss:$16 sps:$4 sm:$0xff]  }
 0x227   :  { %5198 = vmatpush1.bf16.msra.mxu0 %v8100_v0  ;;  %5731 = vmatpush1.bf16.msra.mxu1 %v8103_v1  ;;  %v8195_v0 = vld [vmem:[%s11088_s1 + $0x1308] ss:$16 sps:$4 sm:$0xff]   ;;  %v8200_v1 = vld [vmem:[%s11088_s1 + $0x1324] ss:$16 sps:$4 sm:$0xff]  }
 0x228   :  { %5199 = vmatprep.subr.bf16.mxu0 %v8108_v2  ;;  %5732 = vmatprep.subr.bf16.mxu1 %v8111_v3  ;;  %v8203_v2 = vld [vmem:[%s11088_s1 + $0x132c] ss:$16 sps:$4 sm:$0xff]   ;;  %v8198_v3 = vld [vmem:[%s11088_s1 + $0x1320] ss:$16 sps:$4 sm:$0xff]  }
 0x22b   :  { %5200 = vmatpush1.bf16.msra.mxu0 %v8106_v4  ;;  %5733 = vmatpush1.bf16.msra.mxu1 %v8109_v5  ;;  %v8201_v4 = vld [vmem:[%s11088_s1 + $0x1328] ss:$16 sps:$4 sm:$0xff]   ;;  %v8206_v5 = vld [vmem:[%s11088_s1 + $0x1344] ss:$16 sps:$4 sm:$0xff]  }
 0x22c   :  { %5201 = vmatprep.subr.bf16.mxu0 %v8114_v6  ;;  %5734 = vmatprep.subr.bf16.mxu1 %v8117_v7  ;;  %v8209_v6 = vld [vmem:[%s11088_s1 + $0x134c] ss:$16 sps:$4 sm:$0xff]   ;;  %v8204_v7 = vld [vmem:[%s11088_s1 + $0x1340] ss:$16 sps:$4 sm:$0xff]  }
 0x22f   :  { %5202 = vmatpush1.bf16.msra.mxu0 %v8112_v8  ;;  %5735 = vmatpush1.bf16.msra.mxu1 %v8115_v9  ;;  %v8207_v8 = vld [vmem:[%s11088_s1 + $0x1348] ss:$16 sps:$4 sm:$0xff]   ;;  %v8212_v9 = vld [vmem:[%s11088_s1 + $0x1364] ss:$16 sps:$4 sm:$0xff]  }
 0x230   :  { %5203 = vmatprep.subr.bf16.mxu0 %v8120_v10  ;;  %5736 = vmatprep.subr.bf16.mxu1 %v8123_v12  ;;  %v8215_v10 = vld [vmem:[%s11088_s1 + $0x136c] ss:$16 sps:$4 sm:$0xff]   ;;  %v8210_v12 = vld [vmem:[%s11088_s1 + $0x1360] ss:$16 sps:$4 sm:$0xff]  }
 0x233   :  { %5204 = vmatpush1.bf16.msra.mxu0 %v8118_v13  ;;  %5737 = vmatpush1.bf16.msra.mxu1 %v8121_v15  ;;  %v8213_v13 = vld [vmem:[%s11088_s1 + $0x1368] ss:$16 sps:$4 sm:$0xff]   ;;  %v8218_v15 = vld [vmem:[%s11088_s1 + $0x1384] ss:$16 sps:$4 sm:$0xff]  }
 0x234   :  { %5205 = vmatprep.subr.bf16.mxu0 %v8126_v11  ;;  %5738 = vmatprep.subr.bf16.mxu1 %v8129_v17  ;;  %v8221_v11 = vld [vmem:[%s11088_s1 + $0x138c] ss:$16 sps:$4 sm:$0xff]   ;;  %v8216_v17 = vld [vmem:[%s11088_s1 + $0x1380] ss:$16 sps:$4 sm:$0xff]  }
 0x237   :  { %5206 = vmatpush1.bf16.msra.mxu0 %v8124_v14  ;;  %5739 = vmatpush1.bf16.msra.mxu1 %v8127_v19  ;;  %v8219_v14 = vld [vmem:[%s11088_s1 + $0x1388] ss:$16 sps:$4 sm:$0xff]   ;;  %v8224_v19 = vld [vmem:[%s11088_s1 + $0x13a4] ss:$16 sps:$4 sm:$0xff]  }
 0x238   :  { %5207 = vmatprep.subr.bf16.mxu0 %v8132_v20  ;;  %5740 = vmatprep.subr.bf16.mxu1 %v8135_v16  ;;  %v8227_v20 = vld [vmem:[%s11088_s1 + $0x13ac] ss:$16 sps:$4 sm:$0xff]   ;;  %v8222_v16 = vld [vmem:[%s11088_s1 + $0x13a0] ss:$16 sps:$4 sm:$0xff]  }
 0x23b   :  { %5208 = vmatpush1.bf16.msra.mxu0 %v8130_v22  ;;  %5741 = vmatpush1.bf16.msra.mxu1 %v8133_v23  ;;  %v8225_v22 = vld [vmem:[%s11088_s1 + $0x13a8] ss:$16 sps:$4 sm:$0xff]   ;;  %v8230_v23 = vld [vmem:[%s11088_s1 + $0x13c4] ss:$16 sps:$4 sm:$0xff]  }
 0x23c   :  { %5209 = vmatprep.subr.bf16.mxu0 %v8138_v18  ;;  %5742 = vmatprep.subr.bf16.mxu1 %v8141_v25  ;;  %v8233_v18 = vld [vmem:[%s11088_s1 + $0x13cc] ss:$16 sps:$4 sm:$0xff]   ;;  %v8228_v25 = vld [vmem:[%s11088_s1 + $0x13c0] ss:$16 sps:$4 sm:$0xff]  }
 0x23f   :  { %5210 = vmatpush1.bf16.msra.mxu0 %v8136_v26  ;;  %5743 = vmatpush1.bf16.msra.mxu1 %v8139_v27  ;;  %v8231_v26 = vld [vmem:[%s11088_s1 + $0x13c8] ss:$16 sps:$4 sm:$0xff]   ;;  %v8236_v27 = vld [vmem:[%s11088_s1 + $0x13e4] ss:$16 sps:$4 sm:$0xff]  }
 0x240   :  { %5220 = vmatprep.subr.bf16.mxu0 %v8146_v28  ;;  %5753 = vmatprep.subr.bf16.mxu1 %v8149_v29  ;;  %v8239_v28 = vld [vmem:[%s11088_s1 + $0x13ec] ss:$16 sps:$4 sm:$0xff]   ;;  %v8234_v29 = vld [vmem:[%s11088_s1 + $0x13e0] ss:$16 sps:$4 sm:$0xff]  }
 0x242   :  { %5212 = vmatmul.mubr.bf16.vlgmr.msra.gmra.mrb[0].mxu0 %v6289_v24  ;;  %5745 = vmatmul.mubr.bf16.vlgmr.msra.gmra.mrb[0].mxu1 %v6289_v24  ;;  %v8237_v24 = vld [vmem:[%s11088_s1 + $0x13e8] ss:$16 sps:$4 sm:$0xff]  }
 0x243   :  { %5221 = vmatpush1.bf16.msra.mxu0 %v8144_v31  ;;  %5754 = vmatpush1.bf16.msra.mxu1 %v8147_v32  ;;  %v8244_v31 = vld [vmem:[%s11088_s1 + $0x1404] ss:$16 sps:$4 sm:$0xff]   ;;  %v8247_v32 = vld [vmem:[%s11088_s1 + $0x140c] ss:$16 sps:$4 sm:$0xff]  }
 0x244   :  { %5222 = vmatprep.subr.bf16.mxu0 %v8152_v21  ;;  %5755 = vmatprep.subr.bf16.mxu1 %v8155_v33  ;;  %v6291_v21 = vcombine.low %v10338_v30, %v10338_v30  ;;  %v10539_v33 = vld [vmem:[%s11089_s0 + $0x50] sm:$0xff] }
 0x245   :  { %5252 = vmatprep.mubr.bf16.mxu0 %v6292_v34  ;;  %5785 = vmatprep.mubr.bf16.mxu1 %v6292_v34  ;;  %v8242_v34 = vld [vmem:[%s11088_s1 + $0x1400] ss:$16 sps:$4 sm:$0xff]   ;;  %v8250_v30 = vld [vmem:[%s11088_s1 + $0x1424] ss:$16 sps:$4 sm:$0xff]  }
 0x247   :  { %5223 = vmatpush1.bf16.msra.mxu0 %v8150_v35  ;;  %5756 = vmatpush1.bf16.msra.mxu1 %v8153_v36  ;;  %v8245_v35 = vld [vmem:[%s11088_s1 + $0x1408] ss:$16 sps:$4 sm:$0xff]   ;;  %v8253_v36 = vld [vmem:[%s11088_s1 + $0x142c] ss:$16 sps:$4 sm:$0xff]  }
 0x248   :  { %5224 = vmatprep.subr.bf16.mxu0 %v8158_v37  ;;  %5757 = vmatprep.subr.bf16.mxu1 %v8161_v38  ;;  %v6294_v37 = vcombine.high %v10539_v33, %v10539_v33  ;;  %v8248_v38 = vld [vmem:[%s11088_s1 + $0x1420] ss:$16 sps:$4 sm:$0xff]  }
 0x24b   :  { %5225 = vmatpush1.bf16.msra.mxu0 %v8156_v39  ;;  %5758 = vmatpush1.bf16.msra.mxu1 %v8159_v40  ;;  %v8251_v39 = vld [vmem:[%s11088_s1 + $0x1428] ss:$16 sps:$4 sm:$0xff]   ;;  %v8256_v40 = vld [vmem:[%s11088_s1 + $0x1444] ss:$16 sps:$4 sm:$0xff]  }
 0x24c   :  { %5226 = vmatprep.subr.bf16.mxu0 %v8164_v41  ;;  %5759 = vmatprep.subr.bf16.mxu1 %v8167_v42  ;;  %v8259_v41 = vld [vmem:[%s11088_s1 + $0x144c] ss:$16 sps:$4 sm:$0xff]   ;;  %v8254_v42 = vld [vmem:[%s11088_s1 + $0x1440] ss:$16 sps:$4 sm:$0xff]  }
 0x24f   :  { %5227 = vmatpush1.bf16.msra.mxu0 %v8162_v43  ;;  %5760 = vmatpush1.bf16.msra.mxu1 %v8165_v44  ;;  %v8257_v43 = vld [vmem:[%s11088_s1 + $0x1448] ss:$16 sps:$4 sm:$0xff]   ;;  %v8262_v44 = vld [vmem:[%s11088_s1 + $0x1464] ss:$16 sps:$4 sm:$0xff]  }
 0x250   :  { %5228 = vmatprep.subr.bf16.mxu0 %v8170_v45  ;;  %5761 = vmatprep.subr.bf16.mxu1 %v8173_v46  ;;  %v8265_v45 = vld [vmem:[%s11088_s1 + $0x146c] ss:$16 sps:$4 sm:$0xff]   ;;  %v8260_v46 = vld [vmem:[%s11088_s1 + $0x1460] ss:$16 sps:$4 sm:$0xff]  }
 0x253   :  { %5229 = vmatpush1.bf16.msra.mxu0 %v8168_v47  ;;  %5762 = vmatpush1.bf16.msra.mxu1 %v8171_v48  ;;  %v8263_v47 = vld [vmem:[%s11088_s1 + $0x1468] ss:$16 sps:$4 sm:$0xff]   ;;  %v8268_v48 = vld [vmem:[%s11088_s1 + $0x1484] ss:$16 sps:$4 sm:$0xff]  }
 0x254   :  { %5230 = vmatprep.subr.bf16.mxu0 %v8176_v49  ;;  %5763 = vmatprep.subr.bf16.mxu1 %v8179_v50  ;;  %v8271_v49 = vld [vmem:[%s11088_s1 + $0x148c] ss:$16 sps:$4 sm:$0xff]   ;;  %v8266_v50 = vld [vmem:[%s11088_s1 + $0x1480] ss:$16 sps:$4 sm:$0xff]  }
 0x257   :  { %5231 = vmatpush1.bf16.msra.mxu0 %v8174_v51  ;;  %5764 = vmatpush1.bf16.msra.mxu1 %v8177_v52  ;;  %v8269_v51 = vld [vmem:[%s11088_s1 + $0x1488] ss:$16 sps:$4 sm:$0xff]   ;;  %v8274_v52 = vld [vmem:[%s11088_s1 + $0x14a4] ss:$16 sps:$4 sm:$0xff]  }
 0x258   :  { %5232 = vmatprep.subr.bf16.mxu0 %v8182_v53  ;;  %5765 = vmatprep.subr.bf16.mxu1 %v8185_v54  ;;  %v8277_v53 = vld [vmem:[%s11088_s1 + $0x14ac] ss:$16 sps:$4 sm:$0xff]   ;;  %v8272_v54 = vld [vmem:[%s11088_s1 + $0x14a0] ss:$16 sps:$4 sm:$0xff]  }
 0x25b   :  { %5233 = vmatpush1.bf16.msra.mxu0 %v8180_v55  ;;  %5766 = vmatpush1.bf16.msra.mxu1 %v8183_v56  ;;  %v8275_v55 = vld [vmem:[%s11088_s1 + $0x14a8] ss:$16 sps:$4 sm:$0xff]   ;;  %v8280_v56 = vld [vmem:[%s11088_s1 + $0x14c4] ss:$16 sps:$4 sm:$0xff]  }
 0x25c   :  { %5234 = vmatprep.subr.bf16.mxu0 %v8188_v57  ;;  %5767 = vmatprep.subr.bf16.mxu1 %v8191_v58  ;;  %v8283_v57 = vld [vmem:[%s11088_s1 + $0x14cc] ss:$16 sps:$4 sm:$0xff]   ;;  %v8278_v58 = vld [vmem:[%s11088_s1 + $0x14c0] ss:$16 sps:$4 sm:$0xff]  }
 0x25f   :  { %5235 = vmatpush1.bf16.msra.mxu0 %v8186_v59  ;;  %5768 = vmatpush1.bf16.msra.mxu1 %v8189_v60  ;;  %v8281_v59 = vld [vmem:[%s11088_s1 + $0x14c8] ss:$16 sps:$4 sm:$0xff]   ;;  %v8286_v60 = vld [vmem:[%s11088_s1 + $0x14e4] ss:$16 sps:$4 sm:$0xff]  }
 0x260   :  { %5236 = vmatprep.subr.bf16.mxu0 %v8194_v61  ;;  %5769 = vmatprep.subr.bf16.mxu1 %v8197_v62  ;;  %v8289_v61 = vld [vmem:[%s11088_s1 + $0x14ec] ss:$16 sps:$4 sm:$0xff]   ;;  %v8284_v62 = vld [vmem:[%s11088_s1 + $0x14e0] ss:$16 sps:$4 sm:$0xff]  }
 0x263   :  { %5237 = vmatpush1.bf16.msra.mxu0 %v8192_v63  ;;  %5770 = vmatpush1.bf16.msra.mxu1 %v8195_v0  ;;  %v8287_v63 = vld [vmem:[%s11088_s1 + $0x14e8] ss:$16 sps:$4 sm:$0xff]   ;;  %v8292_v0 = vld [vmem:[%s11088_s1 + $0x1504] ss:$16 sps:$4 sm:$0xff]  }
 0x264   :  { %5238 = vmatprep.subr.bf16.mxu0 %v8200_v1  ;;  %5771 = vmatprep.subr.bf16.mxu1 %v8203_v2  ;;  %v8295_v1 = vld [vmem:[%s11088_s1 + $0x150c] ss:$16 sps:$4 sm:$0xff]   ;;  %v8290_v2 = vld [vmem:[%s11088_s1 + $0x1500] ss:$16 sps:$4 sm:$0xff]  }
 0x267   :  { %5239 = vmatpush1.bf16.msra.mxu0 %v8198_v3  ;;  %5772 = vmatpush1.bf16.msra.mxu1 %v8201_v4  ;;  %v8293_v3 = vld [vmem:[%s11088_s1 + $0x1508] ss:$16 sps:$4 sm:$0xff]   ;;  %v8298_v4 = vld [vmem:[%s11088_s1 + $0x1524] ss:$16 sps:$4 sm:$0xff]  }
 0x268   :  { %5240 = vmatprep.subr.bf16.mxu0 %v8206_v5  ;;  %5773 = vmatprep.subr.bf16.mxu1 %v8209_v6  ;;  %v8301_v5 = vld [vmem:[%s11088_s1 + $0x152c] ss:$16 sps:$4 sm:$0xff]   ;;  %v8296_v6 = vld [vmem:[%s11088_s1 + $0x1520] ss:$16 sps:$4 sm:$0xff]  }
 0x26b   :  { %5241 = vmatpush1.bf16.msra.mxu0 %v8204_v7  ;;  %5774 = vmatpush1.bf16.msra.mxu1 %v8207_v8  ;;  %v8299_v7 = vld [vmem:[%s11088_s1 + $0x1528] ss:$16 sps:$4 sm:$0xff]   ;;  %v8304_v8 = vld [vmem:[%s11088_s1 + $0x1544] ss:$16 sps:$4 sm:$0xff]  }
 0x26c   :  { %5242 = vmatprep.subr.bf16.mxu0 %v8212_v9  ;;  %5775 = vmatprep.subr.bf16.mxu1 %v8215_v10  ;;  %v8307_v9 = vld [vmem:[%s11088_s1 + $0x154c] ss:$16 sps:$4 sm:$0xff]   ;;  %v8302_v10 = vld [vmem:[%s11088_s1 + $0x1540] ss:$16 sps:$4 sm:$0xff]  }
 0x26f   :  { %5243 = vmatpush1.bf16.msra.mxu0 %v8210_v12  ;;  %5776 = vmatpush1.bf16.msra.mxu1 %v8213_v13  ;;  %v8305_v12 = vld [vmem:[%s11088_s1 + $0x1548] ss:$16 sps:$4 sm:$0xff]   ;;  %v8310_v13 = vld [vmem:[%s11088_s1 + $0x1564] ss:$16 sps:$4 sm:$0xff]  }
 0x270   :  { %5244 = vmatprep.subr.bf16.mxu0 %v8218_v15  ;;  %5777 = vmatprep.subr.bf16.mxu1 %v8221_v11  ;;  %v8313_v15 = vld [vmem:[%s11088_s1 + $0x156c] ss:$16 sps:$4 sm:$0xff]   ;;  %v8308_v11 = vld [vmem:[%s11088_s1 + $0x1560] ss:$16 sps:$4 sm:$0xff]  }
 0x273   :  { %5245 = vmatpush1.bf16.msra.mxu0 %v8216_v17  ;;  %5778 = vmatpush1.bf16.msra.mxu1 %v8219_v14  ;;  %v8311_v17 = vld [vmem:[%s11088_s1 + $0x1568] ss:$16 sps:$4 sm:$0xff]   ;;  %v8316_v14 = vld [vmem:[%s11088_s1 + $0x1584] ss:$16 sps:$4 sm:$0xff]  }
 0x274   :  { %5246 = vmatprep.subr.bf16.mxu0 %v8224_v19  ;;  %5779 = vmatprep.subr.bf16.mxu1 %v8227_v20  ;;  %v8319_v19 = vld [vmem:[%s11088_s1 + $0x158c] ss:$16 sps:$4 sm:$0xff]   ;;  %v8314_v20 = vld [vmem:[%s11088_s1 + $0x1580] ss:$16 sps:$4 sm:$0xff]  }
 0x277   :  { %5247 = vmatpush1.bf16.msra.mxu0 %v8222_v16  ;;  %5780 = vmatpush1.bf16.msra.mxu1 %v8225_v22  ;;  %v8317_v16 = vld [vmem:[%s11088_s1 + $0x1588] ss:$16 sps:$4 sm:$0xff]   ;;  %v8322_v22 = vld [vmem:[%s11088_s1 + $0x15a4] ss:$16 sps:$4 sm:$0xff]  }
 0x278   :  { %5248 = vmatprep.subr.bf16.mxu0 %v8230_v23  ;;  %5781 = vmatprep.subr.bf16.mxu1 %v8233_v18  ;;  %v8325_v23 = vld [vmem:[%s11088_s1 + $0x15ac] ss:$16 sps:$4 sm:$0xff]   ;;  %v8320_v18 = vld [vmem:[%s11088_s1 + $0x15a0] ss:$16 sps:$4 sm:$0xff]  }
 0x27b   :  { %5249 = vmatpush1.bf16.msra.mxu0 %v8228_v25  ;;  %5782 = vmatpush1.bf16.msra.mxu1 %v8231_v26  ;;  %v8323_v25 = vld [vmem:[%s11088_s1 + $0x15a8] ss:$16 sps:$4 sm:$0xff]   ;;  %v8328_v26 = vld [vmem:[%s11088_s1 + $0x15c4] ss:$16 sps:$4 sm:$0xff]  }
 0x27c   :  { %5250 = vmatprep.subr.bf16.mxu0 %v8236_v27  ;;  %5783 = vmatprep.subr.bf16.mxu1 %v8239_v28  ;;  %v8331_v27 = vld [vmem:[%s11088_s1 + $0x15cc] ss:$16 sps:$4 sm:$0xff]   ;;  %v8326_v28 = vld [vmem:[%s11088_s1 + $0x15c0] ss:$16 sps:$4 sm:$0xff]  }
 0x27f   :  { %5251 = vmatpush1.bf16.msra.mxu0 %v8234_v29  ;;  %5784 = vmatpush1.bf16.msra.mxu1 %v8237_v24  ;;  %v8329_v29 = vld [vmem:[%s11088_s1 + $0x15c8] ss:$16 sps:$4 sm:$0xff]   ;;  %v8334_v24 = vld [vmem:[%s11088_s1 + $0x15e4] ss:$16 sps:$4 sm:$0xff]  }
 0x280   :  { %5261 = vmatprep.subr.bf16.mxu0 %v8244_v31  ;;  %5794 = vmatprep.subr.bf16.mxu1 %v8247_v32  ;;  %v8337_v31 = vld [vmem:[%s11088_s1 + $0x15ec] ss:$16 sps:$4 sm:$0xff]   ;;  %v8332_v32 = vld [vmem:[%s11088_s1 + $0x15e0] ss:$16 sps:$4 sm:$0xff]  }
 0x282   :  { %5253 = vmatmul.mubr.bf16.vlgmr.msra.gmra.mrb[0].mxu0 %v6291_v21  ;;  %5786 = vmatmul.mubr.bf16.vlgmr.msra.gmra.mrb[0].mxu1 %v6291_v21  ;;  %v8335_v21 = vld [vmem:[%s11088_s1 + $0x15e8] ss:$16 sps:$4 sm:$0xff]  }
 0x283   :  { %5262 = vmatpush1.bf16.msra.mxu0 %v8242_v34  ;;  %5795 = vmatpush1.bf16.msra.mxu1 %v8245_v35  ;;  %v8342_v34 = vld [vmem:[%s11088_s1 + $0x1604] ss:$16 sps:$4 sm:$0xff]   ;;  %v8345_v35 = vld [vmem:[%s11088_s1 + $0x160c] ss:$16 sps:$4 sm:$0xff]  }
 0x284   :  { %5263 = vmatprep.subr.bf16.mxu0 %v8250_v30  ;;  %5796 = vmatprep.subr.bf16.mxu1 %v8253_v36  ;;  %v6293_v30 = vcombine.low %v10539_v33, %v10539_v33  ;;  %v10740_v36 = vld [vmem:[%s11089_s0 + $0x58] sm:$0xff]  ;;  %v8348_v33 = vld [vmem:[%s11088_s1 + $0x1624] ss:$16 sps:$4 sm:$0xff]  }
 0x285   :  { %5293 = vmatprep.mubr.bf16.mxu0 %v6294_v37  ;;  %5826 = vmatprep.mubr.bf16.mxu1 %v6294_v37  ;;  %v8340_v37 = vld [vmem:[%s11088_s1 + $0x1600] ss:$16 sps:$4 sm:$0xff]  }
 0x287   :  { %5264 = vmatpush1.bf16.msra.mxu0 %v8248_v38  ;;  %5797 = vmatpush1.bf16.msra.mxu1 %v8251_v39  ;;  %v8343_v38 = vld [vmem:[%s11088_s1 + $0x1608] ss:$16 sps:$4 sm:$0xff]   ;;  %v8351_v39 = vld [vmem:[%s11088_s1 + $0x162c] ss:$16 sps:$4 sm:$0xff]  }
 0x288   :  { %5265 = vmatprep.subr.bf16.mxu0 %v8256_v40  ;;  %5798 = vmatprep.subr.bf16.mxu1 %v8259_v41  ;;  %v6296_v40 = vcombine.high %v10740_v36, %v10740_v36  ;;  %v8346_v41 = vld [vmem:[%s11088_s1 + $0x1620] ss:$16 sps:$4 sm:$0xff]  }
 0x28b   :  { %5266 = vmatpush1.bf16.msra.mxu0 %v8254_v42  ;;  %5799 = vmatpush1.bf16.msra.mxu1 %v8257_v43  ;;  %v8349_v42 = vld [vmem:[%s11088_s1 + $0x1628] ss:$16 sps:$4 sm:$0xff]   ;;  %v8354_v43 = vld [vmem:[%s11088_s1 + $0x1644] ss:$16 sps:$4 sm:$0xff]  }
 0x28c   :  { %5267 = vmatprep.subr.bf16.mxu0 %v8262_v44  ;;  %5800 = vmatprep.subr.bf16.mxu1 %v8265_v45  ;;  %v8357_v44 = vld [vmem:[%s11088_s1 + $0x164c] ss:$16 sps:$4 sm:$0xff]   ;;  %v8352_v45 = vld [vmem:[%s11088_s1 + $0x1640] ss:$16 sps:$4 sm:$0xff]  }
 0x28f   :  { %5268 = vmatpush1.bf16.msra.mxu0 %v8260_v46  ;;  %5801 = vmatpush1.bf16.msra.mxu1 %v8263_v47  ;;  %v8355_v46 = vld [vmem:[%s11088_s1 + $0x1648] ss:$16 sps:$4 sm:$0xff]   ;;  %v8360_v47 = vld [vmem:[%s11088_s1 + $0x1664] ss:$16 sps:$4 sm:$0xff]  }
 0x290   :  { %5269 = vmatprep.subr.bf16.mxu0 %v8268_v48  ;;  %5802 = vmatprep.subr.bf16.mxu1 %v8271_v49  ;;  %v8363_v48 = vld [vmem:[%s11088_s1 + $0x166c] ss:$16 sps:$4 sm:$0xff]   ;;  %v8358_v49 = vld [vmem:[%s11088_s1 + $0x1660] ss:$16 sps:$4 sm:$0xff]  }
 0x293   :  { %5270 = vmatpush1.bf16.msra.mxu0 %v8266_v50  ;;  %5803 = vmatpush1.bf16.msra.mxu1 %v8269_v51  ;;  %v8361_v50 = vld [vmem:[%s11088_s1 + $0x1668] ss:$16 sps:$4 sm:$0xff]   ;;  %v8366_v51 = vld [vmem:[%s11088_s1 + $0x1684] ss:$16 sps:$4 sm:$0xff]  }
 0x294   :  { %5271 = vmatprep.subr.bf16.mxu0 %v8274_v52  ;;  %5804 = vmatprep.subr.bf16.mxu1 %v8277_v53  ;;  %v8369_v52 = vld [vmem:[%s11088_s1 + $0x168c] ss:$16 sps:$4 sm:$0xff]   ;;  %v8364_v53 = vld [vmem:[%s11088_s1 + $0x1680] ss:$16 sps:$4 sm:$0xff]  }
 0x297   :  { %5272 = vmatpush1.bf16.msra.mxu0 %v8272_v54  ;;  %5805 = vmatpush1.bf16.msra.mxu1 %v8275_v55  ;;  %v8367_v54 = vld [vmem:[%s11088_s1 + $0x1688] ss:$16 sps:$4 sm:$0xff]   ;;  %v8372_v55 = vld [vmem:[%s11088_s1 + $0x16a4] ss:$16 sps:$4 sm:$0xff]  }
 0x298   :  { %5273 = vmatprep.subr.bf16.mxu0 %v8280_v56  ;;  %5806 = vmatprep.subr.bf16.mxu1 %v8283_v57  ;;  %v8375_v56 = vld [vmem:[%s11088_s1 + $0x16ac] ss:$16 sps:$4 sm:$0xff]   ;;  %v8370_v57 = vld [vmem:[%s11088_s1 + $0x16a0] ss:$16 sps:$4 sm:$0xff]  }
 0x29b   :  { %5274 = vmatpush1.bf16.msra.mxu0 %v8278_v58  ;;  %5807 = vmatpush1.bf16.msra.mxu1 %v8281_v59  ;;  %v8373_v58 = vld [vmem:[%s11088_s1 + $0x16a8] ss:$16 sps:$4 sm:$0xff]   ;;  %v8378_v59 = vld [vmem:[%s11088_s1 + $0x16c4] ss:$16 sps:$4 sm:$0xff]  }
 0x29c   :  { %5275 = vmatprep.subr.bf16.mxu0 %v8286_v60  ;;  %5808 = vmatprep.subr.bf16.mxu1 %v8289_v61  ;;  %v8381_v60 = vld [vmem:[%s11088_s1 + $0x16cc] ss:$16 sps:$4 sm:$0xff]   ;;  %v8376_v61 = vld [vmem:[%s11088_s1 + $0x16c0] ss:$16 sps:$4 sm:$0xff]  }
 0x29f   :  { %5276 = vmatpush1.bf16.msra.mxu0 %v8284_v62  ;;  %5809 = vmatpush1.bf16.msra.mxu1 %v8287_v63  ;;  %v8379_v62 = vld [vmem:[%s11088_s1 + $0x16c8] ss:$16 sps:$4 sm:$0xff]   ;;  %v8384_v63 = vld [vmem:[%s11088_s1 + $0x16e4] ss:$16 sps:$4 sm:$0xff]  }
 0x2a0   :  { %5277 = vmatprep.subr.bf16.mxu0 %v8292_v0  ;;  %5810 = vmatprep.subr.bf16.mxu1 %v8295_v1  ;;  %v8387_v0 = vld [vmem:[%s11088_s1 + $0x16ec] ss:$16 sps:$4 sm:$0xff]   ;;  %v8382_v1 = vld [vmem:[%s11088_s1 + $0x16e0] ss:$16 sps:$4 sm:$0xff]  }
 0x2a3   :  { %5278 = vmatpush1.bf16.msra.mxu0 %v8290_v2  ;;  %5811 = vmatpush1.bf16.msra.mxu1 %v8293_v3  ;;  %v8385_v2 = vld [vmem:[%s11088_s1 + $0x16e8] ss:$16 sps:$4 sm:$0xff]   ;;  %v8390_v3 = vld [vmem:[%s11088_s1 + $0x1704] ss:$16 sps:$4 sm:$0xff]  }
 0x2a4   :  { %5279 = vmatprep.subr.bf16.mxu0 %v8298_v4  ;;  %5812 = vmatprep.subr.bf16.mxu1 %v8301_v5  ;;  %v8393_v4 = vld [vmem:[%s11088_s1 + $0x170c] ss:$16 sps:$4 sm:$0xff]   ;;  %v8388_v5 = vld [vmem:[%s11088_s1 + $0x1700] ss:$16 sps:$4 sm:$0xff]  }
 0x2a7   :  { %5280 = vmatpush1.bf16.msra.mxu0 %v8296_v6  ;;  %5813 = vmatpush1.bf16.msra.mxu1 %v8299_v7  ;;  %v8391_v6 = vld [vmem:[%s11088_s1 + $0x1708] ss:$16 sps:$4 sm:$0xff]   ;;  %v8396_v7 = vld [vmem:[%s11088_s1 + $0x1724] ss:$16 sps:$4 sm:$0xff]  }
 0x2a8   :  { %5281 = vmatprep.subr.bf16.mxu0 %v8304_v8  ;;  %5814 = vmatprep.subr.bf16.mxu1 %v8307_v9  ;;  %v8399_v8 = vld [vmem:[%s11088_s1 + $0x172c] ss:$16 sps:$4 sm:$0xff]   ;;  %v8394_v9 = vld [vmem:[%s11088_s1 + $0x1720] ss:$16 sps:$4 sm:$0xff]  }
 0x2ab   :  { %5282 = vmatpush1.bf16.msra.mxu0 %v8302_v10  ;;  %5815 = vmatpush1.bf16.msra.mxu1 %v8305_v12  ;;  %v8397_v10 = vld [vmem:[%s11088_s1 + $0x1728] ss:$16 sps:$4 sm:$0xff]   ;;  %v8402_v12 = vld [vmem:[%s11088_s1 + $0x1744] ss:$16 sps:$4 sm:$0xff]  }
 0x2ac   :  { %5283 = vmatprep.subr.bf16.mxu0 %v8310_v13  ;;  %5816 = vmatprep.subr.bf16.mxu1 %v8313_v15  ;;  %v8405_v13 = vld [vmem:[%s11088_s1 + $0x174c] ss:$16 sps:$4 sm:$0xff]   ;;  %v8400_v15 = vld [vmem:[%s11088_s1 + $0x1740] ss:$16 sps:$4 sm:$0xff]  }
 0x2af   :  { %5284 = vmatpush1.bf16.msra.mxu0 %v8308_v11  ;;  %5817 = vmatpush1.bf16.msra.mxu1 %v8311_v17  ;;  %v8403_v11 = vld [vmem:[%s11088_s1 + $0x1748] ss:$16 sps:$4 sm:$0xff]   ;;  %v8408_v17 = vld [vmem:[%s11088_s1 + $0x1764] ss:$16 sps:$4 sm:$0xff]  }
 0x2b0   :  { %5285 = vmatprep.subr.bf16.mxu0 %v8316_v14  ;;  %5818 = vmatprep.subr.bf16.mxu1 %v8319_v19  ;;  %v8411_v14 = vld [vmem:[%s11088_s1 + $0x176c] ss:$16 sps:$4 sm:$0xff]   ;;  %v8406_v19 = vld [vmem:[%s11088_s1 + $0x1760] ss:$16 sps:$4 sm:$0xff]  }
 0x2b3   :  { %5286 = vmatpush1.bf16.msra.mxu0 %v8314_v20  ;;  %5819 = vmatpush1.bf16.msra.mxu1 %v8317_v16  ;;  %v8409_v20 = vld [vmem:[%s11088_s1 + $0x1768] ss:$16 sps:$4 sm:$0xff]   ;;  %v8414_v16 = vld [vmem:[%s11088_s1 + $0x1784] ss:$16 sps:$4 sm:$0xff]  }
 0x2b4   :  { %5287 = vmatprep.subr.bf16.mxu0 %v8322_v22  ;;  %5820 = vmatprep.subr.bf16.mxu1 %v8325_v23  ;;  %v8417_v22 = vld [vmem:[%s11088_s1 + $0x178c] ss:$16 sps:$4 sm:$0xff]   ;;  %v8412_v23 = vld [vmem:[%s11088_s1 + $0x1780] ss:$16 sps:$4 sm:$0xff]  }
 0x2b7   :  { %5288 = vmatpush1.bf16.msra.mxu0 %v8320_v18  ;;  %5821 = vmatpush1.bf16.msra.mxu1 %v8323_v25  ;;  %v8415_v18 = vld [vmem:[%s11088_s1 + $0x1788] ss:$16 sps:$4 sm:$0xff]   ;;  %v8420_v25 = vld [vmem:[%s11088_s1 + $0x17a4] ss:$16 sps:$4 sm:$0xff]  }
 0x2b8   :  { %5289 = vmatprep.subr.bf16.mxu0 %v8328_v26  ;;  %5822 = vmatprep.subr.bf16.mxu1 %v8331_v27  ;;  %v8423_v26 = vld [vmem:[%s11088_s1 + $0x17ac] ss:$16 sps:$4 sm:$0xff]   ;;  %v8418_v27 = vld [vmem:[%s11088_s1 + $0x17a0] ss:$16 sps:$4 sm:$0xff]  }
 0x2bb   :  { %5290 = vmatpush1.bf16.msra.mxu0 %v8326_v28  ;;  %5823 = vmatpush1.bf16.msra.mxu1 %v8329_v29  ;;  %v8421_v28 = vld [vmem:[%s11088_s1 + $0x17a8] ss:$16 sps:$4 sm:$0xff]   ;;  %v8426_v29 = vld [vmem:[%s11088_s1 + $0x17c4] ss:$16 sps:$4 sm:$0xff]  }
 0x2bc   :  { %5291 = vmatprep.subr.bf16.mxu0 %v8334_v24  ;;  %5824 = vmatprep.subr.bf16.mxu1 %v8337_v31  ;;  %v8429_v24 = vld [vmem:[%s11088_s1 + $0x17cc] ss:$16 sps:$4 sm:$0xff]   ;;  %v8424_v31 = vld [vmem:[%s11088_s1 + $0x17c0] ss:$16 sps:$4 sm:$0xff]  }
 0x2bf   :  { %5292 = vmatpush1.bf16.msra.mxu0 %v8332_v32  ;;  %5825 = vmatpush1.bf16.msra.mxu1 %v8335_v21  ;;  %v8427_v32 = vld [vmem:[%s11088_s1 + $0x17c8] ss:$16 sps:$4 sm:$0xff]   ;;  %v8432_v21 = vld [vmem:[%s11088_s1 + $0x17e4] ss:$16 sps:$4 sm:$0xff]  }
 0x2c0   :  { %5302 = vmatprep.subr.bf16.mxu0 %v8342_v34  ;;  %5835 = vmatprep.subr.bf16.mxu1 %v8345_v35  ;;  %v8435_v34 = vld [vmem:[%s11088_s1 + $0x17ec] ss:$16 sps:$4 sm:$0xff]   ;;  %v8430_v35 = vld [vmem:[%s11088_s1 + $0x17e0] ss:$16 sps:$4 sm:$0xff]  }
 0x2c2   :  { %5294 = vmatmul.mubr.bf16.vlgmr.msra.gmra.mrb[0].mxu0 %v6293_v30  ;;  %5827 = vmatmul.mubr.bf16.vlgmr.msra.gmra.mrb[0].mxu1 %v6293_v30  ;;  %v8433_v30 = vld [vmem:[%s11088_s1 + $0x17e8] ss:$16 sps:$4 sm:$0xff]  }
 0x2c3   :  { %5303 = vmatpush1.bf16.msra.mxu0 %v8340_v37  ;;  %5836 = vmatpush1.bf16.msra.mxu1 %v8343_v38  ;;  %v8440_v37 = vld [vmem:[%s11088_s1 + $0x1804] ss:$16 sps:$4 sm:$0xff]   ;;  %v8443_v38 = vld [vmem:[%s11088_s1 + $0x180c] ss:$16 sps:$4 sm:$0xff]  }
 0x2c4   :  { %5304 = vmatprep.subr.bf16.mxu0 %v8348_v33  ;;  %5837 = vmatprep.subr.bf16.mxu1 %v8351_v39  ;;  %v6295_v33 = vcombine.low %v10740_v36, %v10740_v36  ;;  %v8438_v39 = vld [vmem:[%s11088_s1 + $0x1800] ss:$16 sps:$4 sm:$0xff]   ;;  %v8449_v36 = vld [vmem:[%s11088_s1 + $0x182c] ss:$16 sps:$4 sm:$0xff]  }
 0x2c5   :  { %5334 = vmatprep.mubr.bf16.mxu0 %v6296_v40  ;;  %5867 = vmatprep.mubr.bf16.mxu1 %v6296_v40  ;;  %v8441_v40 = vld [vmem:[%s11088_s1 + $0x1808] ss:$16 sps:$4 sm:$0xff]  }
 0x2c7   :  { %5305 = vmatpush1.bf16.msra.mxu0 %v8346_v41  ;;  %5838 = vmatpush1.bf16.msra.mxu1 %v8349_v42  ;;  %v8446_v41 = vld [vmem:[%s11088_s1 + $0x1824] ss:$16 sps:$4 sm:$0xff]   ;;  %v8444_v42 = vld [vmem:[%s11088_s1 + $0x1820] ss:$16 sps:$4 sm:$0xff]  }
 0x2c8   :  { %5306 = vmatprep.subr.bf16.mxu0 %v8354_v43  ;;  %5839 = vmatprep.subr.bf16.mxu1 %v8357_v44  ;;  %v8447_v43 = vld [vmem:[%s11088_s1 + $0x1828] ss:$16 sps:$4 sm:$0xff]   ;;  %v8452_v44 = vld [vmem:[%s11088_s1 + $0x1844] ss:$16 sps:$4 sm:$0xff]  }
 0x2cb   :  { %5307 = vmatpush1.bf16.msra.mxu0 %v8352_v45  ;;  %5840 = vmatpush1.bf16.msra.mxu1 %v8355_v46  ;;  %v8455_v45 = vld [vmem:[%s11088_s1 + $0x184c] ss:$16 sps:$4 sm:$0xff]   ;;  %v8495_v46 = vmov 0  }
 0x2cc   :  { %5308 = vmatprep.subr.bf16.mxu0 %v8360_v47  ;;  %5841 = vmatprep.subr.bf16.mxu1 %v8363_v48  ;;  %v8450_v47 = vld [vmem:[%s11088_s1 + $0x1840] ss:$16 sps:$4 sm:$0xff]   ;;  %v8453_v48 = vld [vmem:[%s11088_s1 + $0x1848] ss:$16 sps:$4 sm:$0xff]  }
 0x2cf   :  { %5309 = vmatpush1.bf16.msra.mxu0 %v8358_v49  ;;  %5842 = vmatpush1.bf16.msra.mxu1 %v8361_v50  ;;  %v8458_v49 = vld [vmem:[%s11088_s1 + $0x1864] ss:$16 sps:$4 sm:$0xff]   ;;  %v8461_v50 = vld [vmem:[%s11088_s1 + $0x186c] ss:$16 sps:$4 sm:$0xff]  }
 0x2d0   :  { %5310 = vmatprep.subr.bf16.mxu0 %v8366_v51  ;;  %5843 = vmatprep.subr.bf16.mxu1 %v8369_v52  ;;  %v8456_v51 = vld [vmem:[%s11088_s1 + $0x1860] ss:$16 sps:$4 sm:$0xff]   ;;  %v8459_v52 = vld [vmem:[%s11088_s1 + $0x1868] ss:$16 sps:$4 sm:$0xff]  }
 0x2d3   :  { %5311 = vmatpush1.bf16.msra.mxu0 %v8364_v53  ;;  %5844 = vmatpush1.bf16.msra.mxu1 %v8367_v54  ;;  %v8463_v53 = vld [vmem:[%s11090_s3 + $0x40] sm:$0xff]  }
 0x2d4   :  { %5312 = vmatprep.subr.bf16.mxu0 %v8372_v55  ;;  %5845 = vmatprep.subr.bf16.mxu1 %v8375_v56  ;;  %v8464_v54 = vld [vmem:[%s11090_s3 + $0xc0] sm:$0xff]  }
 0x2d5   :  { %v8462_v55 = vld [vmem:[%s11089_s0 + $0x60] ss:$0 sps:$4 sm:$0xff]  }
 0x2d6   :  { %v8465_v56 = vld [vmem:[%s11090_s3] sm:$0xff]  }
 0x2d7   :  { %5313 = vmatpush1.bf16.msra.mxu0 %v8370_v57  ;;  %5846 = vmatpush1.bf16.msra.mxu1 %v8373_v58  ;;  %v8466_v57 = vld [vmem:[%s11090_s3 + $0x80] sm:$0xff]   ;;  %v8467_v58 = vld [vmem:[%s11090_s3 + $0x48] sm:$0xff]  }
 0x2d8   :  { %5314 = vmatprep.subr.bf16.mxu0 %v8378_v59  ;;  %5847 = vmatprep.subr.bf16.mxu1 %v8381_v60  ;;  %v8468_v59 = vld [vmem:[%s11090_s3 + $0xc8] sm:$0xff]  }
 0x2d9   :  { %v8469_v60 = vld [vmem:[%s11090_s3 + $0x8] sm:$0xff]  }
 0x2db   :  { %5315 = vmatpush1.bf16.msra.mxu0 %v8376_v61  ;;  %5848 = vmatpush1.bf16.msra.mxu1 %v8379_v62  ;;  %v8470_v61 = vld [vmem:[%s11090_s3 + $0x88] sm:$0xff]   ;;  %v8471_v62 = vld [vmem:[%s11090_s3 + $0x50] sm:$0xff]  }
 0x2dc   :  { %5316 = vmatprep.subr.bf16.mxu0 %v8384_v63  ;;  %5849 = vmatprep.subr.bf16.mxu1 %v8387_v0  ;;  %v8472_v63 = vld [vmem:[%s11090_s3 + $0xd0] sm:$0xff]  }
 0x2dd   :  { %v8473_v0 = vld [vmem:[%s11090_s3 + $0x10] sm:$0xff]  }
 0x2df   :  { %5317 = vmatpush1.bf16.msra.mxu0 %v8382_v1  ;;  %5850 = vmatpush1.bf16.msra.mxu1 %v8385_v2  ;;  %v8474_v1 = vld [vmem:[%s11090_s3 + $0x90] sm:$0xff]   ;;  %v8475_v2 = vld [vmem:[%s11090_s3 + $0x58] sm:$0xff]  }
 0x2e0   :  { %5318 = vmatprep.subr.bf16.mxu0 %v8390_v3  ;;  %5851 = vmatprep.subr.bf16.mxu1 %v8393_v4  ;;  %v8476_v3 = vld [vmem:[%s11090_s3 + $0xd8] sm:$0xff]  }
 0x2e1   :  { %v8477_v4 = vld [vmem:[%s11090_s3 + $0x18] sm:$0xff]  }
 0x2e3   :  { %5319 = vmatpush1.bf16.msra.mxu0 %v8388_v5  ;;  %5852 = vmatpush1.bf16.msra.mxu1 %v8391_v6  ;;  %v8478_v5 = vld [vmem:[%s11090_s3 + $0x98] sm:$0xff]   ;;  %v8479_v6 = vld [vmem:[%s11090_s3 + $0x60] sm:$0xff]  }
 0x2e4   :  { %5320 = vmatprep.subr.bf16.mxu0 %v8396_v7  ;;  %5853 = vmatprep.subr.bf16.mxu1 %v8399_v8  ;;  %v8480_v7 = vld [vmem:[%s11090_s3 + $0xe0] sm:$0xff]  }
 0x2e5   :  { %v8481_v8 = vld [vmem:[%s11090_s3 + $0x20] sm:$0xff]  }
 0x2e7   :  { %5321 = vmatpush1.bf16.msra.mxu0 %v8394_v9  ;;  %5854 = vmatpush1.bf16.msra.mxu1 %v8397_v10  ;;  %v8482_v9 = vld [vmem:[%s11090_s3 + $0xa0] sm:$0xff]   ;;  %v8483_v10 = vld [vmem:[%s11090_s3 + $0x68] sm:$0xff]  }
 0x2e8   :  { %5322 = vmatprep.subr.bf16.mxu0 %v8402_v12  ;;  %5855 = vmatprep.subr.bf16.mxu1 %v8405_v13  ;;  %v8484_v12 = vld [vmem:[%s11090_s3 + $0xe8] sm:$0xff]  }
 0x2e9   :  { %v8485_v13 = vld [vmem:[%s11090_s3 + $0x28] sm:$0xff]  }
 0x2eb   :  { %5323 = vmatpush1.bf16.msra.mxu0 %v8400_v15  ;;  %5856 = vmatpush1.bf16.msra.mxu1 %v8403_v11  ;;  %v8486_v15 = vld [vmem:[%s11090_s3 + $0xa8] sm:$0xff]   ;;  %v8487_v11 = vld [vmem:[%s11090_s3 + $0x70] sm:$0xff]  }
 0x2ec   :  { %5324 = vmatprep.subr.bf16.mxu0 %v8408_v17  ;;  %5857 = vmatprep.subr.bf16.mxu1 %v8411_v14  ;;  %v8488_v17 = vld [vmem:[%s11090_s3 + $0xf0] sm:$0xff]  }
 0x2ed   :  { %v8489_v14 = vld [vmem:[%s11090_s3 + $0x30] sm:$0xff]  }
 0x2ef   :  { %5325 = vmatpush1.bf16.msra.mxu0 %v8406_v19  ;;  %5858 = vmatpush1.bf16.msra.mxu1 %v8409_v20  ;;  %v8490_v19 = vld [vmem:[%s11090_s3 + $0xb0] sm:$0xff]   ;;  %v8491_v20 = vld [vmem:[%s11090_s3 + $0x78] sm:$0xff]  }
 0x2f0   :  { %5326 = vmatprep.subr.bf16.mxu0 %v8414_v16  ;;  %5859 = vmatprep.subr.bf16.mxu1 %v8417_v22  ;;  %v8492_v16 = vld [vmem:[%s11090_s3 + $0xf8] sm:$0xff]  }
 0x2f1   :  { %v8493_v22 = vld [vmem:[%s11090_s3 + $0x38] sm:$0xff]  }
 0x2f3   :  { %5327 = vmatpush1.bf16.msra.mxu0 %v8412_v23  ;;  %5860 = vmatpush1.bf16.msra.mxu1 %v8415_v18  ;;  %v8494_v23 = vld [vmem:[%s11090_s3 + $0xb8] sm:$0xff]   ;;  %v820_v18 = vlaneseq }
 0x2f4   :  { %5328 = vmatprep.subr.bf16.mxu0 %v8420_v25  ;;  %5861 = vmatprep.subr.bf16.mxu1 %v8423_v26 }
 0x2f5   :  { %v821_v25 = vshrl.u32 %v820_v18, 7 }
 0x2f7   :  { %5329 = vmatpush1.bf16.msra.mxu0 %v8418_v27  ;;  %5862 = vmatpush1.bf16.msra.mxu1 %v8421_v28  ;;  %v822_v26 = vsub.s32 0, %v821_v25  ;;  %v830_v27 = vsub.s32 2, %v821_v25  ;;  %v818_v28 = vld [vmem:[%s11091_s2] sm:$0xf] }
 0x2f8   :  { %5330 = vmatprep.subr.bf16.mxu0 %v8426_v29  ;;  %5863 = vmatprep.subr.bf16.mxu1 %v8429_v24  ;;  %v826_v29 = vsub.s32 1, %v821_v25  ;;  %v834_v24 = vsub.s32 3, %v821_v25 }
 0x2fb   :  { %5331 = vmatpush1.bf16.msra.mxu0 %v8424_v31  ;;  %5864 = vmatpush1.bf16.msra.mxu1 %v8427_v32  ;;  %v823_v31 = vrot.slane %v818_v28, %v822_v26  ;;  %v831_v32 = vrot.slane %v818_v28, %v830_v27 }
 0x2fc   :  { %5332 = vmatprep.subr.bf16.mxu0 %v8432_v21  ;;  %5865 = vmatprep.subr.bf16.mxu1 %v8435_v34  ;;  %v827_v21 = vrot.slane %v818_v28, %v826_v29  ;;  %v835_v34 = vrot.slane %v818_v28, %v834_v24 }
 0x2ff   :  { %5333 = vmatpush1.bf16.msra.mxu0 %v8430_v35  ;;  %5866 = vmatpush1.bf16.msra.mxu1 %v8433_v30 }
 0x300   :  { %5343 = vmatprep.subr.bf16.mxu0 %v8440_v37  ;;  %5876 = vmatprep.subr.bf16.mxu1 %v8443_v38 }
 0x302   :  { %5335 = vmatmul.mubr.bf16.vlgmr.msra.gmra.mrb[0].mxu0 %v6295_v33  ;;  %5868 = vmatmul.mubr.bf16.vlgmr.msra.gmra.mrb[0].mxu1 %v6295_v33 }
 0x303   :  { %5344 = vmatpush1.bf16.msra.mxu0 %v8438_v39  ;;  %5877 = vmatpush1.bf16.msra.mxu1 %v8441_v40 }
 0x304   :  { %5345 = vmatprep.subr.bf16.mxu0 %v8446_v41  ;;  %5878 = vmatprep.subr.bf16.mxu1 %v8449_v36 }
 0x305   :  { %5375 = vmatprep.mubr.bf16.mxu0 %v8495_v46  ;;  %5908 = vmatprep.mubr.bf16.mxu1 %v8495_v46 }
 0x307   :  { %5346 = vmatpush1.bf16.msra.mxu0 %v8444_v42  ;;  %5879 = vmatpush1.bf16.msra.mxu1 %v8447_v43 }
 0x308   :  { %5347 = vmatprep.subr.bf16.mxu0 %v8452_v44  ;;  %5880 = vmatprep.subr.bf16.mxu1 %v8455_v45 }
 0x30b   :  { %5348 = vmatpush1.bf16.msra.mxu0 %v8450_v47  ;;  %5881 = vmatpush1.bf16.msra.mxu1 %v8453_v48 }
 0x30c   :  { %5349 = vmatprep.subr.bf16.mxu0 %v8458_v49  ;;  %5882 = vmatprep.subr.bf16.mxu1 %v8461_v50 }
 0x30f   :  { %5350 = vmatpush1.bf16.msra.mxu0 %v8456_v51  ;;  %5883 = vmatpush1.bf16.msra.mxu1 %v8459_v52 }
 0x310   :  { %7117 = vmatprep.subr.bf16.mxu0 %v8463_v53  ;;  %7139 = vmatprep.subr.bf16.mxu1 %v8464_v54 }
 0x312   :  { %7082 = vmatmul.mubr.msk.bf16.vlgmr.msra.gmra.mrb[0].mxu0 %vm4847_vm0, %v8462_v55  ;;  %7083 = vmatmul.mubr.msk.bf16.vlgmr.msra.gmra.mrb[0].mxu1 %vm4847_vm0, %v8462_v55  ;;  %v7084_v55 = vld [vmem:[%s11092_s4] ss:$0 sm:$0xff] }
 0x313   :  { %7118 = vmatpush3.bf16.msra.mxu0 %v8465_v56  ;;  %7140 = vmatpush3.bf16.msra.mxu1 %v8466_v57 }
 0x314   :  { %7119 = vmatprep.subr.bf16.mxu0 %v8467_v58  ;;  %7141 = vmatprep.subr.bf16.mxu1 %v8468_v59 }
 0x317   :  { %7120 = vmatpush3.bf16.msra.mxu0 %v8469_v60  ;;  %7142 = vmatpush3.bf16.msra.mxu1 %v8470_v61 }
 0x318   :  { %7121 = vmatprep.subr.bf16.mxu0 %v8471_v62  ;;  %7143 = vmatprep.subr.bf16.mxu1 %v8472_v63 }
 0x31b   :  { %7122 = vmatpush3.bf16.msra.mxu0 %v8473_v0  ;;  %7144 = vmatpush3.bf16.msra.mxu1 %v8474_v1 }
 0x31c   :  { %7123 = vmatprep.subr.bf16.mxu0 %v8475_v2  ;;  %7145 = vmatprep.subr.bf16.mxu1 %v8476_v3 }
 0x31f   :  { %7124 = vmatpush3.bf16.msra.mxu0 %v8477_v4  ;;  %7146 = vmatpush3.bf16.msra.mxu1 %v8478_v5 }
 0x320   :  { %7125 = vmatprep.subr.bf16.mxu0 %v8479_v6  ;;  %7147 = vmatprep.subr.bf16.mxu1 %v8480_v7 }
 0x323   :  { %7126 = vmatpush3.bf16.msra.mxu0 %v8481_v8  ;;  %7148 = vmatpush3.bf16.msra.mxu1 %v8482_v9 }
 0x324   :  { %7127 = vmatprep.subr.bf16.mxu0 %v8483_v10  ;;  %7149 = vmatprep.subr.bf16.mxu1 %v8484_v12 }
 0x327   :  { %7128 = vmatpush3.bf16.msra.mxu0 %v8485_v13  ;;  %7150 = vmatpush3.bf16.msra.mxu1 %v8486_v15 }
 0x328   :  { %7129 = vmatprep.subr.bf16.mxu0 %v8487_v11  ;;  %7151 = vmatprep.subr.bf16.mxu1 %v8488_v17 }
 0x32b   :  { %7130 = vmatpush3.bf16.msra.mxu0 %v8489_v14  ;;  %7152 = vmatpush3.bf16.msra.mxu1 %v8490_v19 }
 0x32c   :  { %7131 = vmatprep.subr.bf16.mxu0 %v8491_v20  ;;  %7153 = vmatprep.subr.bf16.mxu1 %v8492_v16 }
 0x32f   :  { %7132 = vmatpush3.bf16.msra.mxu0 %v8493_v22  ;;  %7154 = vmatpush3.bf16.msra.mxu1 %v8494_v23 }
 0x3e5   :  { %v5377_v35 = vpop.f32.mrb[0].mxu0  ;;  %v5910_v30 = vpop.f32.mrb[0].mxu1 }
 0x3e6   :  { %v7161_v37 = vadd.f32 %v5377_v35, %v823_v31  ;;  %v7163_v38 = vadd.f32 %v5910_v30, %v831_v32  ;;  %v5379_v33 = vpop.f32.mrb[1].mxu0  ;;  %v5912_v39 = vpop.f32.mrb[1].mxu1 }
 0x3e7   :  { %v7162_v40 = vadd.f32 %v5379_v33, %v827_v21  ;;  %v7164_v41 = vadd.f32 %v5912_v39, %v835_v34  ;;  %v5381_v36 = vpop.f32.mrb[2].mxu0  ;;  %v5914_v42 = vpop.f32.mrb[2].mxu1 }
 0x3e8   :  { %v5917_v43 = vmax.f32 %v7161_v37, 0.0  ;;  %v5919_v44 = vmax.f32 %v7163_v38, 0.0  ;;  %v5382_v45 = vpop.f32.mrb[3].mxu0  ;;  %v5915_v46 = vpop.f32.mrb[3].mxu1 }
 0x3e9   :  { %v5918_v47 = vmax.f32 %v7162_v40, 0.0  ;;  %v5920_v48 = vmax.f32 %v7164_v41, 0.0 }
 0x3ea   :  { %v5921_v51 = vpack.c.bf16 %v5917_v43, %v5917_v43  ;;  %v5923_v52 = vpack.c.bf16 %v5919_v44, %v5919_v44 }
 0x3eb   :  { %v5922_v49 = vpack.c.bf16 %v5918_v47, %v5918_v47  ;;  %v5924_v50 = vpack.c.bf16 %v5920_v48, %v5920_v48 }
 0x3ed   :  { %6220 = vmatprep.mubr.bf16.mxu0 %v5922_v49  ;;  %6260 = vmatprep.mubr.bf16.mxu1 %v5924_v50 }
 0x3ee   :  { %6221 = vmatmul.mubr.bf16.vlgmr.msra.gmra.mrb[4].mxu0 %v5921_v51  ;;  %6261 = vmatmul.mubr.bf16.vlgmr.msra.gmra.mrb[4].mxu1 %v5923_v52 }
 0x4c1   :  { %v7133_v53 = vpop.f32.mrb[4].mxu0  ;;  %v7155_v54 = vpop.f32.mrb[4].mxu1 }
 0x4c2   :  { %v7134_v56 = vpop.f32.mrb[5].mxu0  ;;  %v7156_v57 = vpop.f32.mrb[5].mxu1 }
 0x4c3   :  { %v7135_v58 = vadd.f32 %v7134_v56, %v7133_v53  ;;  %v7157_v59 = vadd.f32 %v7156_v57, %v7155_v54  ;;  %v7136_v60 = vpop.f32.mrb[6].mxu0  ;;  %v7158_v61 = vpop.f32.mrb[6].mxu1 }
 0x4c4   :  { %v7137_v62 = vpop.f32.mrb[7].mxu0  ;;  %v7159_v63 = vpop.f32.mrb[7].mxu1 }
 0x4c5   :  { %v6223_v0 = vadd.f32 %v7135_v58, %v7084_v55 }
 0x4c7   :  { %v6263_v1 = vadd.f32 %v7157_v59, %v6223_v0 }
 0x4c9   :  { %6268 = vst [vmem:[%s11093_s5] sm:$0xff] %v6263_v1 }

// kernel: net_forward.2
= control target key start
LH: loop header
LB: loop body
LE: loop exit
PB: predicated region body
PF: predicated region fallthrough
CT: control target
= control target key end

     0   :  { %10 = vsyncpa [#allocation3], 0  ;;  %s14811_s0 = inlined_call_operand.vmem [shape: bf16[2,30,30], index: 0, kind: input, shape index: {}]   ;;  %s14812_s1 = inlined_call_operand.hbm [shape: bf16[5,30,832], index: 1, kind: input, shape index: {}]   ;;  %s14813_s2 = inlined_call_operand.hbm [shape: f32[1,832], index: 2, kind: input, shape index: {}]   ;;  %s14814_s3 = inlined_call_operand.hbm [shape: bf16[5,512,768], index: 3, kind: input, shape index: {}]   ;;  %s14815_s4 = inlined_call_operand.hbm [shape: f32[1,768], index: 4, kind: input, shape index: {}]   ;;  %s14816_s5 = inlined_call_operand.vmem [shape: bf16[2,7,448], index: 5, kind: output, shape index: {}]  }
   0x1   :  { %11 = vsyncpa [#allocation5], 0 }
   0x2   :  { %12 = vsyncpa [#allocation8], 0  ;;  %s13599_s18 = smov 0  }
   0x3 LB: > { %s13557_s19 = smov [#allocation4]   ;;  %s13605_s21 = sadd.s32 4294967295, %s13555_s18   ;;  %s13555_s18 = sphi %s13599_s18, %s18_s18  }
   0x4   : > { %s185_s20 = sshll.u32 %s13557_s19, 4  ;;  %p10278_p0 = scmp.ge.s32.totalorder %s13555_s18, 1  ;;  %s186_s20 = int_to_ptr.vmem [resolvable:$true] %s185_s20 }
   0x5   : > { %p159_p1 = scmp.lt.s32.totalorder %s13555_s18, 3  ;;  %p14817_p2 = scmp.eq.s32.totalorder %s13605_s21, 0 }
   0x6   : > { %s13558_s23 = smov [#allocation2]   ;;  %s13559_s26 = smov [#allocation6]  }
   0x7   : > { %p13610_p3 = pnand %p10278_p0, %p159_p1  ;;  %s171_s24 = sshll.u32 %s13558_s23, 4  ;;  %s13616_s24 = int_to_ptr.vmem [resolvable:$true] %s171_s24 }
   0x8   : > { %s195_s27 = sshll.u32 %s13559_s26, 4  ;;  %s13425_s30 = scalar_lea.hbm %s14813_s2, 112  ;;  %s13624_s27 = int_to_ptr.vmem [resolvable:$true] %s195_s27 }
   0x9   : > { %s14830_s22 = scalar_select %p13610_p3, 1, 0 }
   0xa   : > { %p11737_p4 = pneg %p13610_p3  ;;  %p13426_p6 = scmp.ne.s32.totalorder %s14813_s2, %s13425_s30 }
   0xb   : > { %p13432_p10 = scmp.lt.u32.totalorder %s13425_s30, %s14813_s2 }
   0xc   : > { %p13620_p5 = pnand %p14817_p2, %p11737_p4 }
   0xe   : > { %p13634_p7 = pneg %p13620_p5 }
  0x10   : > { %p13428_p8 = pnand %p13634_p7, %p13426_p6 }
  0x12   : > { %p13429_p9 = pneg %p13428_p8 }
  0x14   : > { %p13434_p11 = pnand %p13432_p10, %p13429_p9 }
  0x16   : > { %13437 = shalt.err (!%p13434_p11)
}
  0x17   : > { %s13438_s11 = scalar_lea.vmem %s186_s20, 112  ;;  %s13445_s12 = scalar_lea.vmem %s186_s20, 128 }
  0x18   : > { %p13439_p12 = scmp.ne.s32.totalorder %s186_s20, %s13438_s11  ;;  %p13446_p1 = scmp.lt.s32.totalorder %s186_s20, %s186_s20 }
  0x19   : > { %p13447_p4 = scmp.lt.s32.totalorder %s13445_s12, %s13438_s11 }
  0x1a   : > { %p13441_p13 = pnand %p13439_p12, %p13634_p7 }
  0x1b   : > { %p13448_p2 = por %p13447_p4, %p13446_p1 }
  0x1c   : > { %p13442_p0 = pneg %p13441_p13 }
  0x1e   : > { %p13449_p3 = pnand %p13448_p2, %p13442_p0 }
  0x20   : > { %13452 = shalt.err (!%p13449_p3)
}
  0x21   : > { %11743 = dma.hbm_to_vmem [thread:$0]  (!%p13620_p5), %s14813_s2, 112, %s186_s20, [#allocation5]  }
  0x22   : > { %s13453_s17 = scalar_lea.hbm %s14812_s1, 8960 }
  0x23   : > { %p13454_p6 = scmp.ne.s32.totalorder %s14812_s1, %s13453_s17  ;;  %p13460_p2 = scmp.lt.u32.totalorder %s13453_s17, %s14812_s1 }
  0x25   : > { %p13456_p8 = pnand %p13454_p6, %p13634_p7 }
  0x27   : > { %p13457_p9 = pneg %p13456_p8 }
  0x29   : > { %p13462_p3 = pnand %p13460_p2, %p13457_p9 }
  0x2b   : > { %13465 = shalt.err (!%p13462_p3)
}
  0x2c   : > { %s13466_s20 = scalar_lea.vmem %s13616_s24, 8960  ;;  %p13474_p13 = scmp.lt.s32.totalorder %s13616_s24, %s13616_s24 }
  0x2d   : > { %p13467_p10 = scmp.ne.s32.totalorder %s13616_s24, %s13466_s20  ;;  %p13475_p0 = scmp.lt.s32.totalorder %s13466_s20, %s13466_s20 }
  0x2f   : > { %p13469_p11 = pnand %p13467_p10, %p13634_p7  ;;  %p13476_p1 = por %p13475_p0, %p13474_p13 }
  0x31   : > { %p13470_p12 = pneg %p13469_p11 }
  0x33   : > { %p13477_p4 = pnand %p13476_p1, %p13470_p12 }
  0x35   : > { %13480 = shalt.err (!%p13477_p4)
}
  0x36   : > { %s13560_s29 = smov 448   ;;  %s13561_s30 = smov 28  }
  0x37   : > { %11740 = dma.hbm_to_vmem [thread:$0]  (!%p13620_p5), %s14812_s1, 8960, %s13616_s24, [#allocation3], %s13560_s29, %s13560_s29, %s13561_s30  }
  0x38   : > { %s13481_s11 = scalar_lea.hbm %s14814_s3, 122880 }
  0x39   : > { %p13482_p6 = scmp.ne.s32.totalorder %s14814_s3, %s13481_s11  ;;  %p13488_p2 = scmp.lt.u32.totalorder %s13481_s11, %s14814_s3 }
  0x3b   : > { %p13484_p8 = pnand %p13482_p6, %p13634_p7 }
  0x3d   : > { %p13485_p9 = pneg %p13484_p8 }
  0x3f   : > { %p13490_p3 = pnand %p13488_p2, %p13485_p9 }
  0x41   : > { %13493 = shalt.err (!%p13490_p3)
}
  0x42   : > { %s13494_s24 = scalar_lea.vmem %s13624_s27, 122880  ;;  %p13502_p13 = scmp.lt.s32.totalorder %s13624_s27, %s13624_s27 }
  0x43   : > { %p13495_p10 = scmp.ne.s32.totalorder %s13624_s27, %s13494_s24  ;;  %p13503_p0 = scmp.lt.s32.totalorder %s13494_s24, %s13494_s24 }
  0x45   : > { %p13497_p11 = pnand %p13495_p10, %p13634_p7  ;;  %p13504_p1 = por %p13503_p0, %p13502_p13 }
  0x47   : > { %p13498_p12 = pneg %p13497_p11 }
  0x49   : > { %p13505_p4 = pnand %p13504_p1, %p13498_p12 }
  0x4b   : > { %13508 = shalt.err (!%p13505_p4)
}
  0x4c   : > { %s13562_s16 = smov 384   ;;  %s13563_s17 = smov 24  }
  0x4d   : > { %11746 = dma.hbm_to_vmem [thread:$0]  (!%p13620_p5), %s14814_s3, 122880, %s13624_s27, [#allocation5], %s13562_s16, %s13562_s16, %s13563_s17  }
  0x4e   : > { %s13564_s26 = smov [#allocation7]   ;;  %s13509_s30 = scalar_lea.hbm %s14815_s4, 96 }
  0x4f   : > { %s209_s28 = sshll.u32 %s13564_s26, 4  ;;  %p13510_p6 = scmp.ne.s32.totalorder %s14815_s4, %s13509_s30  ;;  %s210_s28 = int_to_ptr.vmem [resolvable:$true] %s209_s28 }
  0x50   : > { %p13516_p2 = scmp.lt.u32.totalorder %s13509_s30, %s14815_s4 }
  0x51   : > { %p13512_p8 = pnand %p13510_p6, %p13634_p7 }
  0x53   : > { %p13513_p9 = pneg %p13512_p8 }
  0x55   : > { %p13518_p3 = pnand %p13516_p2, %p13513_p9 }
  0x57   : > { %13521 = shalt.err (!%p13518_p3)
}
  0x58   : > { %s13522_s27 = scalar_lea.vmem %s210_s28, 96  ;;  %p13530_p13 = scmp.lt.s32.totalorder %s210_s28, %s210_s28 }
  0x59   : > { %p13523_p10 = scmp.ne.s32.totalorder %s210_s28, %s13522_s27  ;;  %p13531_p0 = scmp.lt.s32.totalorder %s13522_s27, %s13522_s27 }
  0x5b   : > { %p13525_p11 = pnand %p13523_p10, %p13634_p7  ;;  %p13532_p1 = por %p13531_p0, %p13530_p13 }
  0x5d   : > { %p13526_p12 = pneg %p13525_p11 }
  0x5f   : > { %p13533_p4 = pnand %p13532_p1, %p13526_p12 }
  0x61   : > { %13536 = shalt.err (!%p13533_p4)
}
  0x62   : > { %11749 = dma.hbm_to_vmem [thread:$0]  (!%p13620_p5), %s14815_s4, 96, %s210_s28, [#allocation8]  }
  0x63   : > { %p14833_p6 = scmp.ne.s32.totalorder %s14830_s22, 0 }
  0x65   : > { %230 = sbr.rel (%p14833_p6) target bundleno = 2163 (0x873), region = 40 }
  0x6c   : > { %p14834_p8 = scmp.eq.s32.totalorder %s13605_s21, 0 }
  0x6e   : > { %13542 = dma.done.wait (%p14834_p8), [#allocation3], 8960   ;;  %p14835_p7 = pmov %p14834_p8 }
  0x70   : > { %13544 = vsyncadd (%p14835_p7), [#allocation3], 4294958336  ;;  %p14836_p9 = pmov %p14835_p7 }
  0x71   : > { %p14837_p2 = pmov %p14835_p7 }
  0x72   : > { %13546 = dma.done.wait (%p14836_p9), [#allocation5], 122992  }
  0x73   : > { %13548 = vsyncadd (%p14837_p2), [#allocation5], 4294844304  ;;  %p14838_p3 = pmov %p14837_p2 }
  0x74   : > { %p14839_p5 = pmov %p14837_p2 }
  0x75   : > { %13550 = dma.done.wait (%p14838_p3), [#allocation8], 96  }
  0x76   : > { %13552 = vsyncadd (%p14839_p5), [#allocation8], 4294967200  ;;  %p270_p10 = scmp.lt.s32.totalorder %s13605_s21, 1  ;;  %v13565_v0 = vmov 0   ;;  %v11883_v1 = vld [vmem:[#allocation2 + $0x74] ss:$28 sps:$4 sm:$0xff]  }
  0x77   : > { %470 = vmatprep.mubr.bf16.mxu1 %v13565_v0  ;;  %576 = vmatprep.mubr.bf16.mxu0 %v13565_v0  ;;  %v11885_v2 = vld [vmem:[#allocation2 + $0x84] ss:$28 sps:$4 sm:$0xff]   ;;  %v11887_v3 = vld [vmem:[#allocation2 + $0x70] ss:$28 sps:$4 sm:$0xff]   ;;  %vm416_vm0 = vcmask 1046528   ;;  %vm409_vm2 = vcmask 244736  }
  0x78   : > { %s14892_s21 = smov (!%p270_p10, %s13605_s21), 1  ;;  %438 = vmatprep.subr.bf16.mxu1 %v11883_v1  ;;  %v11888_v4 = vld [vmem:[#allocation2 + $0x80] ss:$28 sps:$4 sm:$0xff]   ;;  %544 = vmatprep.subr.bf16.mxu0 %v11885_v2  ;;  %v11889_v5 = vld [vmem:[#allocation2 + $0xac] ss:$28 sps:$4 sm:$0x7f]  }
  0x79   : > { %s11432_s22 = sshll.u32 %s14892_s21, 4  ;;  %vm328_vm1 = vsmask.f32 7424  ;;  %439 = vmatpush1.bf16.msra.mxu1 %v11887_v3  ;;  %545 = vmatpush1.bf16.msra.mxu0 %v11888_v4  ;;  %v11891_v6 = vld [vmem:[#allocation2 + $0xbc] ss:$28 sps:$4 sm:$0x7f]  }
  0x7a   : > { %s274_s13 = scalar_lea.vmem %s14811_s0, %s11432_s22  ;;  %10309 = vmatprep.subr.msk.bf16.mxu1 %vm416_vm0, %v11889_v5  ;;  %v11893_v8 = vld [vmem:[#allocation2 + $0xa8] ss:$28 sps:$4 sm:$0x7f]   ;;  %v11894_v9 = vld [vmem:[#allocation2 + $0xb8] ss:$28 sps:$4 sm:$0x7f]   ;;  %10315 = vmatprep.subr.msk.bf16.mxu0 %vm416_vm0, %v11891_v6  ;;  %s279_s19 = scalar_lea.vmem %s14816_s5, %s11432_s22 }
  0x7b   : > { %v13740_v7 = vld [vmem:[%s274_s13] sm:$0xff]   ;;  %v418_v10 = vsel %vm416_vm0, %v11893_v8, 0  ;;  %v430_v11 = vsel %vm416_vm0, %v11894_v9, 0  ;;  %v13746_v12 = vld [vmem:[%s274_s13 + $0x8] sm:$0x7f]   ;;  %vm1663_vm4 = vcmask 1045504  }
  0x7c   : > { %v330_v13 = vshrl.u32 %v13740_v7, 16  ;;  %v332_v14 = vshll.u32 %v13740_v7, 16  ;;  %vm1310_vm3 = vsmask.f32 6400  ;;  %v337_v15 = vshll.u32 %v13746_v12, 16  ;;  %s13566_s14 = smov 96  }
  0x7d   : > { %441 = vmatpush1.bf16.msra.mxu1 %v418_v10  ;;  %547 = vmatpush1.bf16.msra.mxu0 %v430_v11  ;;  %v11899_v16 = vld [vmem:[#allocation2 + $0x4] ss:$28 sps:$4 sm:$0xff]   ;;  %v341_v17 = vshrl.u32 %v13746_v12, 16  ;;  %v11902_v25 = vld [vmem:[#allocation2 + $0x7c] ss:$28 sps:$4 sm:$0xff]   ;;  %v1664_v44 = vrot.slane %v13740_v7, 2 }
  0x7e   : > { %v334_v18 = vrot.slane %v332_v14, 1  ;;  %v1311_v19 = vrot.slane %v330_v13, 1  ;;  %v1312_v20 = vrot.slane %v332_v14, 2  ;;  %v11897_v21 = vld [vmem:[#allocation2] ss:$28 sps:$4 sm:$0xff]   ;;  %v339_v22 = vrot.slane %v337_v15, 1  ;;  %736 = vmatprep.subr.bf16.mxu0 %v11899_v16  ;;  %491 = vmatprep.subr.bf16.mxu1 %v11902_v25 }
  0x7f   : > { %v1315_v23 = vrot.slane %v337_v15, 2  ;;  %v1314_v24 = vrot.slane %v341_v17, 1  ;;  %v11903_v27 = vld [vmem:[#allocation2 + $0x3c] ss:$28 sps:$4 sm:$0x7f]   ;;  %v13773_v45 = vrot.slane %v13746_v12, 2 }
  0x80   : > { %v335_v26 = vor.u32 %v334_v18, %v330_v13  ;;  %v1313_v28 = vor.u32 %v1312_v20, %v1311_v19  ;;  %v11905_v30 = vld [vmem:[#allocation2 + $0x38] ss:$28 sps:$4 sm:$0x7f]   ;;  %v11908_v34 = vld [vmem:[#allocation2 + $0xb0] ss:$28 sps:$4 sm:$0x7f]   ;;  %v343_v38 = vor.u32 %v341_v17, %v339_v22 }
  0x81   : > { %v13752_v29 = vor.u32 %v1315_v23, %v1314_v24  ;;  %v11900_v32 = vld [vmem:[#allocation2 + $0x78] ss:$28 sps:$4 sm:$0xff]   ;;  %v716_v36 = vsel %vm416_vm0, %v11905_v30, 0  ;;  %v424_v39 = vsel %vm416_vm0, %v11908_v34, 0  ;;  %v11912_v40 = vld [vmem:[#allocation2 + $0x88] ss:$28 sps:$4 sm:$0xff]   ;;  %v13781_v47 = vsel %vm1663_vm4, %v1664_v44, %v13773_v45 }
  0x82   : > { %v340_v31 = vsel %vm328_vm1, %v335_v26, %v339_v22  ;;  %v11906_v33 = vld [vmem:[#allocation2 + $0xb4] ss:$28 sps:$4 sm:$0x7f]   ;;  %v11913_v42 = vld [vmem:[#allocation2 + $0x4c] ss:$28 sps:$4 sm:$0x7f]  }
  0x83   : > { %10310 = vmatmul.mubr.msk.bf16.vlgmr.msra.gmra.mrb[0].mxu1 %vm409_vm2, %v340_v31  ;;  %10316 = vmatmul.mubr.msk.bf16.vlgmr.msra.gmra.mrb[0].mxu0 %vm409_vm2, %v340_v31  ;;  %v13759_v35 = vsel %vm1310_vm3, %v1313_v28, %v13752_v29  ;;  %v11911_v37 = vld [vmem:[#allocation2 + $0x14] ss:$28 sps:$4 sm:$0xff]   ;;  %v11915_v43 = vld [vmem:[#allocation2 + $0x48] ss:$28 sps:$4 sm:$0x7f]   ;;  %v962_v63 = vrot.slane %v13740_v7, 1 }
  0x84   : > { %737 = vmatpush1.bf16.msra.mxu0 %v11897_v21  ;;  %480 = vmatprep.mubr.bf16.mxu1 %v13565_v0  ;;  %v11909_v41 = vld [vmem:[#allocation2 + $0x10] ss:$28 sps:$4 sm:$0xff]   ;;  %v11916_v46 = vld [vmem:[#allocation2 + $0xc0] ss:$28 sps:$4 sm:$0x7f]   ;;  %v728_v48 = vsel %vm416_vm0, %v11915_v43, 0 }
  0x85   : > { %586 = vmatprep.mubr.bf16.mxu0 %v13565_v0  ;;  %10334 = vmatprep.subr.msk.bf16.mxu0 %vm416_vm0, %v11903_v27  ;;  %v11922_v49 = vld [vmem:[#allocation2 + $0xe4] ss:$28 sps:$4 sm:$0xff]   ;;  %v436_v50 = vsel %vm416_vm0, %v11916_v46, 0  ;;  %v11919_v51 = vld [vmem:[#allocation2 + $0xc] ss:$28 sps:$4 sm:$0xff]   ;;  %v13810_v1 = vrot.slane %v13746_v12, 1 }
  0x86   : > { %492 = vmatpush1.bf16.msra.mxu1 %v11900_v32  ;;  %v11917_v52 = vld [vmem:[#allocation2 + $0x8] ss:$28 sps:$4 sm:$0xff]   ;;  %v11920_v53 = vld [vmem:[#allocation2 + $0xe0] ss:$28 sps:$4 sm:$0xff]   ;;  %v11929_v60 = vld [vmem:[#allocation2 + $0x18] ss:$28 sps:$4 sm:$0xff]  }
  0x87   : > { %10312 = vmatprep.subr.msk.bf16.mxu1 %vm416_vm0, %v11906_v33  ;;  %v11923_v54 = vld [vmem:[#allocation2 + $0x44] ss:$28 sps:$4 sm:$0x7f]   ;;  %v11926_v56 = vld [vmem:[#allocation2 + $0x11c] ss:$28 sps:$4 sm:$0x7f]   ;;  %v964_v8 = vsel %vm416_vm0, %v962_v63, %v13810_v1 }
  0x88   : > { %739 = vmatpush1.bf16.msra.mxu0 %v716_v36  ;;  %v11925_v55 = vld [vmem:[#allocation2 + $0x40] ss:$28 sps:$4 sm:$0x7f]   ;;  %v11928_v57 = vld [vmem:[#allocation2 + $0x118] ss:$28 sps:$4 sm:$0x7f]  }
  0x89   : > { %842 = vmatprep.subr.bf16.mxu0 %v11911_v37  ;;  %v722_v58 = vsel %vm416_vm0, %v11925_v55, 0  ;;  %v1037_v59 = vsel %vm416_vm0, %v11928_v57, 0  ;;  %v11932_v61 = vld [vmem:[#allocation2 + $0xf4] ss:$28 sps:$4 sm:$0xff]   ;;  %v11936_v2 = vld [vmem:[#allocation2 + $0xec] ss:$28 sps:$4 sm:$0xff]  }
  0x8a   : > { %494 = vmatpush1.bf16.msra.mxu1 %v424_v39  ;;  %v11933_v62 = vld [vmem:[#allocation2 + $0x50] ss:$28 sps:$4 sm:$0x7f]   ;;  %v11939_v6 = vld [vmem:[#allocation2 + $0x128] ss:$28 sps:$4 sm:$0x7f]  }
  0x8b   : > { %10311 = vmatmul.mubr.msk.bf16.gmra.mrb[4].mxu1 %vm409_vm2, %v343_v38  ;;  %10317 = vmatmul.mubr.msk.bf16.gmra.mrb[4].mxu0 %vm409_vm2, %v343_v38  ;;  %v11930_v3 = vld [vmem:[#allocation2 + $0xf0] ss:$28 sps:$4 sm:$0xff]   ;;  %v734_v4 = vsel %vm416_vm0, %v11933_v62, 0  ;;  %v1049_v10 = vsel %vm416_vm0, %v11939_v6, 0  ;;  %v11934_v11 = vld [vmem:[#allocation2 + $0xe8] ss:$28 sps:$4 sm:$0xff]  }
  0x8c   : > { %523 = vmatprep.mubr.bf16.mxu1 %v13565_v0  ;;  %768 = vmatprep.mubr.bf16.mxu0 %v13565_v0  ;;  %v11937_v5 = vld [vmem:[#allocation2 + $0x12c] ss:$28 sps:$4 sm:$0x7f]   ;;  %v11945_v9 = vld [vmem:[#allocation2 + $0x154] ss:$28 sps:$4 sm:$0xff]   ;;  %vm2410_vm5 = vcmask 1040384  }
  0x8d   : > { %11456 = vmatprep.subr.bf16.mxu1 %v11912_v40  ;;  %v11940_v13 = vld [vmem:[#allocation2 + $0x124] ss:$28 sps:$4 sm:$0x7f]   ;;  %v11946_v15 = vld [vmem:[#allocation2 + $0xf8] ss:$28 sps:$4 sm:$0xff]   ;;  %vm2418_vm6 = vcmask 1041408   ;;  %vm10804_vm13 = vmneg %vm2410_vm5 }
  0x8e   : > { %v11942_v14 = vld [vmem:[#allocation2 + $0x120] ss:$28 sps:$4 sm:$0x7f]   ;;  %v11943_v16 = vld [vmem:[#allocation2 + $0x150] ss:$28 sps:$4 sm:$0xff]   ;;  %vm2426_vm7 = vcmask 1042432   ;;  %vm14554_vm14 = vmpackc.low %vm416_vm0, %vm10804_vm13 }
  0x8f   : > { %v11947_v17 = vld [vmem:[#allocation2 + $0x18c] ss:$28 sps:$4 sm:$0x7f]   ;;  %v11953_v22 = vld [vmem:[#allocation2 + $0x15c] ss:$28 sps:$4 sm:$0xff]   ;;  %vm2434_vm8 = vcmask 1043456  }
  0x90   : > { %v11949_v18 = vld [vmem:[#allocation2 + $0x188] ss:$28 sps:$4 sm:$0x7f]   ;;  %v11950_v19 = vld [vmem:[#allocation2 + $0x130] ss:$28 sps:$4 sm:$0x7f]  }
  0x91   : > { %v1390_v20 = vsel %vm416_vm0, %v11949_v18, 0  ;;  %v1055_v21 = vsel %vm416_vm0, %v11950_v19, 0  ;;  %v11951_v23 = vld [vmem:[#allocation2 + $0x158] ss:$28 sps:$4 sm:$0xff]   ;;  %v11954_v24 = vld [vmem:[#allocation2 + $0x160] ss:$28 sps:$4 sm:$0xff]  }
  0x92   : > { %v11957_v25 = vld [vmem:[#allocation2 + $0x194] ss:$28 sps:$4 sm:$0x7f]   ;;  %v11960_v28 = vld [vmem:[#allocation2 + $0x19c] ss:$28 sps:$4 sm:$0x7f]  }
  0x93   : > { %10313 = vmatmul.mubr.msk.bf16.vlgmr.msra.gmra.mrb[8].mxu1 %vm409_vm2, %v340_v31  ;;  %10335 = vmatmul.mubr.msk.bf16.vlgmr.msra.gmra.mrb[8].mxu0 %vm409_vm2, %v13740_v7  ;;  %v11959_v26 = vld [vmem:[#allocation2 + $0x190] ss:$28 sps:$4 sm:$0x7f]   ;;  %v11962_v27 = vld [vmem:[#allocation2 + $0x198] ss:$28 sps:$4 sm:$0x7f]  }
  0x94   : > { %843 = vmatpush1.bf16.msra.mxu0 %v11909_v41  ;;  %533 = vmatprep.mubr.bf16.mxu1 %v13565_v0  ;;  %v11963_v30 = vld [vmem:[#allocation2 + $0x168] ss:$28 sps:$4 sm:$0xff]   ;;  %v1396_v32 = vsel %vm416_vm0, %v11959_v26, 0  ;;  %v1402_v33 = vsel %vm416_vm0, %v11962_v27, 0  ;;  %v11964_v37 = vld [vmem:[#allocation2 + $0x1c0] ss:$28 sps:$4 sm:$0xff]  }
  0x95   : > { %778 = vmatprep.mubr.bf16.mxu0 %v13565_v0  ;;  %10340 = vmatprep.subr.msk.bf16.mxu0 %vm416_vm0, %v11913_v42  ;;  %v11967_v34 = vld [vmem:[#allocation2 + $0x1a0] ss:$28 sps:$4 sm:$0x7f]   ;;  %v11972_v36 = vld [vmem:[#allocation2 + $0x1cc] ss:$28 sps:$4 sm:$0xff]   ;;  %vm2442_vm9 = vcmask 1044480  }
  0x96   : > { %11457 = vmatpush3.bf16.msra.mxu1 %v11912_v40  ;;  %v11968_v39 = vld [vmem:[#allocation2 + $0x1fc] ss:$28 sps:$4 sm:$0x7f]   ;;  %v11979_v41 = vld [vmem:[#allocation2 + $0x1d4] ss:$28 sps:$4 sm:$0xff]   ;;  %s13567_s15 = smov 32  }
  0x97   : > { %11716 = vmatprep.subr.msk.bf16.mxu1 %vm416_vm0, %v11916_v46  ;;  %v11973_v40 = vld [vmem:[#allocation2 + $0x1f8] ss:$28 sps:$4 sm:$0x7f]   ;;  %v11970_v43 = vld [vmem:[#allocation2 + $0x1c8] ss:$28 sps:$4 sm:$0xff]   ;;  %s13568_s24 = smov 64  }
  0x98   : > { %845 = vmatpush1.bf16.msra.mxu0 %v728_v48  ;;  %v1739_v42 = vsel %vm416_vm0, %v11973_v40, 0  ;;  %v11974_v44 = vld [vmem:[#allocation2 + $0x204] ss:$28 sps:$4 sm:$0x7f]   ;;  %v11982_v48 = vld [vmem:[#allocation2 + $0x1d8] ss:$28 sps:$4 sm:$0xff]  }
  0x99   : > { %1057 = vmatprep.subr.bf16.mxu0 %v11922_v49  ;;  %v11976_v46 = vld [vmem:[#allocation2 + $0x200] ss:$28 sps:$4 sm:$0x7f]   ;;  %v11977_v49 = vld [vmem:[#allocation2 + $0x1d0] ss:$28 sps:$4 sm:$0xff]   ;;  %vm2664_vm10 = vcmask 261120  }
  0x9a   : > { %11459 = vmatpush3.bf16.msra.mxu1 %v436_v50  ;;  %v11980_v50 = vld [vmem:[#allocation2 + $0x20c] ss:$28 sps:$4 sm:$0x7f]   ;;  %v13915_v63 = vld [vmem:[#allocation4] sm:$0x7f]  ;;  %vm2667_vm11 = vcmask 523264  }
  0x9b   : > { %10314 = vmatmul.mubr.msk.bf16.gmra.mrb[12].mxu1 %vm409_vm2, %v343_v38  ;;  %10336 = vmatmul.mubr.msk.bf16.gmra.mrb[12].mxu0 %vm409_vm2, %v13746_v12  ;;  %vm2670_vm12 = vcmask 785408   ;;  %vm10166_vm15 = vsmask.f32 3328  ;;  %vm10174_vm3 = vcmask 523268  }
  0x9c   : > { %11460 = vmatprep.mubr.msk.bf16.mxu1 %vm409_vm2, %v340_v31  ;;  %874 = vmatprep.mubr.bf16.mxu0 %v13565_v0  ;;  %v11966_v31 = vld [vmem:[#allocation2 + $0x1c4] ss:$28 sps:$4 sm:$0xff]  }
  0x9d   : > { %789 = vmatprep.subr.bf16.mxu1 %v11919_v51  ;;  %v11983_v51 = vld [vmem:[#allocation2 + $0x208] ss:$28 sps:$4 sm:$0x7f]  }
  0xa3   : > { %11461 = vmatmul.mubr.msk.bf16.vlgmr.msra.gmra.mrb[16].mxu1 %vm409_vm2, %v343_v38  ;;  %10341 = vmatmul.mubr.msk.bf16.vlgmr.msra.gmra.mrb[0].mxu0 %vm409_vm2, %v13740_v7  ;;  %v1408_v38 = vsel %vm416_vm0, %v11967_v34, 0 }
  0xa4   : > { %790 = vmatpush1.bf16.msra.mxu1 %v11917_v52  ;;  %1058 = vmatpush1.bf16.msra.mxu0 %v11920_v53  ;;  %v11984_v52 = vld [vmem:[#allocation2 + $0x210] ss:$28 sps:$4 sm:$0x7f]  }
  0xa5   : > { %10337 = vmatprep.subr.msk.bf16.mxu1 %vm416_vm0, %v11923_v54  ;;  %821 = vmatprep.mubr.bf16.mxu1 %v13565_v0  ;;  %v1757_v53 = vsel %vm416_vm0, %v11984_v52, 0 }
  0xa6   : > { %884 = vmatprep.mubr.bf16.mxu0 %v13565_v0  ;;  %10359 = vmatprep.subr.msk.bf16.mxu0 %vm416_vm0, %v11926_v56 }
  0xa8   : > { %792 = vmatpush1.bf16.msra.mxu1 %v722_v58  ;;  %1060 = vmatpush1.bf16.msra.mxu0 %v1037_v59 }
  0xa9   : > { %11464 = vmatprep.subr.bf16.mxu1 %v11929_v60  ;;  %1163 = vmatprep.subr.bf16.mxu0 %v11932_v61 }
  0xab   : > { %10338 = vmatmul.mubr.msk.bf16.vlgmr.msra.gmra.mrb[8].mxu1 %vm409_vm2, %v13740_v7  ;;  %10342 = vmatmul.mubr.msk.bf16.gmra.mrb[4].mxu0 %vm409_vm2, %v13746_v12 }
  0xac   : > { %831 = vmatprep.mubr.bf16.mxu1 %v13565_v0  ;;  %1089 = vmatprep.mubr.bf16.mxu0 %v13565_v0 }
  0xad   : > { %11465 = vmatpush3.bf16.msra.mxu1 %v11929_v60 }
  0xae   : > { %11717 = vmatprep.subr.msk.bf16.mxu1 %vm416_vm0, %v11933_v62 }
  0xb1   : > { %11467 = vmatpush3.bf16.msra.mxu1 %v734_v4 }
  0xb2   : > { %1110 = vmatprep.subr.bf16.mxu1 %v11936_v2 }
  0xb3   : > { %10339 = vmatmul.mubr.msk.bf16.gmra.mrb[12].mxu1 %vm409_vm2, %v13746_v12  ;;  %10360 = vmatmul.mubr.msk.bf16.vlgmr.msra.gmra.mrb[8].mxu0 %vm409_vm2, %v964_v8 }
  0xb4   : > { %1164 = vmatpush1.bf16.msra.mxu0 %v11930_v3  ;;  %11468 = vmatprep.mubr.msk.bf16.mxu1 %vm409_vm2, %v13740_v7  ;;  %v1043_v7 = vsel %vm416_vm0, %v11942_v14, 0 }
  0xb5   : > { %1099 = vmatprep.mubr.bf16.mxu0 %v13565_v0  ;;  %10365 = vmatprep.subr.msk.bf16.mxu0 %vm416_vm0, %v11937_v5 }
  0xb8   : > { %1166 = vmatpush1.bf16.msra.mxu0 %v1049_v10 }
  0xb9   : > { %1410 = vmatprep.subr.bf16.mxu0 %v11945_v9 }
  0xbb   : > { %11469 = vmatmul.mubr.msk.bf16.vlgmr.msra.gmra.mrb[16].mxu1 %vm409_vm2, %v13746_v12  ;;  %10361 = vmatmul.mubr.msk.bf16.gmra.mrb[12].mxu0 %vm409_vm2, %v13810_v1  ;;  %v11956_v12 = vld [vmem:[#allocation2 + $0x164] ss:$28 sps:$4 sm:$0xff]  }
  0xbc   : > { %1111 = vmatpush1.bf16.msra.mxu1 %v11934_v11  ;;  %1142 = vmatprep.mubr.bf16.mxu1 %v13565_v0 }
  0xbd   : > { %10362 = vmatprep.subr.msk.bf16.mxu1 %vm416_vm0, %v11940_v13  ;;  %1195 = vmatprep.mubr.bf16.mxu0 %v13565_v0 }
  0xc0   : > { %1113 = vmatpush1.bf16.msra.mxu1 %v1043_v7 }
  0xc1   : > { %11472 = vmatprep.subr.bf16.mxu1 %v11946_v15 }
  0xc3   : > { %10363 = vmatmul.mubr.msk.bf16.vlgmr.msra.gmra.mrb[8].mxu1 %vm409_vm2, %v964_v8  ;;  %10366 = vmatmul.mubr.msk.bf16.vlgmr.msra.gmra.mrb[0].mxu0 %vm409_vm2, %v964_v8 }
  0xc4   : > { %1411 = vmatpush1.bf16.msra.mxu0 %v11943_v16  ;;  %1152 = vmatprep.mubr.bf16.mxu1 %v13565_v0 }
  0xc5   : > { %1205 = vmatprep.mubr.bf16.mxu0 %v13565_v0  ;;  %10384 = vmatprep.subr.msk.bf16.mxu0 %vm416_vm0, %v11947_v17 }
  0xc6   : > { %11473 = vmatpush3.bf16.msra.mxu1 %v11946_v15 }
  0xc7   : > { %11718 = vmatprep.subr.msk.bf16.mxu1 %vm416_vm0, %v11950_v19 }
  0xc8   : > { %1413 = vmatpush1.bf16.msra.mxu0 %v1390_v20 }
  0xc9   : > { %1516 = vmatprep.subr.bf16.mxu0 %v11956_v12 }
  0xca   : > { %11475 = vmatpush3.bf16.msra.mxu1 %v1055_v21 }
  0xcb   : > { %10364 = vmatmul.mubr.msk.bf16.gmra.mrb[12].mxu1 %vm409_vm2, %v13810_v1  ;;  %10367 = vmatmul.mubr.msk.bf16.gmra.mrb[4].mxu0 %vm409_vm2, %v13810_v1 }
  0xcc   : > { %11476 = vmatprep.mubr.msk.bf16.mxu1 %vm409_vm2, %v964_v8  ;;  %1442 = vmatprep.mubr.bf16.mxu0 %v13565_v0 }
  0xcd   : > { %1463 = vmatprep.subr.bf16.mxu1 %v11953_v22 }
  0xd3   : > { %11477 = vmatmul.mubr.msk.bf16.vlgmr.msra.gmra.mrb[16].mxu1 %vm409_vm2, %v13810_v1  ;;  %10385 = vmatmul.mubr.msk.bf16.vlgmr.msra.gmra.mrb[8].mxu0 %vm409_vm2, %v13759_v35 }
  0xd4   : > { %1464 = vmatpush1.bf16.msra.mxu1 %v11951_v23  ;;  %1517 = vmatpush1.bf16.msra.mxu0 %v11954_v24 }
  0xd5   : > { %10387 = vmatprep.subr.msk.bf16.mxu1 %vm416_vm0, %v11957_v25  ;;  %1452 = vmatprep.mubr.bf16.mxu0 %v13565_v0 }
  0xd6   : > { %1495 = vmatprep.mubr.bf16.mxu1 %v13565_v0  ;;  %10390 = vmatprep.subr.msk.bf16.mxu0 %vm416_vm0, %v11960_v28 }
  0xd8   : > { %1466 = vmatpush1.bf16.msra.mxu1 %v1396_v32  ;;  %1519 = vmatpush1.bf16.msra.mxu0 %v1402_v33 }
  0xd9   : > { %11480 = vmatprep.subr.bf16.mxu1 %v11963_v30  ;;  %1759 = vmatprep.subr.bf16.mxu0 %v11966_v31 }
  0xdb   : > { %10386 = vmatmul.mubr.msk.bf16.gmra.mrb[12].mxu0 %vm409_vm2, %v13752_v29  ;;  %10388 = vmatmul.mubr.msk.bf16.vlgmr.msra.gmra.mrb[8].mxu1 %vm409_vm2, %v13759_v35 }
  0xdc   : > { %1505 = vmatprep.mubr.bf16.mxu1 %v13565_v0  ;;  %1548 = vmatprep.mubr.bf16.mxu0 %v13565_v0 }
  0xdd   : > { %11481 = vmatpush3.bf16.msra.mxu1 %v11963_v30 }
  0xde   : > { %11719 = vmatprep.subr.msk.bf16.mxu1 %vm416_vm0, %v11967_v34 }
  0xe1   : > { %11483 = vmatpush3.bf16.msra.mxu1 %v1408_v38 }
  0xe2   : > { %1812 = vmatprep.subr.bf16.mxu1 %v11972_v36 }
  0xe3   : > { %10389 = vmatmul.mubr.msk.bf16.gmra.mrb[12].mxu1 %vm409_vm2, %v13752_v29  ;;  %10391 = vmatmul.mubr.msk.bf16.vlgmr.msra.gmra.mrb[0].mxu0 %vm409_vm2, %v13759_v35 }
  0xe4   : > { %1760 = vmatpush1.bf16.msra.mxu0 %v11964_v37  ;;  %1558 = vmatprep.mubr.bf16.mxu0 %v13565_v0 }
  0xe5   : > { %11484 = vmatprep.mubr.msk.bf16.mxu1 %vm409_vm2, %v13759_v35  ;;  %10409 = vmatprep.subr.msk.bf16.mxu0 %vm416_vm0, %v11968_v39  ;;  %v1745_v35 = vsel %vm416_vm0, %v11976_v46, 0 }
  0xe8   : > { %1762 = vmatpush1.bf16.msra.mxu0 %v1739_v42 }
  0xe9   : > { %1865 = vmatprep.subr.bf16.mxu0 %v11979_v41 }
  0xeb   : > { %10392 = vmatmul.mubr.msk.bf16.gmra.mrb[4].mxu0 %vm409_vm2, %v13752_v29  ;;  %11485 = vmatmul.mubr.msk.bf16.vlgmr.msra.gmra.mrb[16].mxu1 %vm409_vm2, %v13752_v29  ;;  %v1751_v29 = vsel %vm416_vm0, %v11983_v51, 0 }
  0xec   : > { %1813 = vmatpush1.bf16.msra.mxu1 %v11970_v43  ;;  %1791 = vmatprep.mubr.bf16.mxu0 %v13565_v0 }
  0xed   : > { %10412 = vmatprep.subr.msk.bf16.mxu1 %vm416_vm0, %v11974_v44  ;;  %1844 = vmatprep.mubr.bf16.mxu1 %v13565_v0 }
  0xf0   : > { %1815 = vmatpush1.bf16.msra.mxu1 %v1745_v35 }
  0xf1   : > { %11488 = vmatprep.subr.bf16.mxu1 %v11982_v48 }
  0xf3   : > { %10410 = vmatmul.mubr.msk.bf16.vlgmr.msra.gmra.mrb[8].mxu0 %vm409_vm2, %v13781_v47  ;;  %10413 = vmatmul.mubr.msk.bf16.vlgmr.msra.gmra.mrb[8].mxu1 %vm409_vm2, %v13781_v47 }
  0xf4   : > { %1866 = vmatpush1.bf16.msra.mxu0 %v11977_v49  ;;  %1801 = vmatprep.mubr.bf16.mxu0 %v13565_v0 }
  0xf5   : > { %1854 = vmatprep.mubr.bf16.mxu1 %v13565_v0  ;;  %10415 = vmatprep.subr.msk.bf16.mxu0 %vm416_vm0, %v11980_v50 }
  0xf6   : > { %11489 = vmatpush3.bf16.msra.mxu1 %v11982_v48 }
  0xf7   : > { %11720 = vmatprep.subr.msk.bf16.mxu1 %vm416_vm0, %v11984_v52 }
  0xf8   : > { %1868 = vmatpush1.bf16.msra.mxu0 %v1751_v29 }
  0xfa   : > { %11491 = vmatpush3.bf16.msra.mxu1 %v1757_v53 }
  0xfb   : > { %10411 = vmatmul.mubr.msk.bf16.gmra.mrb[12].mxu0 %vm409_vm2, %v13773_v45  ;;  %10414 = vmatmul.mubr.msk.bf16.gmra.mrb[12].mxu1 %vm409_vm2, %v13773_v45 }
  0xfc   : > { %1897 = vmatprep.mubr.bf16.mxu0 %v13565_v0  ;;  %11492 = vmatprep.mubr.msk.bf16.mxu1 %vm409_vm2, %v13781_v47 }
 0x103   : > { %10416 = vmatmul.mubr.msk.bf16.vlgmr.msra.gmra.mrb[0].mxu0 %vm409_vm2, %v13781_v47  ;;  %11493 = vmatmul.mubr.msk.bf16.vlgmr.msra.gmra.mrb[16].mxu1 %vm409_vm2, %v13773_v45  ;;  %v1997_v47 = vlaneseq }
 0x104   : > { %1907 = vmatprep.mubr.bf16.mxu0 %v13565_v0 }
 0x105   : > { %v13913_v62 = vshrl.u32 %v1997_v47, 7 }
 0x107   : > { %14840 = vst [vmem:[#allocation12_spill] sm:$0xff] %v13913_v62  ;;  %v14822_v0 = vsub.s32 2, %v13913_v62  ;;  %v14824_v1 = vsub.s32 0, %v13913_v62  ;;  %v14823_v2 = vsub.s32 1, %v13913_v62  ;;  %v14820_v5 = vsub.s32 4, %v13913_v62 }
 0x108   : > { %v2023_v6 = vsub.s32 6, %v13913_v62  ;;  %v14819_v16 = vsub.s32 5, %v13913_v62 }
 0x109   : > { %v13924_v3 = vrot.slane %v13915_v63, %v14822_v0  ;;  %v13936_v8 = vrot.slane %v13915_v63, %v14824_v1  ;;  %v13941_v11 = vrot.slane %v13915_v63, %v14823_v2  ;;  %v13949_v20 = vrot.slane %v13915_v63, %v14820_v5 }
 0x10a   : > { %v13952_v21 = vrot.slane %v13915_v63, %v2023_v6 }
 0x10b   : > { %10417 = vmatmul.mubr.msk.bf16.gmra.mrb[4].mxu0 %vm409_vm2, %v13773_v45  ;;  %v14821_v45 = vsub.s32 3, %v13913_v62  ;;  %vm14782_vm2 = vmand %vm2434_vm8, %vm10166_vm15 }
 0x10d   : > { %v13929_v4 = vrot.slane %v13915_v63, %v14821_v45 }
 0x156   : > { %v472_v54 = vpop.f32.mrb[0].mxu1 }
 0x157   : > { %v474_v55 = vpop.f32.mrb[1].mxu1 }
 0x158   : > { %v476_v56 = vpop.f32.mrb[2].mxu1 }
 0x159   : > { %v478_v57 = vpop.f32.mrb[3].mxu1 }
 0x15e   : > { %v13905_v58 = vpop.f32.mrb[4].mxu1 }
 0x15f   : > { %v13907_v59 = vpop.f32.mrb[5].mxu1 }
 0x160   : > { %v13909_v60 = vpop.f32.mrb[6].mxu1 }
 0x161   : > { %v13911_v61 = vpop.f32.mrb[7].mxu1 }
 0x1c6   : > { %v1793_v9 = vpop.f32.mrb[8].mxu0  ;;  %v1846_v10 = vpop.f32.mrb[8].mxu1 }
 0x1c7   : > { %v11496_v13 = vadd.f32 %v1793_v9, %v472_v54  ;;  %v2034_v14 = vadd.f32 %v13924_v3, %v1846_v10  ;;  %v1795_v15 = vpop.f32.mrb[9].mxu0  ;;  %v1848_v7 = vpop.f32.mrb[9].mxu1 }
 0x1c8   : > { %v11497_v17 = vadd.f32 %v1795_v15, %v474_v55  ;;  %v2035_v18 = vadd.f32 %v13929_v4, %v1848_v7  ;;  %v1797_v19 = vpop.f32.mrb[10].mxu0  ;;  %v1850_v12 = vpop.f32.mrb[10].mxu1 }
 0x1c9   : > { %v2032_v22 = vadd.f32 %v11496_v13, %v13936_v8  ;;  %v2062_v23 = vmax.f32 %v2034_v14, 0.0  ;;  %v11498_v24 = vadd.f32 %v1797_v19, %v476_v56  ;;  %v2041_v25 = vadd.f32 %v13924_v3, %v1850_v12  ;;  %v1799_v26 = vpop.f32.mrb[11].mxu0  ;;  %v1852_v27 = vpop.f32.mrb[11].mxu1 }
 0x1ca   : > { %v2033_v28 = vadd.f32 %v11497_v17, %v13941_v11  ;;  %v2063_v30 = vmax.f32 %v2035_v18, 0.0  ;;  %v11499_v31 = vadd.f32 %v1799_v26, %v478_v57  ;;  %v2042_v32 = vadd.f32 %v13929_v4, %v1852_v27 }
 0x1cb   : > { %v2060_v33 = vmax.f32 %v2032_v22, 0.0  ;;  %v2097_v34 = vrot.slane %v2062_v23, 1  ;;  %v2039_v36 = vadd.f32 %v11498_v24, %v13936_v8  ;;  %v13959_v37 = vmax.f32 %v2041_v25, 0.0 }
 0x1cc   : > { %v2061_v38 = vmax.f32 %v2033_v28, 0.0  ;;  %v2098_v39 = vrot.slane %v2063_v30, 1  ;;  %v2040_v40 = vadd.f32 %v11499_v31, %v13941_v11  ;;  %v13962_v41 = vmax.f32 %v2042_v32, 0.0 }
 0x1cd   : > { %v2095_v42 = vrot.slane %v2060_v33, 1  ;;  %v13964_v43 = vmax.f32 %v2062_v23, %v2097_v34  ;;  %v13966_v44 = vmax.f32 %v2039_v36, 0.0  ;;  %v2125_v46 = vrot.slane %v13959_v37, 1 }
 0x1ce   : > { %v2096_v48 = vrot.slane %v2061_v38, 1  ;;  %v2112_v35 = vmax.f32 %v2063_v30, %v2098_v39  ;;  %v13969_v49 = vmax.f32 %v2040_v40, 0.0  ;;  %v2126_v50 = vrot.slane %v13962_v41, 1  ;;  %v1803_v51 = vpop.f32.mrb[12].mxu0  ;;  %v1856_v52 = vpop.f32.mrb[12].mxu1 }
 0x1cf   : > { %v13972_v29 = vmax.f32 %v2060_v33, %v2095_v42  ;;  %v2223_v53 = vrot.slane %v13964_v43, 1  ;;  %v2413_v55 = vsel %vm2410_vm5, %v2062_v23, %v13964_v43  ;;  %v1805_v56 = vpop.f32.mrb[13].mxu0  ;;  %v1858_v57 = vpop.f32.mrb[13].mxu1  ;;  %v13988_v12 = vrot.slane %v13915_v63, %v14819_v16 }
 0x1d0   : > { %v13978_v47 = vmax.f32 %v2061_v38, %v2096_v48  ;;  %v2224_v6 = vrot.slane %v2112_v35, 1  ;;  %v2238_v9 = vrot.slane %v2112_v35, 2  ;;  %v2414_v10 = vsel %vm2410_vm5, %v2063_v30, %v2112_v35  ;;  %v1807_v13 = vpop.f32.mrb[14].mxu0  ;;  %v1860_v14 = vpop.f32.mrb[14].mxu1 }
 0x1d1   : > { %v2221_v15 = vrot.slane %v13972_v29, 1  ;;  %v2411_v17 = vsel %vm2410_vm5, %v2060_v33, %v13972_v29  ;;  %v1809_v18 = vpop.f32.mrb[15].mxu0  ;;  %v1862_v19 = vpop.f32.mrb[15].mxu1  ;;  %v13991_v22 = vsel %vm2418_vm6, %v2413_v55, %v2223_v53  ;;  %v2123_v31 = vrot.slane %v13966_v44, 1 }
 0x1d2   : > { %v2222_v24 = vrot.slane %v13978_v47, 1  ;;  %v2412_v25 = vsel %vm2410_vm5, %v2061_v38, %v13978_v47  ;;  %v2422_v26 = vsel %vm2418_vm6, %v2414_v10, %v2224_v6  ;;  %v14002_v32 = vmax.f32 %v2062_v23, %v2125_v46 }
 0x1d3   : > { %v13998_v27 = vsel %vm2418_vm6, %v2411_v17, %v2221_v15  ;;  %v2430_v63 = vsel %vm2426_vm7, %v2422_v26, %v2238_v9  ;;  %v14006_v34 = vmax.f32 %v13959_v37, %v2125_v46  ;;  %v2124_v36 = vrot.slane %v13969_v49, 1 }
 0x1d4   : > { %v2140_v39 = vmax.f32 %v2063_v30, %v2126_v50  ;;  %v14010_v40 = vsel %vm2418_vm6, %v2412_v25, %v2222_v24  ;;  %v14012_v42 = vmax.f32 %v2060_v33, %v2123_v31  ;;  %v14015_v48 = vmax.f32 %v13966_v44, %v2123_v31 }
 0x1d5   : > { %v14018_v35 = vmax.f32 %v13962_v41, %v2126_v50  ;;  %v14022_v46 = vmax.f32 %v2061_v38, %v2124_v36  ;;  %v14025_v55 = vmax.f32 %v13969_v49, %v2124_v36  ;;  %v11500_v45 = vadd.f32 %v1803_v51, %v13905_v58 }
 0x1d6   : > { %v14027_v30 = vpop.f32.mrb[0].mxu0  ;;  %v14029_v6 = vpop.f32.mrb[16].mxu1  ;;  %v2259_v10 = vrot.slane %v2140_v39, 3  ;;  %v2048_v1 = vadd.f32 %v13924_v3, %v1856_v52  ;;  %v11501_v26 = vadd.f32 %v1805_v56, %v13907_v59  ;;  %v2049_v38 = vadd.f32 %v13929_v4, %v1858_v57 }
 0x1d7   : > { %v14034_v15 = vpop.f32.mrb[1].mxu0  ;;  %v14036_v17 = vpop.f32.mrb[17].mxu1  ;;  %v11502_v25 = vadd.f32 %v1807_v13, %v13909_v60  ;;  %v2046_v16 = vadd.f32 %v11500_v45, %v13936_v8  ;;  %v2055_v39 = vadd.f32 %v13924_v3, %v1860_v14  ;;  %v14064_v58 = vadd.f32 %v13929_v4, %v1862_v19 }
 0x1d8   : > { %v14042_v31 = vpop.f32.mrb[2].mxu0  ;;  %v14044_v36 = vpop.f32.mrb[18].mxu1  ;;  %v14049_v5 = vsel %vm2434_vm8, %v2430_v63, %v2259_v10  ;;  %v11503_v63 = vadd.f32 %v1809_v18, %v13911_v61  ;;  %v2076_v51 = vmax.f32 %v2048_v1, 0.0  ;;  %v2047_v10 = vadd.f32 %v11501_v26, %v13941_v11 }
 0x1d9   : > { %v14052_v0 = vpop.f32.mrb[3].mxu0  ;;  %v14054_v2 = vpop.f32.mrb[19].mxu1  ;;  %14841 = vst [vmem:[#allocation13_spill] sm:$0xff] %v14064_v58  ;;  %v14067_v9 = vmax.f32 %v2049_v38, 0.0  ;;  %v2053_v59 = vadd.f32 %v11502_v25, %v13936_v8  ;;  %v2074_v56 = vmax.f32 %v2046_v16, 0.0  ;;  %v2083_v60 = vmax.f32 %v2055_v39, 0.0 }
 0x1da   : > { %v2054_v45 = vadd.f32 %v11503_v63, %v13941_v11  ;;  %v2160_v57 = vrot.slane %v2076_v51, 1  ;;  %v2075_v3 = vmax.f32 %v2047_v10, 0.0  ;;  %v14825_v19 = vmax.f32 %v14064_v58, 0.0 }
 0x1db   : > { %v2161_v61 = vrot.slane %v14067_v9, 1  ;;  %v2081_v13 = vmax.f32 %v2053_v59, 0.0  ;;  %v2158_v1 = vrot.slane %v2074_v56, 1  ;;  %v2195_v14 = vrot.slane %v2083_v60, 1 }
 0x1dc   : > { %v14075_v18 = vrot.slane %v2083_v60, 4  ;;  %v2174_v16 = vmax.f32 %v13959_v37, %v2160_v57  ;;  %v14081_v38 = vmax.f32 %v2076_v51, %v2160_v57  ;;  %v2159_v11 = vrot.slane %v2075_v3, 1 }
 0x1dd   : > { %v2175_v25 = vmax.f32 %v13962_v41, %v2161_v61  ;;  %v2172_v39 = vmax.f32 %v13966_v44, %v2158_v1  ;;  %v14087_v63 = vmax.f32 %v2074_v56, %v2158_v1  ;;  %v14090_v10 = vmax.f32 %v14067_v9, %v2161_v61 }
 0x1de   : > { %v14073_v4 = vpop.f32.mrb[4].mxu0  ;;  %v2082_v59 = vmax.f32 %v2054_v45, 0.0  ;;  %v2328_v52 = vrot.slane %v2174_v16, 7  ;;  %v2173_v57 = vmax.f32 %v13969_v49, %v2159_v11  ;;  %v2193_v24 = vrot.slane %v2081_v13, 1 }
 0x1df   : > { %v14078_v8 = vpop.f32.mrb[5].mxu0  ;;  %14842 = vst [vmem:[#allocation14_spill] sm:$0xff] %v14090_v10  ;;  %v2326_v33 = vrot.slane %v2172_v39, 7  ;;  %v14098_v44 = vmax.f32 %v2075_v3, %v2159_v11  ;;  %v2329_v1 = vrot.slane %v2175_v25, 7  ;;  %v2350_v16 = vrot.slane %v14090_v10, 1 }
 0x1e0   : > { %v14084_v26 = vpop.f32.mrb[6].mxu0  ;;  %v14102_v61 = vsel %vm2410_vm5, %v2328_v52, %v14081_v38  ;;  %v2327_v45 = vrot.slane %v2173_v57, 7  ;;  %v2207_v57 = vmax.f32 %v2074_v56, %v2193_v24  ;;  %v14122_v50 = vrot.slane %v2081_v13, 4 }
 0x1e1   : > { %v14092_v60 = vpop.f32.mrb[7].mxu0  ;;  %v14108_v49 = vsel %vm2410_vm5, %v2326_v33, %v14087_v63  ;;  %v2468_v25 = vsel %vm2410_vm5, %v2329_v1, %v14090_v10  ;;  %v2209_v33 = vmax.f32 %v2076_v51, %v2195_v14  ;;  %v2194_v53 = vrot.slane %v2082_v59, 1 }
 0x1e2   : > { %v14114_v11 = vsel %vm2410_vm5, %v2327_v45, %v14098_v44  ;;  %v14120_v7 = vsel %vm2418_vm6, %v2468_v25, %v2350_v16  ;;  %v14124_v39 = vrot.slane %v2207_v57, 3  ;;  %v14126_v41 = vrot.slane %v2082_v59, 4 }
 0x1e3   : > { %14843 = vst [vmem:[#allocation15_spill] sm:$0xff] %v14120_v7  ;;  %v2196_v45 = vrot.slane %v14825_v19, 1  ;;  %v2036_v52 = vadd.f32 %v13949_v20, %v14027_v30  ;;  %v14132_v28 = vrot.slane %v2209_v33, 3  ;;  %v2208_v24 = vmax.f32 %v2075_v3, %v2194_v53 }
 0x1e4   : > { %v2052_v56 = vadd.f32 %v14029_v6, %v13952_v21  ;;  %v2037_v51 = vadd.f32 %v13988_v12, %v14034_v15  ;;  %v2038_v59 = vadd.f32 %v13952_v21, %v14036_v17  ;;  %v2043_v1 = vadd.f32 %v13949_v20, %v14042_v31 }
 0x1e5   : > { %v2210_v13 = vmax.f32 %v14067_v9, %v2196_v45  ;;  %v2064_v14 = vmax.f32 %v2036_v52, 0.0  ;;  %v14143_v16 = vrot.slane %v2208_v24, 3  ;;  %v2059_v53 = vadd.f32 %v14044_v36, %v13952_v21 }
 0x1e6   : > { %v2080_v30 = vmax.f32 %v2052_v56, 0.0  ;;  %v2065_v25 = vmax.f32 %v2037_v51, 0.0  ;;  %v2066_v15 = vmax.f32 %v2038_v59, 0.0  ;;  %v14149_v57 = vmax.f32 %v2043_v1, 0.0 }
 0x1e7   : > { %v14147_v6 = vrot.slane %v2210_v13, 3  ;;  %v2099_v3 = vrot.slane %v2064_v14, 1  ;;  %v2087_v33 = vmax.f32 %v2059_v53, 0.0  ;;  %v2044_v17 = vadd.f32 %v13988_v12, %v14052_v0 }
 0x1e8   : > { %v2164_v9 = vrot.slane %v2080_v30, 1  ;;  %v2100_v52 = vrot.slane %v2065_v25, 1  ;;  %v2101_v45 = vrot.slane %v2066_v15, 1  ;;  %v2127_v24 = vrot.slane %v14149_v57, 1 }
 0x1e9   : > { %14844 = vst [vmem:[#allocation16_spill] sm:$0xff] %v14147_v6  ;;  %v2113_v31 = vmax.f32 %v2064_v14, %v2099_v3  ;;  %v2045_v56 = vadd.f32 %v13952_v21, %v14054_v2  ;;  %v2199_v13 = vrot.slane %v2087_v33, 1  ;;  %v14158_v59 = vrot.slane %v2087_v33, 4 }
 0x1ea   : > { %v14156_v36 = vmax.f32 %v2080_v30, %v2164_v9  ;;  %v2114_v51 = vmax.f32 %v2065_v25, %v2100_v52  ;;  %v2115_v23 = vmax.f32 %v2066_v15, %v2101_v45  ;;  %v14171_v3 = vmax.f32 %v14149_v57, %v2127_v24 }
 0x1eb   : > { %v2225_v1 = vrot.slane %v2113_v31, 1  ;;  %v2239_v19 = vrot.slane %v2113_v31, 2  ;;  %v2415_v53 = vsel %vm2410_vm5, %v2064_v14, %v2113_v31  ;;  %v2141_v31 = vmax.f32 %v2064_v14, %v2127_v24 }
 0x1ec   : > { %v2226_v37 = vrot.slane %v2114_v51, 1  ;;  %v2240_v54 = vrot.slane %v2114_v51, 2  ;;  %v2416_v2 = vsel %vm2410_vm5, %v2065_v25, %v2114_v51  ;;  %v2227_v21 = vrot.slane %v2115_v23, 1 }
 0x1ed   : > { %v2423_v62 = vsel %vm2418_vm6, %v2415_v53, %v2225_v1  ;;  %v2241_v52 = vrot.slane %v2115_v23, 2  ;;  %v2417_v7 = vsel %vm2410_vm5, %v2066_v15, %v2115_v23  ;;  %v2213_v10 = vmax.f32 %v2080_v30, %v2199_v13 }
 0x1ee   : > { %v2431_v33 = vsel %vm2426_vm7, %v2423_v62, %v2239_v19  ;;  %v2424_v6 = vsel %vm2418_vm6, %v2416_v2, %v2226_v37  ;;  %v2425_v0 = vsel %vm2418_vm6, %v2417_v7, %v2227_v21  ;;  %v2260_v51 = vrot.slane %v2141_v31, 3 }
 0x1ef   : > { %v2432_v45 = vsel %vm2426_vm7, %v2424_v6, %v2240_v54  ;;  %v14174_v1 = vsel %vm2426_vm7, %v2425_v0, %v2241_v52  ;;  %v2072_v53 = vmax.f32 %v2044_v17, 0.0  ;;  %v2073_v58 = vmax.f32 %v2045_v56, 0.0 }
 0x1f0   : > { %v2281_v62 = vrot.slane %v14171_v3, 4  ;;  %v2295_v19 = vrot.slane %v14171_v3, 5  ;;  %v14179_v37 = vrot.slane %v2213_v10, 3  ;;  %v14182_v54 = vsel %vm2434_vm8, %v2431_v33, %v2260_v51 }
 0x1f1   : > { %v2128_v7 = vrot.slane %v2072_v53, 1  ;;  %v2129_v14 = vrot.slane %v2073_v58, 1  ;;  %v2178_v30 = vmax.f32 %v2073_v58, %v2164_v9  ;;  %v2050_v6 = vadd.f32 %v13949_v20, %v14073_v4 }
 0x1f2   : > { %v2051_v17 = vadd.f32 %v13988_v12, %v14078_v8  ;;  %v2057_v24 = vadd.f32 %v13949_v20, %v14084_v26  ;;  %v2307_v56 = vrot.slane %v14006_v34, 6 }
 0x1f3   : > { %v2142_v10 = vmax.f32 %v2065_v25, %v2128_v7  ;;  %v14191_v13 = vmax.f32 %v2072_v53, %v2128_v7  ;;  %v14193_v0 = vmax.f32 %v2066_v15, %v2129_v14  ;;  %v14195_v2 = vmax.f32 %v2073_v58, %v2129_v14 }
 0x1f4   : > { %v2332_v9 = vrot.slane %v2178_v30, 7  ;;  %v2078_v21 = vmax.f32 %v2050_v6, 0.0  ;;  %v2079_v52 = vmax.f32 %v2051_v17, 0.0  ;;  %v2085_v33 = vmax.f32 %v2057_v24, 0.0 }
 0x1f5   : > { %v2261_v4 = vrot.slane %v2142_v10, 3  ;;  %v2262_v26 = vrot.slane %v14193_v0, 3  ;;  %v2283_v25 = vrot.slane %v14195_v2, 4  ;;  %v2297_v15 = vrot.slane %v14195_v2, 5 }
 0x1f6   : > { %v14205_v58 = vsel %vm2410_vm5, %v2332_v9, %v14156_v36  ;;  %v2162_v7 = vrot.slane %v2078_v21, 1  ;;  %v2163_v14 = vrot.slane %v2079_v52, 1  ;;  %v2197_v30 = vrot.slane %v2085_v33, 1 }
 0x1f7   : > { %v14208_v51 = vsel %vm2434_vm8, %v2432_v45, %v2261_v4  ;;  %v14210_v6 = vrot.slane %v2085_v33, 4  ;;  %v14845_v17 = vrot.slane %v13964_v43, 2  ;;  %v14846_v10 = vrot.slane %v14081_v38, 1 }
 0x1f8   : > { %v2058_v9 = vadd.f32 %v13988_v12, %v14092_v60  ;;  %v2176_v45 = vmax.f32 %v14149_v57, %v2162_v7  ;;  %v14223_v4 = vmax.f32 %v2078_v21, %v2162_v7  ;;  %v2177_v8 = vmax.f32 %v2072_v53, %v2163_v14 }
 0x1f9   : > { %v2429_v24 = vsel %vm2426_vm7, %v13991_v22, %v14845_v17  ;;  %v2474_v20 = vsel %vm2418_vm6, %v14102_v61, %v14846_v10  ;;  %v14225_v33 = vmax.f32 %v2079_v52, %v2163_v14  ;;  %v2211_v31 = vmax.f32 %v2078_v21, %v2197_v30 }
 0x1fa   : > { %v14847_v43 = vrot.slane %v14002_v32, 3  ;;  %v14848_v17 = vrot.slane %v14081_v38, 2  ;;  %v2086_v61 = vmax.f32 %v2058_v9, 0.0  ;;  %v2330_v10 = vrot.slane %v2176_v45, 7 }
 0x1fb   : > { %v2351_v12 = vrot.slane %v14223_v4, 1  ;;  %v2365_v60 = vrot.slane %v14223_v4, 2  ;;  %v2331_v57 = vrot.slane %v2177_v8, 7  ;;  %v2352_v53 = vrot.slane %v14225_v33, 1 }
 0x1fc   : > { %v2437_v22 = vsel %vm2434_vm8, %v2429_v24, %v14847_v43  ;;  %v2481_v23 = vsel %vm2426_vm7, %v2474_v20, %v14848_v17  ;;  %v2366_v7 = vrot.slane %v14225_v33, 2  ;;  %v2386_v21 = vrot.slane %v2211_v31, 3 }
 0x1fd   : > { %v14849_v32 = vrot.slane %v14006_v34, 4  ;;  %v2469_v38 = vsel %vm2410_vm5, %v2330_v10, %v14223_v4  ;;  %v2470_v20 = vsel %vm2410_vm5, %v2331_v57, %v14225_v33  ;;  %v14850_v30 = vrot.slane %v14006_v34, 5 }
 0x1fe   : > { %v2488_v8 = vsel %vm2434_vm8, %v2481_v23, %v14132_v28  ;;  %v2476_v9 = vsel %vm2418_vm6, %v2469_v38, %v2351_v12  ;;  %v2477_v31 = vsel %vm2418_vm6, %v2470_v20, %v2352_v53  ;;  %v2198_v34 = vrot.slane %v2086_v61, 1 }
 0x1ff   : > { %v2445_v14 = vsel %vm2442_vm9, %v2437_v22, %v14849_v32  ;;  %v14256_v4 = vsel %vm2442_vm9, %v2488_v8, %v14075_v18  ;;  %v2401_v43 = vrot.slane %v2086_v61, 4  ;;  %v2305_v22 = vrot.slane %v14015_v48, 6 }
 0x200   : > { %v2453_v24 = vsel %vm1663_vm4, %v2445_v14, %v14850_v30  ;;  %v14851_v28 = vrot.slane %v13972_v29, 2  ;;  %v14852_v17 = vrot.slane %v14087_v63, 1  ;;  %v2306_v18 = vrot.slane %v14025_v55, 6 }
 0x201   : > { %v14252_v45 = vsel %vm416_vm0, %v2453_v24, %v2307_v56  ;;  %v14853_v10 = vrot.slane %v13978_v47, 2  ;;  %v2212_v61 = vmax.f32 %v2079_v52, %v2198_v34  ;;  %v14854_v29 = vrot.slane %v14012_v42, 3 }
 0x202   : > { %v11778_v33 = vpack.i.bf16 %v14256_v4, %v14252_v45  ;;  %v2427_v23 = vsel %vm2426_vm7, %v13998_v27, %v14851_v28  ;;  %v2472_v56 = vsel %vm2418_vm6, %v14108_v49, %v14852_v17  ;;  %v14855_v57 = vrot.slane %v14087_v63, 2 }
 0x203   : > { %v2428_v12 = vsel %vm2426_vm7, %v14010_v40, %v14853_v10  ;;  %v2435_v27 = vsel %vm2434_vm8, %v2427_v23, %v14854_v29  ;;  %v14856_v49 = vrot.slane %v14022_v46, 3  ;;  %v14857_v47 = vrot.slane %v14015_v48, 4 }
 0x204   : > { %11779 = vrot.lane.b32.xlu0 %v11778_v33, %s13566_s14  ;;  %v2479_v53 = vsel %vm2426_vm7, %v2472_v56, %v14855_v57  ;;  %v14858_v52 = vrot.slane %v14025_v55, 4  ;;  %v14859_v38 = vrot.slane %v14098_v44, 1  ;;  %v2387_v20 = vrot.slane %v2212_v61, 3 }
 0x205   : > { %v2436_v32 = vsel %vm2434_vm8, %v2428_v12, %v14856_v49  ;;  %v2443_v40 = vsel %vm2442_vm9, %v2435_v27, %v14857_v47  ;;  %v2486_v14 = vsel %vm2434_vm8, %v2479_v53, %v14124_v39  ;;  %v14860_v46 = vrot.slane %v14015_v48, 5  ;;  %v14871_v27 = vld [vmem:[#allocation13_spill] sm:$0xff] }
 0x206   : > { %v2444_v42 = vsel %vm2442_vm9, %v2436_v32, %v14858_v52  ;;  %v2473_v63 = vsel %vm2418_vm6, %v14114_v11, %v14859_v38  ;;  %v14301_v24 = vsel %vm2442_vm9, %v2486_v14, %v14122_v50  ;;  %v14861_v39 = vrot.slane %v14025_v55, 5  ;;  %v14874_v32 = vld [vmem:[#allocation14_spill] sm:$0xff]  ;;  %v14877_v52 = vld [vmem:[#allocation16_spill] sm:$0xff] }
 0x207   : > { %v2451_v30 = vsel %vm1663_vm4, %v2443_v40, %v14860_v46  ;;  %v14862_v11 = vrot.slane %v14098_v44, 2  ;;  %v2311_v28 = vrot.slane %v14195_v2, 6  ;;  %v14863_v23 = vrot.slane %v14156_v36, 1  ;;  %v14876_v40 = vld [vmem:[#allocation15_spill] sm:$0xff]  ;;  %v11990_v46 = vld [vmem:[#allocation6 + $0x634] ss:$24 sps:$4 sm:$0xff]  }
 0x208   : > { %v2452_v8 = vsel %vm1663_vm4, %v2444_v42, %v14861_v39  ;;  %v14307_v33 = vsel %vm416_vm0, %v2451_v30, %v2305_v22  ;;  %v2441_v22 = vsel %vm2434_vm8, %v14174_v1, %v2262_v26  ;;  %v2447_v1 = vsel %vm2442_vm9, %v14182_v54, %v2281_v62  ;;  %v11997_v30 = vld [vmem:[#allocation6 + $0x300] ss:$24 sps:$4 sm:$0xff]   ;;  %v11988_v39 = vld [vmem:[#allocation6 + $0x630] ss:$24 sps:$4 sm:$0xff]  }
 0x209   : > { %v14310_v34 = vsel %vm416_vm0, %v2452_v8, %v2306_v18  ;;  %v2480_v48 = vsel %vm2426_vm7, %v2473_v63, %v14862_v11  ;;  %v11783_v50 = vpack.i.bf16 %v14301_v24, %v14307_v33  ;;  %v2478_v44 = vsel %vm2418_vm6, %v14205_v58, %v14863_v23  ;;  %v11985_v63 = vld [vmem:[#allocation6 + $0x600] ss:$24 sps:$4 sm:$0xff]   ;;  %v11999_v8 = vld [vmem:[#allocation6 + $0x304] ss:$24 sps:$4 sm:$0xff]   ;;  %v11996_v23 = vld [vmem:[#allocation6 + $0x694] ss:$24 sps:$4 sm:$0xff]  }
 0x20a   : > { %v2487_v55 = vsel %vm2434_vm8, %v2480_v48, %v14143_v16  ;;  %v2449_v56 = vsel %vm2442_vm9, %v2441_v22, %v2283_v25  ;;  %v14864_v16 = vrot.slane %v14156_v36, 2  ;;  %v2455_v36 = vsel %vm1663_vm4, %v2447_v1, %v2295_v19  ;;  %v11993_v11 = vld [vmem:[#allocation6 + $0x664] ss:$24 sps:$4 sm:$0xff]   ;;  %v12005_v48 = vld [vmem:[#allocation6 + $0x334] ss:$24 sps:$4 sm:$0xff]   ;;  %5369 = vmatprep.subr.bf16.mxu1 %v11999_v8 }
 0x20b   : > { %v14330_v17 = vsel %vm2442_vm9, %v2487_v55, %v14126_v41  ;;  %11784 = vrot.lane.b32.xlu1 %v11783_v50, %s13566_s14  ;;  %v2457_v41 = vsel %vm1663_vm4, %v2449_v56, %v2297_v15  ;;  %v14865_v54 = vrot.slane %v14171_v3, 6  ;;  %v2483_v2 = vsel %vm2426_vm7, %v2476_v9, %v2365_v60  ;;  %5370 = vmatpush1.bf16.msra.mxu1 %v11997_v30  ;;  %v11991_v55 = vld [vmem:[#allocation6 + $0x660] ss:$24 sps:$4 sm:$0xff]   ;;  %v12011_v22 = vld [vmem:[#allocation6 + $0x364] ss:$24 sps:$4 sm:$0xff]  }
 0x20c   : > { %v2485_v0 = vsel %vm2426_vm7, %v2478_v44, %v14864_v16  ;;  %v11788_v26 = vpack.i.bf16 %v14330_v17, %v14310_v34  ;;  %v2464_v58 = vsel %vm416_vm0, %v2457_v41, %v2311_v28  ;;  %v14866_v19 = vrot.slane %v14191_v13, 4  ;;  %v12003_v28 = vld [vmem:[#allocation6 + $0x330] ss:$24 sps:$4 sm:$0xff]   ;;  %5371 = vmatprep.subr.bf16.mxu1 %v12005_v48  ;;  %v12009_v44 = vld [vmem:[#allocation6 + $0x360] ss:$24 sps:$4 sm:$0xff]  }
 0x20d   : > { %v2492_v25 = vsel %vm2434_vm8, %v2485_v0, %v14179_v37  ;;  %v14359_v18 = vsel %vm416_vm0, %v2455_v36, %v14865_v54  ;;  %v2490_v37 = vsel %vm2434_vm8, %v2483_v2, %v2386_v21  ;;  %v14867_v12 = vrot.slane %v14191_v13, 5  ;;  %v11994_v56 = vld [vmem:[#allocation6 + $0x690] ss:$24 sps:$4 sm:$0xff]   ;;  %v12002_v16 = vld [vmem:[#allocation6 + $0x6c4] ss:$24 sps:$4 sm:$0xff]  }
 0x20e   : > { %v2499_v62 = vsel %vm2442_vm9, %v2492_v25, %v14158_v59  ;;  %11789 = vrot.lane.b32.xlu0 %v11788_v26, %s13566_s14  ;;  %v2448_v10 = vsel %vm2442_vm9, %v14208_v51, %v14866_v19  ;;  %v2484_v59 = vsel %vm2426_vm7, %v2477_v31, %v2366_v7  ;;  %v14373_v3 = vsel %vm2442_vm9, %v2490_v37, %v14210_v6  ;;  %v12015_v0 = vld [vmem:[#allocation6 + $0x390] ss:$24 sps:$4 sm:$0xff]   ;;  %v12000_v1 = vld [vmem:[#allocation6 + $0x6c0] ss:$24 sps:$4 sm:$0xff]   ;;  %v12023_v26 = vld [vmem:[#allocation6 + $0x3c4] ss:$24 sps:$4 sm:$0xff]  }
 0x20f   : > { %v14363_v15 = vpack.i.bf16 %v2499_v62, %v2464_v58  ;;  %v2456_v60 = vsel %vm1663_vm4, %v2448_v10, %v14867_v12  ;;  %v2491_v9 = vsel %vm2434_vm8, %v2484_v59, %v2387_v20  ;;  %v14868_v61 = vrot.slane %v14018_v35, 4  ;;  %v11987_v20 = vld [vmem:[#allocation6 + $0x604] ss:$24 sps:$4 sm:$0xff]   ;;  %5372 = vmatpush1.bf16.msra.mxu1 %v12003_v28  ;;  %v12008_v41 = vld [vmem:[#allocation6 + $0x6f4] ss:$24 sps:$4 sm:$0xff]  }
 0x210   : > { %v14869_v29 = vrot.slane %v14191_v13, 6  ;;  %v14389_v7 = vsel %vm2442_vm9, %v2491_v9, %v2401_v43  ;;  %v14870_v6 = vrot.slane %v14018_v35, 5  ;;  %v14872_v57 = vmax.f32 %v14871_v27, 0.0  ;;  %4108 = vmatprep.subr.bf16.mxu0 %v11987_v20  ;;  %5373 = vmatprep.subr.bf16.mxu1 %v12011_v22  ;;  %v12021_v25 = vld [vmem:[#allocation6 + $0x3c0] ss:$24 sps:$4 sm:$0xff]  }
 0x211   : > { %v2446_v21 = vsel %vm2442_vm9, %v14049_v5, %v14868_v61  ;;  %v14873_v5 = vrot.slane %v14018_v35, 6  ;;  %v14875_v47 = vrot.slane %v14874_v32, 2  ;;  %v11808_v14 = vpack.i.bf16 %v14373_v3, %v14359_v18  ;;  %4109 = vmatpush1.bf16.msra.mxu0 %v11985_v63  ;;  %v12006_v36 = vld [vmem:[#allocation6 + $0x6f0] ss:$24 sps:$4 sm:$0xff]   ;;  %v12029_v58 = vld [vmem:[#allocation6 + $0x3f4] ss:$24 sps:$4 sm:$0xff]  }
 0x212   : > { %v14386_v51 = vsel %vm416_vm0, %v2456_v60, %v14869_v29  ;;  %v2454_v31 = vsel %vm1663_vm4, %v2446_v21, %v14870_v6  ;;  %v2399_v53 = vrot.slane %v14872_v57, 4  ;;  %11794 = vrot.lane.b32.xlu0 %v14363_v15, %s13566_s14  ;;  %4110 = vmatprep.subr.bf16.mxu0 %v11990_v46  ;;  %v12014_v62 = vld [vmem:[#allocation6 + $0x724] ss:$24 sps:$4 sm:$0xff]   ;;  %v12027_v54 = vld [vmem:[#allocation6 + $0x3f0] ss:$24 sps:$4 sm:$0xff]  }
 0x213   : > { %v11798_v49 = vpack.i.bf16 %v14389_v7, %v14386_v51  ;;  %v14401_v13 = vsel %vm416_vm0, %v2454_v31, %v14873_v5  ;;  %v2482_v43 = vsel %vm2426_vm7, %v14876_v40, %v14875_v47  ;;  %5374 = vmatpush1.bf16.msra.mxu1 %v12009_v44  ;;  %v12012_v2 = vld [vmem:[#allocation6 + $0x720] ss:$24 sps:$4 sm:$0xff]   ;;  %v12035_v37 = vld [vmem:[#allocation6 + $0x424] ss:$24 sps:$4 sm:$0xff]   ;;  %v12020_v19 = vld [vmem:[#allocation6 + $0x754] ss:$24 sps:$4 sm:$0xff]  }
 0x214   : > { %v2489_v42 = vsel %vm2434_vm8, %v2482_v43, %v14877_v52  ;;  %v12033_v10 = vld [vmem:[#allocation6 + $0x420] ss:$24 sps:$4 sm:$0xff]   ;;  %v12018_v59 = vld [vmem:[#allocation6 + $0x750] ss:$24 sps:$4 sm:$0xff]   ;;  %v12026_v12 = vld [vmem:[#allocation6 + $0x784] ss:$24 sps:$4 sm:$0xff]  }
 0x215   : > { %11799 = vrot.lane.b32.xlu1 %v11798_v49, %s13566_s14  ;;  %v14415_v35 = vsel %vm2442_vm9, %v2489_v42, %v2399_v53  ;;  %4111 = vmatpush1.bf16.msra.mxu0 %v11988_v39  ;;  %v12024_v60 = vld [vmem:[#allocation6 + $0x780] ss:$24 sps:$4 sm:$0xff]   ;;  %v12032_v9 = vld [vmem:[#allocation6 + $0x7b4] ss:$24 sps:$4 sm:$0xff]   ;;  %v12030_v61 = vld [vmem:[#allocation6 + $0x7b0] ss:$24 sps:$4 sm:$0xff]  }
 0x216   : > { %v11803_v38 = vpack.i.bf16 %v14415_v35, %v14401_v13  ;;  %11809 = vrot.lane.b32.xlu0 %v11808_v14, %s13566_s14  ;;  %4112 = vmatprep.subr.bf16.mxu0 %v11993_v11  ;;  %v12038_v21 = vld [vmem:[#allocation6 + $0x7e4] ss:$24 sps:$4 sm:$0xff]   ;;  %v12036_v29 = vld [vmem:[#allocation6 + $0x7e0] ss:$24 sps:$4 sm:$0xff]   ;;  %v12039_v46 = vld [vmem:[#allocation6 + $0x450] ss:$24 sps:$4 sm:$0xff]  }
 0x217   : > { %v12041_v30 = vld [vmem:[#allocation6 + $0x454] ss:$24 sps:$4 sm:$0xff]   ;;  %v12042_v39 = vld [vmem:[#allocation6 + $0x810] ss:$24 sps:$4 sm:$0xff]   ;;  %v12047_v22 = vld [vmem:[#allocation6 + $0x484] ss:$24 sps:$4 sm:$0xff]  }
 0x218   : > { %v12044_v8 = vld [vmem:[#allocation6 + $0x814] ss:$24 sps:$4 sm:$0xff]  }
 0x219   : > { %11804 = vrot.lane.b32.xlu1 %v11803_v38, %s13566_s14  ;;  %4113 = vmatpush1.bf16.msra.mxu0 %v11991_v55 }
 0x21a   : > { %4114 = vmatprep.subr.bf16.mxu0 %v11996_v23 }
 0x21d   : > { %11814 = vrot.lane.b32.xlu1 %v11783_v50, %s13567_s15  ;;  %v12017_v50 = vld [vmem:[#allocation6 + $0x394] ss:$24 sps:$4 sm:$0xff]   ;;  %4115 = vmatpush1.bf16.msra.mxu0 %v11994_v56 }
 0x21e   : > { %5375 = vmatprep.subr.bf16.mxu1 %v12017_v50  ;;  %4116 = vmatprep.subr.bf16.mxu0 %v12002_v16  ;;  %v12045_v50 = vld [vmem:[#allocation6 + $0x480] ss:$24 sps:$4 sm:$0xff]  }
 0x21f   : > { %5376 = vmatpush1.bf16.msra.mxu1 %v12015_v0  ;;  %v12048_v16 = vld [vmem:[#allocation6 + $0x840] ss:$24 sps:$4 sm:$0xff]   ;;  %v12050_v0 = vld [vmem:[#allocation6 + $0x844] ss:$24 sps:$4 sm:$0xff]  }
 0x220   : > { %5377 = vmatprep.subr.bf16.mxu1 %v12023_v26  ;;  %v12056_v26 = vld [vmem:[#allocation6 + $0x874] ss:$24 sps:$4 sm:$0xff]  }
 0x221   : > { %4117 = vmatpush1.bf16.msra.mxu0 %v12000_v1 }
 0x222   : > { %4118 = vmatprep.subr.bf16.mxu0 %v12008_v41 }
 0x223   : > { %5378 = vmatpush1.bf16.msra.mxu1 %v12021_v25 }
 0x224   : > { %5379 = vmatprep.subr.bf16.mxu1 %v12029_v58 }
 0x225   : > { %4119 = vmatpush1.bf16.msra.mxu0 %v12006_v36 }
 0x226   : > { %4120 = vmatprep.subr.bf16.mxu0 %v12014_v62 }
 0x227   : > { %5380 = vmatpush1.bf16.msra.mxu1 %v12027_v54 }
 0x228   : > { %5381 = vmatprep.subr.bf16.mxu1 %v12035_v37  ;;  %v12054_v37 = vld [vmem:[#allocation6 + $0x870] ss:$24 sps:$4 sm:$0xff]  }
 0x229   : > { %4121 = vmatpush1.bf16.msra.mxu0 %v12012_v2  ;;  %v12051_v2 = vld [vmem:[#allocation6 + $0x4b0] ss:$24 sps:$4 sm:$0xff]  }
 0x22a   : > { %4122 = vmatprep.subr.bf16.mxu0 %v12020_v19 }
 0x22b   : > { %5382 = vmatpush1.bf16.msra.mxu1 %v12033_v10 }
 0x22c   : > { %5383 = vmatprep.subr.bf16.mxu1 %v12041_v30  ;;  %v12075_v30 = vld [vmem:[#allocation6 + $0x570] ss:$24 sps:$4 sm:$0xff]  }
 0x22d   : > { %4123 = vmatpush1.bf16.msra.mxu0 %v12018_v59 }
 0x22e   : > { %4124 = vmatprep.subr.bf16.mxu0 %v12026_v12 }
 0x22f   : > { %5384 = vmatpush1.bf16.msra.mxu1 %v12039_v46  ;;  %v12077_v46 = vld [vmem:[#allocation6 + $0x574] ss:$24 sps:$4 sm:$0xff]  }
 0x230   : > { %5385 = vmatprep.subr.bf16.mxu1 %v12047_v22 }
 0x231   : > { %4125 = vmatpush1.bf16.msra.mxu0 %v12024_v60  ;;  %v12059_v60 = vld [vmem:[#allocation6 + $0x4e4] ss:$24 sps:$4 sm:$0xff]  }
 0x232   : > { %4126 = vmatprep.subr.bf16.mxu0 %v12032_v9 }
 0x233   : > { %5386 = vmatpush1.bf16.msra.mxu1 %v12045_v50 }
 0x235   : > { %4127 = vmatpush1.bf16.msra.mxu0 %v12030_v61 }
 0x236   : > { %4128 = vmatprep.subr.bf16.mxu0 %v12038_v21  ;;  %v12062_v21 = vld [vmem:[#allocation6 + $0x8a4] ss:$24 sps:$4 sm:$0xff]  }
 0x239   : > { %4129 = vmatpush1.bf16.msra.mxu0 %v12036_v29 }
 0x23a   : > { %4130 = vmatprep.subr.bf16.mxu0 %v12044_v8  ;;  %v12081_v8 = vld [vmem:[#allocation6 + $0x5a0] ss:$24 sps:$4 sm:$0xff]  }
 0x23d   : > { %4131 = vmatpush1.bf16.msra.mxu0 %v12042_v39  ;;  %v12083_v39 = vld [vmem:[#allocation6 + $0x5a4] ss:$24 sps:$4 sm:$0xff]  }
 0x23e   : > { %4132 = vmatprep.subr.bf16.mxu0 %v12050_v0 }
 0x241   : > { %4133 = vmatpush1.bf16.msra.mxu0 %v12048_v16 }
 0x242   : > { %4134 = vmatprep.subr.bf16.mxu0 %v12056_v26 }
 0x245   : > { %4135 = vmatpush1.bf16.msra.mxu0 %v12054_v37 }
 0x246   : > { %4136 = vmatprep.subr.bf16.mxu0 %v12062_v21 }
 0x276   : > { %v11780_v6 = vpop.permute.xlu0 %11779 }
 0x277   : > { %v11782_v31 = vunpack.i.h.bf16 %v11780_v6  ;;  %v11781_v27 = vunpack.i.l.bf16 %v11780_v6 }
 0x279   : > { %v2531_v57 = vmax.f32 %v14330_v17, %v11782_v31  ;;  %v2530_v53 = vmax.f32 %v14310_v34, %v11781_v27  ;;  %v2533_v49 = vmax.f32 %v14256_v4, %v11782_v31  ;;  %v2532_v5 = vmax.f32 %v14252_v45, %v11781_v27  ;;  %v12057_v27 = vld [vmem:[#allocation6 + $0x4e0] ss:$24 sps:$4 sm:$0xff]  }
 0x27b   : > { %v11818_v32 = vpack.i.bf16 %v2531_v57, %v2530_v53  ;;  %v11823_v52 = vpack.i.bf16 %v2533_v49, %v2532_v5  ;;  %v12060_v57 = vld [vmem:[#allocation6 + $0x8a0] ss:$24 sps:$4 sm:$0xff]   ;;  %v12065_v5 = vld [vmem:[#allocation6 + $0x514] ss:$24 sps:$4 sm:$0xff]  }
 0x27c   : > { %4137 = vmatpush1.bf16.msra.mxu0 %v12060_v57 }
 0x27d   : > { %v11785_v47 = vpop.permute.xlu1 %11784  ;;  %11819 = vrot.lane.b32.xlu0 %v11818_v32, %s13568_s24 }
 0x27e   : > { %v11787_v40 = vunpack.i.h.bf16 %v11785_v47  ;;  %v11786_v43 = vunpack.i.l.bf16 %v11785_v47  ;;  %v12063_v47 = vld [vmem:[#allocation6 + $0x510] ss:$24 sps:$4 sm:$0xff]  }
 0x280   : > { %v14427_v14 = vpop.permute.xlu0 %11789  ;;  %v2509_v42 = vmax.f32 %v14301_v24, %v11787_v40  ;;  %v2508_v38 = vmax.f32 %v14307_v33, %v11786_v43  ;;  %v12066_v40 = vld [vmem:[#allocation6 + $0x8d0] ss:$24 sps:$4 sm:$0xff]   ;;  %v12071_v43 = vld [vmem:[#allocation6 + $0x544] ss:$24 sps:$4 sm:$0xff]  }
 0x281   : > { %v11792_v63 = vunpack.i.h.bf16 %v14427_v14  ;;  %v11791_v20 = vunpack.i.l.bf16 %v14427_v14  ;;  %11824 = vrot.lane.b32.xlu0 %v11823_v52, %s13567_s15  ;;  %v12074_v52 = vld [vmem:[#allocation6 + $0x904] ss:$24 sps:$4 sm:$0xff]  }
 0x282   : > { %v11833_v28 = vpack.i.bf16 %v2509_v42, %v2508_v38  ;;  %v12069_v38 = vld [vmem:[#allocation6 + $0x540] ss:$24 sps:$4 sm:$0xff]  }
 0x283   : > { %v2521_v11 = vmax.f32 %v14330_v17, %v11792_v63  ;;  %v2520_v48 = vmax.f32 %v14310_v34, %v11791_v20  ;;  %v12053_v17 = vld [vmem:[#allocation6 + $0x4b4] ss:$24 sps:$4 sm:$0xff]   ;;  %v2519_v0 = vmax.f32 %v14301_v24, %v11792_v63 }
 0x284   : > { %v11795_v55 = vpop.permute.xlu0 %11794  ;;  %11834 = vrot.lane.b32.xlu1 %v11833_v28, %s13567_s15  ;;  %5387 = vmatprep.subr.bf16.mxu1 %v12053_v17  ;;  %v12095_v28 = vld [vmem:[#allocation6 + $0x14] ss:$24 sps:$4 sm:$0xff]   ;;  %v2518_v17 = vmax.f32 %v14307_v33, %v11791_v20 }
 0x285   : > { %v11797_v23 = vunpack.i.h.bf16 %v11795_v55  ;;  %v11796_v44 = vunpack.i.l.bf16 %v11795_v55  ;;  %v11838_v41 = vpack.i.bf16 %v2521_v11, %v2520_v48  ;;  %5388 = vmatpush1.bf16.msra.mxu1 %v12051_v2  ;;  %v12089_v11 = vld [vmem:[#allocation6 + $0x5d4] ss:$24 sps:$4 sm:$0xff]   ;;  %v12087_v48 = vld [vmem:[#allocation6 + $0x5d0] ss:$24 sps:$4 sm:$0xff]  }
 0x286   : > { %5389 = vmatprep.subr.bf16.mxu1 %v12059_v60 }
 0x287   : > { %v14440_v56 = vpop.permute.xlu1 %11799  ;;  %v2579_v34 = vmax.f32 %v14389_v7, %v11797_v23  ;;  %v2578_v1 = vmax.f32 %v14386_v51, %v11796_v44 }
 0x288   : > { %v11810_v25 = vpop.permute.xlu0 %11809  ;;  %v11802_v62 = vunpack.i.h.bf16 %v14440_v56  ;;  %11839 = vrot.lane.b32.xlu1 %v11838_v41, %s13566_s14  ;;  %v11801_v19 = vunpack.i.l.bf16 %v14440_v56 }
 0x289   : > { %v11812_v36 = vunpack.i.h.bf16 %v11810_v25  ;;  %v11811_v58 = vunpack.i.l.bf16 %v11810_v25  ;;  %v11843_v10 = vpack.i.bf16 %v2579_v34, %v2578_v1  ;;  %5390 = vmatpush1.bf16.msra.mxu1 %v12057_v27 }
 0x28a   : > { %v2569_v31 = vmax.f32 %v14389_v7, %v11802_v62  ;;  %v2568_v53 = vmax.f32 %v14386_v51, %v11801_v19  ;;  %5391 = vmatprep.subr.bf16.mxu1 %v12065_v5 }
 0x28b   : > { %v14446_v54 = vpop.permute.xlu1 %11804  ;;  %v2555_v9 = vmax.f32 %v14415_v35, %v11812_v36  ;;  %v2554_v61 = vmax.f32 %v14401_v13, %v11811_v58  ;;  %v2557_v32 = vmax.f32 %v14373_v3, %v11812_v36  ;;  %v2556_v7 = vmax.f32 %v14359_v18, %v11811_v58 }
 0x28c   : > { %v11807_v59 = vunpack.i.h.bf16 %v14446_v54  ;;  %v11806_v12 = vunpack.i.l.bf16 %v14446_v54  ;;  %11844 = vrot.lane.b32.xlu1 %v11843_v10, %s13568_s24  ;;  %v11853_v51 = vpack.i.bf16 %v2569_v31, %v2568_v53 }
 0x28d   : > { %v11848_v49 = vpack.i.bf16 %v2555_v9, %v2554_v61  ;;  %v11863_v42 = vpack.i.bf16 %v2557_v32, %v2556_v7  ;;  %5392 = vmatpush1.bf16.msra.mxu1 %v12063_v47  ;;  %v2566_v32 = vmax.f32 %v14359_v18, %v11801_v19 }
 0x28e   : > { %v2545_v29 = vmax.f32 %v14415_v35, %v11807_v59  ;;  %v2544_v6 = vmax.f32 %v14401_v13, %v11806_v12  ;;  %v12068_v13 = vld [vmem:[#allocation6 + $0x8d4] ss:$24 sps:$4 sm:$0xff]   ;;  %5393 = vmatprep.subr.bf16.mxu1 %v12071_v43  ;;  %v2543_v20 = vmax.f32 %v14256_v4, %v11807_v59  ;;  %v2542_v60 = vmax.f32 %v14252_v45, %v11806_v12 }
 0x28f   : > { %4138 = vmatprep.subr.bf16.mxu0 %v12068_v13  ;;  %v11815_v55 = vpop.permute.xlu1 %11814 }
 0x290   : > { %v11828_v35 = vpack.i.bf16 %v2545_v29, %v2544_v6  ;;  %11849 = vrot.lane.b32.xlu1 %v11848_v49, %s13568_s24  ;;  %4139 = vmatpush1.bf16.msra.mxu0 %v12066_v40  ;;  %v11817_v23 = vunpack.i.h.bf16 %v11815_v55  ;;  %v11816_v44 = vunpack.i.l.bf16 %v11815_v55  ;;  %v2567_v49 = vmax.f32 %v14373_v3, %v11802_v62 }
 0x291   : > { %4151 = vmatprep.subr.bf16.mxu0 %v12074_v52  ;;  %5394 = vmatpush1.bf16.msra.mxu1 %v12069_v38 }
 0x292   : > { %11829 = vrot.lane.b32.xlu0 %v11828_v35, %s13566_s14  ;;  %5395 = vmatprep.subr.bf16.mxu1 %v12077_v46  ;;  %v2666_v34 = vsel %vm2664_vm10, 0.0, %v11817_v23  ;;  %v2665_v1 = vsel %vm2664_vm10, 0.0, %v11816_v44 }
 0x294   : > { %11864 = vrot.lane.b32.xlu1 %v11863_v42, %s13567_s15 }
 0x295   : > { %5396 = vmatpush1.bf16.msra.mxu1 %v12075_v30 }
 0x296   : > { %11854 = vrot.lane.b32.xlu0 %v11853_v51, %s13566_s14  ;;  %5397 = vmatprep.subr.bf16.mxu1 %v12083_v39 }
 0x299   : > { %5398 = vmatpush1.bf16.msra.mxu1 %v12081_v8 }
 0x29a   : > { %11859 = vrot.lane.b32.xlu0 %v14363_v15, %s13567_s15  ;;  %5399 = vmatprep.subr.bf16.mxu1 %v12089_v11 }
 0x29d   : > { %5400 = vmatpush1.bf16.msra.mxu1 %v12087_v48 }
 0x29e   : > { %5498 = vmatprep.subr.bf16.mxu1 %v12095_v28 }
 0x2ef   : > { %v11820_v22 = vpop.permute.xlu0 %11819 }
 0x2f0   : > { %v11822_v36 = vunpack.i.h.bf16 %v11820_v22  ;;  %v11821_v58 = vunpack.i.l.bf16 %v11820_v22 }
 0x2f3   : > { %v11825_v25 = vpop.permute.xlu0 %11824 }
 0x2f4   : > { %v11827_v9 = vunpack.i.h.bf16 %v11825_v25  ;;  %v11826_v61 = vunpack.i.l.bf16 %v11825_v25 }
 0x2f6   : > { %v11835_v15 = vpop.permute.xlu1 %11834 }
 0x2f7   : > { %v11837_v50 = vunpack.i.h.bf16 %v11835_v15  ;;  %v11836_v16 = vunpack.i.l.bf16 %v11835_v15 }
 0x2f9   : > { %v2668_v26 = vsel %vm2667_vm11, %v2665_v1, %v11836_v16  ;;  %v2669_v41 = vsel %vm2667_vm11, %v2666_v34, %v11837_v50 }
 0x2fa   : > { %v2671_v2 = vsel %vm2670_vm12, %v2668_v26, %v2518_v17  ;;  %v2672_v37 = vsel %vm2670_vm12, %v2669_v41, %v2519_v0  ;;  %v11840_v24 = vpop.permute.xlu1 %11839 }
 0x2fb   : > { %v2699_v63 = vrot.slane %v2671_v2, 7  ;;  %v2703_v14 = vrot.slane %v2672_v37, 7  ;;  %v11842_v10 = vunpack.i.h.bf16 %v11840_v24  ;;  %v11841_v33 = vunpack.i.l.bf16 %v11840_v24 }
 0x2fd   : > { %v2704_v21 = vsel %vm2410_vm5, %v2699_v63, %v2703_v14  ;;  %v2719_v29 = vsel %vm2410_vm5, 0.0, %v2699_v63  ;;  %v2673_v6 = vsel %vm2664_vm10, %v11841_v33, %v11821_v58  ;;  %v2674_v31 = vsel %vm2664_vm10, %v11842_v10, %v11822_v36  ;;  %v12072_v33 = vld [vmem:[#allocation6 + $0x900] ss:$24 sps:$4 sm:$0xff]  }
 0x2fe   : > { %v2723_v27 = vsel %vm416_vm0, %v2704_v21, 0.0  ;;  %v2675_v57 = vsel %vm2667_vm11, %v2673_v6, %v11826_v61  ;;  %v2676_v4 = vsel %vm2667_vm11, %v2674_v31, %v11827_v9  ;;  %v11845_v59 = vpop.permute.xlu1 %11844  ;;  %v14500_v54 = vpack.c.bf16 %v2704_v21, %v2699_v63  ;;  %v12080_v61 = vld [vmem:[#allocation6 + $0x934] ss:$24 sps:$4 sm:$0xff]  }
 0x2ff   : > { %v14502_v45 = vpack.c.bf16 %v2723_v27, %v2719_v29  ;;  %v2677_v12 = vsel %vm2670_vm12, %v2675_v57, %v2542_v60  ;;  %v2678_v53 = vsel %vm2670_vm12, %v2676_v4, %v2543_v20  ;;  %v11847_v43 = vunpack.i.h.bf16 %v11845_v59 }
 0x300   : > { %v2700_v35 = vrot.slane %v2677_v12, 7  ;;  %v2705_v5 = vrot.slane %v2678_v53, 7  ;;  %v11846_v11 = vunpack.i.l.bf16 %v11845_v59  ;;  %v12078_v12 = vld [vmem:[#allocation6 + $0x930] ss:$24 sps:$4 sm:$0xff]  }
 0x301   : > { %v3117_v47 = vshrl.u32 %v14502_v45, 16  ;;  %v3119_v40 = vshll.u32 %v14502_v45, 16 }
 0x302   : > { %v2706_v51 = vsel %vm2410_vm5, %v2700_v35, %v2705_v5  ;;  %v11850_v52 = vpop.permute.xlu1 %11849  ;;  %v2720_v38 = vsel %vm2410_vm5, 0.0, %v2700_v35 }
 0x303   : > { %v11852_v3 = vunpack.i.h.bf16 %v11850_v52  ;;  %v11851_v62 = vunpack.i.l.bf16 %v11850_v52  ;;  %v2724_v46 = vsel %vm416_vm0, %v2706_v51, 0.0  ;;  %v3121_v30 = vrot.slane %v3119_v40, 1  ;;  %v12101_v52 = vld [vmem:[#allocation6 + $0x44] ss:$24 sps:$4 sm:$0xff]  }
 0x304   : > { %v11830_v13 = vpop.permute.xlu0 %11829  ;;  %v14517_v56 = vpack.c.bf16 %v2724_v46, %v2720_v38  ;;  %v14519_v19 = vpack.c.bf16 %v2706_v51, %v2700_v35  ;;  %v7212_v39 = vrot.slane %v3117_v47, 1  ;;  %v7213_v8 = vrot.slane %v3119_v40, 2  ;;  %v12086_v35 = vld [vmem:[#allocation6 + $0x964] ss:$24 sps:$4 sm:$0xff]   ;;  %v12093_v51 = vld [vmem:[#allocation6 + $0x10] ss:$24 sps:$4 sm:$0xff]  }
 0x305   : > { %v11831_v7 = vunpack.i.l.bf16 %v11830_v13  ;;  %v11832_v42 = vunpack.i.h.bf16 %v11830_v13  ;;  %v14528_v34 = vor.u32 %v3121_v30, %v3117_v47 }
 0x306   : > { %v11865_v22 = vpop.permute.xlu1 %11864  ;;  %v3124_v44 = vshrl.u32 %v14517_v56, 16  ;;  %v3126_v15 = vshll.u32 %v14517_v56, 16  ;;  %v14525_v50 = vor.u32 %v7213_v8, %v7212_v39 }
 0x307   : > { %v2679_v48 = vsel %vm2664_vm10, %v11831_v7, %v11851_v62  ;;  %v2680_v23 = vsel %vm2664_vm10, %v11832_v42, %v11852_v3  ;;  %v11867_v16 = vunpack.i.h.bf16 %v11865_v22  ;;  %v11866_v0 = vunpack.i.l.bf16 %v11865_v22  ;;  %v12084_v3 = vld [vmem:[#allocation6 + $0x960] ss:$24 sps:$4 sm:$0xff]   ;;  %v12092_v62 = vld [vmem:[#allocation6 + $0x994] ss:$24 sps:$4 sm:$0xff]   ;;  %v12090_v22 = vld [vmem:[#allocation6 + $0x990] ss:$24 sps:$4 sm:$0xff]  }
 0x308   : > { %v11855_v18 = vpop.permute.xlu0 %11854  ;;  %v3128_v1 = vrot.slane %v3126_v15, 1  ;;  %v7215_v25 = vrot.slane %v3124_v44, 1  ;;  %v7216_v36 = vrot.slane %v3126_v15, 2 }
 0x309   : > { %v11857_v28 = vunpack.i.h.bf16 %v11855_v18  ;;  %v11856_v55 = vunpack.i.l.bf16 %v11855_v18  ;;  %v2681_v58 = vsel %vm2667_vm11, %v2679_v48, %v11866_v0  ;;  %v2682_v2 = vsel %vm2667_vm11, %v2680_v23, %v11867_v16  ;;  %v12099_v18 = vld [vmem:[#allocation6 + $0x40] ss:$24 sps:$4 sm:$0xff]   ;;  %v12107_v48 = vld [vmem:[#allocation6 + $0x74] ss:$24 sps:$4 sm:$0xff]   ;;  %v12105_v0 = vld [vmem:[#allocation6 + $0x70] ss:$24 sps:$4 sm:$0xff]  }
 0x30a   : > { %v2683_v63 = vsel %vm2670_vm12, %v2681_v58, %v2566_v32  ;;  %v2684_v14 = vsel %vm2670_vm12, %v2682_v2, %v2567_v49  ;;  %v14535_v10 = vor.u32 %v3128_v1, %v3124_v44  ;;  %v14537_v20 = vor.u32 %v7216_v36, %v7215_v25  ;;  %v12098_v44 = vld [vmem:[#allocation6 + $0x9c4] ss:$24 sps:$4 sm:$0xff]   ;;  %v12096_v1 = vld [vmem:[#allocation6 + $0x9c0] ss:$24 sps:$4 sm:$0xff]   ;;  %v12119_v25 = vld [vmem:[#allocation6 + $0xd4] ss:$24 sps:$4 sm:$0xff]  }
 0x30b   : > { %v2685_v17 = vsel %vm2664_vm10, %v11856_v55, %v11846_v11  ;;  %v2686_v26 = vsel %vm2664_vm10, %v11857_v28, %v11847_v43  ;;  %v2701_v60 = vrot.slane %v2683_v63, 7  ;;  %v2707_v9 = vrot.slane %v2684_v14, 7  ;;  %v12102_v36 = vld [vmem:[#allocation6 + $0x9f0] ss:$24 sps:$4 sm:$0xff]   ;;  %v12110_v58 = vld [vmem:[#allocation6 + $0xa24] ss:$24 sps:$4 sm:$0xff]  }
 0x30c   : > { %v11860_v41 = vpop.permute.xlu0 %11859  ;;  %4140 = vmatprep.mubr.bf16.mxu0 %v14535_v10  ;;  %v12117_v2 = vld [vmem:[#allocation6 + $0xd0] ss:$24 sps:$4 sm:$0xff]   ;;  %v12116_v63 = vld [vmem:[#allocation6 + $0xa54] ss:$24 sps:$4 sm:$0xff]   ;;  %v12123_v14 = vld [vmem:[#allocation6 + $0x100] ss:$24 sps:$4 sm:$0xff]  }
 0x30d   : > { %v11862_v37 = vunpack.i.h.bf16 %v11860_v41  ;;  %v11861_v24 = vunpack.i.l.bf16 %v11860_v41  ;;  %v2721_v27 = vsel %vm2410_vm5, 0.0, %v2701_v60  ;;  %4141 = vmatmul.mubr.bf16.vlgmr.msra.gmra.mrb[16].mxu0 %v14528_v34  ;;  %v2708_v59 = vsel %vm2410_vm5, %v2701_v60, %v2707_v9  ;;  %v12111_v41 = vld [vmem:[#allocation6 + $0xa0] ss:$24 sps:$4 sm:$0xff]   ;;  %v12122_v9 = vld [vmem:[#allocation6 + $0xa84] ss:$24 sps:$4 sm:$0xff]  }
 0x30e   : > { %4152 = vmatpush1.bf16.msra.mxu0 %v12072_v33  ;;  %v2725_v53 = vsel %vm416_vm0, %v2708_v59, 0.0  ;;  %v14549_v49 = vpack.c.bf16 %v2708_v59, %v2701_v60  ;;  %v12131_v33 = vld [vmem:[#allocation6 + $0x134] ss:$24 sps:$4 sm:$0xff]   ;;  %v12114_v60 = vld [vmem:[#allocation6 + $0xa50] ss:$24 sps:$4 sm:$0xff]  }
 0x30f   : > { %v2687_v21 = vsel %vm2667_vm11, %v2685_v17, %v11861_v24  ;;  %v2688_v29 = vsel %vm2667_vm11, %v2686_v26, %v11862_v37  ;;  %4153 = vmatprep.subr.bf16.mxu0 %v12080_v61  ;;  %v14558_v7 = vpack.c.bf16 %v2725_v53, %v2721_v27  ;;  %v12113_v17 = vld [vmem:[#allocation6 + $0xa4] ss:$24 sps:$4 sm:$0xff]   ;;  %v12104_v26 = vld [vmem:[#allocation6 + $0x9f4] ss:$24 sps:$4 sm:$0xff]   ;;  %v12108_v24 = vld [vmem:[#allocation6 + $0xa20] ss:$24 sps:$4 sm:$0xff]  }
 0x310   : > { %v2689_v6 = vsel %vm2670_vm12, %v2687_v21, 0.0  ;;  %v2690_v31 = vsel %vm2670_vm12, %v2688_v29, 0.0  ;;  %v12125_v37 = vld [vmem:[#allocation6 + $0x104] ss:$24 sps:$4 sm:$0xff]   ;;  %v12129_v61 = vld [vmem:[#allocation6 + $0x130] ss:$24 sps:$4 sm:$0xff]  }
 0x311   : > { %v2702_v57 = vrot.slane %v2689_v6, 7  ;;  %v2709_v4 = vrot.slane %v2690_v31, 7  ;;  %v3131_v42 = vshrl.u32 %v14558_v7, 16  ;;  %v3133_v38 = vshll.u32 %v14558_v7, 16  ;;  %v12137_v21 = vld [vmem:[#allocation6 + $0x164] ss:$24 sps:$4 sm:$0xff]  }
 0x312   : > { %4154 = vmatpush1.bf16.msra.mxu0 %v12078_v12  ;;  %v12120_v29 = vld [vmem:[#allocation6 + $0xa80] ss:$24 sps:$4 sm:$0xff]   ;;  %v12128_v6 = vld [vmem:[#allocation6 + $0xab4] ss:$24 sps:$4 sm:$0xff]   ;;  %v12141_v59 = vld [vmem:[#allocation6 + $0x190] ss:$24 sps:$4 sm:$0xff]  }
 0x313   : > { %v2710_v5 = vsel %vm2410_vm5, %v2702_v57, %v2709_v4  ;;  %v2722_v13 = vsel %vm2410_vm5, 0.0, %v2702_v57  ;;  %4155 = vmatprep.subr.bf16.mxu0 %v12086_v35  ;;  %v7218_v39 = vrot.slane %v3131_v42, 1  ;;  %v7219_v8 = vrot.slane %v3133_v38, 2  ;;  %v12135_v31 = vld [vmem:[#allocation6 + $0x160] ss:$24 sps:$4 sm:$0xff]  }
 0x314   : > { %v2726_v47 = vsel %vm416_vm0, %v2710_v5, 0.0  ;;  %v14561_v40 = vpack.c.bf16 %v2710_v5, %v2702_v57  ;;  %v12143_v27 = vld [vmem:[#allocation6 + $0x194] ss:$24 sps:$4 sm:$0xff]   ;;  %v12126_v57 = vld [vmem:[#allocation6 + $0xab0] ss:$24 sps:$4 sm:$0xff]   ;;  %vm10168_vm0 = vcmask 1047556  }
 0x315   : > { %v14563_v43 = vpack.c.bf16 %v2726_v47, %v2722_v13  ;;  %v14582_v23 = vor.u32 %v7219_v8, %v7218_v39  ;;  %v12134_v4 = vld [vmem:[#allocation6 + $0xae4] ss:$24 sps:$4 sm:$0xff]   ;;  %v12132_v53 = vld [vmem:[#allocation6 + $0xae0] ss:$24 sps:$4 sm:$0xff]   ;;  %v12140_v35 = vld [vmem:[#allocation6 + $0xb14] ss:$24 sps:$4 sm:$0xff]  }
 0x316   : > { %10815 = vmatprep.mubr.msk.bf16.mxu1 %vm14554_vm14, %v14561_v40  ;;  %4156 = vmatpush1.bf16.msra.mxu0 %v12084_v3  ;;  %v12149_v12 = vld [vmem:[#allocation6 + $0x1c4] ss:$24 sps:$4 sm:$0xff]   ;;  %v12147_v5 = vld [vmem:[#allocation6 + $0x1c0] ss:$24 sps:$4 sm:$0xff]   ;;  %v12155_v13 = vld [vmem:[#allocation6 + $0x1f4] ss:$24 sps:$4 sm:$0xff]  }
 0x317   : > { %10819 = vmatmul.mubr.msk.bf16.vlgmr.msra.gmra.mrb[20].mxu1 %vm14554_vm14, %v14549_v49  ;;  %v3138_v46 = vshrl.u32 %v14563_v43, 16  ;;  %v3140_v30 = vshll.u32 %v14563_v43, 16  ;;  %4157 = vmatprep.subr.bf16.mxu0 %v12092_v62  ;;  %v12138_v47 = vld [vmem:[#allocation6 + $0xb10] ss:$24 sps:$4 sm:$0xff]   ;;  %v12161_v3 = vld [vmem:[#allocation6 + $0x224] ss:$24 sps:$4 sm:$0xff]  }
 0x318   : > { %5499 = vmatpush1.bf16.msra.mxu1 %v12093_v51  ;;  %10839 = vmatprep.mubr.msk.bf16.mxu1 %vm14554_vm14, %v14519_v19  ;;  %v12146_v51 = vld [vmem:[#allocation6 + $0xb44] ss:$24 sps:$4 sm:$0xff]   ;;  %v12144_v62 = vld [vmem:[#allocation6 + $0xb40] ss:$24 sps:$4 sm:$0xff]   ;;  %v12150_v39 = vld [vmem:[#allocation6 + $0xb70] ss:$24 sps:$4 sm:$0xff]  }
 0x319   : > { %5500 = vmatprep.subr.bf16.mxu1 %v12101_v52  ;;  %v3142_v11 = vrot.slane %v3140_v30, 1  ;;  %v7221_v28 = vrot.slane %v3138_v46, 1  ;;  %v7222_v55 = vrot.slane %v3140_v30, 2  ;;  %v12153_v52 = vld [vmem:[#allocation6 + $0x1f0] ss:$24 sps:$4 sm:$0xff]  }
 0x31a   : > { %4158 = vmatpush1.bf16.msra.mxu0 %v12090_v22  ;;  %v12159_v30 = vld [vmem:[#allocation6 + $0x220] ss:$24 sps:$4 sm:$0xff]   ;;  %v12158_v8 = vld [vmem:[#allocation6 + $0xba4] ss:$24 sps:$4 sm:$0xff]   ;;  %v12875_v32 = vld [vmem:[#allocation6 + $0x1274] ss:$24 sps:$4 sm:$0xff]  }
 0x31b   : > { %v14584_v15 = vor.u32 %v3142_v11, %v3138_v46  ;;  %v14586_v16 = vor.u32 %v7222_v55, %v7221_v28  ;;  %4159 = vmatprep.subr.bf16.mxu0 %v12098_v44  ;;  %v12152_v46 = vld [vmem:[#allocation6 + $0xb74] ss:$24 sps:$4 sm:$0xff]   ;;  %v12165_v11 = vld [vmem:[#allocation6 + $0x250] ss:$24 sps:$4 sm:$0xff]   ;;  %v12156_v28 = vld [vmem:[#allocation6 + $0xba0] ss:$24 sps:$4 sm:$0xff]  }
 0x31c   : > { %5501 = vmatpush1.bf16.msra.mxu1 %v12099_v18  ;;  %v12167_v18 = vld [vmem:[#allocation6 + $0x254] ss:$24 sps:$4 sm:$0xff]   ;;  %v12171_v22 = vld [vmem:[#allocation6 + $0x280] ss:$24 sps:$4 sm:$0xff]  }
 0x31d   : > { %4183 = vmatprep.mubr.bf16.mxu0 %v14584_v15  ;;  %5502 = vmatprep.subr.bf16.mxu1 %v12107_v48  ;;  %v12173_v48 = vld [vmem:[#allocation6 + $0x284] ss:$24 sps:$4 sm:$0xff]   ;;  %v12164_v55 = vld [vmem:[#allocation6 + $0xbd4] ss:$24 sps:$4 sm:$0xff]  }
 0x31e   : > { %4160 = vmatpush1.bf16.msra.mxu0 %v12096_v1  ;;  %v12179_v44 = vld [vmem:[#allocation6 + $0x2b4] ss:$24 sps:$4 sm:$0xff]  }
 0x31f   : > { %4161 = vmatprep.subr.bf16.mxu0 %v12104_v26  ;;  %v12170_v1 = vld [vmem:[#allocation6 + $0x60c] ss:$24 sps:$4 sm:$0xff]   ;;  %v12177_v26 = vld [vmem:[#allocation6 + $0x2b0] ss:$24 sps:$4 sm:$0xff]  }
 0x320   : > { %5503 = vmatpush1.bf16.msra.mxu1 %v12105_v0  ;;  %v12162_v0 = vld [vmem:[#allocation6 + $0xbd0] ss:$24 sps:$4 sm:$0xff]  }
 0x321   : > { %5504 = vmatprep.subr.bf16.mxu1 %v12113_v17  ;;  %v3135_v17 = vrot.slane %v3133_v38, 1  ;;  %v12174_v38 = vld [vmem:[#allocation6 + $0x638] ss:$24 sps:$4 sm:$0xff]  }
 0x322   : > { %4162 = vmatpush1.bf16.msra.mxu0 %v12102_v36 }
 0x323   : > { %4163 = vmatprep.subr.bf16.mxu0 %v12110_v58  ;;  %v14593_v36 = vor.u32 %v3135_v17, %v3131_v42  ;;  %v12176_v58 = vld [vmem:[#allocation6 + $0x63c] ss:$24 sps:$4 sm:$0xff]   ;;  %v12180_v42 = vld [vmem:[#allocation6 + $0x668] ss:$24 sps:$4 sm:$0xff]  }
 0x324   : > { %5505 = vmatpush1.bf16.msra.mxu1 %v12111_v41  ;;  %v12185_v41 = vld [vmem:[#allocation6 + $0x2e4] ss:$24 sps:$4 sm:$0xff]   ;;  %v12251_v17 = vld [vmem:[#allocation6 + $0x4f4] ss:$24 sps:$4 sm:$0xff]  }
 0x325   : > { %5506 = vmatprep.subr.bf16.mxu1 %v12119_v25  ;;  %v12168_v25 = vld [vmem:[#allocation6 + $0x608] ss:$24 sps:$4 sm:$0xff]  }
 0x326   : > { %4164 = vmatpush1.bf16.msra.mxu0 %v12108_v24  ;;  %v12182_v24 = vld [vmem:[#allocation6 + $0x66c] ss:$24 sps:$4 sm:$0xff]  }
 0x327   : > { %4165 = vmatprep.subr.bf16.mxu0 %v12116_v63  ;;  %v12189_v63 = vld [vmem:[#allocation6 + $0x310] ss:$24 sps:$4 sm:$0xff]  }
 0x328   : > { %5507 = vmatpush1.bf16.msra.mxu1 %v12117_v2  ;;  %v12183_v2 = vld [vmem:[#allocation6 + $0x2e0] ss:$24 sps:$4 sm:$0xff]  }
 0x329   : > { %5508 = vmatprep.subr.bf16.mxu1 %v12125_v37  ;;  %v12191_v37 = vld [vmem:[#allocation6 + $0x314] ss:$24 sps:$4 sm:$0xff]  }
 0x32a   : > { %4166 = vmatpush1.bf16.msra.mxu0 %v12114_v60  ;;  %v12195_v60 = vld [vmem:[#allocation6 + $0x340] ss:$24 sps:$4 sm:$0xff]  }
 0x32b   : > { %4167 = vmatprep.subr.bf16.mxu0 %v12122_v9  ;;  %v12203_v9 = vld [vmem:[#allocation6 + $0x374] ss:$24 sps:$4 sm:$0xff]  }
 0x32c   : > { %5509 = vmatpush1.bf16.msra.mxu1 %v12123_v14  ;;  %v12197_v14 = vld [vmem:[#allocation6 + $0x344] ss:$24 sps:$4 sm:$0xff]  }
 0x32d   : > { %5510 = vmatprep.subr.bf16.mxu1 %v12131_v33  ;;  %v12188_v33 = vld [vmem:[#allocation6 + $0x69c] ss:$24 sps:$4 sm:$0xff]  }
 0x32e   : > { %4168 = vmatpush1.bf16.msra.mxu0 %v12120_v29  ;;  %v12201_v29 = vld [vmem:[#allocation6 + $0x370] ss:$24 sps:$4 sm:$0xff]  }
 0x32f   : > { %4169 = vmatprep.subr.bf16.mxu0 %v12128_v6  ;;  %v12209_v6 = vld [vmem:[#allocation6 + $0x3a4] ss:$24 sps:$4 sm:$0xff]  }
 0x330   : > { %5511 = vmatpush1.bf16.msra.mxu1 %v12129_v61  ;;  %v12186_v61 = vld [vmem:[#allocation6 + $0x698] ss:$24 sps:$4 sm:$0xff]  }
 0x331   : > { %5512 = vmatprep.subr.bf16.mxu1 %v12137_v21  ;;  %v12194_v21 = vld [vmem:[#allocation6 + $0x6cc] ss:$24 sps:$4 sm:$0xff]  }
 0x332   : > { %4170 = vmatpush1.bf16.msra.mxu0 %v12126_v57  ;;  %v12207_v57 = vld [vmem:[#allocation6 + $0x3a0] ss:$24 sps:$4 sm:$0xff]  }
 0x333   : > { %4171 = vmatprep.subr.bf16.mxu0 %v12134_v4  ;;  %v12215_v4 = vld [vmem:[#allocation6 + $0x3d4] ss:$24 sps:$4 sm:$0xff]  }
 0x334   : > { %5513 = vmatpush1.bf16.msra.mxu1 %v12135_v31  ;;  %v12192_v31 = vld [vmem:[#allocation6 + $0x6c8] ss:$24 sps:$4 sm:$0xff]  }
 0x335   : > { %5514 = vmatprep.subr.bf16.mxu1 %v12143_v27  ;;  %v12200_v27 = vld [vmem:[#allocation6 + $0x6fc] ss:$24 sps:$4 sm:$0xff]  }
 0x336   : > { %4172 = vmatpush1.bf16.msra.mxu0 %v12132_v53  ;;  %v12213_v53 = vld [vmem:[#allocation6 + $0x3d0] ss:$24 sps:$4 sm:$0xff]  }
 0x337   : > { %4173 = vmatprep.subr.bf16.mxu0 %v12140_v35  ;;  %v12221_v35 = vld [vmem:[#allocation6 + $0x404] ss:$24 sps:$4 sm:$0xff]  }
 0x338   : > { %5515 = vmatpush1.bf16.msra.mxu1 %v12141_v59  ;;  %v12198_v59 = vld [vmem:[#allocation6 + $0x6f8] ss:$24 sps:$4 sm:$0xff]  }
 0x339   : > { %5516 = vmatprep.subr.bf16.mxu1 %v12149_v12  ;;  %v12206_v12 = vld [vmem:[#allocation6 + $0x72c] ss:$24 sps:$4 sm:$0xff]  }
 0x33a   : > { %4174 = vmatpush1.bf16.msra.mxu0 %v12138_v47  ;;  %v12219_v47 = vld [vmem:[#allocation6 + $0x400] ss:$24 sps:$4 sm:$0xff]  }
 0x33b   : > { %4175 = vmatprep.subr.bf16.mxu0 %v12146_v51  ;;  %v12227_v51 = vld [vmem:[#allocation6 + $0x434] ss:$24 sps:$4 sm:$0xff]  }
 0x33c   : > { %5517 = vmatpush1.bf16.msra.mxu1 %v12147_v5  ;;  %v12204_v5 = vld [vmem:[#allocation6 + $0x728] ss:$24 sps:$4 sm:$0xff]  }
 0x33d   : > { %5518 = vmatprep.subr.bf16.mxu1 %v12155_v13  ;;  %v12212_v13 = vld [vmem:[#allocation6 + $0x75c] ss:$24 sps:$4 sm:$0xff]  }
 0x33e   : > { %4176 = vmatpush1.bf16.msra.mxu0 %v12144_v62  ;;  %v12225_v62 = vld [vmem:[#allocation6 + $0x430] ss:$24 sps:$4 sm:$0xff]  }
 0x33f   : > { %4177 = vmatprep.subr.bf16.mxu0 %v12152_v46  ;;  %v12233_v46 = vld [vmem:[#allocation6 + $0x464] ss:$24 sps:$4 sm:$0xff]  }
 0x340   : > { %5519 = vmatpush1.bf16.msra.mxu1 %v12153_v52  ;;  %v12210_v52 = vld [vmem:[#allocation6 + $0x758] ss:$24 sps:$4 sm:$0xff]  }
 0x341   : > { %5520 = vmatprep.subr.bf16.mxu1 %v12161_v3  ;;  %v12218_v3 = vld [vmem:[#allocation6 + $0x78c] ss:$24 sps:$4 sm:$0xff]  }
 0x342   : > { %4178 = vmatpush1.bf16.msra.mxu0 %v12150_v39  ;;  %v12231_v39 = vld [vmem:[#allocation6 + $0x460] ss:$24 sps:$4 sm:$0xff]  }
 0x343   : > { %4179 = vmatprep.subr.bf16.mxu0 %v12158_v8  ;;  %v12239_v8 = vld [vmem:[#allocation6 + $0x494] ss:$24 sps:$4 sm:$0xff]  }
 0x344   : > { %5521 = vmatpush1.bf16.msra.mxu1 %v12159_v30  ;;  %v12216_v30 = vld [vmem:[#allocation6 + $0x788] ss:$24 sps:$4 sm:$0xff]  }
 0x345   : > { %5522 = vmatprep.subr.bf16.mxu1 %v12167_v18  ;;  %v12224_v18 = vld [vmem:[#allocation6 + $0x7bc] ss:$24 sps:$4 sm:$0xff]  }
 0x346   : > { %4180 = vmatpush1.bf16.msra.mxu0 %v12156_v28  ;;  %v12237_v28 = vld [vmem:[#allocation6 + $0x490] ss:$24 sps:$4 sm:$0xff]  }
 0x347   : > { %4181 = vmatprep.subr.bf16.mxu0 %v12164_v55  ;;  %v12245_v55 = vld [vmem:[#allocation6 + $0x4c4] ss:$24 sps:$4 sm:$0xff]  }
 0x348   : > { %5523 = vmatpush1.bf16.msra.mxu1 %v12165_v11  ;;  %v12222_v11 = vld [vmem:[#allocation6 + $0x7b8] ss:$24 sps:$4 sm:$0xff]  }
 0x349   : > { %5524 = vmatprep.subr.bf16.mxu1 %v12173_v48  ;;  %v12230_v48 = vld [vmem:[#allocation6 + $0x7ec] ss:$24 sps:$4 sm:$0xff]  }
 0x34a   : > { %4182 = vmatpush1.bf16.msra.mxu0 %v12162_v0  ;;  %v12243_v0 = vld [vmem:[#allocation6 + $0x4c0] ss:$24 sps:$4 sm:$0xff]  }
 0x34b   : > { %4194 = vmatprep.subr.bf16.mxu0 %v12170_v1  ;;  %v12234_v1 = vld [vmem:[#allocation6 + $0x818] ss:$24 sps:$4 sm:$0xff]  }
 0x34c   : > { %5525 = vmatpush1.bf16.msra.mxu1 %v12171_v22  ;;  %v12228_v22 = vld [vmem:[#allocation6 + $0x7e8] ss:$24 sps:$4 sm:$0xff]  }
 0x34d   : > { %5526 = vmatprep.subr.bf16.mxu1 %v12179_v44  ;;  %4184 = vmatmul.mubr.bf16.vlgmr.msra.gmra.mrb[16].mxu0 %v14593_v36  ;;  %v12236_v44 = vld [vmem:[#allocation6 + $0x81c] ss:$24 sps:$4 sm:$0xff]  }
 0x34e   : > { %4195 = vmatpush1.bf16.msra.mxu0 %v12168_v25  ;;  %4226 = vmatprep.mubr.bf16.mxu0 %v14535_v10  ;;  %v12257_v25 = vld [vmem:[#allocation6 + $0x524] ss:$24 sps:$4 sm:$0xff]  }
 0x34f   : > { %4196 = vmatprep.subr.bf16.mxu0 %v12176_v58  ;;  %v12240_v58 = vld [vmem:[#allocation6 + $0x848] ss:$24 sps:$4 sm:$0xff]  }
 0x350   : > { %5527 = vmatpush1.bf16.msra.mxu1 %v12177_v26  ;;  %v12242_v26 = vld [vmem:[#allocation6 + $0x84c] ss:$24 sps:$4 sm:$0xff]  }
 0x351   : > { %5528 = vmatprep.subr.bf16.mxu1 %v12185_v41  ;;  %v12249_v41 = vld [vmem:[#allocation6 + $0x4f0] ss:$24 sps:$4 sm:$0xff]  }
 0x352   : > { %4197 = vmatpush1.bf16.msra.mxu0 %v12174_v38  ;;  %v12263_v38 = vld [vmem:[#allocation6 + $0x554] ss:$24 sps:$4 sm:$0xff]  }
 0x353   : > { %4198 = vmatprep.subr.bf16.mxu0 %v12182_v24  ;;  %v12246_v24 = vld [vmem:[#allocation6 + $0x878] ss:$24 sps:$4 sm:$0xff]  }
 0x354   : > { %5529 = vmatpush1.bf16.msra.mxu1 %v12183_v2  ;;  %v12248_v2 = vld [vmem:[#allocation6 + $0x87c] ss:$24 sps:$4 sm:$0xff]  }
 0x355   : > { %5541 = vmatprep.subr.bf16.mxu1 %v12191_v37  ;;  %v12255_v37 = vld [vmem:[#allocation6 + $0x520] ss:$24 sps:$4 sm:$0xff]  }
 0x356   : > { %4199 = vmatpush1.bf16.msra.mxu0 %v12180_v42  ;;  %v12269_v42 = vld [vmem:[#allocation6 + $0x584] ss:$24 sps:$4 sm:$0xff]  }
 0x357   : > { %10843 = vmatmul.mubr.msk.bf16.vlgmr.msra.gmra.mrb[24].mxu1 %vm14554_vm14, %v14500_v54  ;;  %4200 = vmatprep.subr.bf16.mxu0 %v12188_v33  ;;  %v12252_v33 = vld [vmem:[#allocation6 + $0x8a8] ss:$24 sps:$4 sm:$0xff]  }
 0x358   : > { %5542 = vmatpush1.bf16.msra.mxu1 %v12189_v63  ;;  %10847 = vmatprep.mubr.msk.bf16.mxu1 %vm14554_vm14, %v14561_v40  ;;  %v12254_v63 = vld [vmem:[#allocation6 + $0x8ac] ss:$24 sps:$4 sm:$0xff]  }
 0x359   : > { %5543 = vmatprep.subr.bf16.mxu1 %v12197_v14  ;;  %v12261_v14 = vld [vmem:[#allocation6 + $0x550] ss:$24 sps:$4 sm:$0xff]  }
 0x35a   : > { %4201 = vmatpush1.bf16.msra.mxu0 %v12186_v61  ;;  %v12275_v61 = vld [vmem:[#allocation6 + $0x5b4] ss:$24 sps:$4 sm:$0xff]  }
 0x35b   : > { %4202 = vmatprep.subr.bf16.mxu0 %v12194_v21  ;;  %v12258_v21 = vld [vmem:[#allocation6 + $0x8d8] ss:$24 sps:$4 sm:$0xff]  }
 0x35c   : > { %5544 = vmatpush1.bf16.msra.mxu1 %v12195_v60  ;;  %v12260_v60 = vld [vmem:[#allocation6 + $0x8dc] ss:$24 sps:$4 sm:$0xff]  }
 0x35d   : > { %5545 = vmatprep.subr.bf16.mxu1 %v12203_v9  ;;  %v12267_v9 = vld [vmem:[#allocation6 + $0x580] ss:$24 sps:$4 sm:$0xff]  }
 0x35e   : > { %4203 = vmatpush1.bf16.msra.mxu0 %v12192_v31  ;;  %v12281_v31 = vld [vmem:[#allocation6 + $0x5e4] ss:$24 sps:$4 sm:$0xff]  }
 0x35f   : > { %4204 = vmatprep.subr.bf16.mxu0 %v12200_v27  ;;  %v12264_v27 = vld [vmem:[#allocation6 + $0x908] ss:$24 sps:$4 sm:$0xff]  }
 0x360   : > { %5546 = vmatpush1.bf16.msra.mxu1 %v12201_v29  ;;  %v12266_v29 = vld [vmem:[#allocation6 + $0x90c] ss:$24 sps:$4 sm:$0xff]  }
 0x361   : > { %5547 = vmatprep.subr.bf16.mxu1 %v12209_v6  ;;  %v12273_v6 = vld [vmem:[#allocation6 + $0x5b0] ss:$24 sps:$4 sm:$0xff]  }
 0x362   : > { %4205 = vmatpush1.bf16.msra.mxu0 %v12198_v59  ;;  %v12287_v59 = vld [vmem:[#allocation6 + $0xc04] ss:$24 sps:$4 sm:$0xff]  }
 0x363   : > { %4206 = vmatprep.subr.bf16.mxu0 %v12206_v12  ;;  %v12270_v12 = vld [vmem:[#allocation6 + $0x938] ss:$24 sps:$4 sm:$0xff]  }
 0x364   : > { %5548 = vmatpush1.bf16.msra.mxu1 %v12207_v57  ;;  %v12272_v57 = vld [vmem:[#allocation6 + $0x93c] ss:$24 sps:$4 sm:$0xff]  }
 0x365   : > { %5549 = vmatprep.subr.bf16.mxu1 %v12215_v4  ;;  %v12279_v4 = vld [vmem:[#allocation6 + $0x5e0] ss:$24 sps:$4 sm:$0xff]  }
 0x366   : > { %4207 = vmatpush1.bf16.msra.mxu0 %v12204_v5  ;;  %v12293_v5 = vld [vmem:[#allocation6 + $0xc34] ss:$24 sps:$4 sm:$0xff]  }
 0x367   : > { %4208 = vmatprep.subr.bf16.mxu0 %v12212_v13  ;;  %v12276_v13 = vld [vmem:[#allocation6 + $0x968] ss:$24 sps:$4 sm:$0xff]  }
 0x368   : > { %5550 = vmatpush1.bf16.msra.mxu1 %v12213_v53  ;;  %v12278_v53 = vld [vmem:[#allocation6 + $0x96c] ss:$24 sps:$4 sm:$0xff]  }
 0x369   : > { %5551 = vmatprep.subr.bf16.mxu1 %v12221_v35  ;;  %v12285_v35 = vld [vmem:[#allocation6 + $0xc00] ss:$24 sps:$4 sm:$0xff]  }
 0x36a   : > { %4209 = vmatpush1.bf16.msra.mxu0 %v12210_v52  ;;  %v12291_v52 = vld [vmem:[#allocation6 + $0xc30] ss:$24 sps:$4 sm:$0xff]  }
 0x36b   : > { %4210 = vmatprep.subr.bf16.mxu0 %v12218_v3  ;;  %v12299_v3 = vld [vmem:[#allocation6 + $0xc64] ss:$24 sps:$4 sm:$0xff]  }
 0x36c   : > { %5552 = vmatpush1.bf16.msra.mxu1 %v12219_v47  ;;  %v14606_v47 = vrot.slane %v14517_v56, 1 }
 0x36d   : > { %5553 = vmatprep.subr.bf16.mxu1 %v12227_v51  ;;  %v12284_v51 = vld [vmem:[#allocation6 + $0x99c] ss:$24 sps:$4 sm:$0xff]  }
 0x36e   : > { %4211 = vmatpush1.bf16.msra.mxu0 %v12216_v30  ;;  %v12297_v30 = vld [vmem:[#allocation6 + $0xc60] ss:$24 sps:$4 sm:$0xff]  }
 0x36f   : > { %4212 = vmatprep.subr.bf16.mxu0 %v12224_v18  ;;  %v12305_v18 = vld [vmem:[#allocation6 + $0xc94] ss:$24 sps:$4 sm:$0xff]  }
 0x370   : > { %5554 = vmatpush1.bf16.msra.mxu1 %v12225_v62  ;;  %v12282_v62 = vld [vmem:[#allocation6 + $0x998] ss:$24 sps:$4 sm:$0xff]  }
 0x371   : > { %5555 = vmatprep.subr.bf16.mxu1 %v12233_v46  ;;  %v12290_v46 = vld [vmem:[#allocation6 + $0x9cc] ss:$24 sps:$4 sm:$0xff]  }
 0x372   : > { %4213 = vmatpush1.bf16.msra.mxu0 %v12222_v11  ;;  %v12303_v11 = vld [vmem:[#allocation6 + $0xc90] ss:$24 sps:$4 sm:$0xff]  }
 0x373   : > { %4214 = vmatprep.subr.bf16.mxu0 %v12230_v48  ;;  %v12311_v48 = vld [vmem:[#allocation6 + $0xcc4] ss:$24 sps:$4 sm:$0xff]  }
 0x374   : > { %5556 = vmatpush1.bf16.msra.mxu1 %v12231_v39  ;;  %v12288_v39 = vld [vmem:[#allocation6 + $0x9c8] ss:$24 sps:$4 sm:$0xff]  }
 0x375   : > { %5557 = vmatprep.subr.bf16.mxu1 %v12239_v8  ;;  %v12296_v8 = vld [vmem:[#allocation6 + $0x9fc] ss:$24 sps:$4 sm:$0xff]  }
 0x376   : > { %4215 = vmatpush1.bf16.msra.mxu0 %v12228_v22  ;;  %v12309_v22 = vld [vmem:[#allocation6 + $0xcc0] ss:$24 sps:$4 sm:$0xff]  }
 0x377   : > { %4216 = vmatprep.subr.bf16.mxu0 %v12236_v44  ;;  %v12317_v44 = vld [vmem:[#allocation6 + $0xcf4] ss:$24 sps:$4 sm:$0xff]  }
 0x378   : > { %5558 = vmatpush1.bf16.msra.mxu1 %v12237_v28  ;;  %v12294_v28 = vld [vmem:[#allocation6 + $0x9f8] ss:$24 sps:$4 sm:$0xff]  }
 0x379   : > { %5559 = vmatprep.subr.bf16.mxu1 %v12245_v55  ;;  %v12302_v55 = vld [vmem:[#allocation6 + $0xa2c] ss:$24 sps:$4 sm:$0xff]  }
 0x37a   : > { %4217 = vmatpush1.bf16.msra.mxu0 %v12234_v1  ;;  %v12315_v1 = vld [vmem:[#allocation6 + $0xcf0] ss:$24 sps:$4 sm:$0xff]  }
 0x37b   : > { %4218 = vmatprep.subr.bf16.mxu0 %v12242_v26  ;;  %v12323_v26 = vld [vmem:[#allocation6 + $0xd24] ss:$24 sps:$4 sm:$0xff]  }
 0x37c   : > { %5560 = vmatpush1.bf16.msra.mxu1 %v12243_v0  ;;  %v12300_v0 = vld [vmem:[#allocation6 + $0xa28] ss:$24 sps:$4 sm:$0xff]  }
 0x37d   : > { %5561 = vmatprep.subr.bf16.mxu1 %v12251_v17  ;;  %v12308_v17 = vld [vmem:[#allocation6 + $0xa5c] ss:$24 sps:$4 sm:$0xff]  }
 0x37e   : > { %4219 = vmatpush1.bf16.msra.mxu0 %v12240_v58  ;;  %v12321_v58 = vld [vmem:[#allocation6 + $0xd20] ss:$24 sps:$4 sm:$0xff]  }
 0x37f   : > { %4220 = vmatprep.subr.bf16.mxu0 %v12248_v2  ;;  %v12329_v2 = vld [vmem:[#allocation6 + $0xd54] ss:$24 sps:$4 sm:$0xff]  }
 0x380   : > { %5562 = vmatpush1.bf16.msra.mxu1 %v12249_v41  ;;  %v12306_v41 = vld [vmem:[#allocation6 + $0xa58] ss:$24 sps:$4 sm:$0xff]  }
 0x381   : > { %5563 = vmatprep.subr.bf16.mxu1 %v12257_v25  ;;  %v12314_v25 = vld [vmem:[#allocation6 + $0xa8c] ss:$24 sps:$4 sm:$0xff]  }
 0x382   : > { %4221 = vmatpush1.bf16.msra.mxu0 %v12246_v24  ;;  %v12327_v24 = vld [vmem:[#allocation6 + $0xd50] ss:$24 sps:$4 sm:$0xff]  }
 0x383   : > { %4222 = vmatprep.subr.bf16.mxu0 %v12254_v63  ;;  %v12335_v63 = vld [vmem:[#allocation6 + $0xd84] ss:$24 sps:$4 sm:$0xff]  }
 0x384   : > { %5564 = vmatpush1.bf16.msra.mxu1 %v12255_v37  ;;  %v12312_v37 = vld [vmem:[#allocation6 + $0xa88] ss:$24 sps:$4 sm:$0xff]  }
 0x385   : > { %5565 = vmatprep.subr.bf16.mxu1 %v12263_v38  ;;  %v12320_v38 = vld [vmem:[#allocation6 + $0xabc] ss:$24 sps:$4 sm:$0xff]  }
 0x386   : > { %4223 = vmatpush1.bf16.msra.mxu0 %v12252_v33  ;;  %v12333_v33 = vld [vmem:[#allocation6 + $0xd80] ss:$24 sps:$4 sm:$0xff]  }
 0x387   : > { %4224 = vmatprep.subr.bf16.mxu0 %v12260_v60  ;;  %v12341_v60 = vld [vmem:[#allocation6 + $0xdb4] ss:$24 sps:$4 sm:$0xff]  }
 0x388   : > { %5566 = vmatpush1.bf16.msra.mxu1 %v12261_v14  ;;  %v12318_v14 = vld [vmem:[#allocation6 + $0xab8] ss:$24 sps:$4 sm:$0xff]  }
 0x389   : > { %5567 = vmatprep.subr.bf16.mxu1 %v12269_v42  ;;  %v12326_v42 = vld [vmem:[#allocation6 + $0xaec] ss:$24 sps:$4 sm:$0xff]  }
 0x38a   : > { %4225 = vmatpush1.bf16.msra.mxu0 %v12258_v21  ;;  %v12339_v21 = vld [vmem:[#allocation6 + $0xdb0] ss:$24 sps:$4 sm:$0xff]  }
 0x38b   : > { %4237 = vmatprep.subr.bf16.mxu0 %v12266_v29  ;;  %v12347_v29 = vld [vmem:[#allocation6 + $0xde4] ss:$24 sps:$4 sm:$0xff]  }
 0x38c   : > { %5568 = vmatpush1.bf16.msra.mxu1 %v12267_v9  ;;  %v12324_v9 = vld [vmem:[#allocation6 + $0xae8] ss:$24 sps:$4 sm:$0xff]  }
 0x38d   : > { %5569 = vmatprep.subr.bf16.mxu1 %v12275_v61  ;;  %4227 = vmatmul.mubr.bf16.vlgmr.msra.gmra.mrb[20].mxu0 %v14528_v34  ;;  %v12332_v61 = vld [vmem:[#allocation6 + $0xb1c] ss:$24 sps:$4 sm:$0xff]  }
 0x38e   : > { %4238 = vmatpush1.bf16.msra.mxu0 %v12264_v27  ;;  %4269 = vmatprep.mubr.bf16.mxu0 %v14584_v15  ;;  %v12345_v27 = vld [vmem:[#allocation6 + $0xde0] ss:$24 sps:$4 sm:$0xff]  }
 0x38f   : > { %4239 = vmatprep.subr.bf16.mxu0 %v12272_v57  ;;  %v12353_v57 = vld [vmem:[#allocation6 + $0xe14] ss:$24 sps:$4 sm:$0xff]  }
 0x390   : > { %5570 = vmatpush1.bf16.msra.mxu1 %v12273_v6  ;;  %v12330_v6 = vld [vmem:[#allocation6 + $0xb18] ss:$24 sps:$4 sm:$0xff]  }
 0x391   : > { %5571 = vmatprep.subr.bf16.mxu1 %v12281_v31  ;;  %v12338_v31 = vld [vmem:[#allocation6 + $0xb4c] ss:$24 sps:$4 sm:$0xff]  }
 0x392   : > { %4240 = vmatpush1.bf16.msra.mxu0 %v12270_v12  ;;  %v12351_v12 = vld [vmem:[#allocation6 + $0xe10] ss:$24 sps:$4 sm:$0xff]  }
 0x393   : > { %4241 = vmatprep.subr.bf16.mxu0 %v12278_v53  ;;  %v12359_v53 = vld [vmem:[#allocation6 + $0xe44] ss:$24 sps:$4 sm:$0xff]  }
 0x394   : > { %5572 = vmatpush1.bf16.msra.mxu1 %v12279_v4  ;;  %v12336_v4 = vld [vmem:[#allocation6 + $0xb48] ss:$24 sps:$4 sm:$0xff]  }
 0x395   : > { %6749 = vmatprep.subr.bf16.mxu1 %v12287_v59  ;;  %v12344_v59 = vld [vmem:[#allocation6 + $0xb7c] ss:$24 sps:$4 sm:$0xff]  }
 0x396   : > { %4242 = vmatpush1.bf16.msra.mxu0 %v12276_v13  ;;  %v12357_v13 = vld [vmem:[#allocation6 + $0xe40] ss:$24 sps:$4 sm:$0xff]  }
 0x397   : > { %10851 = vmatmul.mubr.msk.bf16.vlgmr.msra.gmra.mrb[24].mxu1 %vm14554_vm14, %v14549_v49  ;;  %4243 = vmatprep.subr.bf16.mxu0 %v12284_v51  ;;  %v12365_v51 = vld [vmem:[#allocation6 + $0xe74] ss:$24 sps:$4 sm:$0xff]  }
 0x398   : > { %6750 = vmatpush1.bf16.msra.mxu1 %v12285_v35  ;;  %6781 = vmatprep.mubr.bf16.mxu1 %v14606_v47  ;;  %v12342_v35 = vld [vmem:[#allocation6 + $0xb78] ss:$24 sps:$4 sm:$0xff]  }
 0x399   : > { %6751 = vmatprep.subr.bf16.mxu1 %v12293_v5  ;;  %v12350_v5 = vld [vmem:[#allocation6 + $0xbac] ss:$24 sps:$4 sm:$0xff]  }
 0x39a   : > { %4244 = vmatpush1.bf16.msra.mxu0 %v12282_v62  ;;  %v12363_v62 = vld [vmem:[#allocation6 + $0xe70] ss:$24 sps:$4 sm:$0xff]  }
 0x39b   : > { %4245 = vmatprep.subr.bf16.mxu0 %v12290_v46  ;;  %v12371_v46 = vld [vmem:[#allocation6 + $0xea4] ss:$24 sps:$4 sm:$0xff]  }
 0x39c   : > { %6752 = vmatpush1.bf16.msra.mxu1 %v12291_v52  ;;  %v12348_v52 = vld [vmem:[#allocation6 + $0xba8] ss:$24 sps:$4 sm:$0xff]  }
 0x39d   : > { %6753 = vmatprep.subr.bf16.mxu1 %v12299_v3  ;;  %v12356_v3 = vld [vmem:[#allocation6 + $0xbdc] ss:$24 sps:$4 sm:$0xff]  }
 0x39e   : > { %4246 = vmatpush1.bf16.msra.mxu0 %v12288_v39  ;;  %v12369_v39 = vld [vmem:[#allocation6 + $0xea0] ss:$24 sps:$4 sm:$0xff]  }
 0x39f   : > { %4247 = vmatprep.subr.bf16.mxu0 %v12296_v8  ;;  %v12377_v8 = vld [vmem:[#allocation6 + $0xed4] ss:$24 sps:$4 sm:$0xff]  }
 0x3a0   : > { %6754 = vmatpush1.bf16.msra.mxu1 %v12297_v30  ;;  %v12354_v30 = vld [vmem:[#allocation6 + $0xbd8] ss:$24 sps:$4 sm:$0xff]  }
 0x3a1   : > { %6755 = vmatprep.subr.bf16.mxu1 %v12305_v18  ;;  %v12362_v18 = vld [vmem:[#allocation6 + $0x614] ss:$24 sps:$4 sm:$0xff]  }
 0x3a2   : > { %4248 = vmatpush1.bf16.msra.mxu0 %v12294_v28  ;;  %v12375_v28 = vld [vmem:[#allocation6 + $0xed0] ss:$24 sps:$4 sm:$0xff]  }
 0x3a3   : > { %4249 = vmatprep.subr.bf16.mxu0 %v12302_v55  ;;  %v12383_v55 = vld [vmem:[#allocation6 + $0xf04] ss:$24 sps:$4 sm:$0xff]  }
 0x3a4   : > { %6756 = vmatpush1.bf16.msra.mxu1 %v12303_v11  ;;  %v12360_v11 = vld [vmem:[#allocation6 + $0x610] ss:$24 sps:$4 sm:$0xff]  }
 0x3a5   : > { %6757 = vmatprep.subr.bf16.mxu1 %v12311_v48  ;;  %v12368_v48 = vld [vmem:[#allocation6 + $0x644] ss:$24 sps:$4 sm:$0xff]  }
 0x3a6   : > { %4250 = vmatpush1.bf16.msra.mxu0 %v12300_v0  ;;  %v12381_v0 = vld [vmem:[#allocation6 + $0xf00] ss:$24 sps:$4 sm:$0xff]  }
 0x3a7   : > { %4251 = vmatprep.subr.bf16.mxu0 %v12308_v17  ;;  %v14615_v17 = vrot.slane %v14502_v45, 1 }
 0x3a8   : > { %6758 = vmatpush1.bf16.msra.mxu1 %v12309_v22  ;;  %v12366_v22 = vld [vmem:[#allocation6 + $0x640] ss:$24 sps:$4 sm:$0xff]  }
 0x3a9   : > { %6759 = vmatprep.subr.bf16.mxu1 %v12317_v44  ;;  %v12374_v44 = vld [vmem:[#allocation6 + $0x674] ss:$24 sps:$4 sm:$0xff]  }
 0x3aa   : > { %4252 = vmatpush1.bf16.msra.mxu0 %v12306_v41  ;;  %v14618_v41 = vrot.slane %v14563_v43, 1 }
 0x3ab   : > { %4253 = vmatprep.subr.bf16.mxu0 %v12314_v25  ;;  %v12380_v25 = vld [vmem:[#allocation6 + $0x6a4] ss:$24 sps:$4 sm:$0xff]  }
 0x3ac   : > { %6760 = vmatpush1.bf16.msra.mxu1 %v12315_v1  ;;  %v12389_v1 = vld [vmem:[#allocation6 + $0xf34] ss:$24 sps:$4 sm:$0xff]  }
 0x3ad   : > { %6761 = vmatprep.subr.bf16.mxu1 %v12323_v26  ;;  %v12372_v26 = vld [vmem:[#allocation6 + $0x670] ss:$24 sps:$4 sm:$0xff]  }
 0x3ae   : > { %4254 = vmatpush1.bf16.msra.mxu0 %v12312_v37  ;;  %v12386_v37 = vld [vmem:[#allocation6 + $0x6d4] ss:$24 sps:$4 sm:$0xff]  }
 0x3af   : > { %4255 = vmatprep.subr.bf16.mxu0 %v12320_v38  ;;  %v12393_v38 = vld [vmem:[#allocation6 + $0xf60] ss:$24 sps:$4 sm:$0xff]  }
 0x3b0   : > { %6762 = vmatpush1.bf16.msra.mxu1 %v12321_v58  ;;  %v12395_v58 = vld [vmem:[#allocation6 + $0xf64] ss:$24 sps:$4 sm:$0xff]  }
 0x3b1   : > { %6763 = vmatprep.subr.bf16.mxu1 %v12329_v2  ;;  %v12378_v2 = vld [vmem:[#allocation6 + $0x6a0] ss:$24 sps:$4 sm:$0xff]  }
 0x3b2   : > { %4256 = vmatpush1.bf16.msra.mxu0 %v12318_v14  ;;  %v12392_v14 = vld [vmem:[#allocation6 + $0x704] ss:$24 sps:$4 sm:$0xff]  }
 0x3b3   : > { %4257 = vmatprep.subr.bf16.mxu0 %v12326_v42  ;;  %v12399_v42 = vld [vmem:[#allocation6 + $0xf90] ss:$24 sps:$4 sm:$0xff]  }
 0x3b4   : > { %6764 = vmatpush1.bf16.msra.mxu1 %v12327_v24  ;;  %v12401_v24 = vld [vmem:[#allocation6 + $0xf94] ss:$24 sps:$4 sm:$0xff]  }
 0x3b5   : > { %6765 = vmatprep.subr.bf16.mxu1 %v12335_v63  ;;  %v12384_v63 = vld [vmem:[#allocation6 + $0x6d0] ss:$24 sps:$4 sm:$0xff]  }
 0x3b6   : > { %4258 = vmatpush1.bf16.msra.mxu0 %v12324_v9  ;;  %v12398_v9 = vld [vmem:[#allocation6 + $0x734] ss:$24 sps:$4 sm:$0xff]  }
 0x3b7   : > { %4259 = vmatprep.subr.bf16.mxu0 %v12332_v61  ;;  %v12405_v61 = vld [vmem:[#allocation6 + $0xfc0] ss:$24 sps:$4 sm:$0xff]  }
 0x3b8   : > { %6766 = vmatpush1.bf16.msra.mxu1 %v12333_v33  ;;  %v12407_v33 = vld [vmem:[#allocation6 + $0xfc4] ss:$24 sps:$4 sm:$0xff]  }
 0x3b9   : > { %6767 = vmatprep.subr.bf16.mxu1 %v12341_v60  ;;  %v12390_v60 = vld [vmem:[#allocation6 + $0x700] ss:$24 sps:$4 sm:$0xff]  }
 0x3ba   : > { %4260 = vmatpush1.bf16.msra.mxu0 %v12330_v6  ;;  %v12404_v6 = vld [vmem:[#allocation6 + $0x764] ss:$24 sps:$4 sm:$0xff]  }
 0x3bb   : > { %4261 = vmatprep.subr.bf16.mxu0 %v12338_v31  ;;  %v12411_v31 = vld [vmem:[#allocation6 + $0xff0] ss:$24 sps:$4 sm:$0xff]  }
 0x3bc   : > { %6768 = vmatpush1.bf16.msra.mxu1 %v12339_v21  ;;  %v12413_v21 = vld [vmem:[#allocation6 + $0xff4] ss:$24 sps:$4 sm:$0xff]  }
 0x3bd   : > { %6769 = vmatprep.subr.bf16.mxu1 %v12347_v29  ;;  %v12396_v29 = vld [vmem:[#allocation6 + $0x730] ss:$24 sps:$4 sm:$0xff]  }
 0x3be   : > { %4262 = vmatpush1.bf16.msra.mxu0 %v12336_v4  ;;  %v12410_v4 = vld [vmem:[#allocation6 + $0x794] ss:$24 sps:$4 sm:$0xff]  }
 0x3bf   : > { %4263 = vmatprep.subr.bf16.mxu0 %v12344_v59  ;;  %v12417_v59 = vld [vmem:[#allocation6 + $0x1020] ss:$24 sps:$4 sm:$0xff]  }
 0x3c0   : > { %6770 = vmatpush1.bf16.msra.mxu1 %v12345_v27  ;;  %v12419_v27 = vld [vmem:[#allocation6 + $0x1024] ss:$24 sps:$4 sm:$0xff]  }
 0x3c1   : > { %6771 = vmatprep.subr.bf16.mxu1 %v12353_v57  ;;  %v12402_v57 = vld [vmem:[#allocation6 + $0x760] ss:$24 sps:$4 sm:$0xff]  }
 0x3c2   : > { %4264 = vmatpush1.bf16.msra.mxu0 %v12342_v35  ;;  %v12416_v35 = vld [vmem:[#allocation6 + $0x7c4] ss:$24 sps:$4 sm:$0xff]  }
 0x3c3   : > { %4265 = vmatprep.subr.bf16.mxu0 %v12350_v5  ;;  %v12423_v5 = vld [vmem:[#allocation6 + $0x1050] ss:$24 sps:$4 sm:$0xff]  }
 0x3c4   : > { %6772 = vmatpush1.bf16.msra.mxu1 %v12351_v12  ;;  %v12425_v12 = vld [vmem:[#allocation6 + $0x1054] ss:$24 sps:$4 sm:$0xff]  }
 0x3c5   : > { %6773 = vmatprep.subr.bf16.mxu1 %v12359_v53  ;;  %v12408_v53 = vld [vmem:[#allocation6 + $0x790] ss:$24 sps:$4 sm:$0xff]  }
 0x3c6   : > { %4266 = vmatpush1.bf16.msra.mxu0 %v12348_v52  ;;  %v12422_v52 = vld [vmem:[#allocation6 + $0x7f4] ss:$24 sps:$4 sm:$0xff]  }
 0x3c7   : > { %4267 = vmatprep.subr.bf16.mxu0 %v12356_v3  ;;  %v12429_v3 = vld [vmem:[#allocation6 + $0x1080] ss:$24 sps:$4 sm:$0xff]  }
 0x3c8   : > { %6774 = vmatpush1.bf16.msra.mxu1 %v12357_v13  ;;  %v12431_v13 = vld [vmem:[#allocation6 + $0x1084] ss:$24 sps:$4 sm:$0xff]  }
 0x3c9   : > { %6775 = vmatprep.subr.bf16.mxu1 %v12365_v51  ;;  %v12414_v51 = vld [vmem:[#allocation6 + $0x7c0] ss:$24 sps:$4 sm:$0xff]  }
 0x3ca   : > { %4268 = vmatpush1.bf16.msra.mxu0 %v12354_v30  ;;  %v12428_v30 = vld [vmem:[#allocation6 + $0x824] ss:$24 sps:$4 sm:$0xff]  }
 0x3cb   : > { %4280 = vmatprep.subr.bf16.mxu0 %v12362_v18  ;;  %v12435_v18 = vld [vmem:[#allocation6 + $0x10b0] ss:$24 sps:$4 sm:$0xff]  }
 0x3cc   : > { %6776 = vmatpush1.bf16.msra.mxu1 %v12363_v62  ;;  %v12437_v62 = vld [vmem:[#allocation6 + $0x10b4] ss:$24 sps:$4 sm:$0xff]  }
 0x3cd   : > { %6777 = vmatprep.subr.bf16.mxu1 %v12371_v46  ;;  %4270 = vmatmul.mubr.bf16.vlgmr.msra.gmra.mrb[20].mxu0 %v14593_v36  ;;  %v12420_v46 = vld [vmem:[#allocation6 + $0x7f0] ss:$24 sps:$4 sm:$0xff]  }
 0x3ce   : > { %4281 = vmatpush1.bf16.msra.mxu0 %v12360_v11  ;;  %4312 = vmatprep.mubr.bf16.mxu0 %v14535_v10  ;;  %v12387_v10 = vld [vmem:[#allocation6 + $0xf30] ss:$24 sps:$4 sm:$0xff]   ;;  %v12434_v11 = vld [vmem:[#allocation6 + $0x854] ss:$24 sps:$4 sm:$0xff]  }
 0x3cf   : > { %4282 = vmatprep.subr.bf16.mxu0 %v12368_v48  ;;  %v12441_v48 = vld [vmem:[#allocation6 + $0x10e0] ss:$24 sps:$4 sm:$0xff]  }
 0x3d0   : > { %6778 = vmatpush1.bf16.msra.mxu1 %v12369_v39  ;;  %v12443_v39 = vld [vmem:[#allocation6 + $0x10e4] ss:$24 sps:$4 sm:$0xff]  }
 0x3d1   : > { %6779 = vmatprep.subr.bf16.mxu1 %v12377_v8  ;;  %v12426_v8 = vld [vmem:[#allocation6 + $0x820] ss:$24 sps:$4 sm:$0xff]  }
 0x3d2   : > { %4283 = vmatpush1.bf16.msra.mxu0 %v12366_v22  ;;  %v12440_v22 = vld [vmem:[#allocation6 + $0x884] ss:$24 sps:$4 sm:$0xff]  }
 0x3d3   : > { %4284 = vmatprep.subr.bf16.mxu0 %v12374_v44  ;;  %v12447_v44 = vld [vmem:[#allocation6 + $0x1110] ss:$24 sps:$4 sm:$0xff]  }
 0x3d4   : > { %6780 = vmatpush1.bf16.msra.mxu1 %v12375_v28  ;;  %v12449_v28 = vld [vmem:[#allocation6 + $0x1114] ss:$24 sps:$4 sm:$0xff]  }
 0x3d5   : > { %6792 = vmatprep.subr.bf16.mxu1 %v12383_v55  ;;  %v12432_v55 = vld [vmem:[#allocation6 + $0x850] ss:$24 sps:$4 sm:$0xff]  }
 0x3d6   : > { %4285 = vmatpush1.bf16.msra.mxu0 %v12372_v26  ;;  %v12446_v26 = vld [vmem:[#allocation6 + $0x8b4] ss:$24 sps:$4 sm:$0xff]  }
 0x3d7   : > { %6782 = vmatmul.mubr.bf16.vlgmr.msra.gmra.mrb[20].mxu1 %v14615_v17  ;;  %4286 = vmatprep.subr.bf16.mxu0 %v12380_v25  ;;  %v12453_v25 = vld [vmem:[#allocation6 + $0x1140] ss:$24 sps:$4 sm:$0xff]  }
 0x3d8   : > { %6793 = vmatpush1.bf16.msra.mxu1 %v12381_v0  ;;  %6824 = vmatprep.mubr.bf16.mxu1 %v14618_v41  ;;  %v12455_v0 = vld [vmem:[#allocation6 + $0x1144] ss:$24 sps:$4 sm:$0xff]  }
 0x3d9   : > { %6794 = vmatprep.subr.bf16.mxu1 %v12389_v1  ;;  %v12438_v1 = vld [vmem:[#allocation6 + $0x880] ss:$24 sps:$4 sm:$0xff]  }
 0x3da   : > { %4287 = vmatpush1.bf16.msra.mxu0 %v12378_v2  ;;  %v12452_v2 = vld [vmem:[#allocation6 + $0x8e4] ss:$24 sps:$4 sm:$0xff]  }
 0x3db   : > { %4288 = vmatprep.subr.bf16.mxu0 %v12386_v37  ;;  %v12459_v37 = vld [vmem:[#allocation6 + $0x1170] ss:$24 sps:$4 sm:$0xff]  }
 0x3dc   : > { %6795 = vmatpush1.bf16.msra.mxu1 %v12387_v10  ;;  %v12461_v10 = vld [vmem:[#allocation6 + $0x1174] ss:$24 sps:$4 sm:$0xff]  }
 0x3dd   : > { %6796 = vmatprep.subr.bf16.mxu1 %v12395_v58  ;;  %v12444_v58 = vld [vmem:[#allocation6 + $0x8b0] ss:$24 sps:$4 sm:$0xff]  }
 0x3de   : > { %4289 = vmatpush1.bf16.msra.mxu0 %v12384_v63  ;;  %v12458_v63 = vld [vmem:[#allocation6 + $0x914] ss:$24 sps:$4 sm:$0xff]  }
 0x3df   : > { %4290 = vmatprep.subr.bf16.mxu0 %v12392_v14  ;;  %v12465_v14 = vld [vmem:[#allocation6 + $0x11a0] ss:$24 sps:$4 sm:$0xff]  }
 0x3e0   : > { %6797 = vmatpush1.bf16.msra.mxu1 %v12393_v38  ;;  %v12467_v38 = vld [vmem:[#allocation6 + $0x11a4] ss:$24 sps:$4 sm:$0xff]  }
 0x3e1   : > { %6798 = vmatprep.subr.bf16.mxu1 %v12401_v24  ;;  %v12450_v24 = vld [vmem:[#allocation6 + $0x8e0] ss:$24 sps:$4 sm:$0xff]  }
 0x3e2   : > { %4291 = vmatpush1.bf16.msra.mxu0 %v12390_v60  ;;  %v12464_v60 = vld [vmem:[#allocation6 + $0x944] ss:$24 sps:$4 sm:$0xff]  }
 0x3e3   : > { %4292 = vmatprep.subr.bf16.mxu0 %v12398_v9  ;;  %v12471_v9 = vld [vmem:[#allocation6 + $0x11d0] ss:$24 sps:$4 sm:$0xff]  }
 0x3e4   : > { %6799 = vmatpush1.bf16.msra.mxu1 %v12399_v42  ;;  %v12473_v42 = vld [vmem:[#allocation6 + $0x11d4] ss:$24 sps:$4 sm:$0xff]  }
 0x3e5   : > { %6800 = vmatprep.subr.bf16.mxu1 %v12407_v33  ;;  %v12456_v33 = vld [vmem:[#allocation6 + $0x910] ss:$24 sps:$4 sm:$0xff]  }
 0x3e6   : > { %4293 = vmatpush1.bf16.msra.mxu0 %v12396_v29  ;;  %v12470_v29 = vld [vmem:[#allocation6 + $0x974] ss:$24 sps:$4 sm:$0xff]  }
 0x3e7   : > { %4294 = vmatprep.subr.bf16.mxu0 %v12404_v6  ;;  %v12477_v6 = vld [vmem:[#allocation6 + $0xc10] ss:$24 sps:$4 sm:$0xff]  }
 0x3e8   : > { %6801 = vmatpush1.bf16.msra.mxu1 %v12405_v61  ;;  %v12479_v61 = vld [vmem:[#allocation6 + $0xc14] ss:$24 sps:$4 sm:$0xff]  }
 0x3e9   : > { %6802 = vmatprep.subr.bf16.mxu1 %v12413_v21  ;;  %v12462_v21 = vld [vmem:[#allocation6 + $0x940] ss:$24 sps:$4 sm:$0xff]  }
 0x3ea   : > { %4295 = vmatpush1.bf16.msra.mxu0 %v12402_v57  ;;  %v12468_v57 = vld [vmem:[#allocation6 + $0x970] ss:$24 sps:$4 sm:$0xff]  }
 0x3eb   : > { %4296 = vmatprep.subr.bf16.mxu0 %v12410_v4  ;;  %v12476_v4 = vld [vmem:[#allocation6 + $0x9a4] ss:$24 sps:$4 sm:$0xff]  }
 0x3ec   : > { %6803 = vmatpush1.bf16.msra.mxu1 %v12411_v31  ;;  %v14625_v31 = vrot.slane %v14558_v7, 1 }
 0x3ed   : > { %6804 = vmatprep.subr.bf16.mxu1 %v12419_v27  ;;  %v12485_v27 = vld [vmem:[#allocation6 + $0xc44] ss:$24 sps:$4 sm:$0xff]  }
 0x3ee   : > { %4297 = vmatpush1.bf16.msra.mxu0 %v12408_v53  ;;  %v12489_v53 = vld [vmem:[#allocation6 + $0xc70] ss:$24 sps:$4 sm:$0xff]  }
 0x3ef   : > { %4298 = vmatprep.subr.bf16.mxu0 %v12416_v35  ;;  %v12497_v35 = vld [vmem:[#allocation6 + $0xca4] ss:$24 sps:$4 sm:$0xff]  }
 0x3f0   : > { %6805 = vmatpush1.bf16.msra.mxu1 %v12417_v59  ;;  %v12474_v59 = vld [vmem:[#allocation6 + $0x9a0] ss:$24 sps:$4 sm:$0xff]  }
 0x3f1   : > { %6806 = vmatprep.subr.bf16.mxu1 %v12425_v12  ;;  %v12482_v12 = vld [vmem:[#allocation6 + $0x9d4] ss:$24 sps:$4 sm:$0xff]  }
 0x3f2   : > { %4299 = vmatpush1.bf16.msra.mxu0 %v12414_v51  ;;  %v12495_v51 = vld [vmem:[#allocation6 + $0xca0] ss:$24 sps:$4 sm:$0xff]  }
 0x3f3   : > { %4300 = vmatprep.subr.bf16.mxu0 %v12422_v52  ;;  %v12503_v52 = vld [vmem:[#allocation6 + $0xcd4] ss:$24 sps:$4 sm:$0xff]  }
 0x3f4   : > { %6807 = vmatpush1.bf16.msra.mxu1 %v12423_v5  ;;  %v12480_v5 = vld [vmem:[#allocation6 + $0x9d0] ss:$24 sps:$4 sm:$0xff]  }
 0x3f5   : > { %6808 = vmatprep.subr.bf16.mxu1 %v12431_v13  ;;  %v12488_v13 = vld [vmem:[#allocation6 + $0xa04] ss:$24 sps:$4 sm:$0xff]  }
 0x3f6   : > { %4301 = vmatpush1.bf16.msra.mxu0 %v12420_v46  ;;  %v12501_v46 = vld [vmem:[#allocation6 + $0xcd0] ss:$24 sps:$4 sm:$0xff]  }
 0x3f7   : > { %4302 = vmatprep.subr.bf16.mxu0 %v12428_v30  ;;  %v12509_v30 = vld [vmem:[#allocation6 + $0xd04] ss:$24 sps:$4 sm:$0xff]  }
 0x3f8   : > { %6809 = vmatpush1.bf16.msra.mxu1 %v12429_v3  ;;  %v12486_v3 = vld [vmem:[#allocation6 + $0xa00] ss:$24 sps:$4 sm:$0xff]  }
 0x3f9   : > { %6810 = vmatprep.subr.bf16.mxu1 %v12437_v62  ;;  %v12494_v62 = vld [vmem:[#allocation6 + $0xa34] ss:$24 sps:$4 sm:$0xff]  }
 0x3fa   : > { %4303 = vmatpush1.bf16.msra.mxu0 %v12426_v8  ;;  %v12507_v8 = vld [vmem:[#allocation6 + $0xd00] ss:$24 sps:$4 sm:$0xff]  }
 0x3fb   : > { %4304 = vmatprep.subr.bf16.mxu0 %v12434_v11  ;;  %v12515_v11 = vld [vmem:[#allocation6 + $0xd34] ss:$24 sps:$4 sm:$0xff]  }
 0x3fc   : > { %6811 = vmatpush1.bf16.msra.mxu1 %v12435_v18  ;;  %v12492_v18 = vld [vmem:[#allocation6 + $0xa30] ss:$24 sps:$4 sm:$0xff]  }
 0x3fd   : > { %6812 = vmatprep.subr.bf16.mxu1 %v12443_v39  ;;  %v12500_v39 = vld [vmem:[#allocation6 + $0xa64] ss:$24 sps:$4 sm:$0xff]  }
 0x3fe   : > { %4305 = vmatpush1.bf16.msra.mxu0 %v12432_v55  ;;  %v12513_v55 = vld [vmem:[#allocation6 + $0xd30] ss:$24 sps:$4 sm:$0xff]  }
 0x3ff   : > { %4306 = vmatprep.subr.bf16.mxu0 %v12440_v22  ;;  %v12521_v22 = vld [vmem:[#allocation6 + $0xd64] ss:$24 sps:$4 sm:$0xff]  }
 0x400   : > { %6813 = vmatpush1.bf16.msra.mxu1 %v12441_v48  ;;  %v12498_v48 = vld [vmem:[#allocation6 + $0xa60] ss:$24 sps:$4 sm:$0xff]  }
 0x401   : > { %6814 = vmatprep.subr.bf16.mxu1 %v12449_v28  ;;  %v12506_v28 = vld [vmem:[#allocation6 + $0xa94] ss:$24 sps:$4 sm:$0xff]  }
 0x402   : > { %4307 = vmatpush1.bf16.msra.mxu0 %v12438_v1  ;;  %v12519_v1 = vld [vmem:[#allocation6 + $0xd60] ss:$24 sps:$4 sm:$0xff]  }
 0x403   : > { %4308 = vmatprep.subr.bf16.mxu0 %v12446_v26  ;;  %v12527_v26 = vld [vmem:[#allocation6 + $0xd94] ss:$24 sps:$4 sm:$0xff]  }
 0x404   : > { %6815 = vmatpush1.bf16.msra.mxu1 %v12447_v44  ;;  %v12504_v44 = vld [vmem:[#allocation6 + $0xa90] ss:$24 sps:$4 sm:$0xff]  }
 0x405   : > { %6816 = vmatprep.subr.bf16.mxu1 %v12455_v0  ;;  %v12512_v0 = vld [vmem:[#allocation6 + $0xac4] ss:$24 sps:$4 sm:$0xff]  }
 0x406   : > { %4309 = vmatpush1.bf16.msra.mxu0 %v12444_v58  ;;  %v12525_v58 = vld [vmem:[#allocation6 + $0xd90] ss:$24 sps:$4 sm:$0xff]  }
 0x407   : > { %4310 = vmatprep.subr.bf16.mxu0 %v12452_v2  ;;  %v12533_v2 = vld [vmem:[#allocation6 + $0xdc4] ss:$24 sps:$4 sm:$0xff]  }
 0x408   : > { %6817 = vmatpush1.bf16.msra.mxu1 %v12453_v25  ;;  %v12510_v25 = vld [vmem:[#allocation6 + $0xac0] ss:$24 sps:$4 sm:$0xff]  }
 0x409   : > { %6818 = vmatprep.subr.bf16.mxu1 %v12461_v10  ;;  %v12518_v10 = vld [vmem:[#allocation6 + $0xaf4] ss:$24 sps:$4 sm:$0xff]  }
 0x40a   : > { %4311 = vmatpush1.bf16.msra.mxu0 %v12450_v24  ;;  %v12531_v24 = vld [vmem:[#allocation6 + $0xdc0] ss:$24 sps:$4 sm:$0xff]  }
 0x40b   : > { %4323 = vmatprep.subr.bf16.mxu0 %v12458_v63  ;;  %v12539_v63 = vld [vmem:[#allocation6 + $0xdf4] ss:$24 sps:$4 sm:$0xff]  }
 0x40c   : > { %6819 = vmatpush1.bf16.msra.mxu1 %v12459_v37  ;;  %v12516_v37 = vld [vmem:[#allocation6 + $0xaf0] ss:$24 sps:$4 sm:$0xff]  }
 0x40d   : > { %6820 = vmatprep.subr.bf16.mxu1 %v12467_v38  ;;  %4313 = vmatmul.mubr.bf16.vlgmr.msra.gmra.mrb[24].mxu0 %v14528_v34  ;;  %v12483_v34 = vld [vmem:[#allocation6 + $0xc40] ss:$24 sps:$4 sm:$0xff]   ;;  %v12524_v38 = vld [vmem:[#allocation6 + $0xb24] ss:$24 sps:$4 sm:$0xff]  }
 0x40e   : > { %4324 = vmatpush1.bf16.msra.mxu0 %v12456_v33  ;;  %4355 = vmatprep.mubr.bf16.mxu0 %v14584_v15  ;;  %v12491_v15 = vld [vmem:[#allocation6 + $0xc74] ss:$24 sps:$4 sm:$0xff]   ;;  %v12537_v33 = vld [vmem:[#allocation6 + $0xdf0] ss:$24 sps:$4 sm:$0xff]  }
 0x40f   : > { %4325 = vmatprep.subr.bf16.mxu0 %v12464_v60  ;;  %v12545_v60 = vld [vmem:[#allocation6 + $0xe24] ss:$24 sps:$4 sm:$0xff]  }
 0x410   : > { %6821 = vmatpush1.bf16.msra.mxu1 %v12465_v14  ;;  %v12522_v14 = vld [vmem:[#allocation6 + $0xb20] ss:$24 sps:$4 sm:$0xff]  }
 0x411   : > { %6822 = vmatprep.subr.bf16.mxu1 %v12473_v42  ;;  %v12530_v42 = vld [vmem:[#allocation6 + $0xb54] ss:$24 sps:$4 sm:$0xff]  }
 0x412   : > { %4326 = vmatpush1.bf16.msra.mxu0 %v12462_v21  ;;  %v12543_v21 = vld [vmem:[#allocation6 + $0xe20] ss:$24 sps:$4 sm:$0xff]  }
 0x413   : > { %4327 = vmatprep.subr.bf16.mxu0 %v12470_v29  ;;  %v12551_v29 = vld [vmem:[#allocation6 + $0xe54] ss:$24 sps:$4 sm:$0xff]  }
 0x414   : > { %6823 = vmatpush1.bf16.msra.mxu1 %v12471_v9  ;;  %v12528_v9 = vld [vmem:[#allocation6 + $0xb50] ss:$24 sps:$4 sm:$0xff]  }
 0x415   : > { %6921 = vmatprep.subr.bf16.mxu1 %v12479_v61  ;;  %v12536_v61 = vld [vmem:[#allocation6 + $0xb84] ss:$24 sps:$4 sm:$0xff]  }
 0x416   : > { %4328 = vmatpush1.bf16.msra.mxu0 %v12468_v57  ;;  %v12549_v57 = vld [vmem:[#allocation6 + $0xe50] ss:$24 sps:$4 sm:$0xff]  }
 0x417   : > { %6825 = vmatmul.mubr.bf16.vlgmr.msra.gmra.mrb[20].mxu1 %v14625_v31  ;;  %4329 = vmatprep.subr.bf16.mxu0 %v12476_v4  ;;  %v12557_v4 = vld [vmem:[#allocation6 + $0xe84] ss:$24 sps:$4 sm:$0xff]  }
 0x418   : > { %6922 = vmatpush1.bf16.msra.mxu1 %v12477_v6  ;;  %6953 = vmatprep.mubr.bf16.mxu1 %v14606_v47  ;;  %v12534_v6 = vld [vmem:[#allocation6 + $0xb80] ss:$24 sps:$4 sm:$0xff]  }
 0x419   : > { %6923 = vmatprep.subr.bf16.mxu1 %v12485_v27  ;;  %v12542_v27 = vld [vmem:[#allocation6 + $0xbb4] ss:$24 sps:$4 sm:$0xff]  }
 0x41a   : > { %4330 = vmatpush1.bf16.msra.mxu0 %v12474_v59  ;;  %v12555_v59 = vld [vmem:[#allocation6 + $0xe80] ss:$24 sps:$4 sm:$0xff]  }
 0x41b   : > { %4331 = vmatprep.subr.bf16.mxu0 %v12482_v12  ;;  %v12563_v12 = vld [vmem:[#allocation6 + $0xeb4] ss:$24 sps:$4 sm:$0xff]  }
 0x41c   : > { %6924 = vmatpush1.bf16.msra.mxu1 %v12483_v34  ;;  %v12540_v34 = vld [vmem:[#allocation6 + $0xbb0] ss:$24 sps:$4 sm:$0xff]  }
 0x41d   : > { %6925 = vmatprep.subr.bf16.mxu1 %v12491_v15  ;;  %v12548_v15 = vld [vmem:[#allocation6 + $0xbe4] ss:$24 sps:$4 sm:$0xff]  }
 0x41e   : > { %4332 = vmatpush1.bf16.msra.mxu0 %v12480_v5  ;;  %v12561_v5 = vld [vmem:[#allocation6 + $0xeb0] ss:$24 sps:$4 sm:$0xff]  }
 0x41f   : > { %4333 = vmatprep.subr.bf16.mxu0 %v12488_v13  ;;  %v12569_v13 = vld [vmem:[#allocation6 + $0xee4] ss:$24 sps:$4 sm:$0xff]  }
 0x420   : > { %6926 = vmatpush1.bf16.msra.mxu1 %v12489_v53  ;;  %v12546_v53 = vld [vmem:[#allocation6 + $0xbe0] ss:$24 sps:$4 sm:$0xff]  }
 0x421   : > { %6927 = vmatprep.subr.bf16.mxu1 %v12497_v35  ;;  %v12554_v35 = vld [vmem:[#allocation6 + $0x4] ss:$24 sps:$4 sm:$0xff]  }
 0x422   : > { %4334 = vmatpush1.bf16.msra.mxu0 %v12486_v3  ;;  %v12567_v3 = vld [vmem:[#allocation6 + $0xee0] ss:$24 sps:$4 sm:$0xff]  }
 0x423   : > { %4335 = vmatprep.subr.bf16.mxu0 %v12494_v62  ;;  %v12575_v62 = vld [vmem:[#allocation6 + $0xf14] ss:$24 sps:$4 sm:$0xff]  }
 0x424   : > { %6928 = vmatpush1.bf16.msra.mxu1 %v12495_v51  ;;  %v12552_v51 = vld [vmem:[#allocation6] ss:$24 sps:$4 sm:$0xff]  }
 0x425   : > { %6929 = vmatprep.subr.bf16.mxu1 %v12503_v52  ;;  %v12560_v52 = vld [vmem:[#allocation6 + $0x34] ss:$24 sps:$4 sm:$0xff]  }
 0x426   : > { %4336 = vmatpush1.bf16.msra.mxu0 %v12492_v18  ;;  %v12573_v18 = vld [vmem:[#allocation6 + $0xf10] ss:$24 sps:$4 sm:$0xff]  }
 0x427   : > { %4337 = vmatprep.subr.bf16.mxu0 %v12500_v39  ;;  %v12581_v39 = vld [vmem:[#allocation6 + $0xf44] ss:$24 sps:$4 sm:$0xff]  }
 0x428   : > { %6930 = vmatpush1.bf16.msra.mxu1 %v12501_v46  ;;  %v12558_v46 = vld [vmem:[#allocation6 + $0x30] ss:$24 sps:$4 sm:$0xff]  }
 0x429   : > { %6931 = vmatprep.subr.bf16.mxu1 %v12509_v30  ;;  %v12566_v30 = vld [vmem:[#allocation6 + $0x64] ss:$24 sps:$4 sm:$0xff]  }
 0x42a   : > { %4338 = vmatpush1.bf16.msra.mxu0 %v12498_v48  ;;  %v12587_v48 = vld [vmem:[#allocation6 + $0xf74] ss:$24 sps:$4 sm:$0xff]  }
 0x42b   : > { %4339 = vmatprep.subr.bf16.mxu0 %v12506_v28  ;;  %v12570_v28 = vld [vmem:[#allocation6 + $0x90] ss:$24 sps:$4 sm:$0xff]  }
 0x42c   : > { %6932 = vmatpush1.bf16.msra.mxu1 %v12507_v8  ;;  %v12564_v8 = vld [vmem:[#allocation6 + $0x60] ss:$24 sps:$4 sm:$0xff]  }
 0x42d   : > { %6933 = vmatprep.subr.bf16.mxu1 %v12515_v11  ;;  %v12572_v11 = vld [vmem:[#allocation6 + $0x94] ss:$24 sps:$4 sm:$0xff]  }
 0x42e   : > { %4340 = vmatpush1.bf16.msra.mxu0 %v12504_v44  ;;  %v12593_v44 = vld [vmem:[#allocation6 + $0xfa4] ss:$24 sps:$4 sm:$0xff]  }
 0x42f   : > { %4341 = vmatprep.subr.bf16.mxu0 %v12512_v0  ;;  %v12576_v0 = vld [vmem:[#allocation6 + $0xc0] ss:$24 sps:$4 sm:$0xff]  }
 0x430   : > { %6934 = vmatpush1.bf16.msra.mxu1 %v12513_v55  ;;  %v12578_v55 = vld [vmem:[#allocation6 + $0xc4] ss:$24 sps:$4 sm:$0xff]  }
 0x431   : > { %6935 = vmatprep.subr.bf16.mxu1 %v12521_v22  ;;  %v12585_v22 = vld [vmem:[#allocation6 + $0xf70] ss:$24 sps:$4 sm:$0xff]  }
 0x432   : > { %4342 = vmatpush1.bf16.msra.mxu0 %v12510_v25  ;;  %v12599_v25 = vld [vmem:[#allocation6 + $0xfd4] ss:$24 sps:$4 sm:$0xff]  }
 0x433   : > { %4343 = vmatprep.subr.bf16.mxu0 %v12518_v10  ;;  %v12582_v10 = vld [vmem:[#allocation6 + $0xf0] ss:$24 sps:$4 sm:$0xff]  }
 0x434   : > { %6936 = vmatpush1.bf16.msra.mxu1 %v12519_v1  ;;  %v12584_v1 = vld [vmem:[#allocation6 + $0xf4] ss:$24 sps:$4 sm:$0xff]  }
 0x435   : > { %6937 = vmatprep.subr.bf16.mxu1 %v12527_v26  ;;  %v12591_v26 = vld [vmem:[#allocation6 + $0xfa0] ss:$24 sps:$4 sm:$0xff]  }
 0x436   : > { %4344 = vmatpush1.bf16.msra.mxu0 %v12516_v37  ;;  %v12605_v37 = vld [vmem:[#allocation6 + $0x1004] ss:$24 sps:$4 sm:$0xff]  }
 0x437   : > { %4345 = vmatprep.subr.bf16.mxu0 %v12524_v38  ;;  %v12588_v38 = vld [vmem:[#allocation6 + $0x120] ss:$24 sps:$4 sm:$0xff]  }
 0x438   : > { %6938 = vmatpush1.bf16.msra.mxu1 %v12525_v58  ;;  %v12590_v58 = vld [vmem:[#allocation6 + $0x124] ss:$24 sps:$4 sm:$0xff]  }
 0x439   : > { %6939 = vmatprep.subr.bf16.mxu1 %v12533_v2  ;;  %v12597_v2 = vld [vmem:[#allocation6 + $0xfd0] ss:$24 sps:$4 sm:$0xff]  }
 0x43a   : > { %4346 = vmatpush1.bf16.msra.mxu0 %v12522_v14  ;;  %v12611_v14 = vld [vmem:[#allocation6 + $0x1034] ss:$24 sps:$4 sm:$0xff]  }
 0x43b   : > { %4347 = vmatprep.subr.bf16.mxu0 %v12530_v42  ;;  %v12594_v42 = vld [vmem:[#allocation6 + $0x150] ss:$24 sps:$4 sm:$0xff]  }
 0x43c   : > { %6940 = vmatpush1.bf16.msra.mxu1 %v12531_v24  ;;  %v12596_v24 = vld [vmem:[#allocation6 + $0x154] ss:$24 sps:$4 sm:$0xff]  }
 0x43d   : > { %6941 = vmatprep.subr.bf16.mxu1 %v12539_v63  ;;  %v12603_v63 = vld [vmem:[#allocation6 + $0x1000] ss:$24 sps:$4 sm:$0xff]  }
 0x43e   : > { %4348 = vmatpush1.bf16.msra.mxu0 %v12528_v9  ;;  %v12617_v9 = vld [vmem:[#allocation6 + $0x1064] ss:$24 sps:$4 sm:$0xff]  }
 0x43f   : > { %4349 = vmatprep.subr.bf16.mxu0 %v12536_v61  ;;  %v12600_v61 = vld [vmem:[#allocation6 + $0x180] ss:$24 sps:$4 sm:$0xff]  }
 0x440   : > { %6942 = vmatpush1.bf16.msra.mxu1 %v12537_v33  ;;  %v12602_v33 = vld [vmem:[#allocation6 + $0x184] ss:$24 sps:$4 sm:$0xff]  }
 0x441   : > { %6943 = vmatprep.subr.bf16.mxu1 %v12545_v60  ;;  %v12609_v60 = vld [vmem:[#allocation6 + $0x1030] ss:$24 sps:$4 sm:$0xff]  }
 0x442   : > { %4350 = vmatpush1.bf16.msra.mxu0 %v12534_v6  ;;  %v12623_v6 = vld [vmem:[#allocation6 + $0x1094] ss:$24 sps:$4 sm:$0xff]  }
 0x443   : > { %4351 = vmatprep.subr.bf16.mxu0 %v12542_v27  ;;  %v12606_v27 = vld [vmem:[#allocation6 + $0x1b0] ss:$24 sps:$4 sm:$0xff]  }
 0x444   : > { %6944 = vmatpush1.bf16.msra.mxu1 %v12543_v21  ;;  %v12608_v21 = vld [vmem:[#allocation6 + $0x1b4] ss:$24 sps:$4 sm:$0xff]  }
 0x445   : > { %6945 = vmatprep.subr.bf16.mxu1 %v12551_v29  ;;  %v12615_v29 = vld [vmem:[#allocation6 + $0x1060] ss:$24 sps:$4 sm:$0xff]  }
 0x446   : > { %4352 = vmatpush1.bf16.msra.mxu0 %v12540_v34  ;;  %v12629_v34 = vld [vmem:[#allocation6 + $0x10c4] ss:$24 sps:$4 sm:$0xff]  }
 0x447   : > { %4353 = vmatprep.subr.bf16.mxu0 %v12548_v15  ;;  %v12612_v15 = vld [vmem:[#allocation6 + $0x1e0] ss:$24 sps:$4 sm:$0xff]  }
 0x448   : > { %6946 = vmatpush1.bf16.msra.mxu1 %v12549_v57  ;;  %v12614_v57 = vld [vmem:[#allocation6 + $0x1e4] ss:$24 sps:$4 sm:$0xff]  }
 0x449   : > { %6947 = vmatprep.subr.bf16.mxu1 %v12557_v4  ;;  %v12621_v4 = vld [vmem:[#allocation6 + $0x1090] ss:$24 sps:$4 sm:$0xff]  }
 0x44a   : > { %4354 = vmatpush1.bf16.msra.mxu0 %v12546_v53  ;;  %v12635_v53 = vld [vmem:[#allocation6 + $0x10f4] ss:$24 sps:$4 sm:$0xff]  }
 0x44b   : > { %5326 = vmatprep.subr.bf16.mxu0 %v12554_v35  ;;  %v12618_v35 = vld [vmem:[#allocation6 + $0x210] ss:$24 sps:$4 sm:$0xff]  }
 0x44c   : > { %6948 = vmatpush1.bf16.msra.mxu1 %v12555_v59  ;;  %v12620_v59 = vld [vmem:[#allocation6 + $0x214] ss:$24 sps:$4 sm:$0xff]  }
 0x44d   : > { %6949 = vmatprep.subr.bf16.mxu1 %v12563_v12  ;;  %4356 = vmatmul.mubr.bf16.vlgmr.msra.gmra.mrb[24].mxu0 %v14593_v36  ;;  %v12579_v36 = vld [vmem:[#allocation6 + $0xf40] ss:$24 sps:$4 sm:$0xff]  }
 0x44e   : > { %5327 = vmatpush1.bf16.msra.mxu0 %v12552_v51  ;;  %10807 = vmatprep.mubr.msk.bf16.mxu0 %vm14554_vm14, %v14519_v19  ;;  %v12627_v12 = vld [vmem:[#allocation6 + $0x10c0] ss:$24 sps:$4 sm:$0xff]   ;;  %v12641_v51 = vld [vmem:[#allocation6 + $0x1124] ss:$24 sps:$4 sm:$0xff]  }
 0x44f   : > { %5328 = vmatprep.subr.bf16.mxu0 %v12560_v52  ;;  %v12624_v52 = vld [vmem:[#allocation6 + $0x240] ss:$24 sps:$4 sm:$0xff]  }
 0x450   : > { %6950 = vmatpush1.bf16.msra.mxu1 %v12561_v5  ;;  %v12626_v5 = vld [vmem:[#allocation6 + $0x244] ss:$24 sps:$4 sm:$0xff]  }
 0x451   : > { %6951 = vmatprep.subr.bf16.mxu1 %v12569_v13  ;;  %v12633_v13 = vld [vmem:[#allocation6 + $0x10f0] ss:$24 sps:$4 sm:$0xff]  }
 0x452   : > { %5329 = vmatpush1.bf16.msra.mxu0 %v12558_v46  ;;  %v12647_v46 = vld [vmem:[#allocation6 + $0x1154] ss:$24 sps:$4 sm:$0xff]  }
 0x453   : > { %5330 = vmatprep.subr.bf16.mxu0 %v12566_v30  ;;  %v12630_v30 = vld [vmem:[#allocation6 + $0x270] ss:$24 sps:$4 sm:$0xff]  }
 0x454   : > { %6952 = vmatpush1.bf16.msra.mxu1 %v12567_v3  ;;  %v12632_v3 = vld [vmem:[#allocation6 + $0x274] ss:$24 sps:$4 sm:$0xff]  }
 0x455   : > { %6964 = vmatprep.subr.bf16.mxu1 %v12575_v62  ;;  %v12639_v62 = vld [vmem:[#allocation6 + $0x1120] ss:$24 sps:$4 sm:$0xff]  }
 0x456   : > { %5331 = vmatpush1.bf16.msra.mxu0 %v12564_v8  ;;  %v12653_v8 = vld [vmem:[#allocation6 + $0x1184] ss:$24 sps:$4 sm:$0xff]  }
 0x457   : > { %6954 = vmatmul.mubr.bf16.vlgmr.msra.gmra.mrb[24].mxu1 %v14615_v17  ;;  %5332 = vmatprep.subr.bf16.mxu0 %v12572_v11  ;;  %v12636_v11 = vld [vmem:[#allocation6 + $0x2a0] ss:$24 sps:$4 sm:$0xff]  }
 0x458   : > { %6965 = vmatpush1.bf16.msra.mxu1 %v12573_v18  ;;  %6996 = vmatprep.mubr.bf16.mxu1 %v14618_v41  ;;  %v12638_v18 = vld [vmem:[#allocation6 + $0x2a4] ss:$24 sps:$4 sm:$0xff]  }
 0x459   : > { %6966 = vmatprep.subr.bf16.mxu1 %v12581_v39  ;;  %v12645_v39 = vld [vmem:[#allocation6 + $0x1150] ss:$24 sps:$4 sm:$0xff]  }
 0x45a   : > { %5333 = vmatpush1.bf16.msra.mxu0 %v12570_v28  ;;  %v12659_v28 = vld [vmem:[#allocation6 + $0x11b4] ss:$24 sps:$4 sm:$0xff]  }
 0x45b   : > { %5334 = vmatprep.subr.bf16.mxu0 %v12578_v55  ;;  %v12642_v55 = vld [vmem:[#allocation6 + $0x2d0] ss:$24 sps:$4 sm:$0xff]  }
 0x45c   : > { %6967 = vmatpush1.bf16.msra.mxu1 %v12579_v36  ;;  %v12644_v36 = vld [vmem:[#allocation6 + $0x2d4] ss:$24 sps:$4 sm:$0xff]  }
 0x45d   : > { %6968 = vmatprep.subr.bf16.mxu1 %v12587_v48  ;;  %v12651_v48 = vld [vmem:[#allocation6 + $0x1180] ss:$24 sps:$4 sm:$0xff]  }
 0x45e   : > { %5335 = vmatpush1.bf16.msra.mxu0 %v12576_v0  ;;  %v12665_v0 = vld [vmem:[#allocation6 + $0x11e4] ss:$24 sps:$4 sm:$0xff]  }
 0x45f   : > { %5336 = vmatprep.subr.bf16.mxu0 %v12584_v1  ;;  %v12648_v1 = vld [vmem:[#allocation6 + $0x8] ss:$24 sps:$4 sm:$0xff]  }
 0x460   : > { %6969 = vmatpush1.bf16.msra.mxu1 %v12585_v22  ;;  %v12650_v22 = vld [vmem:[#allocation6 + $0xc] ss:$24 sps:$4 sm:$0xff]  }
 0x461   : > { %6970 = vmatprep.subr.bf16.mxu1 %v12593_v44  ;;  %v12657_v44 = vld [vmem:[#allocation6 + $0x11b0] ss:$24 sps:$4 sm:$0xff]  }
 0x462   : > { %5337 = vmatpush1.bf16.msra.mxu0 %v12582_v10  ;;  %v12671_v10 = vld [vmem:[#allocation6 + $0x1204] ss:$24 sps:$4 sm:$0xff]  }
 0x463   : > { %5338 = vmatprep.subr.bf16.mxu0 %v12590_v58  ;;  %v12654_v58 = vld [vmem:[#allocation6 + $0x38] ss:$24 sps:$4 sm:$0xff]  }
 0x464   : > { %6971 = vmatpush1.bf16.msra.mxu1 %v12591_v26  ;;  %v12656_v26 = vld [vmem:[#allocation6 + $0x3c] ss:$24 sps:$4 sm:$0xff]  }
 0x465   : > { %6972 = vmatprep.subr.bf16.mxu1 %v12599_v25  ;;  %v12663_v25 = vld [vmem:[#allocation6 + $0x11e0] ss:$24 sps:$4 sm:$0xff]  }
 0x466   : > { %5339 = vmatpush1.bf16.msra.mxu0 %v12588_v38  ;;  %v12677_v38 = vld [vmem:[#allocation6 + $0x1234] ss:$24 sps:$4 sm:$0xff]  }
 0x467   : > { %5340 = vmatprep.subr.bf16.mxu0 %v12596_v24  ;;  %v12660_v24 = vld [vmem:[#allocation6 + $0x68] ss:$24 sps:$4 sm:$0xff]  }
 0x468   : > { %6973 = vmatpush1.bf16.msra.mxu1 %v12597_v2  ;;  %v12662_v2 = vld [vmem:[#allocation6 + $0x6c] ss:$24 sps:$4 sm:$0xff]  }
 0x469   : > { %6974 = vmatprep.subr.bf16.mxu1 %v12605_v37  ;;  %v12669_v37 = vld [vmem:[#allocation6 + $0x1200] ss:$24 sps:$4 sm:$0xff]  }
 0x46a   : > { %5341 = vmatpush1.bf16.msra.mxu0 %v12594_v42  ;;  %v12683_v42 = vld [vmem:[#allocation6 + $0x1264] ss:$24 sps:$4 sm:$0xff]  }
 0x46b   : > { %5342 = vmatprep.subr.bf16.mxu0 %v12602_v33  ;;  %v12674_v33 = vld [vmem:[#allocation6 + $0xcc] ss:$24 sps:$4 sm:$0xff]  }
 0x46c   : > { %6975 = vmatpush1.bf16.msra.mxu1 %v12603_v63  ;;  %v12668_v63 = vld [vmem:[#allocation6 + $0x9c] ss:$24 sps:$4 sm:$0xff]  }
 0x46d   : > { %6976 = vmatprep.subr.bf16.mxu1 %v12611_v14  ;;  %v12675_v14 = vld [vmem:[#allocation6 + $0x1230] ss:$24 sps:$4 sm:$0xff]  }
 0x46e   : > { %5343 = vmatpush1.bf16.msra.mxu0 %v12600_v61  ;;  %v12672_v61 = vld [vmem:[#allocation6 + $0xc8] ss:$24 sps:$4 sm:$0xff]  }
 0x46f   : > { %5344 = vmatprep.subr.bf16.mxu0 %v12608_v21  ;;  %v12680_v21 = vld [vmem:[#allocation6 + $0xfc] ss:$24 sps:$4 sm:$0xff]  }
 0x470   : > { %6977 = vmatpush1.bf16.msra.mxu1 %v12609_v60  ;;  %v12681_v60 = vld [vmem:[#allocation6 + $0x1260] ss:$24 sps:$4 sm:$0xff]  }
 0x471   : > { %6978 = vmatprep.subr.bf16.mxu1 %v12617_v9  ;;  %v12689_v9 = vld [vmem:[#allocation6 + $0x1294] ss:$24 sps:$4 sm:$0xff]  }
 0x472   : > { %5345 = vmatpush1.bf16.msra.mxu0 %v12606_v27  ;;  %v12678_v27 = vld [vmem:[#allocation6 + $0xf8] ss:$24 sps:$4 sm:$0xff]  }
 0x473   : > { %5346 = vmatprep.subr.bf16.mxu0 %v12614_v57  ;;  %v12686_v57 = vld [vmem:[#allocation6 + $0x12c] ss:$24 sps:$4 sm:$0xff]  }
 0x474   : > { %6979 = vmatpush1.bf16.msra.mxu1 %v12615_v29  ;;  %v12687_v29 = vld [vmem:[#allocation6 + $0x1290] ss:$24 sps:$4 sm:$0xff]  }
 0x475   : > { %6980 = vmatprep.subr.bf16.mxu1 %v12623_v6  ;;  %v12695_v6 = vld [vmem:[#allocation6 + $0x12c4] ss:$24 sps:$4 sm:$0xff]  }
 0x476   : > { %5347 = vmatpush1.bf16.msra.mxu0 %v12612_v15  ;;  %v12684_v15 = vld [vmem:[#allocation6 + $0x128] ss:$24 sps:$4 sm:$0xff]  }
 0x477   : > { %5348 = vmatprep.subr.bf16.mxu0 %v12620_v59  ;;  %v12692_v59 = vld [vmem:[#allocation6 + $0x15c] ss:$24 sps:$4 sm:$0xff]  }
 0x478   : > { %6981 = vmatpush1.bf16.msra.mxu1 %v12621_v4  ;;  %v12693_v4 = vld [vmem:[#allocation6 + $0x12c0] ss:$24 sps:$4 sm:$0xff]  }
 0x479   : > { %6982 = vmatprep.subr.bf16.mxu1 %v12629_v34  ;;  %v12701_v34 = vld [vmem:[#allocation6 + $0x12f4] ss:$24 sps:$4 sm:$0xff]  }
 0x47a   : > { %5349 = vmatpush1.bf16.msra.mxu0 %v12618_v35  ;;  %v12690_v35 = vld [vmem:[#allocation6 + $0x158] ss:$24 sps:$4 sm:$0xff]  }
 0x47b   : > { %5350 = vmatprep.subr.bf16.mxu0 %v12626_v5  ;;  %v12698_v5 = vld [vmem:[#allocation6 + $0x18c] ss:$24 sps:$4 sm:$0xff]  }
 0x47c   : > { %6983 = vmatpush1.bf16.msra.mxu1 %v12627_v12  ;;  %v12699_v12 = vld [vmem:[#allocation6 + $0x12f0] ss:$24 sps:$4 sm:$0xff]  }
 0x47d   : > { %6984 = vmatprep.subr.bf16.mxu1 %v12635_v53  ;;  %v12707_v53 = vld [vmem:[#allocation6 + $0x1324] ss:$24 sps:$4 sm:$0xff]  }
 0x47e   : > { %5351 = vmatpush1.bf16.msra.mxu0 %v12624_v52  ;;  %v12696_v52 = vld [vmem:[#allocation6 + $0x188] ss:$24 sps:$4 sm:$0xff]  }
 0x47f   : > { %5352 = vmatprep.subr.bf16.mxu0 %v12632_v3  ;;  %v12704_v3 = vld [vmem:[#allocation6 + $0x1bc] ss:$24 sps:$4 sm:$0xff]  }
 0x480   : > { %6985 = vmatpush1.bf16.msra.mxu1 %v12633_v13  ;;  %v12705_v13 = vld [vmem:[#allocation6 + $0x1320] ss:$24 sps:$4 sm:$0xff]  }
 0x481   : > { %6986 = vmatprep.subr.bf16.mxu1 %v12641_v51  ;;  %v12713_v51 = vld [vmem:[#allocation6 + $0x1354] ss:$24 sps:$4 sm:$0xff]  }
 0x482   : > { %5353 = vmatpush1.bf16.msra.mxu0 %v12630_v30  ;;  %v12702_v30 = vld [vmem:[#allocation6 + $0x1b8] ss:$24 sps:$4 sm:$0xff]  }
 0x483   : > { %5354 = vmatprep.subr.bf16.mxu0 %v12638_v18  ;;  %v12710_v18 = vld [vmem:[#allocation6 + $0x1ec] ss:$24 sps:$4 sm:$0xff]  }
 0x484   : > { %6987 = vmatpush1.bf16.msra.mxu1 %v12639_v62  ;;  %v12711_v62 = vld [vmem:[#allocation6 + $0x1350] ss:$24 sps:$4 sm:$0xff]  }
 0x485   : > { %6988 = vmatprep.subr.bf16.mxu1 %v12647_v46  ;;  %v12719_v46 = vld [vmem:[#allocation6 + $0x1384] ss:$24 sps:$4 sm:$0xff]  }
 0x486   : > { %5355 = vmatpush1.bf16.msra.mxu0 %v12636_v11  ;;  %v12708_v11 = vld [vmem:[#allocation6 + $0x1e8] ss:$24 sps:$4 sm:$0xff]  }
 0x487   : > { %5356 = vmatprep.subr.bf16.mxu0 %v12644_v36  ;;  %v12716_v36 = vld [vmem:[#allocation6 + $0x21c] ss:$24 sps:$4 sm:$0xff]  }
 0x488   : > { %6989 = vmatpush1.bf16.msra.mxu1 %v12645_v39  ;;  %v12717_v39 = vld [vmem:[#allocation6 + $0x1380] ss:$24 sps:$4 sm:$0xff]  }
 0x489   : > { %6990 = vmatprep.subr.bf16.mxu1 %v12653_v8  ;;  %v12725_v8 = vld [vmem:[#allocation6 + $0x13b4] ss:$24 sps:$4 sm:$0xff]  }
 0x48a   : > { %5357 = vmatpush1.bf16.msra.mxu0 %v12642_v55  ;;  %v12714_v55 = vld [vmem:[#allocation6 + $0x218] ss:$24 sps:$4 sm:$0xff]  }
 0x48b   : > { %5412 = vmatprep.subr.bf16.mxu0 %v12650_v22  ;;  %v12722_v22 = vld [vmem:[#allocation6 + $0x24c] ss:$24 sps:$4 sm:$0xff]  }
 0x48c   : > { %6991 = vmatpush1.bf16.msra.mxu1 %v12651_v48  ;;  %v12723_v48 = vld [vmem:[#allocation6 + $0x13b0] ss:$24 sps:$4 sm:$0xff]  }
 0x48d   : > { %6992 = vmatprep.subr.bf16.mxu1 %v12659_v28  ;;  %10811 = vmatmul.mubr.msk.bf16.vlgmr.msra.gmra.mrb[16].mxu0 %vm14554_vm14, %v14500_v54  ;;  %v12731_v28 = vld [vmem:[#allocation6 + $0x13e4] ss:$24 sps:$4 sm:$0xff]  }
 0x48e   : > { %5413 = vmatpush1.bf16.msra.mxu0 %v12648_v1  ;;  %10823 = vmatprep.mubr.msk.bf16.mxu0 %vm14554_vm14, %v14519_v19  ;;  %v12666_v19 = vld [vmem:[#allocation6 + $0x98] ss:$24 sps:$4 sm:$0xff]   ;;  %v12720_v1 = vld [vmem:[#allocation6 + $0x248] ss:$24 sps:$4 sm:$0xff]  }
 0x48f   : > { %5414 = vmatprep.subr.bf16.mxu0 %v12656_v26  ;;  %v12728_v26 = vld [vmem:[#allocation6 + $0x27c] ss:$24 sps:$4 sm:$0xff]  }
 0x490   : > { %6993 = vmatpush1.bf16.msra.mxu1 %v12657_v44  ;;  %v12729_v44 = vld [vmem:[#allocation6 + $0x13e0] ss:$24 sps:$4 sm:$0xff]  }
 0x491   : > { %6994 = vmatprep.subr.bf16.mxu1 %v12665_v0  ;;  %v12737_v0 = vld [vmem:[#allocation6 + $0x1414] ss:$24 sps:$4 sm:$0xff]  }
 0x492   : > { %5415 = vmatpush1.bf16.msra.mxu0 %v12654_v58  ;;  %v12726_v58 = vld [vmem:[#allocation6 + $0x278] ss:$24 sps:$4 sm:$0xff]  }
 0x493   : > { %5416 = vmatprep.subr.bf16.mxu0 %v12662_v2  ;;  %v12734_v2 = vld [vmem:[#allocation6 + $0x2ac] ss:$24 sps:$4 sm:$0xff]  }
 0x494   : > { %6995 = vmatpush1.bf16.msra.mxu1 %v12663_v25  ;;  %v12735_v25 = vld [vmem:[#allocation6 + $0x1410] ss:$24 sps:$4 sm:$0xff]  }
 0x495   : > { %8188 = vmatprep.subr.bf16.mxu1 %v12671_v10  ;;  %v12743_v10 = vld [vmem:[#allocation6 + $0x1444] ss:$24 sps:$4 sm:$0xff]  }
 0x496   : > { %5417 = vmatpush1.bf16.msra.mxu0 %v12660_v24  ;;  %v12732_v24 = vld [vmem:[#allocation6 + $0x2a8] ss:$24 sps:$4 sm:$0xff]  }
 0x497   : > { %6997 = vmatmul.mubr.bf16.vlgmr.msra.gmra.mrb[24].mxu1 %v14625_v31  ;;  %5418 = vmatprep.subr.bf16.mxu0 %v12668_v63  ;;  %v12740_v63 = vld [vmem:[#allocation6 + $0x2dc] ss:$24 sps:$4 sm:$0xff]  }
 0x498   : > { %8189 = vmatpush1.bf16.msra.mxu1 %v12669_v37  ;;  %8220 = vmatprep.mubr.bf16.mxu1 %v14537_v20  ;;  %v12741_v37 = vld [vmem:[#allocation6 + $0x1440] ss:$24 sps:$4 sm:$0xff]  }
 0x499   : > { %8190 = vmatprep.subr.bf16.mxu1 %v12677_v38  ;;  %v12749_v38 = vld [vmem:[#allocation6 + $0x1474] ss:$24 sps:$4 sm:$0xff]  }
 0x49a   : > { %5419 = vmatpush1.bf16.msra.mxu0 %v12666_v19  ;;  %v12738_v19 = vld [vmem:[#allocation6 + $0x2d8] ss:$24 sps:$4 sm:$0xff]  }
 0x49b   : > { %5420 = vmatprep.subr.bf16.mxu0 %v12674_v33  ;;  %v12746_v33 = vld [vmem:[#allocation6 + $0x30c] ss:$24 sps:$4 sm:$0xff]  }
 0x49c   : > { %8191 = vmatpush1.bf16.msra.mxu1 %v12675_v14  ;;  %v12747_v14 = vld [vmem:[#allocation6 + $0x1470] ss:$24 sps:$4 sm:$0xff]  }
 0x49d   : > { %8192 = vmatprep.subr.bf16.mxu1 %v12683_v42  ;;  %v12755_v42 = vld [vmem:[#allocation6 + $0x14a4] ss:$24 sps:$4 sm:$0xff]  }
 0x49e   : > { %5421 = vmatpush1.bf16.msra.mxu0 %v12672_v61  ;;  %v12744_v61 = vld [vmem:[#allocation6 + $0x308] ss:$24 sps:$4 sm:$0xff]  }
 0x49f   : > { %5422 = vmatprep.subr.bf16.mxu0 %v12680_v21  ;;  %v12752_v21 = vld [vmem:[#allocation6 + $0x33c] ss:$24 sps:$4 sm:$0xff]  }
 0x4a0   : > { %8193 = vmatpush1.bf16.msra.mxu1 %v12681_v60  ;;  %v12753_v60 = vld [vmem:[#allocation6 + $0x14a0] ss:$24 sps:$4 sm:$0xff]  }
 0x4a1   : > { %8194 = vmatprep.subr.bf16.mxu1 %v12689_v9  ;;  %v12761_v9 = vld [vmem:[#allocation6 + $0x14d4] ss:$24 sps:$4 sm:$0xff]  }
 0x4a2   : > { %5423 = vmatpush1.bf16.msra.mxu0 %v12678_v27  ;;  %v12750_v27 = vld [vmem:[#allocation6 + $0x338] ss:$24 sps:$4 sm:$0xff]  }
 0x4a3   : > { %5424 = vmatprep.subr.bf16.mxu0 %v12686_v57  ;;  %v12758_v57 = vld [vmem:[#allocation6 + $0x36c] ss:$24 sps:$4 sm:$0xff]  }
 0x4a4   : > { %8195 = vmatpush1.bf16.msra.mxu1 %v12687_v29  ;;  %v12759_v29 = vld [vmem:[#allocation6 + $0x14d0] ss:$24 sps:$4 sm:$0xff]  }
 0x4a5   : > { %8196 = vmatprep.subr.bf16.mxu1 %v12695_v6  ;;  %v12767_v6 = vld [vmem:[#allocation6 + $0x1504] ss:$24 sps:$4 sm:$0xff]  }
 0x4a6   : > { %5425 = vmatpush1.bf16.msra.mxu0 %v12684_v15  ;;  %v12756_v15 = vld [vmem:[#allocation6 + $0x368] ss:$24 sps:$4 sm:$0xff]  }
 0x4a7   : > { %5426 = vmatprep.subr.bf16.mxu0 %v12692_v59  ;;  %v12764_v59 = vld [vmem:[#allocation6 + $0x39c] ss:$24 sps:$4 sm:$0xff]  }
 0x4a8   : > { %8197 = vmatpush1.bf16.msra.mxu1 %v12693_v4  ;;  %v12765_v4 = vld [vmem:[#allocation6 + $0x1500] ss:$24 sps:$4 sm:$0xff]  }
 0x4a9   : > { %8198 = vmatprep.subr.bf16.mxu1 %v12701_v34  ;;  %v12773_v34 = vld [vmem:[#allocation6 + $0x1534] ss:$24 sps:$4 sm:$0xff]  }
 0x4aa   : > { %5427 = vmatpush1.bf16.msra.mxu0 %v12690_v35  ;;  %v12777_v35 = vld [vmem:[#allocation6 + $0x1560] ss:$24 sps:$4 sm:$0xff]  }
 0x4ab   : > { %5428 = vmatprep.subr.bf16.mxu0 %v12698_v5  ;;  %v12785_v5 = vld [vmem:[#allocation6 + $0x1594] ss:$24 sps:$4 sm:$0xff]  }
 0x4ac   : > { %8199 = vmatpush1.bf16.msra.mxu1 %v12699_v12  ;;  %v12779_v12 = vld [vmem:[#allocation6 + $0x1564] ss:$24 sps:$4 sm:$0xff]  }
 0x4ad   : > { %8200 = vmatprep.subr.bf16.mxu1 %v12707_v53  ;;  %v12770_v53 = vld [vmem:[#allocation6 + $0x3cc] ss:$24 sps:$4 sm:$0xff]  }
 0x4ae   : > { %5429 = vmatpush1.bf16.msra.mxu0 %v12696_v52  ;;  %v12783_v52 = vld [vmem:[#allocation6 + $0x1590] ss:$24 sps:$4 sm:$0xff]  }
 0x4af   : > { %5430 = vmatprep.subr.bf16.mxu0 %v12704_v3  ;;  %v12791_v3 = vld [vmem:[#allocation6 + $0x15c4] ss:$24 sps:$4 sm:$0xff]  }
 0x4b0   : > { %8201 = vmatpush1.bf16.msra.mxu1 %v12705_v13  ;;  %v12768_v13 = vld [vmem:[#allocation6 + $0x3c8] ss:$24 sps:$4 sm:$0xff]  }
 0x4b1   : > { %8202 = vmatprep.subr.bf16.mxu1 %v12713_v51  ;;  %v12776_v51 = vld [vmem:[#allocation6 + $0x3fc] ss:$24 sps:$4 sm:$0xff]  }
 0x4b2   : > { %5431 = vmatpush1.bf16.msra.mxu0 %v12702_v30  ;;  %v12789_v30 = vld [vmem:[#allocation6 + $0x15c0] ss:$24 sps:$4 sm:$0xff]  }
 0x4b3   : > { %5432 = vmatprep.subr.bf16.mxu0 %v12710_v18  ;;  %v12797_v18 = vld [vmem:[#allocation6 + $0x15f4] ss:$24 sps:$4 sm:$0xff]  }
 0x4b4   : > { %8203 = vmatpush1.bf16.msra.mxu1 %v12711_v62  ;;  %v12774_v62 = vld [vmem:[#allocation6 + $0x3f8] ss:$24 sps:$4 sm:$0xff]  }
 0x4b5   : > { %8204 = vmatprep.subr.bf16.mxu1 %v12719_v46  ;;  %v12782_v46 = vld [vmem:[#allocation6 + $0x42c] ss:$24 sps:$4 sm:$0xff]  }
 0x4b6   : > { %5433 = vmatpush1.bf16.msra.mxu0 %v12708_v11  ;;  %v12795_v11 = vld [vmem:[#allocation6 + $0x15f0] ss:$24 sps:$4 sm:$0xff]  }
 0x4b7   : > { %5434 = vmatprep.subr.bf16.mxu0 %v12716_v36  ;;  %v12803_v36 = vld [vmem:[#allocation6 + $0x1624] ss:$24 sps:$4 sm:$0xff]  }
 0x4b8   : > { %8205 = vmatpush1.bf16.msra.mxu1 %v12717_v39  ;;  %v12780_v39 = vld [vmem:[#allocation6 + $0x428] ss:$24 sps:$4 sm:$0xff]  }
 0x4b9   : > { %8206 = vmatprep.subr.bf16.mxu1 %v12725_v8  ;;  %v12788_v8 = vld [vmem:[#allocation6 + $0x45c] ss:$24 sps:$4 sm:$0xff]  }
 0x4ba   : > { %5435 = vmatpush1.bf16.msra.mxu0 %v12714_v55  ;;  %v12801_v55 = vld [vmem:[#allocation6 + $0x1620] ss:$24 sps:$4 sm:$0xff]  }
 0x4bb   : > { %5436 = vmatprep.subr.bf16.mxu0 %v12722_v22  ;;  %v12809_v22 = vld [vmem:[#allocation6 + $0x1654] ss:$24 sps:$4 sm:$0xff]  }
 0x4bc   : > { %8207 = vmatpush1.bf16.msra.mxu1 %v12723_v48  ;;  %v12786_v48 = vld [vmem:[#allocation6 + $0x458] ss:$24 sps:$4 sm:$0xff]  }
 0x4bd   : > { %8208 = vmatprep.subr.bf16.mxu1 %v12731_v28  ;;  %v12794_v28 = vld [vmem:[#allocation6 + $0x48c] ss:$24 sps:$4 sm:$0xff]  }
 0x4be   : > { %5437 = vmatpush1.bf16.msra.mxu0 %v12720_v1  ;;  %v12807_v1 = vld [vmem:[#allocation6 + $0x1650] ss:$24 sps:$4 sm:$0xff]  }
 0x4bf   : > { %5438 = vmatprep.subr.bf16.mxu0 %v12728_v26  ;;  %v12815_v26 = vld [vmem:[#allocation6 + $0x1684] ss:$24 sps:$4 sm:$0xff]  }
 0x4c0   : > { %8209 = vmatpush1.bf16.msra.mxu1 %v12729_v44  ;;  %v12792_v44 = vld [vmem:[#allocation6 + $0x488] ss:$24 sps:$4 sm:$0xff]  }
 0x4c1   : > { %8210 = vmatprep.subr.bf16.mxu1 %v12737_v0  ;;  %v12800_v0 = vld [vmem:[#allocation6 + $0x4bc] ss:$24 sps:$4 sm:$0xff]  }
 0x4c2   : > { %5439 = vmatpush1.bf16.msra.mxu0 %v12726_v58  ;;  %v12813_v58 = vld [vmem:[#allocation6 + $0x1680] ss:$24 sps:$4 sm:$0xff]  }
 0x4c3   : > { %5440 = vmatprep.subr.bf16.mxu0 %v12734_v2  ;;  %v12821_v2 = vld [vmem:[#allocation6 + $0x16b4] ss:$24 sps:$4 sm:$0xff]  }
 0x4c4   : > { %8211 = vmatpush1.bf16.msra.mxu1 %v12735_v25  ;;  %v12798_v25 = vld [vmem:[#allocation6 + $0x4b8] ss:$24 sps:$4 sm:$0xff]  }
 0x4c5   : > { %8212 = vmatprep.subr.bf16.mxu1 %v12743_v10  ;;  %v12806_v10 = vld [vmem:[#allocation6 + $0x4ec] ss:$24 sps:$4 sm:$0xff]  }
 0x4c6   : > { %5441 = vmatpush1.bf16.msra.mxu0 %v12732_v24  ;;  %v12819_v24 = vld [vmem:[#allocation6 + $0x16b0] ss:$24 sps:$4 sm:$0xff]  }
 0x4c7   : > { %5442 = vmatprep.subr.bf16.mxu0 %v12740_v63  ;;  %v12827_v63 = vld [vmem:[#allocation6 + $0x16e4] ss:$24 sps:$4 sm:$0xff]  }
 0x4c8   : > { %8213 = vmatpush1.bf16.msra.mxu1 %v12741_v37  ;;  %v12804_v37 = vld [vmem:[#allocation6 + $0x4e8] ss:$24 sps:$4 sm:$0xff]  }
 0x4c9   : > { %8214 = vmatprep.subr.bf16.mxu1 %v12749_v38  ;;  %v12812_v38 = vld [vmem:[#allocation6 + $0x51c] ss:$24 sps:$4 sm:$0xff]  }
 0x4ca   : > { %5443 = vmatpush1.bf16.msra.mxu0 %v12738_v19  ;;  %v12825_v19 = vld [vmem:[#allocation6 + $0x16e0] ss:$24 sps:$4 sm:$0xff]  }
 0x4cb   : > { %5455 = vmatprep.subr.bf16.mxu0 %v12746_v33  ;;  %v12833_v33 = vld [vmem:[#allocation6 + $0x1714] ss:$24 sps:$4 sm:$0xff]  }
 0x4cc   : > { %8215 = vmatpush1.bf16.msra.mxu1 %v12747_v14  ;;  %v12810_v14 = vld [vmem:[#allocation6 + $0x518] ss:$24 sps:$4 sm:$0xff]  }
 0x4cd   : > { %8216 = vmatprep.subr.bf16.mxu1 %v12755_v42  ;;  %10827 = vmatmul.mubr.msk.bf16.vlgmr.msra.gmra.mrb[20].mxu0 %vm14554_vm14, %v14500_v54  ;;  %v12771_v54 = vld [vmem:[#allocation6 + $0x1530] ss:$24 sps:$4 sm:$0xff]   ;;  %v12818_v42 = vld [vmem:[#allocation6 + $0x54c] ss:$24 sps:$4 sm:$0xff]  }
 0x4ce   : > { %5456 = vmatpush1.bf16.msra.mxu0 %v12744_v61  ;;  %10831 = vmatprep.mubr.msk.bf16.mxu0 %vm14554_vm14, %v14561_v40  ;;  %v12762_v40 = vld [vmem:[#allocation6 + $0x398] ss:$24 sps:$4 sm:$0xff]  }
 0x4cf   : > { %5457 = vmatprep.subr.bf16.mxu0 %v12752_v21  ;;  %v12831_v61 = vld [vmem:[#allocation6 + $0x1710] ss:$24 sps:$4 sm:$0xff]   ;;  %v12839_v21 = vld [vmem:[#allocation6 + $0x1744] ss:$24 sps:$4 sm:$0xff]  }
 0x4d0   : > { %8217 = vmatpush1.bf16.msra.mxu1 %v12753_v60  ;;  %v12816_v60 = vld [vmem:[#allocation6 + $0x548] ss:$24 sps:$4 sm:$0xff]  }
 0x4d1   : > { %8218 = vmatprep.subr.bf16.mxu1 %v12761_v9  ;;  %v12824_v9 = vld [vmem:[#allocation6 + $0x57c] ss:$24 sps:$4 sm:$0xff]  }
 0x4d2   : > { %5458 = vmatpush1.bf16.msra.mxu0 %v12750_v27  ;;  %v12837_v27 = vld [vmem:[#allocation6 + $0x1740] ss:$24 sps:$4 sm:$0xff]  }
 0x4d3   : > { %5459 = vmatprep.subr.bf16.mxu0 %v12758_v57  ;;  %v12845_v57 = vld [vmem:[#allocation6 + $0x1774] ss:$24 sps:$4 sm:$0xff]  }
 0x4d4   : > { %8219 = vmatpush1.bf16.msra.mxu1 %v12759_v29  ;;  %v12822_v29 = vld [vmem:[#allocation6 + $0x578] ss:$24 sps:$4 sm:$0xff]  }
 0x4d5   : > { %8231 = vmatprep.subr.bf16.mxu1 %v12767_v6  ;;  %v12830_v6 = vld [vmem:[#allocation6 + $0x5ac] ss:$24 sps:$4 sm:$0xff]  }
 0x4d6   : > { %5460 = vmatpush1.bf16.msra.mxu0 %v12756_v15  ;;  %v12843_v15 = vld [vmem:[#allocation6 + $0x1770] ss:$24 sps:$4 sm:$0xff]  }
 0x4d7   : > { %8221 = vmatmul.mubr.bf16.vlgmr.msra.gmra.mrb[20].mxu1 %v14525_v50  ;;  %5461 = vmatprep.subr.bf16.mxu0 %v12764_v59  ;;  %v12851_v59 = vld [vmem:[#allocation6 + $0x17a4] ss:$24 sps:$4 sm:$0xff]  }
 0x4d8   : > { %8232 = vmatpush1.bf16.msra.mxu1 %v12765_v4  ;;  %8263 = vmatprep.mubr.bf16.mxu1 %v14586_v16  ;;  %v12828_v4 = vld [vmem:[#allocation6 + $0x5a8] ss:$24 sps:$4 sm:$0xff]  }
 0x4d9   : > { %8233 = vmatprep.subr.bf16.mxu1 %v12773_v34  ;;  %v12836_v34 = vld [vmem:[#allocation6 + $0x5dc] ss:$24 sps:$4 sm:$0xff]  }
 0x4da   : > { %5462 = vmatpush1.bf16.msra.mxu0 %v12762_v40  ;;  %v12849_v40 = vld [vmem:[#allocation6 + $0x17a0] ss:$24 sps:$4 sm:$0xff]  }
 0x4db   : > { %5463 = vmatprep.subr.bf16.mxu0 %v12770_v53  ;;  %v12857_v53 = vld [vmem:[#allocation6 + $0x17d4] ss:$24 sps:$4 sm:$0xff]  }
 0x4dc   : > { %8234 = vmatpush1.bf16.msra.mxu1 %v12771_v54  ;;  %v12834_v54 = vld [vmem:[#allocation6 + $0x5d8] ss:$24 sps:$4 sm:$0xff]  }
 0x4dd   : > { %8235 = vmatprep.subr.bf16.mxu1 %v12779_v12  ;;  %v12842_v12 = vld [vmem:[#allocation6 + $0xc0c] ss:$24 sps:$4 sm:$0xff]  }
 0x4de   : > { %5464 = vmatpush1.bf16.msra.mxu0 %v12768_v13  ;;  %v12855_v13 = vld [vmem:[#allocation6 + $0x17d0] ss:$24 sps:$4 sm:$0xff]  }
 0x4df   : > { %5465 = vmatprep.subr.bf16.mxu0 %v12776_v51  ;;  %v12863_v51 = vld [vmem:[#allocation6 + $0x1214] ss:$24 sps:$4 sm:$0xff]  }
 0x4e0   : > { %8236 = vmatpush1.bf16.msra.mxu1 %v12777_v35  ;;  %v12840_v35 = vld [vmem:[#allocation6 + $0xc08] ss:$24 sps:$4 sm:$0xff]  }
 0x4e1   : > { %8237 = vmatprep.subr.bf16.mxu1 %v12785_v5  ;;  %v12848_v5 = vld [vmem:[#allocation6 + $0xc3c] ss:$24 sps:$4 sm:$0xff]  }
 0x4e2   : > { %5466 = vmatpush1.bf16.msra.mxu0 %v12774_v62  ;;  %v12861_v62 = vld [vmem:[#allocation6 + $0x1210] ss:$24 sps:$4 sm:$0xff]  }
 0x4e3   : > { %5467 = vmatprep.subr.bf16.mxu0 %v12782_v46  ;;  %v12869_v46 = vld [vmem:[#allocation6 + $0x1244] ss:$24 sps:$4 sm:$0xff]  }
 0x4e4   : > { %8238 = vmatpush1.bf16.msra.mxu1 %v12783_v52  ;;  %v12846_v52 = vld [vmem:[#allocation6 + $0xc38] ss:$24 sps:$4 sm:$0xff]  }
 0x4e5   : > { %8239 = vmatprep.subr.bf16.mxu1 %v12791_v3  ;;  %v12854_v3 = vld [vmem:[#allocation6 + $0xc6c] ss:$24 sps:$4 sm:$0xff]  }
 0x4e6   : > { %5468 = vmatpush1.bf16.msra.mxu0 %v12780_v39  ;;  %v12866_v39 = vld [vmem:[#allocation6 + $0xccc] ss:$24 sps:$4 sm:$0xff]  }
 0x4e7   : > { %5469 = vmatprep.subr.bf16.mxu0 %v12788_v8  ;;  %v12873_v8 = vld [vmem:[#allocation6 + $0x1270] ss:$24 sps:$4 sm:$0xff]  }
 0x4e8   : > { %8240 = vmatpush1.bf16.msra.mxu1 %v12789_v30  ;;  %v12852_v30 = vld [vmem:[#allocation6 + $0xc68] ss:$24 sps:$4 sm:$0xff]  }
 0x4e9   : > { %8241 = vmatprep.subr.bf16.mxu1 %v12797_v18  ;;  %v12860_v18 = vld [vmem:[#allocation6 + $0xc9c] ss:$24 sps:$4 sm:$0xff]  }
 0x4ea   : > { %5470 = vmatpush1.bf16.msra.mxu0 %v12786_v48  ;;  %v12872_v48 = vld [vmem:[#allocation6 + $0xcfc] ss:$24 sps:$4 sm:$0xff]  }
 0x4eb   : > { %5471 = vmatprep.subr.bf16.mxu0 %v12794_v28  ;;  %v12879_v28 = vld [vmem:[#allocation6 + $0x12a0] ss:$24 sps:$4 sm:$0xff]  }
 0x4ec   : > { %8242 = vmatpush1.bf16.msra.mxu1 %v12795_v11  ;;  %v12881_v11 = vld [vmem:[#allocation6 + $0x12a4] ss:$24 sps:$4 sm:$0xff]  }
 0x4ed   : > { %8243 = vmatprep.subr.bf16.mxu1 %v12803_v36  ;;  %v12864_v36 = vld [vmem:[#allocation6 + $0xcc8] ss:$24 sps:$4 sm:$0xff]  }
 0x4ee   : > { %5472 = vmatpush1.bf16.msra.mxu0 %v12792_v44  ;;  %v12878_v44 = vld [vmem:[#allocation6 + $0xd2c] ss:$24 sps:$4 sm:$0xff]  }
 0x4ef   : > { %5473 = vmatprep.subr.bf16.mxu0 %v12800_v0 }
 0x4f0   : > { %8244 = vmatpush1.bf16.msra.mxu1 %v12801_v55  ;;  %v12887_v55 = vld [vmem:[#allocation6 + $0x12d4] ss:$24 sps:$4 sm:$0xff]  }
 0x4f1   : > { %8245 = vmatprep.subr.bf16.mxu1 %v12809_v22  ;;  %v12870_v22 = vld [vmem:[#allocation6 + $0xcf8] ss:$24 sps:$4 sm:$0xff]  }
 0x4f2   : > { %5474 = vmatpush1.bf16.msra.mxu0 %v12798_v25  ;;  %v12893_v25 = vld [vmem:[#allocation6 + $0x1304] ss:$24 sps:$4 sm:$0xff]  }
 0x4f3   : > { %5475 = vmatprep.subr.bf16.mxu0 %v12806_v10 }
 0x4f4   : > { %8246 = vmatpush1.bf16.msra.mxu1 %v12807_v1  ;;  %v12885_v1 = vld [vmem:[#allocation6 + $0x12d0] ss:$24 sps:$4 sm:$0xff]  }
 0x4f5   : > { %8247 = vmatprep.subr.bf16.mxu1 %v12815_v26 }
 0x4f6   : > { %5476 = vmatpush1.bf16.msra.mxu0 %v12804_v37  ;;  %v12884_v37 = vld [vmem:[#allocation6 + $0xd5c] ss:$24 sps:$4 sm:$0xff]  }
 0x4f7   : > { %5477 = vmatprep.subr.bf16.mxu0 %v12812_v38  ;;  %v12891_v38 = vld [vmem:[#allocation6 + $0x1300] ss:$24 sps:$4 sm:$0xff]  }
 0x4f8   : > { %8248 = vmatpush1.bf16.msra.mxu1 %v12813_v58  ;;  %v12876_v58 = vld [vmem:[#allocation6 + $0xd28] ss:$24 sps:$4 sm:$0xff]  }
 0x4f9   : > { %8249 = vmatprep.subr.bf16.mxu1 %v12821_v2 }
 0x4fa   : > { %5478 = vmatpush1.bf16.msra.mxu0 %v12810_v14  ;;  %v12890_v14 = vld [vmem:[#allocation6 + $0xd8c] ss:$24 sps:$4 sm:$0xff]  }
 0x4fb   : > { %5479 = vmatprep.subr.bf16.mxu0 %v12818_v42  ;;  %v12897_v42 = vld [vmem:[#allocation6 + $0x1330] ss:$24 sps:$4 sm:$0xff]  }
 0x4fc   : > { %8250 = vmatpush1.bf16.msra.mxu1 %v12819_v24  ;;  %v12899_v24 = vld [vmem:[#allocation6 + $0x1334] ss:$24 sps:$4 sm:$0xff]  }
 0x4fd   : > { %8251 = vmatprep.subr.bf16.mxu1 %v12827_v63  ;;  %v12882_v63 = vld [vmem:[#allocation6 + $0xd58] ss:$24 sps:$4 sm:$0xff]  }
 0x4fe   : > { %5480 = vmatpush1.bf16.msra.mxu0 %v12816_v60  ;;  %v12896_v60 = vld [vmem:[#allocation6 + $0xdbc] ss:$24 sps:$4 sm:$0xff]  }
 0x4ff   : > { %5481 = vmatprep.subr.bf16.mxu0 %v12824_v9  ;;  %v12903_v9 = vld [vmem:[#allocation6 + $0x1360] ss:$24 sps:$4 sm:$0xff]  }
 0x500   : > { %8252 = vmatpush1.bf16.msra.mxu1 %v12825_v19  ;;  %v12905_v19 = vld [vmem:[#allocation6 + $0x1364] ss:$24 sps:$4 sm:$0xff]  }
 0x501   : > { %8253 = vmatprep.subr.bf16.mxu1 %v12833_v33  ;;  %v12888_v33 = vld [vmem:[#allocation6 + $0xd88] ss:$24 sps:$4 sm:$0xff]  }
 0x502   : > { %5482 = vmatpush1.bf16.msra.mxu0 %v12822_v29  ;;  %v12902_v29 = vld [vmem:[#allocation6 + $0xdec] ss:$24 sps:$4 sm:$0xff]  }
 0x503   : > { %5483 = vmatprep.subr.bf16.mxu0 %v12830_v6  ;;  %v12909_v6 = vld [vmem:[#allocation6 + $0x1390] ss:$24 sps:$4 sm:$0xff]  }
 0x504   : > { %8254 = vmatpush1.bf16.msra.mxu1 %v12831_v61  ;;  %v12911_v61 = vld [vmem:[#allocation6 + $0x1394] ss:$24 sps:$4 sm:$0xff]  }
 0x505   : > { %8255 = vmatprep.subr.bf16.mxu1 %v12839_v21  ;;  %v12894_v21 = vld [vmem:[#allocation6 + $0xdb8] ss:$24 sps:$4 sm:$0xff]  }
 0x506   : > { %5484 = vmatpush1.bf16.msra.mxu0 %v12828_v4  ;;  %v12908_v4 = vld [vmem:[#allocation6 + $0xe1c] ss:$24 sps:$4 sm:$0xff]  }
 0x507   : > { %5485 = vmatprep.subr.bf16.mxu0 %v12836_v34  ;;  %v12915_v34 = vld [vmem:[#allocation6 + $0x13c0] ss:$24 sps:$4 sm:$0xff]  }
 0x508   : > { %8256 = vmatpush1.bf16.msra.mxu1 %v12837_v27  ;;  %v12917_v27 = vld [vmem:[#allocation6 + $0x13c4] ss:$24 sps:$4 sm:$0xff]  }
 0x509   : > { %8257 = vmatprep.subr.bf16.mxu1 %v12845_v57  ;;  %v12900_v57 = vld [vmem:[#allocation6 + $0xde8] ss:$24 sps:$4 sm:$0xff]  }
 0x50a   : > { %5486 = vmatpush1.bf16.msra.mxu0 %v12834_v54  ;;  %v12914_v54 = vld [vmem:[#allocation6 + $0xe4c] ss:$24 sps:$4 sm:$0xff]  }
 0x50b   : > { %6835 = vmatprep.subr.bf16.mxu0 %v12842_v12  ;;  %v12921_v12 = vld [vmem:[#allocation6 + $0x13f0] ss:$24 sps:$4 sm:$0xff]  }
 0x50c   : > { %8258 = vmatpush1.bf16.msra.mxu1 %v12843_v15  ;;  %v12923_v15 = vld [vmem:[#allocation6 + $0x13f4] ss:$24 sps:$4 sm:$0xff]  }
 0x50d   : > { %8259 = vmatprep.subr.bf16.mxu1 %v12851_v59  ;;  %10835 = vmatmul.mubr.msk.bf16.vlgmr.msra.gmra.mrb[20].mxu0 %vm14554_vm14, %v14549_v49  ;;  %v12867_v49 = vld [vmem:[#allocation6 + $0x1240] ss:$24 sps:$4 sm:$0xff]  }
 0x50e   : > { %6836 = vmatpush1.bf16.msra.mxu0 %v12840_v35  ;;  %6867 = vmatprep.mubr.bf16.mxu0 %v14606_v47  ;;  %v12858_v47 = vld [vmem:[#allocation6 + $0xc98] ss:$24 sps:$4 sm:$0xff]   ;;  %v12920_v35 = vld [vmem:[#allocation6 + $0xe7c] ss:$24 sps:$4 sm:$0xff]  }
 0x50f   : > { %6837 = vmatprep.subr.bf16.mxu0 %v12848_v5  ;;  %v12906_v59 = vld [vmem:[#allocation6 + $0xe18] ss:$24 sps:$4 sm:$0xff]  }
 0x510   : > { %8260 = vmatpush1.bf16.msra.mxu1 %v12849_v40  ;;  %v12929_v40 = vld [vmem:[#allocation6 + $0x1424] ss:$24 sps:$4 sm:$0xff]   ;;  %v12927_v5 = vld [vmem:[#allocation6 + $0x1420] ss:$24 sps:$4 sm:$0xff]  }
 0x511   : > { %8261 = vmatprep.subr.bf16.mxu1 %v12857_v53  ;;  %v12912_v53 = vld [vmem:[#allocation6 + $0xe48] ss:$24 sps:$4 sm:$0xff]  }
 0x512   : > { %6838 = vmatpush1.bf16.msra.mxu0 %v12846_v52  ;;  %v12926_v52 = vld [vmem:[#allocation6 + $0xeac] ss:$24 sps:$4 sm:$0xff]  }
 0x513   : > { %6839 = vmatprep.subr.bf16.mxu0 %v12854_v3  ;;  %v12933_v3 = vld [vmem:[#allocation6 + $0x1450] ss:$24 sps:$4 sm:$0xff]  }
 0x514   : > { %8262 = vmatpush1.bf16.msra.mxu1 %v12855_v13  ;;  %v12935_v13 = vld [vmem:[#allocation6 + $0x1454] ss:$24 sps:$4 sm:$0xff]  }
 0x515   : > { %8360 = vmatprep.subr.bf16.mxu1 %v12863_v51  ;;  %v12918_v51 = vld [vmem:[#allocation6 + $0xe78] ss:$24 sps:$4 sm:$0xff]  }
 0x516   : > { %6840 = vmatpush1.bf16.msra.mxu0 %v12852_v30  ;;  %v12932_v30 = vld [vmem:[#allocation6 + $0xedc] ss:$24 sps:$4 sm:$0xff]  }
 0x517   : > { %8264 = vmatmul.mubr.bf16.vlgmr.msra.gmra.mrb[20].mxu1 %v14582_v23  ;;  %6841 = vmatprep.subr.bf16.mxu0 %v12860_v18  ;;  %v12939_v18 = vld [vmem:[#allocation6 + $0x1480] ss:$24 sps:$4 sm:$0xff]  }
 0x518   : > { %8361 = vmatpush1.bf16.msra.mxu1 %v12861_v62  ;;  %8392 = vmatprep.mubr.bf16.mxu1 %v14537_v20  ;;  %v12941_v62 = vld [vmem:[#allocation6 + $0x1484] ss:$24 sps:$4 sm:$0xff]  }
 0x519   : > { %8362 = vmatprep.subr.bf16.mxu1 %v12869_v46  ;;  %v12924_v46 = vld [vmem:[#allocation6 + $0xea8] ss:$24 sps:$4 sm:$0xff]  }
 0x51a   : > { %6842 = vmatpush1.bf16.msra.mxu0 %v12858_v47  ;;  %v12938_v47 = vld [vmem:[#allocation6 + $0xf0c] ss:$24 sps:$4 sm:$0xff]  }
 0x51b   : > { %6843 = vmatprep.subr.bf16.mxu0 %v12866_v39  ;;  %v12945_v39 = vld [vmem:[#allocation6 + $0x14b0] ss:$24 sps:$4 sm:$0xff]  }
 0x51c   : > { %8363 = vmatpush1.bf16.msra.mxu1 %v12867_v49  ;;  %v12947_v49 = vld [vmem:[#allocation6 + $0x14b4] ss:$24 sps:$4 sm:$0xff]  }
 0x51d   : > { %8364 = vmatprep.subr.bf16.mxu1 %v12875_v32  ;;  %v12930_v32 = vld [vmem:[#allocation6 + $0xed8] ss:$24 sps:$4 sm:$0xff]  }
 0x51e   : > { %6844 = vmatpush1.bf16.msra.mxu0 %v12864_v36  ;;  %v12944_v36 = vld [vmem:[#allocation6 + $0xf3c] ss:$24 sps:$4 sm:$0xff]  }
 0x51f   : > { %6845 = vmatprep.subr.bf16.mxu0 %v12872_v48  ;;  %v12951_v48 = vld [vmem:[#allocation6 + $0x14e0] ss:$24 sps:$4 sm:$0xff]  }
 0x520   : > { %8365 = vmatpush1.bf16.msra.mxu1 %v12873_v8  ;;  %v14657_v0 = vpop.f32.mrb[24].mxu0  ;;  %v12953_v8 = vld [vmem:[#allocation6 + $0x14e4] ss:$24 sps:$4 sm:$0xff]  }
 0x521   : > { %8366 = vmatprep.subr.bf16.mxu1 %v12881_v11  ;;  %v14659_v26 = vpop.f32.mrb[25].mxu0  ;;  %v12936_v11 = vld [vmem:[#allocation6 + $0xf08] ss:$24 sps:$4 sm:$0xff]  }
 0x522   : > { %v14661_v10 = vpop.f32.mrb[26].mxu0  ;;  %6846 = vmatpush1.bf16.msra.mxu0 %v12870_v22  ;;  %v12950_v22 = vld [vmem:[#allocation6 + $0xf6c] ss:$24 sps:$4 sm:$0xff]  }
 0x523   : > { %v14663_v2 = vpop.f32.mrb[27].mxu0  ;;  %6847 = vmatprep.subr.bf16.mxu0 %v12878_v44  ;;  %v12957_v44 = vld [vmem:[#allocation6 + $0x1510] ss:$24 sps:$4 sm:$0xff]  }
 0x524   : > { %8367 = vmatpush1.bf16.msra.mxu1 %v12879_v28  ;;  %v12959_v28 = vld [vmem:[#allocation6 + $0x1514] ss:$24 sps:$4 sm:$0xff]  }
 0x525   : > { %8368 = vmatprep.subr.bf16.mxu1 %v12887_v55  ;;  %v12942_v55 = vld [vmem:[#allocation6 + $0xf38] ss:$24 sps:$4 sm:$0xff]  }
 0x526   : > { %6848 = vmatpush1.bf16.msra.mxu0 %v12876_v58  ;;  %v12956_v58 = vld [vmem:[#allocation6 + $0xf9c] ss:$24 sps:$4 sm:$0xff]  }
 0x527   : > { %6849 = vmatprep.subr.bf16.mxu0 %v12884_v37  ;;  %v12971_v37 = vld [vmem:[#allocation6 + $0x1574] ss:$24 sps:$4 sm:$0xff]  }
 0x528   : > { %8369 = vmatpush1.bf16.msra.mxu1 %v12885_v1  ;;  %v12965_v1 = vld [vmem:[#allocation6 + $0x1544] ss:$24 sps:$4 sm:$0xff]  }
 0x529   : > { %8370 = vmatprep.subr.bf16.mxu1 %v12893_v25  ;;  %v12948_v25 = vld [vmem:[#allocation6 + $0xf68] ss:$24 sps:$4 sm:$0xff]  }
 0x52a   : > { %6850 = vmatpush1.bf16.msra.mxu0 %v12882_v63  ;;  %v12977_v63 = vld [vmem:[#allocation6 + $0x15a4] ss:$24 sps:$4 sm:$0xff]  }
 0x52b   : > { %6851 = vmatprep.subr.bf16.mxu0 %v12890_v14  ;;  %v12960_v14 = vld [vmem:[#allocation6 + $0xfc8] ss:$24 sps:$4 sm:$0xff]  }
 0x52c   : > { %8371 = vmatpush1.bf16.msra.mxu1 %v12891_v38  ;;  %v12962_v38 = vld [vmem:[#allocation6 + $0xfcc] ss:$24 sps:$4 sm:$0xff]  }
 0x52d   : > { %8372 = vmatprep.subr.bf16.mxu1 %v12899_v24  ;;  %v12969_v24 = vld [vmem:[#allocation6 + $0x1570] ss:$24 sps:$4 sm:$0xff]  }
 0x52e   : > { %6852 = vmatpush1.bf16.msra.mxu0 %v12888_v33  ;;  %v12983_v33 = vld [vmem:[#allocation6 + $0x15d4] ss:$24 sps:$4 sm:$0xff]  }
 0x52f   : > { %6853 = vmatprep.subr.bf16.mxu0 %v12896_v60  ;;  %v12966_v60 = vld [vmem:[#allocation6 + $0xff8] ss:$24 sps:$4 sm:$0xff]  }
 0x530   : > { %8373 = vmatpush1.bf16.msra.mxu1 %v12897_v42  ;;  %v12968_v42 = vld [vmem:[#allocation6 + $0xffc] ss:$24 sps:$4 sm:$0xff]  }
 0x531   : > { %8374 = vmatprep.subr.bf16.mxu1 %v12905_v19  ;;  %v12975_v19 = vld [vmem:[#allocation6 + $0x15a0] ss:$24 sps:$4 sm:$0xff]  }
 0x532   : > { %6854 = vmatpush1.bf16.msra.mxu0 %v12894_v21  ;;  %v12981_v21 = vld [vmem:[#allocation6 + $0x15d0] ss:$24 sps:$4 sm:$0xff]  }
 0x533   : > { %6855 = vmatprep.subr.bf16.mxu0 %v12902_v29 }
 0x534   : > { %8375 = vmatpush1.bf16.msra.mxu1 %v12903_v9  ;;  %v12974_v9 = vld [vmem:[#allocation6 + $0x102c] ss:$24 sps:$4 sm:$0xff]  }
 0x535   : > { %8376 = vmatprep.subr.bf16.mxu1 %v12911_v61 }
 0x536   : > { %6856 = vmatpush1.bf16.msra.mxu0 %v12900_v57  ;;  %v12972_v57 = vld [vmem:[#allocation6 + $0x1028] ss:$24 sps:$4 sm:$0xff]  }
 0x537   : > { %6857 = vmatprep.subr.bf16.mxu0 %v12908_v4 }
 0x538   : > { %8377 = vmatpush1.bf16.msra.mxu1 %v12909_v6  ;;  %v12989_v6 = vld [vmem:[#allocation6 + $0x1604] ss:$24 sps:$4 sm:$0xff]  }
 0x539   : > { %8378 = vmatprep.subr.bf16.mxu1 %v12917_v27 }
 0x53a   : > { %6858 = vmatpush1.bf16.msra.mxu0 %v12906_v59  ;;  %v12995_v59 = vld [vmem:[#allocation6 + $0x1634] ss:$24 sps:$4 sm:$0xff]  }
 0x53b   : > { %6859 = vmatprep.subr.bf16.mxu0 %v12914_v54  ;;  %v12978_v54 = vld [vmem:[#allocation6 + $0x1058] ss:$24 sps:$4 sm:$0xff]  }
 0x53c   : > { %8379 = vmatpush1.bf16.msra.mxu1 %v12915_v34  ;;  %v12980_v34 = vld [vmem:[#allocation6 + $0x105c] ss:$24 sps:$4 sm:$0xff]  }
 0x53d   : > { %8380 = vmatprep.subr.bf16.mxu1 %v12923_v15  ;;  %v12987_v15 = vld [vmem:[#allocation6 + $0x1600] ss:$24 sps:$4 sm:$0xff]  }
 0x53e   : > { %6860 = vmatpush1.bf16.msra.mxu0 %v12912_v53  ;;  %v13001_v53 = vld [vmem:[#allocation6 + $0x1664] ss:$24 sps:$4 sm:$0xff]  }
 0x53f   : > { %6861 = vmatprep.subr.bf16.mxu0 %v12920_v35  ;;  %v12984_v35 = vld [vmem:[#allocation6 + $0x1088] ss:$24 sps:$4 sm:$0xff]  }
 0x540   : > { %8381 = vmatpush1.bf16.msra.mxu1 %v12921_v12  ;;  %v12986_v12 = vld [vmem:[#allocation6 + $0x108c] ss:$24 sps:$4 sm:$0xff]  }
 0x541   : > { %8382 = vmatprep.subr.bf16.mxu1 %v12929_v40  ;;  %v12993_v40 = vld [vmem:[#allocation6 + $0x1630] ss:$24 sps:$4 sm:$0xff]  }
 0x542   : > { %6862 = vmatpush1.bf16.msra.mxu0 %v12918_v51  ;;  %v13007_v51 = vld [vmem:[#allocation6 + $0x1694] ss:$24 sps:$4 sm:$0xff]  }
 0x543   : > { %6863 = vmatprep.subr.bf16.mxu0 %v12926_v52  ;;  %v12990_v52 = vld [vmem:[#allocation6 + $0x10b8] ss:$24 sps:$4 sm:$0xff]  }
 0x544   : > { %8383 = vmatpush1.bf16.msra.mxu1 %v12927_v5  ;;  %v12992_v5 = vld [vmem:[#allocation6 + $0x10bc] ss:$24 sps:$4 sm:$0xff]  }
 0x545   : > { %8384 = vmatprep.subr.bf16.mxu1 %v12935_v13  ;;  %v12999_v13 = vld [vmem:[#allocation6 + $0x1660] ss:$24 sps:$4 sm:$0xff]  }
 0x546   : > { %6864 = vmatpush1.bf16.msra.mxu0 %v12924_v46  ;;  %v13013_v46 = vld [vmem:[#allocation6 + $0x16c4] ss:$24 sps:$4 sm:$0xff]  }
 0x547   : > { %6865 = vmatprep.subr.bf16.mxu0 %v12932_v30  ;;  %v12996_v30 = vld [vmem:[#allocation6 + $0x10e8] ss:$24 sps:$4 sm:$0xff]  }
 0x548   : > { %8385 = vmatpush1.bf16.msra.mxu1 %v12933_v3  ;;  %v12998_v3 = vld [vmem:[#allocation6 + $0x10ec] ss:$24 sps:$4 sm:$0xff]  }
 0x549   : > { %8386 = vmatprep.subr.bf16.mxu1 %v12941_v62  ;;  %v13005_v62 = vld [vmem:[#allocation6 + $0x1690] ss:$24 sps:$4 sm:$0xff]  }
 0x54a   : > { %6866 = vmatpush1.bf16.msra.mxu0 %v12930_v32  ;;  %v13019_v32 = vld [vmem:[#allocation6 + $0x16f4] ss:$24 sps:$4 sm:$0xff]  }
 0x54b   : > { %6878 = vmatprep.subr.bf16.mxu0 %v12938_v47  ;;  %v13002_v47 = vld [vmem:[#allocation6 + $0x1118] ss:$24 sps:$4 sm:$0xff]  }
 0x54c   : > { %8387 = vmatpush1.bf16.msra.mxu1 %v12939_v18  ;;  %v13004_v18 = vld [vmem:[#allocation6 + $0x111c] ss:$24 sps:$4 sm:$0xff]  }
 0x54d   : > { %8388 = vmatprep.subr.bf16.mxu1 %v12947_v49  ;;  %6868 = vmatmul.mubr.bf16.vlgmr.msra.gmra.mrb[20].mxu0 %v14615_v17  ;;  %v12963_v17 = vld [vmem:[#allocation6 + $0x1540] ss:$24 sps:$4 sm:$0xff]  }
 0x54e   : > { %6879 = vmatpush1.bf16.msra.mxu0 %v12936_v11  ;;  %6910 = vmatprep.mubr.bf16.mxu0 %v14618_v41  ;;  %v12954_v41 = vld [vmem:[#allocation6 + $0xf98] ss:$24 sps:$4 sm:$0xff]   ;;  %v13025_v11 = vld [vmem:[#allocation6 + $0x1724] ss:$24 sps:$4 sm:$0xff]  }
 0x54f   : > { %6880 = vmatprep.subr.bf16.mxu0 %v12944_v36  ;;  %v13011_v49 = vld [vmem:[#allocation6 + $0x16c0] ss:$24 sps:$4 sm:$0xff]  }
 0x550   : > { %8389 = vmatpush1.bf16.msra.mxu1 %v12945_v39  ;;  %v13010_v39 = vld [vmem:[#allocation6 + $0x114c] ss:$24 sps:$4 sm:$0xff]   ;;  %v13008_v36 = vld [vmem:[#allocation6 + $0x1148] ss:$24 sps:$4 sm:$0xff]  }
 0x551   : > { %8390 = vmatprep.subr.bf16.mxu1 %v12953_v8  ;;  %v13017_v8 = vld [vmem:[#allocation6 + $0x16f0] ss:$24 sps:$4 sm:$0xff]  }
 0x552   : > { %6881 = vmatpush1.bf16.msra.mxu0 %v12942_v55  ;;  %v13031_v55 = vld [vmem:[#allocation6 + $0x1754] ss:$24 sps:$4 sm:$0xff]  }
 0x553   : > { %6882 = vmatprep.subr.bf16.mxu0 %v12950_v22  ;;  %v13014_v22 = vld [vmem:[#allocation6 + $0x1178] ss:$24 sps:$4 sm:$0xff]  }
 0x554   : > { %8391 = vmatpush1.bf16.msra.mxu1 %v12951_v48  ;;  %v13016_v48 = vld [vmem:[#allocation6 + $0x117c] ss:$24 sps:$4 sm:$0xff]  }
 0x555   : > { %8403 = vmatprep.subr.bf16.mxu1 %v12959_v28  ;;  %v13023_v28 = vld [vmem:[#allocation6 + $0x1720] ss:$24 sps:$4 sm:$0xff]  }
 0x556   : > { %6883 = vmatpush1.bf16.msra.mxu0 %v12948_v25  ;;  %v13037_v25 = vld [vmem:[#allocation6 + $0x1784] ss:$24 sps:$4 sm:$0xff]  }
 0x557   : > { %8393 = vmatmul.mubr.bf16.vlgmr.msra.gmra.mrb[24].mxu1 %v14525_v50  ;;  %6884 = vmatprep.subr.bf16.mxu0 %v12956_v58  ;;  %v13020_v58 = vld [vmem:[#allocation6 + $0x11a8] ss:$24 sps:$4 sm:$0xff]  }
 0x558   : > { %8404 = vmatpush1.bf16.msra.mxu1 %v12957_v44  ;;  %8435 = vmatprep.mubr.bf16.mxu1 %v14586_v16  ;;  %v13022_v44 = vld [vmem:[#allocation6 + $0x11ac] ss:$24 sps:$4 sm:$0xff]  }
 0x559   : > { %8405 = vmatprep.subr.bf16.mxu1 %v12965_v1  ;;  %v13029_v1 = vld [vmem:[#allocation6 + $0x1750] ss:$24 sps:$4 sm:$0xff]  }
 0x55a   : > { %6885 = vmatpush1.bf16.msra.mxu0 %v12954_v41  ;;  %v13043_v41 = vld [vmem:[#allocation6 + $0x17b4] ss:$24 sps:$4 sm:$0xff]  }
 0x55b   : > { %6886 = vmatprep.subr.bf16.mxu0 %v12962_v38  ;;  %v13026_v38 = vld [vmem:[#allocation6 + $0x11d8] ss:$24 sps:$4 sm:$0xff]  }
 0x55c   : > { %8406 = vmatpush1.bf16.msra.mxu1 %v12963_v17  ;;  %v13028_v17 = vld [vmem:[#allocation6 + $0x11dc] ss:$24 sps:$4 sm:$0xff]  }
 0x55d   : > { %8407 = vmatprep.subr.bf16.mxu1 %v12971_v37  ;;  %v13035_v37 = vld [vmem:[#allocation6 + $0x1780] ss:$24 sps:$4 sm:$0xff]  }
 0x55e   : > { %6887 = vmatpush1.bf16.msra.mxu0 %v12960_v14  ;;  %v13049_v14 = vld [vmem:[#allocation6 + $0x17e4] ss:$24 sps:$4 sm:$0xff]  }
 0x55f   : > { %6888 = vmatprep.subr.bf16.mxu0 %v12968_v42  ;;  %v13032_v42 = vld [vmem:[#allocation6 + $0x1208] ss:$24 sps:$4 sm:$0xff]  }
 0x560   : > { %8408 = vmatpush1.bf16.msra.mxu1 %v12969_v24  ;;  %v14669_v61 = vpop.f32.mrb[16].mxu0  ;;  %v13034_v24 = vld [vmem:[#allocation6 + $0x120c] ss:$24 sps:$4 sm:$0xff]  }
 0x561   : > { %8409 = vmatprep.subr.bf16.mxu1 %v12977_v63  ;;  %v14671_v29 = vpop.f32.mrb[17].mxu0  ;;  %v13041_v63 = vld [vmem:[#allocation6 + $0x17b0] ss:$24 sps:$4 sm:$0xff]  }
 0x562   : > { %v14673_v27 = vpop.f32.mrb[18].mxu0  ;;  %6889 = vmatpush1.bf16.msra.mxu0 %v12966_v60  ;;  %v13055_v60 = vld [vmem:[#allocation6 + $0x1804] ss:$24 sps:$4 sm:$0xff]  }
 0x563   : > { %v14675_v4 = vpop.f32.mrb[19].mxu0  ;;  %6890 = vmatprep.subr.bf16.mxu0 %v12974_v9  ;;  %v13038_v9 = vld [vmem:[#allocation6 + $0x1238] ss:$24 sps:$4 sm:$0xff]  }
 0x564   : > { %8410 = vmatpush1.bf16.msra.mxu1 %v12975_v19  ;;  %v13040_v19 = vld [vmem:[#allocation6 + $0x123c] ss:$24 sps:$4 sm:$0xff]  }
 0x565   : > { %8411 = vmatprep.subr.bf16.mxu1 %v12983_v33  ;;  %v13047_v33 = vld [vmem:[#allocation6 + $0x17e0] ss:$24 sps:$4 sm:$0xff]  }
 0x566   : > { %6891 = vmatpush1.bf16.msra.mxu0 %v12972_v57  ;;  %v13061_v57 = vld [vmem:[#allocation6 + $0x1834] ss:$24 sps:$4 sm:$0xff]  }
 0x567   : > { %6892 = vmatprep.subr.bf16.mxu0 %v12980_v34  ;;  %v13044_v34 = vld [vmem:[#allocation6 + $0x1268] ss:$24 sps:$4 sm:$0xff]  }
 0x568   : > { %8412 = vmatpush1.bf16.msra.mxu1 %v12981_v21  ;;  %v13046_v21 = vld [vmem:[#allocation6 + $0x126c] ss:$24 sps:$4 sm:$0xff]  }
 0x569   : > { %8413 = vmatprep.subr.bf16.mxu1 %v12989_v6  ;;  %v13053_v6 = vld [vmem:[#allocation6 + $0x1800] ss:$24 sps:$4 sm:$0xff]  }
 0x56a   : > { %6893 = vmatpush1.bf16.msra.mxu0 %v12978_v54  ;;  %v13050_v54 = vld [vmem:[#allocation6 + $0x1298] ss:$24 sps:$4 sm:$0xff]  }
 0x56b   : > { %6894 = vmatprep.subr.bf16.mxu0 %v12986_v12  ;;  %v13058_v12 = vld [vmem:[#allocation6 + $0x12cc] ss:$24 sps:$4 sm:$0xff]  }
 0x56c   : > { %8414 = vmatpush1.bf16.msra.mxu1 %v12987_v15  ;;  %v14680_v15 = vrot.slane %v14517_v56, 2  ;;  %v13056_v56 = vld [vmem:[#allocation6 + $0x12c8] ss:$24 sps:$4 sm:$0xff]  }
 0x56d   : > { %8415 = vmatprep.subr.bf16.mxu1 %v12995_v59  ;;  %v13052_v59 = vld [vmem:[#allocation6 + $0x129c] ss:$24 sps:$4 sm:$0xff]  }
 0x56e   : > { %6895 = vmatpush1.bf16.msra.mxu0 %v12984_v35  ;;  %v13064_v35 = vld [vmem:[#allocation6 + $0x12fc] ss:$24 sps:$4 sm:$0xff]  }
 0x56f   : > { %6896 = vmatprep.subr.bf16.mxu0 %v12992_v5  ;;  %v13071_v5 = vld [vmem:[#allocation6 + $0x1890] ss:$24 sps:$4 sm:$0xff]  }
 0x570   : > { %8416 = vmatpush1.bf16.msra.mxu1 %v12993_v40  ;;  %v13065_v40 = vld [vmem:[#allocation6 + $0x1860] ss:$24 sps:$4 sm:$0xff]  }
 0x571   : > { %8417 = vmatprep.subr.bf16.mxu1 %v13001_v53  ;;  %v13073_v53 = vld [vmem:[#allocation6 + $0x1894] ss:$24 sps:$4 sm:$0xff]  }
 0x572   : > { %6897 = vmatpush1.bf16.msra.mxu0 %v12990_v52  ;;  %v13070_v52 = vld [vmem:[#allocation6 + $0x132c] ss:$24 sps:$4 sm:$0xff]  }
 0x573   : > { %6898 = vmatprep.subr.bf16.mxu0 %v12998_v3  ;;  %v13077_v3 = vld [vmem:[#allocation6 + $0x18c0] ss:$24 sps:$4 sm:$0xff]  }
 0x574   : > { %8418 = vmatpush1.bf16.msra.mxu1 %v12999_v13  ;;  %v13079_v13 = vld [vmem:[#allocation6 + $0x18c4] ss:$24 sps:$4 sm:$0xff]  }
 0x575   : > { %8419 = vmatprep.subr.bf16.mxu1 %v13007_v51  ;;  %v13062_v51 = vld [vmem:[#allocation6 + $0x12f8] ss:$24 sps:$4 sm:$0xff]  }
 0x576   : > { %6899 = vmatpush1.bf16.msra.mxu0 %v12996_v30  ;;  %v13076_v30 = vld [vmem:[#allocation6 + $0x135c] ss:$24 sps:$4 sm:$0xff]  }
 0x577   : > { %6900 = vmatprep.subr.bf16.mxu0 %v13004_v18  ;;  %v13083_v18 = vld [vmem:[#allocation6 + $0x18f0] ss:$24 sps:$4 sm:$0xff]  }
 0x578   : > { %8420 = vmatpush1.bf16.msra.mxu1 %v13005_v62  ;;  %v13085_v62 = vld [vmem:[#allocation6 + $0x18f4] ss:$24 sps:$4 sm:$0xff]  }
 0x579   : > { %8421 = vmatprep.subr.bf16.mxu1 %v13013_v46  ;;  %v13068_v46 = vld [vmem:[#allocation6 + $0x1328] ss:$24 sps:$4 sm:$0xff]  }
 0x57a   : > { %6901 = vmatpush1.bf16.msra.mxu0 %v13002_v47  ;;  %v13082_v47 = vld [vmem:[#allocation6 + $0x138c] ss:$24 sps:$4 sm:$0xff]  }
 0x57b   : > { %6902 = vmatprep.subr.bf16.mxu0 %v13010_v39  ;;  %v13089_v39 = vld [vmem:[#allocation6 + $0x1920] ss:$24 sps:$4 sm:$0xff]  }
 0x57c   : > { %8422 = vmatpush1.bf16.msra.mxu1 %v13011_v49  ;;  %v13091_v49 = vld [vmem:[#allocation6 + $0x1924] ss:$24 sps:$4 sm:$0xff]  }
 0x57d   : > { %8423 = vmatprep.subr.bf16.mxu1 %v13019_v32  ;;  %v13074_v32 = vld [vmem:[#allocation6 + $0x1358] ss:$24 sps:$4 sm:$0xff]  }
 0x57e   : > { %6903 = vmatpush1.bf16.msra.mxu0 %v13008_v36  ;;  %v13088_v36 = vld [vmem:[#allocation6 + $0x13bc] ss:$24 sps:$4 sm:$0xff]  }
 0x57f   : > { %6904 = vmatprep.subr.bf16.mxu0 %v13016_v48  ;;  %v13095_v48 = vld [vmem:[#allocation6 + $0x1950] ss:$24 sps:$4 sm:$0xff]  }
 0x580   : > { %8424 = vmatpush1.bf16.msra.mxu1 %v13017_v8  ;;  %v13097_v8 = vld [vmem:[#allocation6 + $0x1954] ss:$24 sps:$4 sm:$0xff]  }
 0x581   : > { %8425 = vmatprep.subr.bf16.mxu1 %v13025_v11  ;;  %v13080_v11 = vld [vmem:[#allocation6 + $0x1388] ss:$24 sps:$4 sm:$0xff]  }
 0x582   : > { %6905 = vmatpush1.bf16.msra.mxu0 %v13014_v22  ;;  %v13094_v22 = vld [vmem:[#allocation6 + $0x13ec] ss:$24 sps:$4 sm:$0xff]  }
 0x583   : > { %6906 = vmatprep.subr.bf16.mxu0 %v13022_v44  ;;  %v13101_v44 = vld [vmem:[#allocation6 + $0x1980] ss:$24 sps:$4 sm:$0xff]  }
 0x584   : > { %8426 = vmatpush1.bf16.msra.mxu1 %v13023_v28  ;;  %v13103_v28 = vld [vmem:[#allocation6 + $0x1984] ss:$24 sps:$4 sm:$0xff]  }
 0x585   : > { %8427 = vmatprep.subr.bf16.mxu1 %v13031_v55  ;;  %v13086_v55 = vld [vmem:[#allocation6 + $0x13b8] ss:$24 sps:$4 sm:$0xff]  }
 0x586   : > { %6907 = vmatpush1.bf16.msra.mxu0 %v13020_v58  ;;  %v13100_v58 = vld [vmem:[#allocation6 + $0x141c] ss:$24 sps:$4 sm:$0xff]  }
 0x587   : > { %6908 = vmatprep.subr.bf16.mxu0 %v13028_v17  ;;  %v13107_v17 = vld [vmem:[#allocation6 + $0x19b0] ss:$24 sps:$4 sm:$0xff]  }
 0x588   : > { %8428 = vmatpush1.bf16.msra.mxu1 %v13029_v1  ;;  %v13109_v1 = vld [vmem:[#allocation6 + $0x19b4] ss:$24 sps:$4 sm:$0xff]  }
 0x589   : > { %8429 = vmatprep.subr.bf16.mxu1 %v13037_v25  ;;  %v13092_v25 = vld [vmem:[#allocation6 + $0x13e8] ss:$24 sps:$4 sm:$0xff]  }
 0x58a   : > { %6909 = vmatpush1.bf16.msra.mxu0 %v13026_v38  ;;  %v13106_v38 = vld [vmem:[#allocation6 + $0x144c] ss:$24 sps:$4 sm:$0xff]  }
 0x58b   : > { %8274 = vmatprep.subr.bf16.mxu0 %v13034_v24  ;;  %v13113_v24 = vld [vmem:[#allocation6 + $0x19e0] ss:$24 sps:$4 sm:$0xff]  }
 0x58c   : > { %8430 = vmatpush1.bf16.msra.mxu1 %v13035_v37  ;;  %v13115_v37 = vld [vmem:[#allocation6 + $0x19e4] ss:$24 sps:$4 sm:$0xff]  }
 0x58d   : > { %8431 = vmatprep.subr.bf16.mxu1 %v13043_v41  ;;  %6911 = vmatmul.mubr.bf16.vlgmr.msra.gmra.mrb[20].mxu0 %v14625_v31  ;;  %v13067_v31 = vld [vmem:[#allocation6 + $0x1864] ss:$24 sps:$4 sm:$0xff]   ;;  %v13098_v41 = vld [vmem:[#allocation6 + $0x1418] ss:$24 sps:$4 sm:$0xff]  }
 0x58e   : > { %8275 = vmatpush1.bf16.msra.mxu0 %v13032_v42  ;;  %8306 = vmatprep.mubr.bf16.mxu0 %v14537_v20  ;;  %v13059_v20 = vld [vmem:[#allocation6 + $0x1830] ss:$24 sps:$4 sm:$0xff]   ;;  %v13112_v42 = vld [vmem:[#allocation6 + $0x147c] ss:$24 sps:$4 sm:$0xff]  }
 0x58f   : > { %8276 = vmatprep.subr.bf16.mxu0 %v13040_v19  ;;  %v13119_v19 = vld [vmem:[#allocation6 + $0x1a10] ss:$24 sps:$4 sm:$0xff]  }
 0x590   : > { %8432 = vmatpush1.bf16.msra.mxu1 %v13041_v63  ;;  %v13121_v63 = vld [vmem:[#allocation6 + $0x1a14] ss:$24 sps:$4 sm:$0xff]  }
 0x591   : > { %8433 = vmatprep.subr.bf16.mxu1 %v13049_v14  ;;  %v13104_v14 = vld [vmem:[#allocation6 + $0x1448] ss:$24 sps:$4 sm:$0xff]  }
 0x592   : > { %8277 = vmatpush1.bf16.msra.mxu0 %v13038_v9  ;;  %v13118_v9 = vld [vmem:[#allocation6 + $0x14ac] ss:$24 sps:$4 sm:$0xff]  }
 0x593   : > { %8278 = vmatprep.subr.bf16.mxu0 %v13046_v21  ;;  %v13125_v21 = vld [vmem:[#allocation6 + $0x1a40] ss:$24 sps:$4 sm:$0xff]  }
 0x594   : > { %8434 = vmatpush1.bf16.msra.mxu1 %v13047_v33  ;;  %v13127_v33 = vld [vmem:[#allocation6 + $0x1a44] ss:$24 sps:$4 sm:$0xff]  }
 0x595   : > { %9619 = vmatprep.subr.bf16.mxu1 %v13055_v60  ;;  %v13110_v60 = vld [vmem:[#allocation6 + $0x1478] ss:$24 sps:$4 sm:$0xff]  }
 0x596   : > { %8279 = vmatpush1.bf16.msra.mxu0 %v13044_v34  ;;  %v13124_v34 = vld [vmem:[#allocation6 + $0x14dc] ss:$24 sps:$4 sm:$0xff]  }
 0x597   : > { %8436 = vmatmul.mubr.bf16.vlgmr.msra.gmra.mrb[24].mxu1 %v14582_v23  ;;  %8280 = vmatprep.subr.bf16.mxu0 %v13052_v59  ;;  %v13131_v59 = vld [vmem:[#allocation6 + $0x1a70] ss:$24 sps:$4 sm:$0xff]  }
 0x598   : > { %9620 = vmatpush1.bf16.msra.mxu1 %v13053_v6  ;;  %9651 = vmatprep.mubr.bf16.mxu1 %v14680_v15  ;;  %v13133_v6 = vld [vmem:[#allocation6 + $0x1a74] ss:$24 sps:$4 sm:$0xff]  }
 0x599   : > { %9621 = vmatprep.subr.bf16.mxu1 %v13061_v57  ;;  %v13116_v57 = vld [vmem:[#allocation6 + $0x14a8] ss:$24 sps:$4 sm:$0xff]  }
 0x59a   : > { %8281 = vmatpush1.bf16.msra.mxu0 %v13050_v54  ;;  %v13130_v54 = vld [vmem:[#allocation6 + $0x150c] ss:$24 sps:$4 sm:$0xff]  }
 0x59b   : > { %8282 = vmatprep.subr.bf16.mxu0 %v13058_v12  ;;  %v13137_v12 = vld [vmem:[#allocation6 + $0x1aa0] ss:$24 sps:$4 sm:$0xff]  }
 0x59c   : > { %9622 = vmatpush1.bf16.msra.mxu1 %v13059_v20  ;;  %v13139_v20 = vld [vmem:[#allocation6 + $0x1aa4] ss:$24 sps:$4 sm:$0xff]  }
 0x59d   : > { %9623 = vmatprep.subr.bf16.mxu1 %v13067_v31  ;;  %v13122_v31 = vld [vmem:[#allocation6 + $0x14d8] ss:$24 sps:$4 sm:$0xff]  }
 0x59e   : > { %8283 = vmatpush1.bf16.msra.mxu0 %v13056_v56  ;;  %v13136_v56 = vld [vmem:[#allocation6 + $0x153c] ss:$24 sps:$4 sm:$0xff]  }
 0x59f   : > { %8284 = vmatprep.subr.bf16.mxu0 %v13064_v35  ;;  %v13143_v35 = vld [vmem:[#allocation6 + $0x1ad0] ss:$24 sps:$4 sm:$0xff]  }
 0x5a0   : > { %9624 = vmatpush1.bf16.msra.mxu1 %v13065_v40  ;;  %v13145_v40 = vld [vmem:[#allocation6 + $0x1ad4] ss:$24 sps:$4 sm:$0xff]  }
 0x5a1   : > { %9625 = vmatprep.subr.bf16.mxu1 %v13073_v53  ;;  %v13128_v53 = vld [vmem:[#allocation6 + $0x1508] ss:$24 sps:$4 sm:$0xff]  }
 0x5a2   : > { %8285 = vmatpush1.bf16.msra.mxu0 %v13062_v51  ;;  %v13142_v51 = vld [vmem:[#allocation6 + $0x156c] ss:$24 sps:$4 sm:$0xff]  }
 0x5a3   : > { %8286 = vmatprep.subr.bf16.mxu0 %v13070_v52  ;;  %v13149_v52 = vld [vmem:[#allocation6 + $0x1b00] ss:$24 sps:$4 sm:$0xff]  }
 0x5a4   : > { %9626 = vmatpush1.bf16.msra.mxu1 %v13071_v5  ;;  %v13151_v5 = vld [vmem:[#allocation6 + $0x1b04] ss:$24 sps:$4 sm:$0xff]  }
 0x5a5   : > { %9627 = vmatprep.subr.bf16.mxu1 %v13079_v13  ;;  %v13134_v13 = vld [vmem:[#allocation6 + $0x1538] ss:$24 sps:$4 sm:$0xff]  }
 0x5a6   : > { %8287 = vmatpush1.bf16.msra.mxu0 %v13068_v46  ;;  %v13140_v46 = vld [vmem:[#allocation6 + $0x1568] ss:$24 sps:$4 sm:$0xff]  }
 0x5a7   : > { %8288 = vmatprep.subr.bf16.mxu0 %v13076_v30  ;;  %v14690_v30 = vrot.slane %v14563_v43, 2  ;;  %v13152_v43 = vld [vmem:[#allocation6 + $0x15c8] ss:$24 sps:$4 sm:$0xff]  }
 0x5a8   : > { %9628 = vmatpush1.bf16.msra.mxu1 %v13077_v3  ;;  %v14687_v3 = vrot.slane %v14502_v45, 2  ;;  %v13146_v45 = vld [vmem:[#allocation6 + $0x1598] ss:$24 sps:$4 sm:$0xff]  }
 0x5a9   : > { %9629 = vmatprep.subr.bf16.mxu1 %v13085_v62  ;;  %v13157_v62 = vld [vmem:[#allocation6 + $0x1b34] ss:$24 sps:$4 sm:$0xff]  }
 0x5aa   : > { %8289 = vmatpush1.bf16.msra.mxu0 %v13074_v32  ;;  %v13161_v32 = vld [vmem:[#allocation6 + $0x1b60] ss:$24 sps:$4 sm:$0xff]  }
 0x5ab   : > { %8290 = vmatprep.subr.bf16.mxu0 %v13082_v47  ;;  %v13169_v47 = vld [vmem:[#allocation6 + $0x1b94] ss:$24 sps:$4 sm:$0xff]  }
 0x5ac   : > { %9630 = vmatpush1.bf16.msra.mxu1 %v13083_v18  ;;  %v13163_v18 = vld [vmem:[#allocation6 + $0x1b64] ss:$24 sps:$4 sm:$0xff]  }
 0x5ad   : > { %9631 = vmatprep.subr.bf16.mxu1 %v13091_v49  ;;  %v13154_v49 = vld [vmem:[#allocation6 + $0x15cc] ss:$24 sps:$4 sm:$0xff]  }
 0x5ae   : > { %8291 = vmatpush1.bf16.msra.mxu0 %v13080_v11  ;;  %v13175_v11 = vld [vmem:[#allocation6 + $0x1bc4] ss:$24 sps:$4 sm:$0xff]  }
 0x5af   : > { %8292 = vmatprep.subr.bf16.mxu0 %v13088_v36  ;;  %v13158_v36 = vld [vmem:[#allocation6 + $0x15f8] ss:$24 sps:$4 sm:$0xff]  }
 0x5b0   : > { %9632 = vmatpush1.bf16.msra.mxu1 %v13089_v39  ;;  %v13160_v39 = vld [vmem:[#allocation6 + $0x15fc] ss:$24 sps:$4 sm:$0xff]  }
 0x5b1   : > { %9633 = vmatprep.subr.bf16.mxu1 %v13097_v8  ;;  %v13167_v8 = vld [vmem:[#allocation6 + $0x1b90] ss:$24 sps:$4 sm:$0xff]  }
 0x5b2   : > { %8293 = vmatpush1.bf16.msra.mxu0 %v13086_v55  ;;  %v13181_v55 = vld [vmem:[#allocation6 + $0x1bf4] ss:$24 sps:$4 sm:$0xff]  }
 0x5b3   : > { %8294 = vmatprep.subr.bf16.mxu0 %v13094_v22  ;;  %v13164_v22 = vld [vmem:[#allocation6 + $0x1628] ss:$24 sps:$4 sm:$0xff]  }
 0x5b4   : > { %9634 = vmatpush1.bf16.msra.mxu1 %v13095_v48  ;;  %v13166_v48 = vld [vmem:[#allocation6 + $0x162c] ss:$24 sps:$4 sm:$0xff]  }
 0x5b5   : > { %9635 = vmatprep.subr.bf16.mxu1 %v13103_v28  ;;  %v13173_v28 = vld [vmem:[#allocation6 + $0x1bc0] ss:$24 sps:$4 sm:$0xff]  }
 0x5b6   : > { %8295 = vmatpush1.bf16.msra.mxu0 %v13092_v25  ;;  %v13187_v25 = vld [vmem:[#allocation6 + $0x1c24] ss:$24 sps:$4 sm:$0xff]  }
 0x5b7   : > { %8296 = vmatprep.subr.bf16.mxu0 %v13100_v58  ;;  %v13170_v58 = vld [vmem:[#allocation6 + $0x1658] ss:$24 sps:$4 sm:$0xff]  }
 0x5b8   : > { %9636 = vmatpush1.bf16.msra.mxu1 %v13101_v44  ;;  %v13172_v44 = vld [vmem:[#allocation6 + $0x165c] ss:$24 sps:$4 sm:$0xff]  }
 0x5b9   : > { %9637 = vmatprep.subr.bf16.mxu1 %v13109_v1  ;;  %v13179_v1 = vld [vmem:[#allocation6 + $0x1bf0] ss:$24 sps:$4 sm:$0xff]  }
 0x5ba   : > { %8297 = vmatpush1.bf16.msra.mxu0 %v13098_v41  ;;  %v13193_v41 = vld [vmem:[#allocation6 + $0x1c54] ss:$24 sps:$4 sm:$0xff]  }
 0x5bb   : > { %8298 = vmatprep.subr.bf16.mxu0 %v13106_v38  ;;  %v13176_v38 = vld [vmem:[#allocation6 + $0x1688] ss:$24 sps:$4 sm:$0xff]  }
 0x5bc   : > { %9638 = vmatpush1.bf16.msra.mxu1 %v13107_v17  ;;  %v13178_v17 = vld [vmem:[#allocation6 + $0x168c] ss:$24 sps:$4 sm:$0xff]  }
 0x5bd   : > { %9639 = vmatprep.subr.bf16.mxu1 %v13115_v37  ;;  %v13185_v37 = vld [vmem:[#allocation6 + $0x1c20] ss:$24 sps:$4 sm:$0xff]  }
 0x5be   : > { %8299 = vmatpush1.bf16.msra.mxu0 %v13104_v14  ;;  %v13199_v14 = vld [vmem:[#allocation6 + $0x1c84] ss:$24 sps:$4 sm:$0xff]  }
 0x5bf   : > { %8300 = vmatprep.subr.bf16.mxu0 %v13112_v42  ;;  %v13182_v42 = vld [vmem:[#allocation6 + $0x16b8] ss:$24 sps:$4 sm:$0xff]  }
 0x5c0   : > { %9640 = vmatpush1.bf16.msra.mxu1 %v13113_v24  ;;  %v13184_v24 = vld [vmem:[#allocation6 + $0x16bc] ss:$24 sps:$4 sm:$0xff]  }
 0x5c1   : > { %9641 = vmatprep.subr.bf16.mxu1 %v13121_v63  ;;  %v13191_v63 = vld [vmem:[#allocation6 + $0x1c50] ss:$24 sps:$4 sm:$0xff]  }
 0x5c2   : > { %8301 = vmatpush1.bf16.msra.mxu0 %v13110_v60  ;;  %v13205_v60 = vld [vmem:[#allocation6 + $0x1cb4] ss:$24 sps:$4 sm:$0xff]  }
 0x5c3   : > { %8302 = vmatprep.subr.bf16.mxu0 %v13118_v9  ;;  %v13188_v9 = vld [vmem:[#allocation6 + $0x16e8] ss:$24 sps:$4 sm:$0xff]  }
 0x5c4   : > { %9642 = vmatpush1.bf16.msra.mxu1 %v13119_v19  ;;  %v13190_v19 = vld [vmem:[#allocation6 + $0x16ec] ss:$24 sps:$4 sm:$0xff]  }
 0x5c5   : > { %9643 = vmatprep.subr.bf16.mxu1 %v13127_v33  ;;  %v13197_v33 = vld [vmem:[#allocation6 + $0x1c80] ss:$24 sps:$4 sm:$0xff]  }
 0x5c6   : > { %8303 = vmatpush1.bf16.msra.mxu0 %v13116_v57  ;;  %v13211_v57 = vld [vmem:[#allocation6 + $0x1ce4] ss:$24 sps:$4 sm:$0xff]  }
 0x5c7   : > { %8304 = vmatprep.subr.bf16.mxu0 %v13124_v34  ;;  %v13194_v34 = vld [vmem:[#allocation6 + $0x1718] ss:$24 sps:$4 sm:$0xff]  }
 0x5c8   : > { %9644 = vmatpush1.bf16.msra.mxu1 %v13125_v21  ;;  %v13196_v21 = vld [vmem:[#allocation6 + $0x171c] ss:$24 sps:$4 sm:$0xff]  }
 0x5c9   : > { %9645 = vmatprep.subr.bf16.mxu1 %v13133_v6  ;;  %v13203_v6 = vld [vmem:[#allocation6 + $0x1cb0] ss:$24 sps:$4 sm:$0xff]  }
 0x5ca   : > { %8305 = vmatpush1.bf16.msra.mxu0 %v13122_v31  ;;  %v13217_v31 = vld [vmem:[#allocation6 + $0x1d14] ss:$24 sps:$4 sm:$0xff]  }
 0x5cb   : > { %8317 = vmatprep.subr.bf16.mxu0 %v13130_v54  ;;  %v13200_v54 = vld [vmem:[#allocation6 + $0x1748] ss:$24 sps:$4 sm:$0xff]  }
 0x5cc   : > { %9646 = vmatpush1.bf16.msra.mxu1 %v13131_v59  ;;  %v13202_v59 = vld [vmem:[#allocation6 + $0x174c] ss:$24 sps:$4 sm:$0xff]  }
 0x5cd   : > { %9647 = vmatprep.subr.bf16.mxu1 %v13139_v20  ;;  %8307 = vmatmul.mubr.bf16.vlgmr.msra.gmra.mrb[20].mxu0 %v14525_v50  ;;  %v13148_v50 = vld [vmem:[#allocation6 + $0x159c] ss:$24 sps:$4 sm:$0xff]   ;;  %v13209_v20 = vld [vmem:[#allocation6 + $0x1ce0] ss:$24 sps:$4 sm:$0xff]  }
 0x5ce   : > { %8318 = vmatpush1.bf16.msra.mxu0 %v13128_v53  ;;  %8349 = vmatprep.mubr.bf16.mxu0 %v14586_v16  ;;  %v13155_v16 = vld [vmem:[#allocation6 + $0x1b30] ss:$24 sps:$4 sm:$0xff]   ;;  %v13223_v53 = vld [vmem:[#allocation6 + $0x1d44] ss:$24 sps:$4 sm:$0xff]  }
 0x5cf   : > { %8319 = vmatprep.subr.bf16.mxu0 %v13136_v56  ;;  %v13206_v56 = vld [vmem:[#allocation6 + $0x1778] ss:$24 sps:$4 sm:$0xff]  }
 0x5d0   : > { %9648 = vmatpush1.bf16.msra.mxu1 %v13137_v12  ;;  %v13208_v12 = vld [vmem:[#allocation6 + $0x177c] ss:$24 sps:$4 sm:$0xff]  }
 0x5d1   : > { %9649 = vmatprep.subr.bf16.mxu1 %v13145_v40  ;;  %v13215_v40 = vld [vmem:[#allocation6 + $0x1d10] ss:$24 sps:$4 sm:$0xff]  }
 0x5d2   : > { %8320 = vmatpush1.bf16.msra.mxu0 %v13134_v13  ;;  %v13229_v13 = vld [vmem:[#allocation6 + $0x1d74] ss:$24 sps:$4 sm:$0xff]  }
 0x5d3   : > { %8321 = vmatprep.subr.bf16.mxu0 %v13142_v51  ;;  %v13212_v51 = vld [vmem:[#allocation6 + $0x17a8] ss:$24 sps:$4 sm:$0xff]  }
 0x5d4   : > { %9650 = vmatpush1.bf16.msra.mxu1 %v13143_v35  ;;  %v13214_v35 = vld [vmem:[#allocation6 + $0x17ac] ss:$24 sps:$4 sm:$0xff]  }
 0x5d5   : > { %9662 = vmatprep.subr.bf16.mxu1 %v13151_v5  ;;  %v13221_v5 = vld [vmem:[#allocation6 + $0x1d40] ss:$24 sps:$4 sm:$0xff]  }
 0x5d6   : > { %8322 = vmatpush1.bf16.msra.mxu0 %v13140_v46  ;;  %v13235_v46 = vld [vmem:[#allocation6 + $0x1da4] ss:$24 sps:$4 sm:$0xff]  }
 0x5d7   : > { %9652 = vmatmul.mubr.bf16.vlgmr.msra.gmra.mrb[20].mxu1 %v14687_v3  ;;  %8323 = vmatprep.subr.bf16.mxu0 %v13148_v50  ;;  %v13218_v50 = vld [vmem:[#allocation6 + $0x17d8] ss:$24 sps:$4 sm:$0xff]  }
 0x5d8   : > { %9663 = vmatpush1.bf16.msra.mxu1 %v13149_v52  ;;  %9694 = vmatprep.mubr.bf16.mxu1 %v14690_v30  ;;  %v13220_v52 = vld [vmem:[#allocation6 + $0x17dc] ss:$24 sps:$4 sm:$0xff]  }
 0x5d9   : > { %9664 = vmatprep.subr.bf16.mxu1 %v13157_v62  ;;  %v13227_v62 = vld [vmem:[#allocation6 + $0x1d70] ss:$24 sps:$4 sm:$0xff]  }
 0x5da   : > { %8324 = vmatpush1.bf16.msra.mxu0 %v13146_v45  ;;  %v13241_v45 = vld [vmem:[#allocation6 + $0x1dd4] ss:$24 sps:$4 sm:$0xff]  }
 0x5db   : > { %8325 = vmatprep.subr.bf16.mxu0 %v13154_v49  ;;  %v13224_v49 = vld [vmem:[#allocation6 + $0x1808] ss:$24 sps:$4 sm:$0xff]  }
 0x5dc   : > { %9665 = vmatpush1.bf16.msra.mxu1 %v13155_v16  ;;  %v13226_v16 = vld [vmem:[#allocation6 + $0x180c] ss:$24 sps:$4 sm:$0xff]  }
 0x5dd   : > { %9666 = vmatprep.subr.bf16.mxu1 %v13163_v18  ;;  %v13233_v18 = vld [vmem:[#allocation6 + $0x1da0] ss:$24 sps:$4 sm:$0xff]  }
 0x5de   : > { %8326 = vmatpush1.bf16.msra.mxu0 %v13152_v43  ;;  %v13247_v43 = vld [vmem:[#allocation6 + $0x1814] ss:$24 sps:$4 sm:$0xff]  }
 0x5df   : > { %8327 = vmatprep.subr.bf16.mxu0 %v13160_v39  ;;  %v13230_v39 = vld [vmem:[#allocation6 + $0x1838] ss:$24 sps:$4 sm:$0xff]  }
 0x5e0   : > { %9667 = vmatpush1.bf16.msra.mxu1 %v13161_v32  ;;  %v13232_v32 = vld [vmem:[#allocation6 + $0x183c] ss:$24 sps:$4 sm:$0xff]  }
 0x5e1   : > { %9668 = vmatprep.subr.bf16.mxu1 %v13169_v47  ;;  %v13239_v47 = vld [vmem:[#allocation6 + $0x1dd0] ss:$24 sps:$4 sm:$0xff]  }
 0x5e2   : > { %8328 = vmatpush1.bf16.msra.mxu0 %v13158_v36  ;;  %v14697_v36 = vrot.slane %v14558_v7, 2  ;;  %v13257_v7 = vld [vmem:[#allocation6 + $0x1870] ss:$24 sps:$4 sm:$0xff]  }
 0x5e3   : > { %8329 = vmatprep.subr.bf16.mxu0 %v13166_v48  ;;  %v13253_v48 = vld [vmem:[#allocation6 + $0x1844] ss:$24 sps:$4 sm:$0xff]  }
 0x5e4   : > { %9669 = vmatpush1.bf16.msra.mxu1 %v13167_v8  ;;  %v13238_v8 = vld [vmem:[#allocation6 + $0x186c] ss:$24 sps:$4 sm:$0xff]  }
 0x5e5   : > { %9670 = vmatprep.subr.bf16.mxu1 %v13175_v11  ;;  %v13245_v11 = vld [vmem:[#allocation6 + $0x1810] ss:$24 sps:$4 sm:$0xff]  }
 0x5e6   : > { %8330 = vmatpush1.bf16.msra.mxu0 %v13164_v22  ;;  %v13259_v22 = vld [vmem:[#allocation6 + $0x1874] ss:$24 sps:$4 sm:$0xff]  }
 0x5e7   : > { %8331 = vmatprep.subr.bf16.mxu0 %v13172_v44  ;;  %v13242_v44 = vld [vmem:[#allocation6 + $0x1898] ss:$24 sps:$4 sm:$0xff]  }
 0x5e8   : > { %9671 = vmatpush1.bf16.msra.mxu1 %v13173_v28  ;;  %v13236_v28 = vld [vmem:[#allocation6 + $0x1868] ss:$24 sps:$4 sm:$0xff]  }
 0x5e9   : > { %9672 = vmatprep.subr.bf16.mxu1 %v13181_v55  ;;  %v13244_v55 = vld [vmem:[#allocation6 + $0x189c] ss:$24 sps:$4 sm:$0xff]  }
 0x5ea   : > { %8332 = vmatpush1.bf16.msra.mxu0 %v13170_v58  ;;  %v13248_v58 = vld [vmem:[#allocation6 + $0x18c8] ss:$24 sps:$4 sm:$0xff]  }
 0x5eb   : > { %8333 = vmatprep.subr.bf16.mxu0 %v13178_v17  ;;  %v13256_v17 = vld [vmem:[#allocation6 + $0x18fc] ss:$24 sps:$4 sm:$0xff]  }
 0x5ec   : > { %9673 = vmatpush1.bf16.msra.mxu1 %v13179_v1  ;;  %v13250_v1 = vld [vmem:[#allocation6 + $0x18cc] ss:$24 sps:$4 sm:$0xff]  }
 0x5ed   : > { %9674 = vmatprep.subr.bf16.mxu1 %v13187_v25  ;;  %v13265_v25 = vld [vmem:[#allocation6 + $0x18a4] ss:$24 sps:$4 sm:$0xff]  }
 0x5ee   : > { %8334 = vmatpush1.bf16.msra.mxu0 %v13176_v38  ;;  %v13262_v38 = vld [vmem:[#allocation6 + $0x192c] ss:$24 sps:$4 sm:$0xff]  }
 0x5ef   : > { %8335 = vmatprep.subr.bf16.mxu0 %v13184_v24  ;;  %v13269_v24 = vld [vmem:[#allocation6 + $0x18d0] ss:$24 sps:$4 sm:$0xff]  }
 0x5f0   : > { %9675 = vmatpush1.bf16.msra.mxu1 %v13185_v37  ;;  %v13263_v37 = vld [vmem:[#allocation6 + $0x18a0] ss:$24 sps:$4 sm:$0xff]  }
 0x5f1   : > { %9676 = vmatprep.subr.bf16.mxu1 %v13193_v41  ;;  %v13271_v41 = vld [vmem:[#allocation6 + $0x18d4] ss:$24 sps:$4 sm:$0xff]  }
 0x5f2   : > { %8336 = vmatpush1.bf16.msra.mxu0 %v13182_v42  ;;  %v13268_v42 = vld [vmem:[#allocation6 + $0x195c] ss:$24 sps:$4 sm:$0xff]  }
 0x5f3   : > { %8337 = vmatprep.subr.bf16.mxu0 %v13190_v19  ;;  %v13275_v19 = vld [vmem:[#allocation6 + $0x1900] ss:$24 sps:$4 sm:$0xff]  }
 0x5f4   : > { %9677 = vmatpush1.bf16.msra.mxu1 %v13191_v63  ;;  %v13277_v63 = vld [vmem:[#allocation6 + $0x1904] ss:$24 sps:$4 sm:$0xff]  }
 0x5f5   : > { %9678 = vmatprep.subr.bf16.mxu1 %v13199_v14  ;;  %v13260_v14 = vld [vmem:[#allocation6 + $0x1928] ss:$24 sps:$4 sm:$0xff]  }
 0x5f6   : > { %8338 = vmatpush1.bf16.msra.mxu0 %v13188_v9  ;;  %v13274_v9 = vld [vmem:[#allocation6 + $0x198c] ss:$24 sps:$4 sm:$0xff]  }
 0x5f7   : > { %8339 = vmatprep.subr.bf16.mxu0 %v13196_v21  ;;  %v13281_v21 = vld [vmem:[#allocation6 + $0x1930] ss:$24 sps:$4 sm:$0xff]  }
 0x5f8   : > { %9679 = vmatpush1.bf16.msra.mxu1 %v13197_v33  ;;  %v13283_v33 = vld [vmem:[#allocation6 + $0x1934] ss:$24 sps:$4 sm:$0xff]  }
 0x5f9   : > { %9680 = vmatprep.subr.bf16.mxu1 %v13205_v60  ;;  %v13266_v60 = vld [vmem:[#allocation6 + $0x1958] ss:$24 sps:$4 sm:$0xff]  }
 0x5fa   : > { %8340 = vmatpush1.bf16.msra.mxu0 %v13194_v34  ;;  %v13280_v34 = vld [vmem:[#allocation6 + $0x19bc] ss:$24 sps:$4 sm:$0xff]  }
 0x5fb   : > { %8341 = vmatprep.subr.bf16.mxu0 %v13202_v59  ;;  %v13287_v59 = vld [vmem:[#allocation6 + $0x1960] ss:$24 sps:$4 sm:$0xff]  }
 0x5fc   : > { %9681 = vmatpush1.bf16.msra.mxu1 %v13203_v6  ;;  %v13289_v6 = vld [vmem:[#allocation6 + $0x1964] ss:$24 sps:$4 sm:$0xff]  }
 0x5fd   : > { %9682 = vmatprep.subr.bf16.mxu1 %v13211_v57  ;;  %v13272_v57 = vld [vmem:[#allocation6 + $0x1988] ss:$24 sps:$4 sm:$0xff]  }
 0x5fe   : > { %8342 = vmatpush1.bf16.msra.mxu0 %v13200_v54  ;;  %v13286_v54 = vld [vmem:[#allocation6 + $0x19ec] ss:$24 sps:$4 sm:$0xff]  }
 0x5ff   : > { %8343 = vmatprep.subr.bf16.mxu0 %v13208_v12  ;;  %v13293_v12 = vld [vmem:[#allocation6 + $0x1990] ss:$24 sps:$4 sm:$0xff]  }
 0x600   : > { %9683 = vmatpush1.bf16.msra.mxu1 %v13209_v20  ;;  %v13295_v20 = vld [vmem:[#allocation6 + $0x1994] ss:$24 sps:$4 sm:$0xff]  }
 0x601   : > { %9684 = vmatprep.subr.bf16.mxu1 %v13217_v31  ;;  %v13278_v31 = vld [vmem:[#allocation6 + $0x19b8] ss:$24 sps:$4 sm:$0xff]  }
 0x602   : > { %8344 = vmatpush1.bf16.msra.mxu0 %v13206_v56  ;;  %v13292_v56 = vld [vmem:[#allocation6 + $0x1a1c] ss:$24 sps:$4 sm:$0xff]  }
 0x603   : > { %8345 = vmatprep.subr.bf16.mxu0 %v13214_v35  ;;  %v13299_v35 = vld [vmem:[#allocation6 + $0x19c0] ss:$24 sps:$4 sm:$0xff]  }
 0x604   : > { %9685 = vmatpush1.bf16.msra.mxu1 %v13215_v40  ;;  %v13301_v40 = vld [vmem:[#allocation6 + $0x19c4] ss:$24 sps:$4 sm:$0xff]  }
 0x605   : > { %9686 = vmatprep.subr.bf16.mxu1 %v13223_v53  ;;  %v13284_v53 = vld [vmem:[#allocation6 + $0x19e8] ss:$24 sps:$4 sm:$0xff]  }
 0x606   : > { %8346 = vmatpush1.bf16.msra.mxu0 %v13212_v51  ;;  %v13298_v51 = vld [vmem:[#allocation6 + $0x1a4c] ss:$24 sps:$4 sm:$0xff]  }
 0x607   : > { %8347 = vmatprep.subr.bf16.mxu0 %v13220_v52  ;;  %v13305_v52 = vld [vmem:[#allocation6 + $0x19f0] ss:$24 sps:$4 sm:$0xff]  }
 0x608   : > { %9687 = vmatpush1.bf16.msra.mxu1 %v13221_v5  ;;  %v13307_v5 = vld [vmem:[#allocation6 + $0x19f4] ss:$24 sps:$4 sm:$0xff]  }
 0x609   : > { %9688 = vmatprep.subr.bf16.mxu1 %v13229_v13  ;;  %v13290_v13 = vld [vmem:[#allocation6 + $0x1a18] ss:$24 sps:$4 sm:$0xff]  }
 0x60a   : > { %8348 = vmatpush1.bf16.msra.mxu0 %v13218_v50  ;;  %v13304_v50 = vld [vmem:[#allocation6 + $0x1a7c] ss:$24 sps:$4 sm:$0xff]  }
 0x60b   : > { %9705 = vmatprep.subr.bf16.mxu0 %v13226_v16  ;;  %v13311_v16 = vld [vmem:[#allocation6 + $0x1a20] ss:$24 sps:$4 sm:$0xff]  }
 0x60c   : > { %9689 = vmatpush1.bf16.msra.mxu1 %v13227_v62  ;;  %v13313_v62 = vld [vmem:[#allocation6 + $0x1a24] ss:$24 sps:$4 sm:$0xff]  }
 0x60d   : > { %9690 = vmatprep.subr.bf16.mxu1 %v13235_v46  ;;  %8350 = vmatmul.mubr.bf16.vlgmr.msra.gmra.mrb[20].mxu0 %v14582_v23  ;;  %v13251_v23 = vld [vmem:[#allocation6 + $0x1840] ss:$24 sps:$4 sm:$0xff]  }
 0x60e   : > { %9706 = vmatpush1.bf16.msra.mxu0 %v13224_v49  ;;  %9737 = vmatprep.mubr.bf16.mxu0 %v14680_v15  ;;  %v13296_v46 = vld [vmem:[#allocation6 + $0x1a48] ss:$24 sps:$4 sm:$0xff]   ;;  %v13310_v49 = vld [vmem:[#allocation6 + $0x1aac] ss:$24 sps:$4 sm:$0xff]  }
 0x60f   : > { %9707 = vmatprep.subr.bf16.mxu0 %v13232_v32  ;;  %v13317_v32 = vld [vmem:[#allocation6 + $0x1a50] ss:$24 sps:$4 sm:$0xff]  }
 0x610   : > { %9691 = vmatpush1.bf16.msra.mxu1 %v13233_v18  ;;  %v13319_v18 = vld [vmem:[#allocation6 + $0x1a54] ss:$24 sps:$4 sm:$0xff]  }
 0x611   : > { %9692 = vmatprep.subr.bf16.mxu1 %v13241_v45  ;;  %v13302_v45 = vld [vmem:[#allocation6 + $0x1a78] ss:$24 sps:$4 sm:$0xff]  }
 0x612   : > { %9708 = vmatpush1.bf16.msra.mxu0 %v13230_v39  ;;  %v13316_v39 = vld [vmem:[#allocation6 + $0x1adc] ss:$24 sps:$4 sm:$0xff]  }
 0x613   : > { %9709 = vmatprep.subr.bf16.mxu0 %v13238_v8  ;;  %v13323_v8 = vld [vmem:[#allocation6 + $0x1a80] ss:$24 sps:$4 sm:$0xff]  }
 0x614   : > { %9693 = vmatpush1.bf16.msra.mxu1 %v13239_v47  ;;  %v13325_v47 = vld [vmem:[#allocation6 + $0x1a84] ss:$24 sps:$4 sm:$0xff]  }
 0x615   : > { %9791 = vmatprep.subr.bf16.mxu1 %v13247_v43  ;;  %v13308_v43 = vld [vmem:[#allocation6 + $0x1aa8] ss:$24 sps:$4 sm:$0xff]  }
 0x616   : > { %9710 = vmatpush1.bf16.msra.mxu0 %v13236_v28  ;;  %v13322_v28 = vld [vmem:[#allocation6 + $0x1b0c] ss:$24 sps:$4 sm:$0xff]  }
 0x617   : > { %9695 = vmatmul.mubr.bf16.vlgmr.msra.gmra.mrb[20].mxu1 %v14697_v36  ;;  %9711 = vmatprep.subr.bf16.mxu0 %v13244_v55  ;;  %v13329_v55 = vld [vmem:[#allocation6 + $0x1ab0] ss:$24 sps:$4 sm:$0xff]  }
 0x618   : > { %9792 = vmatpush1.bf16.msra.mxu1 %v13245_v11  ;;  %9823 = vmatprep.mubr.bf16.mxu1 %v14680_v15  ;;  %v13254_v15 = vld [vmem:[#allocation6 + $0x18f8] ss:$24 sps:$4 sm:$0xff]   ;;  %v13331_v11 = vld [vmem:[#allocation6 + $0x1ab4] ss:$24 sps:$4 sm:$0xff]  }
 0x619   : > { %9793 = vmatprep.subr.bf16.mxu1 %v13253_v48  ;;  %v13314_v48 = vld [vmem:[#allocation6 + $0x1ad8] ss:$24 sps:$4 sm:$0xff]  }
 0x61a   : > { %9712 = vmatpush1.bf16.msra.mxu0 %v13242_v44  ;;  %v13328_v44 = vld [vmem:[#allocation6 + $0x1b3c] ss:$24 sps:$4 sm:$0xff]  }
 0x61b   : > { %9713 = vmatprep.subr.bf16.mxu0 %v13250_v1  ;;  %v13335_v1 = vld [vmem:[#allocation6 + $0x1ae0] ss:$24 sps:$4 sm:$0xff]  }
 0x61c   : > { %9794 = vmatpush1.bf16.msra.mxu1 %v13251_v23  ;;  %v13337_v23 = vld [vmem:[#allocation6 + $0x1ae4] ss:$24 sps:$4 sm:$0xff]  }
 0x61d   : > { %9795 = vmatprep.subr.bf16.mxu1 %v13259_v22  ;;  %v13320_v22 = vld [vmem:[#allocation6 + $0x1b08] ss:$24 sps:$4 sm:$0xff]  }
 0x61e   : > { %9714 = vmatpush1.bf16.msra.mxu0 %v13248_v58  ;;  %v13334_v58 = vld [vmem:[#allocation6 + $0x1b6c] ss:$24 sps:$4 sm:$0xff]  }
 0x61f   : > { %9715 = vmatprep.subr.bf16.mxu0 %v13256_v17  ;;  %v13341_v17 = vld [vmem:[#allocation6 + $0x1b10] ss:$24 sps:$4 sm:$0xff]  }
 0x620   : > { %9796 = vmatpush1.bf16.msra.mxu1 %v13257_v7  ;;  %v13343_v7 = vld [vmem:[#allocation6 + $0x1b14] ss:$24 sps:$4 sm:$0xff]  }
 0x621   : > { %9797 = vmatprep.subr.bf16.mxu1 %v13265_v25  ;;  %v13326_v25 = vld [vmem:[#allocation6 + $0x1b38] ss:$24 sps:$4 sm:$0xff]  }
 0x622   : > { %9716 = vmatpush1.bf16.msra.mxu0 %v13254_v15  ;;  %v13340_v15 = vld [vmem:[#allocation6 + $0x1b9c] ss:$24 sps:$4 sm:$0xff]  }
 0x623   : > { %9717 = vmatprep.subr.bf16.mxu0 %v13262_v38  ;;  %v13347_v38 = vld [vmem:[#allocation6 + $0x1b40] ss:$24 sps:$4 sm:$0xff]  }
 0x624   : > { %9798 = vmatpush1.bf16.msra.mxu1 %v13263_v37  ;;  %v13349_v37 = vld [vmem:[#allocation6 + $0x1b44] ss:$24 sps:$4 sm:$0xff]  }
 0x625   : > { %9799 = vmatprep.subr.bf16.mxu1 %v13271_v41  ;;  %v13332_v41 = vld [vmem:[#allocation6 + $0x1b68] ss:$24 sps:$4 sm:$0xff]  }
 0x626   : > { %9718 = vmatpush1.bf16.msra.mxu0 %v13260_v14  ;;  %v13346_v14 = vld [vmem:[#allocation6 + $0x1bcc] ss:$24 sps:$4 sm:$0xff]  }
 0x627   : > { %9719 = vmatprep.subr.bf16.mxu0 %v13268_v42  ;;  %v13353_v42 = vld [vmem:[#allocation6 + $0x1b70] ss:$24 sps:$4 sm:$0xff]  }
 0x628   : > { %9800 = vmatpush1.bf16.msra.mxu1 %v13269_v24  ;;  %v13355_v24 = vld [vmem:[#allocation6 + $0x1b74] ss:$24 sps:$4 sm:$0xff]  }
 0x629   : > { %9801 = vmatprep.subr.bf16.mxu1 %v13277_v63  ;;  %v13338_v63 = vld [vmem:[#allocation6 + $0x1b98] ss:$24 sps:$4 sm:$0xff]  }
 0x62a   : > { %9720 = vmatpush1.bf16.msra.mxu0 %v13266_v60  ;;  %v13352_v60 = vld [vmem:[#allocation6 + $0x1bfc] ss:$24 sps:$4 sm:$0xff]  }
 0x62b   : > { %9721 = vmatprep.subr.bf16.mxu0 %v13274_v9  ;;  %v13367_v9 = vld [vmem:[#allocation6 + $0x1bd4] ss:$24 sps:$4 sm:$0xff]  }
 0x62c   : > { %9802 = vmatpush1.bf16.msra.mxu1 %v13275_v19  ;;  %v13361_v19 = vld [vmem:[#allocation6 + $0x1ba4] ss:$24 sps:$4 sm:$0xff]  }
 0x62d   : > { %9803 = vmatprep.subr.bf16.mxu1 %v13283_v33  ;;  %v13344_v33 = vld [vmem:[#allocation6 + $0x1bc8] ss:$24 sps:$4 sm:$0xff]  }
 0x62e   : > { %9722 = vmatpush1.bf16.msra.mxu0 %v13272_v57  ;;  %v13373_v57 = vld [vmem:[#allocation6 + $0x1c04] ss:$24 sps:$4 sm:$0xff]  }
 0x62f   : > { %9723 = vmatprep.subr.bf16.mxu0 %v13280_v34  ;;  %v13356_v34 = vld [vmem:[#allocation6 + $0x1c28] ss:$24 sps:$4 sm:$0xff]  }
 0x630   : > { %9804 = vmatpush1.bf16.msra.mxu1 %v13281_v21  ;;  %v13358_v21 = vld [vmem:[#allocation6 + $0x1c2c] ss:$24 sps:$4 sm:$0xff]  }
 0x631   : > { %9805 = vmatprep.subr.bf16.mxu1 %v13289_v6  ;;  %v13365_v6 = vld [vmem:[#allocation6 + $0x1bd0] ss:$24 sps:$4 sm:$0xff]  }
 0x632   : > { %9724 = vmatpush1.bf16.msra.mxu0 %v13278_v31  ;;  %v13379_v31 = vld [vmem:[#allocation6 + $0x1c34] ss:$24 sps:$4 sm:$0xff]  }
 0x633   : > { %9725 = vmatprep.subr.bf16.mxu0 %v13286_v54  ;;  %v13362_v54 = vld [vmem:[#allocation6 + $0x1c58] ss:$24 sps:$4 sm:$0xff]  }
 0x634   : > { %9806 = vmatpush1.bf16.msra.mxu1 %v13287_v59  ;;  %v13364_v59 = vld [vmem:[#allocation6 + $0x1c5c] ss:$24 sps:$4 sm:$0xff]  }
 0x635   : > { %9807 = vmatprep.subr.bf16.mxu1 %v13295_v20  ;;  %v13371_v20 = vld [vmem:[#allocation6 + $0x1c00] ss:$24 sps:$4 sm:$0xff]  }
 0x636   : > { %9726 = vmatpush1.bf16.msra.mxu0 %v13284_v53  ;;  %v13385_v53 = vld [vmem:[#allocation6 + $0x1c64] ss:$24 sps:$4 sm:$0xff]  }
 0x637   : > { %9727 = vmatprep.subr.bf16.mxu0 %v13292_v56  ;;  %v13368_v56 = vld [vmem:[#allocation6 + $0x1c88] ss:$24 sps:$4 sm:$0xff]  }
 0x638   : > { %9808 = vmatpush1.bf16.msra.mxu1 %v13293_v12  ;;  %v13370_v12 = vld [vmem:[#allocation6 + $0x1c8c] ss:$24 sps:$4 sm:$0xff]  }
 0x639   : > { %9809 = vmatprep.subr.bf16.mxu1 %v13301_v40  ;;  %v13377_v40 = vld [vmem:[#allocation6 + $0x1c30] ss:$24 sps:$4 sm:$0xff]  }
 0x63a   : > { %9728 = vmatpush1.bf16.msra.mxu0 %v13290_v13  ;;  %v13391_v13 = vld [vmem:[#allocation6 + $0x1c94] ss:$24 sps:$4 sm:$0xff]  }
 0x63b   : > { %9729 = vmatprep.subr.bf16.mxu0 %v13298_v51  ;;  %v13374_v51 = vld [vmem:[#allocation6 + $0x1cb8] ss:$24 sps:$4 sm:$0xff]  }
 0x63c   : > { %9810 = vmatpush1.bf16.msra.mxu1 %v13299_v35  ;;  %v13376_v35 = vld [vmem:[#allocation6 + $0x1cbc] ss:$24 sps:$4 sm:$0xff]  }
 0x63d   : > { %9811 = vmatprep.subr.bf16.mxu1 %v13307_v5  ;;  %v13383_v5 = vld [vmem:[#allocation6 + $0x1c60] ss:$24 sps:$4 sm:$0xff]  }
 0x63e   : > { %9730 = vmatpush1.bf16.msra.mxu0 %v13296_v46  ;;  %v13397_v46 = vld [vmem:[#allocation6 + $0x1cc4] ss:$24 sps:$4 sm:$0xff]  }
 0x63f   : > { %9731 = vmatprep.subr.bf16.mxu0 %v13304_v50  ;;  %v13380_v50 = vld [vmem:[#allocation6 + $0x1ce8] ss:$24 sps:$4 sm:$0xff]  }
 0x640   : > { %9812 = vmatpush1.bf16.msra.mxu1 %v13305_v52  ;;  %v13382_v52 = vld [vmem:[#allocation6 + $0x1cec] ss:$24 sps:$4 sm:$0xff]  }
 0x641   : > { %9813 = vmatprep.subr.bf16.mxu1 %v13313_v62  ;;  %v13389_v62 = vld [vmem:[#allocation6 + $0x1c90] ss:$24 sps:$4 sm:$0xff]  }
 0x642   : > { %9732 = vmatpush1.bf16.msra.mxu0 %v13302_v45  ;;  %v13403_v45 = vld [vmem:[#allocation6 + $0x1cf4] ss:$24 sps:$4 sm:$0xff]  }
 0x643   : > { %9733 = vmatprep.subr.bf16.mxu0 %v13310_v49  ;;  %v13386_v49 = vld [vmem:[#allocation6 + $0x1d18] ss:$24 sps:$4 sm:$0xff]  }
 0x644   : > { %9814 = vmatpush1.bf16.msra.mxu1 %v13311_v16  ;;  %v13388_v16 = vld [vmem:[#allocation6 + $0x1d1c] ss:$24 sps:$4 sm:$0xff]  }
 0x645   : > { %9815 = vmatprep.subr.bf16.mxu1 %v13319_v18  ;;  %v13395_v18 = vld [vmem:[#allocation6 + $0x1cc0] ss:$24 sps:$4 sm:$0xff]  }
 0x646   : > { %9734 = vmatpush1.bf16.msra.mxu0 %v13308_v43  ;;  %v13409_v43 = vld [vmem:[#allocation6 + $0x1d24] ss:$24 sps:$4 sm:$0xff]  }
 0x647   : > { %9735 = vmatprep.subr.bf16.mxu0 %v13316_v39  ;;  %v13392_v39 = vld [vmem:[#allocation6 + $0x1d48] ss:$24 sps:$4 sm:$0xff]  }
 0x648   : > { %9816 = vmatpush1.bf16.msra.mxu1 %v13317_v32  ;;  %v13394_v32 = vld [vmem:[#allocation6 + $0x1d4c] ss:$24 sps:$4 sm:$0xff]  }
 0x649   : > { %9817 = vmatprep.subr.bf16.mxu1 %v13325_v47  ;;  %v13401_v47 = vld [vmem:[#allocation6 + $0x1cf0] ss:$24 sps:$4 sm:$0xff]  }
 0x64a   : > { %9736 = vmatpush1.bf16.msra.mxu0 %v13314_v48  ;;  %v13415_v48 = vld [vmem:[#allocation6 + $0x1d54] ss:$24 sps:$4 sm:$0xff]  }
 0x64b   : > { %9748 = vmatprep.subr.bf16.mxu0 %v13322_v28  ;;  %v13398_v28 = vld [vmem:[#allocation6 + $0x1d78] ss:$24 sps:$4 sm:$0xff]  }
 0x64c   : > { %9818 = vmatpush1.bf16.msra.mxu1 %v13323_v8  ;;  %v13400_v8 = vld [vmem:[#allocation6 + $0x1d7c] ss:$24 sps:$4 sm:$0xff]  }
 0x64d   : > { %9819 = vmatprep.subr.bf16.mxu1 %v13331_v11  ;;  %9738 = vmatmul.mubr.bf16.vlgmr.msra.gmra.mrb[20].mxu0 %v14687_v3  ;;  %v13407_v11 = vld [vmem:[#allocation6 + $0x1d20] ss:$24 sps:$4 sm:$0xff]  }
 0x64e   : > { %9749 = vmatpush1.bf16.msra.mxu0 %v13320_v22  ;;  %9780 = vmatprep.mubr.bf16.mxu0 %v14690_v30  ;;  %v13418_v22 = vld [vmem:[#allocation6 + $0x1d84] ss:$24 sps:$4 sm:$0xff]  }
 0x64f   : > { %9750 = vmatprep.subr.bf16.mxu0 %v13328_v44  ;;  %v13404_v44 = vld [vmem:[#allocation6 + $0x1da8] ss:$24 sps:$4 sm:$0xff]  }
 0x650   : > { %9820 = vmatpush1.bf16.msra.mxu1 %v13329_v55  ;;  %v13406_v55 = vld [vmem:[#allocation6 + $0x1dac] ss:$24 sps:$4 sm:$0xff]  }
 0x651   : > { %9821 = vmatprep.subr.bf16.mxu1 %v13337_v23  ;;  %v13413_v23 = vld [vmem:[#allocation6 + $0x1d50] ss:$24 sps:$4 sm:$0xff]  }
 0x652   : > { %9751 = vmatpush1.bf16.msra.mxu0 %v13326_v25  ;;  %v13421_v25 = vld [vmem:[#allocation6 + $0x1db4] ss:$24 sps:$4 sm:$0xff]  }
 0x653   : > { %9752 = vmatprep.subr.bf16.mxu0 %v13334_v58  ;;  %v13410_v58 = vld [vmem:[#allocation6 + $0x1dd8] ss:$24 sps:$4 sm:$0xff]  }
 0x654   : > { %9822 = vmatpush1.bf16.msra.mxu1 %v13335_v1  ;;  %v13412_v1 = vld [vmem:[#allocation6 + $0x1ddc] ss:$24 sps:$4 sm:$0xff]  }
 0x655   : > { %9834 = vmatprep.subr.bf16.mxu1 %v13343_v7  ;;  %v13416_v7 = vld [vmem:[#allocation6 + $0x1d80] ss:$24 sps:$4 sm:$0xff]  }
 0x656   : > { %9753 = vmatpush1.bf16.msra.mxu0 %v13332_v41  ;;  %v13422_v41 = vld [vmem:[#allocation6 + $0x1de0] ss:$24 sps:$4 sm:$0xff]  }
 0x657   : > { %9824 = vmatmul.mubr.bf16.vlgmr.msra.gmra.mrb[24].mxu1 %v14687_v3  ;;  %9754 = vmatprep.subr.bf16.mxu0 %v13340_v15  ;;  %v13359_v3 = vld [vmem:[#allocation6 + $0x1ba0] ss:$24 sps:$4 sm:$0xff]  }
 0x658   : > { %9835 = vmatpush1.bf16.msra.mxu1 %v13341_v17  ;;  %9866 = vmatprep.mubr.bf16.mxu1 %v14690_v30  ;;  %v13350_v30 = vld [vmem:[#allocation6 + $0x1bf8] ss:$24 sps:$4 sm:$0xff]   ;;  %v14707_v15 = vld [vmem:[#allocation7] sm:$0x3f] }
 0x659   : > { %9836 = vmatprep.subr.bf16.mxu1 %v13349_v37  ;;  %v13419_v17 = vld [vmem:[#allocation6 + $0x1db0] ss:$24 sps:$4 sm:$0xff]   ;;  %v13424_v37 = vld [vmem:[#allocation6 + $0x1de4] ss:$24 sps:$4 sm:$0xff]  }
 0x65a   : > { %9755 = vmatpush1.bf16.msra.mxu0 %v13338_v63 }
 0x65b   : > { %9756 = vmatprep.subr.bf16.mxu0 %v13346_v14 }
 0x65c   : > { %9837 = vmatpush1.bf16.msra.mxu1 %v13347_v38  ;;  %v14880_v38 = vld [vmem:[#allocation12_spill] sm:$0xff] }
 0x65d   : > { %9838 = vmatprep.subr.bf16.mxu1 %v13355_v24  ;;  %v14881_v24 = vsub.s32 0, %v14880_v38 }
 0x65e   : > { %9757 = vmatpush1.bf16.msra.mxu0 %v13344_v33 }
 0x65f   : > { %9758 = vmatprep.subr.bf16.mxu0 %v13352_v60  ;;  %v9894_v63 = vrot.slane %v14707_v15, %v14881_v24 }
 0x660   : > { %9839 = vmatpush1.bf16.msra.mxu1 %v13353_v42  ;;  %v14882_v42 = vsub.s32 1, %v14880_v38 }
 0x661   : > { %9840 = vmatprep.subr.bf16.mxu1 %v13361_v19 }
 0x662   : > { %9759 = vmatpush1.bf16.msra.mxu0 %v13350_v30  ;;  %v9898_v19 = vrot.slane %v14707_v15, %v14882_v42 }
 0x663   : > { %9760 = vmatprep.subr.bf16.mxu0 %v13358_v21 }
 0x664   : > { %9841 = vmatpush1.bf16.msra.mxu1 %v13359_v3 }
 0x665   : > { %9842 = vmatprep.subr.bf16.mxu1 %v13367_v9 }
 0x666   : > { %9761 = vmatpush1.bf16.msra.mxu0 %v13356_v34 }
 0x667   : > { %9762 = vmatprep.subr.bf16.mxu0 %v13364_v59 }
 0x668   : > { %9843 = vmatpush1.bf16.msra.mxu1 %v13365_v6 }
 0x669   : > { %9844 = vmatprep.subr.bf16.mxu1 %v13373_v57 }
 0x66a   : > { %9763 = vmatpush1.bf16.msra.mxu0 %v13362_v54 }
 0x66b   : > { %9764 = vmatprep.subr.bf16.mxu0 %v13370_v12 }
 0x66c   : > { %9845 = vmatpush1.bf16.msra.mxu1 %v13371_v20 }
 0x66d   : > { %9846 = vmatprep.subr.bf16.mxu1 %v13379_v31 }
 0x66e   : > { %9765 = vmatpush1.bf16.msra.mxu0 %v13368_v56 }
 0x66f   : > { %9766 = vmatprep.subr.bf16.mxu0 %v13376_v35 }
 0x670   : > { %9847 = vmatpush1.bf16.msra.mxu1 %v13377_v40 }
 0x671   : > { %9848 = vmatprep.subr.bf16.mxu1 %v13385_v53 }
 0x672   : > { %9767 = vmatpush1.bf16.msra.mxu0 %v13374_v51 }
 0x673   : > { %9768 = vmatprep.subr.bf16.mxu0 %v13382_v52 }
 0x674   : > { %9849 = vmatpush1.bf16.msra.mxu1 %v13383_v5 }
 0x675   : > { %9850 = vmatprep.subr.bf16.mxu1 %v13391_v13 }
 0x676   : > { %9769 = vmatpush1.bf16.msra.mxu0 %v13380_v50 }
 0x677   : > { %9770 = vmatprep.subr.bf16.mxu0 %v13388_v16 }
 0x678   : > { %9851 = vmatpush1.bf16.msra.mxu1 %v13389_v62 }
 0x679   : > { %9852 = vmatprep.subr.bf16.mxu1 %v13397_v46 }
 0x67a   : > { %9771 = vmatpush1.bf16.msra.mxu0 %v13386_v49 }
 0x67b   : > { %9772 = vmatprep.subr.bf16.mxu0 %v13394_v32 }
 0x67c   : > { %9853 = vmatpush1.bf16.msra.mxu1 %v13395_v18 }
 0x67d   : > { %9854 = vmatprep.subr.bf16.mxu1 %v13403_v45 }
 0x67e   : > { %9773 = vmatpush1.bf16.msra.mxu0 %v13392_v39 }
 0x67f   : > { %9774 = vmatprep.subr.bf16.mxu0 %v13400_v8 }
 0x680   : > { %9855 = vmatpush1.bf16.msra.mxu1 %v13401_v47 }
 0x681   : > { %9856 = vmatprep.subr.bf16.mxu1 %v13409_v43 }
 0x682   : > { %9775 = vmatpush1.bf16.msra.mxu0 %v13398_v28 }
 0x683   : > { %9776 = vmatprep.subr.bf16.mxu0 %v13406_v55 }
 0x684   : > { %9857 = vmatpush1.bf16.msra.mxu1 %v13407_v11 }
 0x685   : > { %9858 = vmatprep.subr.bf16.mxu1 %v13415_v48 }
 0x686   : > { %9777 = vmatpush1.bf16.msra.mxu0 %v13404_v44 }
 0x687   : > { %9778 = vmatprep.subr.bf16.mxu0 %v13412_v1 }
 0x688   : > { %9859 = vmatpush1.bf16.msra.mxu1 %v13413_v23 }
 0x689   : > { %9860 = vmatprep.subr.bf16.mxu1 %v13418_v22 }
 0x68a   : > { %9779 = vmatpush1.bf16.msra.mxu0 %v13410_v58  ;;  %v14884_v58 = vsub.s32 3, %v14880_v38 }
 0x68c   : > { %9861 = vmatpush1.bf16.msra.mxu1 %v13416_v7  ;;  %v14883_v7 = vsub.s32 2, %v14880_v38 }
 0x68d   : > { %9862 = vmatprep.subr.bf16.mxu1 %v13421_v25  ;;  %9781 = vmatmul.mubr.bf16.vlgmr.msra.gmra.mrb[20].mxu0 %v14697_v36 }
 0x68e   : > { %v9902_v25 = vrot.slane %v14707_v15, %v14883_v7 }
 0x690   : > { %9863 = vmatpush1.bf16.msra.mxu1 %v13419_v17  ;;  %v9906_v17 = vrot.slane %v14707_v15, %v14884_v58 }
 0x691   : > { %9864 = vmatprep.subr.bf16.mxu1 %v13424_v37 }
 0x694   : > { %9865 = vmatpush1.bf16.msra.mxu1 %v13422_v41 }
 0x697   : > { %9867 = vmatmul.mubr.bf16.vlgmr.msra.gmra.mrb[24].mxu1 %v14697_v36 }
 0x6ea   : > { %v9696_v14 = vpop.f32.mrb[20].mxu1 }
 0x6eb   : > { %v11504_v33 = vadd.f32 %v9696_v14, %v14669_v61  ;;  %v9698_v60 = vpop.f32.mrb[21].mxu1 }
 0x6ec   : > { %v11505_v3 = vadd.f32 %v9698_v60, %v14671_v29  ;;  %v9700_v9 = vpop.f32.mrb[22].mxu1 }
 0x6ed   : > { %v9921_v30 = vadd.f32 %v11504_v33, %v9894_v63  ;;  %v11506_v36 = vadd.f32 %v9700_v9, %v14673_v27  ;;  %v9702_v21 = vpop.f32.mrb[23].mxu1 }
 0x6ee   : > { %v9922_v6 = vadd.f32 %v11505_v3, %v9898_v19  ;;  %v11507_v57 = vadd.f32 %v9702_v21, %v14675_v4 }
 0x6ef   : > { %v9933_v34 = vmax.f32 %v9921_v30, 0.0  ;;  %v9927_v59 = vadd.f32 %v11506_v36, %v9894_v63 }
 0x6f0   : > { %v9934_v20 = vmax.f32 %v9922_v6, 0.0  ;;  %v9928_v31 = vadd.f32 %v11507_v57, %v9898_v19  ;;  %v14885_v57 = vsub.s32 4, %v14880_v38 }
 0x6f1   : > { %v9951_v54 = vrot.slane %v9933_v34, 1  ;;  %v9939_v12 = vmax.f32 %v9927_v59, 0.0  ;;  %v14886_v59 = vsub.s32 5, %v14880_v38 }
 0x6f2   : > { %v9952_v40 = vrot.slane %v9934_v20, 1  ;;  %v9940_v53 = vmax.f32 %v9928_v31, 0.0 }
 0x6f3   : > { %v9963_v61 = vmax.f32 %v9933_v34, %v9951_v54  ;;  %v9975_v56 = vrot.slane %v9939_v12, 1  ;;  %v10065_v47 = vrot.slane %v9939_v12, 5 }
 0x6f4   : > { %v9964_v35 = vmax.f32 %v9934_v20, %v9952_v40  ;;  %v9976_v29 = vrot.slane %v9940_v53, 1  ;;  %v10066_v55 = vrot.slane %v9940_v53, 5 }
 0x6f5   : > { %v10005_v5 = vrot.slane %v9963_v61, 1  ;;  %v10017_v13 = vrot.slane %v9963_v61, 2  ;;  %v10077_v27 = vsel %vm2410_vm5, %v9933_v34, %v9963_v61  ;;  %v9987_v51 = vmax.f32 %v9933_v34, %v9975_v56 }
 0x6f6   : > { %v10006_v52 = vrot.slane %v9964_v35, 1  ;;  %v10018_v62 = vrot.slane %v9964_v35, 2  ;;  %v10078_v4 = vsel %vm2410_vm5, %v9934_v20, %v9964_v35  ;;  %v9993_v46 = vmax.f32 %v9939_v12, %v9975_v56 }
 0x6f7   : > { %v10083_v50 = vsel %vm2418_vm6, %v10077_v27, %v10005_v5  ;;  %v10035_v16 = vrot.slane %v9987_v51, 3  ;;  %v9988_v18 = vmax.f32 %v9934_v20, %v9976_v29  ;;  %v9994_v45 = vmax.f32 %v9940_v53, %v9976_v29 }
 0x6f8   : > { %v10084_v49 = vsel %vm2418_vm6, %v10078_v4, %v10006_v52  ;;  %v10053_v32 = vrot.slane %v9993_v46, 4  ;;  %v10089_v43 = vsel %vm2426_vm7, %v10083_v50, %v10017_v13  ;;  %v9910_v34 = vrot.slane %v14707_v15, %v14885_v57 }
 0x6f9   : > { %v10036_v39 = vrot.slane %v9988_v18, 3  ;;  %v10054_v8 = vrot.slane %v9994_v45, 4  ;;  %v10090_v11 = vsel %vm2426_vm7, %v10084_v49, %v10018_v62  ;;  %v10095_v48 = vsel %vm2434_vm8, %v10089_v43, %v10035_v16 }
 0x6fa   : > { %v10101_v28 = vsel %vm2442_vm9, %v10095_v48, %v10053_v32  ;;  %v9914_v20 = vrot.slane %v14707_v15, %v14886_v59 }
 0x6fb   : > { %v10096_v23 = vsel %vm2434_vm8, %v10090_v11, %v10036_v39  ;;  %v14729_v22 = vsel %vm1663_vm4, %v10101_v28, %v10065_v47 }
 0x6fc   : > { %v10102_v44 = vsel %vm2442_vm9, %v10096_v23, %v10054_v8 }
 0x6fd   : > { %v14733_v1 = vsel %vm1663_vm4, %v10102_v44, %v10066_v55 }
 0x760   : > { %v9782_v37 = vpop.f32.mrb[20].mxu0 }
 0x761   : > { %v9923_v41 = vadd.f32 %v9902_v25, %v9782_v37  ;;  %v9784_v24 = vpop.f32.mrb[21].mxu0 }
 0x762   : > { %v9924_v63 = vadd.f32 %v9906_v17, %v9784_v24  ;;  %v9786_v14 = vpop.f32.mrb[22].mxu0 }
 0x763   : > { %v9935_v42 = vmax.f32 %v9923_v41, 0.0  ;;  %v9929_v19 = vadd.f32 %v9902_v25, %v9786_v14  ;;  %v9788_v33 = vpop.f32.mrb[23].mxu0 }
 0x764   : > { %v9936_v60 = vmax.f32 %v9924_v63, 0.0  ;;  %v9930_v3 = vadd.f32 %v9906_v17, %v9788_v33 }
 0x765   : > { %v9953_v9 = vrot.slane %v9935_v42, 1  ;;  %v9941_v30 = vmax.f32 %v9929_v19, 0.0 }
 0x766   : > { %v9954_v36 = vrot.slane %v9936_v60, 1  ;;  %v9942_v21 = vmax.f32 %v9930_v3, 0.0 }
 0x767   : > { %v9965_v31 = vmax.f32 %v9935_v42, %v9953_v9  ;;  %v9977_v54 = vrot.slane %v9941_v30, 1  ;;  %v10067_v12 = vrot.slane %v9941_v30, 5 }
 0x768   : > { %v9966_v61 = vmax.f32 %v9936_v60, %v9954_v36  ;;  %v9978_v56 = vrot.slane %v9942_v21, 1  ;;  %v10068_v35 = vrot.slane %v9942_v21, 5 }
 0x769   : > { %v10007_v13 = vrot.slane %v9965_v31, 1  ;;  %v10019_v27 = vrot.slane %v9965_v31, 2  ;;  %v10079_v51 = vsel %vm2410_vm5, %v9935_v42, %v9965_v31  ;;  %v9989_v52 = vmax.f32 %v9935_v42, %v9977_v54 }
 0x76a   : > { %v9868_v6 = vpop.f32.mrb[24].mxu1  ;;  %v10008_v62 = vrot.slane %v9966_v61, 1  ;;  %v10020_v15 = vrot.slane %v9966_v61, 2  ;;  %v10080_v4 = vsel %vm2410_vm5, %v9936_v60, %v9966_v61  ;;  %v9995_v46 = vmax.f32 %v9941_v30, %v9977_v54 }
 0x76b   : > { %v11508_v40 = vadd.f32 %v9868_v6, %v14657_v0  ;;  %v9870_v53 = vpop.f32.mrb[25].mxu1  ;;  %v10085_v0 = vsel %vm2418_vm6, %v10079_v51, %v10007_v13  ;;  %v10037_v50 = vrot.slane %v9989_v52, 3  ;;  %v9990_v16 = vmax.f32 %v9936_v60, %v9978_v56 }
 0x76c   : > { %v11509_v29 = vadd.f32 %v9870_v53, %v14659_v26  ;;  %v9872_v5 = vpop.f32.mrb[26].mxu1  ;;  %v9996_v18 = vmax.f32 %v9942_v21, %v9978_v56  ;;  %v10086_v45 = vsel %vm2418_vm6, %v10080_v4, %v10008_v62  ;;  %v10055_v26 = vrot.slane %v9995_v46, 4 }
 0x76d   : > { %v9874_v38 = vpop.f32.mrb[27].mxu1  ;;  %v9925_v49 = vadd.f32 %v11508_v40, %v9910_v34  ;;  %v10038_v47 = vrot.slane %v9990_v16, 3  ;;  %v11510_v39 = vadd.f32 %v9872_v5, %v14661_v10  ;;  %v10092_v28 = vsel %vm2426_vm7, %v10086_v45, %v10020_v15 }
 0x76e   : > { %v9926_v32 = vadd.f32 %v11509_v29, %v9914_v20  ;;  %v10056_v43 = vrot.slane %v9996_v18, 4  ;;  %v11511_v8 = vadd.f32 %v9874_v38, %v14663_v2  ;;  %v10091_v55 = vsel %vm2426_vm7, %v10085_v0, %v10019_v27 }
 0x76f   : > { %v9937_v11 = vmax.f32 %v9925_v49, 0.0  ;;  %v9931_v23 = vadd.f32 %v11510_v39, %v9910_v34  ;;  %v10098_v7 = vsel %vm2434_vm8, %v10092_v28, %v10038_v47  ;;  %v10097_v25 = vsel %vm2434_vm8, %v10091_v55, %v10037_v50 }
 0x770   : > { %v9938_v48 = vmax.f32 %v9926_v32, 0.0  ;;  %v9932_v44 = vadd.f32 %v11511_v8, %v9914_v20  ;;  %v10104_v37 = vsel %vm2442_vm9, %v10098_v7, %v10056_v43  ;;  %v10103_v10 = vsel %vm2442_vm9, %v10097_v25, %v10055_v26  ;;  %v10177_v25 = vld [vmem:[%s279_s19 + $0x8] sm:$0xff] }
 0x771   : > { %v9955_v58 = vrot.slane %v9937_v11, 1  ;;  %v9943_v41 = vmax.f32 %v9931_v23, 0.0  ;;  %v10110_v24 = vsel %vm1663_vm4, %v10104_v37, %v10068_v35  ;;  %v10109_v63 = vsel %vm1663_vm4, %v10103_v10, %v10067_v12 }
 0x772   : > { %v9956_v17 = vrot.slane %v9938_v48, 1  ;;  %v9944_v2 = vmax.f32 %v9932_v44, 0.0  ;;  %v11873_v19 = vpack.i.bf16 %v10110_v24, %v14733_v1 }
 0x773   : > { %v9967_v14 = vmax.f32 %v9937_v11, %v9955_v58  ;;  %v9979_v33 = vrot.slane %v9943_v41, 1  ;;  %v10069_v29 = vrot.slane %v9943_v41, 5 }
 0x774   : > { %v9968_v42 = vmax.f32 %v9938_v48, %v9956_v17  ;;  %v9980_v60 = vrot.slane %v9944_v2, 1  ;;  %11874 = vrot.lane.b32.xlu1 %v11873_v19, %s13568_s24  ;;  %v10070_v13 = vrot.slane %v9944_v2, 5 }
 0x775   : > { %v10009_v3 = vrot.slane %v9967_v14, 1  ;;  %v10021_v9 = vrot.slane %v9967_v14, 2  ;;  %v10081_v30 = vsel %vm2410_vm5, %v9937_v11, %v9967_v14  ;;  %v9991_v57 = vmax.f32 %v9937_v11, %v9979_v33 }
 0x776   : > { %v10010_v36 = vrot.slane %v9968_v42, 1  ;;  %v10022_v21 = vrot.slane %v9968_v42, 2  ;;  %v10082_v6 = vsel %vm2410_vm5, %v9938_v48, %v9968_v42  ;;  %v9997_v34 = vmax.f32 %v9943_v41, %v9979_v33  ;;  %vm10175_vm5 = vmand %vm10174_vm3, %vm328_vm1 }
 0x777   : > { %v10087_v59 = vsel %vm2418_vm6, %v10081_v30, %v10009_v3  ;;  %v9992_v31 = vmax.f32 %v9938_v48, %v9980_v60  ;;  %v9998_v54 = vmax.f32 %v9944_v2, %v9980_v60  ;;  %v10039_v12 = vrot.slane %v9991_v57, 3  ;;  %v10171_v48 = vld [vmem:[%s279_s19] sm:$0xff] }
 0x778   : > { %v10088_v20 = vsel %vm2418_vm6, %v10082_v6, %v10010_v36  ;;  %v10057_v40 = vrot.slane %v9997_v34, 4  ;;  %v10093_v53 = vsel %vm2426_vm7, %v10087_v59, %v10021_v9 }
 0x779   : > { %v10094_v61 = vsel %vm2426_vm7, %v10088_v20, %v10022_v21  ;;  %v10040_v56 = vrot.slane %v9992_v31, 3  ;;  %v10058_v35 = vrot.slane %v9998_v54, 4  ;;  %v10099_v5 = vsel %vm2434_vm8, %v10093_v53, %v10039_v12  ;;  %vm10176_vm7 = vmor %vm10175_vm5, %vm14782_vm2 }
 0x77a   : > { %v10105_v27 = vsel %vm2442_vm9, %v10099_v5, %v10057_v40 }
 0x77b   : > { %v10100_v51 = vsel %vm2434_vm8, %v10094_v61, %v10040_v56  ;;  %v10111_v52 = vsel %vm1663_vm4, %v10105_v27, %v10069_v29 }
 0x77c   : > { %v10106_v38 = vsel %vm2442_vm9, %v10100_v51, %v10058_v35  ;;  %v11868_v62 = vpack.i.bf16 %v10111_v52, %v10109_v63 }
 0x77d   : > { %v10112_v15 = vsel %vm1663_vm4, %v10106_v38, %v10070_v13  ;;  %vm14788_vm4 = vmand %vm10168_vm0, %vm328_vm1 }
 0x77e   : > { %11869 = vrot.lane.b32.xlu0 %v11868_v62, %s13568_s24  ;;  %vm10170_vm6 = vmor %vm14788_vm4, %vm14782_vm2 }
 0x7e6   : > { %v11875_v45 = vpop.permute.xlu1 %11874 }
 0x7e7   : > { %v11876_v26 = vunpack.i.l.bf16 %v11875_v45  ;;  %v11877_v49 = vunpack.i.h.bf16 %v11875_v45 }
 0x7e9   : > { %v10117_v47 = vmax.f32 %v14729_v22, %v11876_v26  ;;  %v10127_v39 = vmax.f32 %v10109_v63, %v11877_v49 }
 0x7eb   : > { %v10146_v55 = vsel %vm2667_vm11, %v14729_v22, %v10117_v47 }
 0x7f0   : > { %v11870_v4 = vpop.permute.xlu0 %11869 }
 0x7f1   : > { %v11872_v46 = vunpack.i.h.bf16 %v11870_v4  ;;  %v11871_v0 = vunpack.i.l.bf16 %v11870_v4 }
 0x7f3   : > { %v10122_v50 = vmax.f32 %v14733_v1, %v11871_v0  ;;  %v10132_v16 = vmax.f32 %v10110_v24, %v11872_v46 }
 0x7f5   : > { %10143 = vrot.lane.b32.xlu1 %v10132_v16, %s13568_s24  ;;  %v11878_v18 = vpack.i.bf16 %v10122_v50, %v10112_v15 }
 0x7f7   : > { %11879 = vrot.lane.b32.xlu0 %v11878_v18, %s13568_s24 }
 0x867   : > { %v10144_v44 = vpop.permute.xlu1 %10143 }
 0x869   : > { %v11880_v43 = vpop.permute.xlu0 %11879 }
 0x86a   : > { %v11882_v8 = vunpack.i.h.bf16 %v11880_v43  ;;  %v11881_v11 = vunpack.i.l.bf16 %v11880_v43 }
 0x86c   : > { %v10137_v28 = vmax.f32 %v10111_v52, %v11881_v11  ;;  %v10147_v23 = vsel %vm2667_vm11, %v11882_v8, %v10127_v39 }
 0x86d   : > { %v11434_v7 = vpack.c.bf16 %v10147_v23, %v10146_v55 }
 0x86e   : > { %v10148_v58 = vsel %vm2667_vm11, %v10144_v44, %v10137_v28 }
 0x86f   : > { %v11435_v17 = vpack.c.bf16 %v11881_v11, %v10148_v58  ;;  %v10172_v37 = vsel %vm10170_vm6, %v11434_v7, %v10171_v48 }
 0x870   : > { %10173 = vst [vmem:[%s279_s19] sm:$0xff] %v10172_v37 }
 0x871   : > { %v10178_v10 = vsel %vm10176_vm7, %v11435_v17, %v10177_v25 }
 0x872   : > { %10179 = vst [vmem:[%s279_s19 + $0x8] sm:$0xff] %v10178_v10 }
 0x873 PF: > { %s18_s18 = sadd.s32 1, %s13555_s18  }
 0x874   : > { %p15_p11 = scmp.ge.s32.totalorder %s18_s18, 4  }
 0x876   :  { %17 = sbr.rel (!%p15_p11) target bundleno = 3 (0x3), region = 95 }
 0x87d   :  { %10201 = vsyncpa [#allocation3], 1 }
 0x87e   :  { %10203 = vsyncpa [#allocation3 + $0x1], 1 }
 0x87f   :  { %10204 = vsyncpa [#allocation5], 1 }
 0x880   :  { %10205 = vsyncpa [#allocation8], 1 }

</bundles_post_ra>
